<compile_context>
chip_gen: v7x
topology: tpu7x:2x2x1
jax: 0.10.0
libtpu: 0.0.40
codegen_flags: <defaults>
</compile_context>

<pallas_src>
import functools

import jax
import jax.numpy as jnp
import numpy as np
from jax.experimental import pallas as pl
from jax.experimental.pallas import tpu as pltpu

LN_EPS = 1e-5  # PyTorch nn.LayerNorm default


# --------------------------------------------------------------------------- #
# Stage 1: input LayerNorm + fused 5-way projection (a / b branches + out gate)
# --------------------------------------------------------------------------- #
def _proj_kernel(use_mask, C, z_ref, w_ref, bias_ref, *rest):
    if use_mask:
        keep_ref, a_ref, b_ref, g_ref = rest
    else:
        a_ref, b_ref, g_ref = rest
        keep_ref = None

    _, Tr, M, D = z_ref.shape
    R = Tr * M

    z = z_ref[0].reshape(R, D).astype(jnp.float32)

    # LayerNorm statistics; gamma_in/beta_in are folded into w_ref / bias_ref.
    mu = jnp.mean(z, axis=-1, keepdims=True)
    var = jnp.mean(jnp.square(z - mu), axis=-1, keepdims=True)
    zhat = (z - mu) * jax.lax.rsqrt(var + LN_EPS)

    # One wide, lane-dense MXU matmul for all five Linear layers consuming zn.
    proj = jnp.dot(zhat.astype(w_ref.dtype), w_ref[...],
                   preferred_element_type=jnp.float32) + bias_ref[...]

    a = jax.nn.sigmoid(proj[:, 0 * C:1 * C]) * proj[:, 1 * C:2 * C]
    b = jax.nn.sigmoid(proj[:, 2 * C:3 * C]) * proj[:, 3 * C:4 * C]
    gate = jax.nn.sigmoid(proj[:, 4 * C:])

    if use_mask:
        keep = keep_ref[0].reshape(R, 1).astype(jnp.float32)
        a = a * keep
        b = b * keep

    a_ref[...] = a.reshape(1, Tr, M, C).astype(a_ref.dtype)
    b_ref[...] = b.reshape(1, Tr, M, C).astype(b_ref.dtype)
    g_ref[...] = gate.reshape(1, Tr, M, gate.shape[-1]).astype(g_ref.dtype)


# --------------------------------------------------------------------------- #
# Stage 2: channel-batched triangular contraction + norm_o statistics
# --------------------------------------------------------------------------- #
def _triangle_kernel(aT_ref, bT_ref, k_ref):
    _, C, Ti, M = aT_ref.shape
    N = bT_ref.shape[2]

    a = aT_ref[0]                                     # (C, Ti, M)
    b = bT_ref[0]                                     # (C, N,  M)
    # k[c,i,j] = sum_m a[c,i,m]*b[c,j,m]: C-batched MXU matmuls, f32 accumulation.
    k = jnp.einsum("cim,cjm->cij", a, b,
                   preferred_element_type=jnp.float32)   # (C, Ti, N) f32

    # LayerNorm over the channel axis (axis 0); gamma_o/beta_o folded into linear_o.
    mu = jnp.mean(k, axis=0, keepdims=True)
    var = jnp.mean(jnp.square(k - mu), axis=0, keepdims=True)
    khat = (k - mu) * jax.lax.rsqrt(var + LN_EPS)

    k_ref[...] = khat.reshape(1, C, Ti, N).astype(k_ref.dtype)


# --------------------------------------------------------------------------- #
# Stage 3: gated output projection
# --------------------------------------------------------------------------- #
def _output_kernel(kT_ref, g_ref, wo_ref, bo_ref, o_ref):
    _, Ti, N, C = kT_ref.shape
    D = wo_ref.shape[1]
    R = Ti * N

    kn = kT_ref[0].reshape(R, C)
    o_lin = jnp.dot(kn, wo_ref[...],
                    preferred_element_type=jnp.float32) + bo_ref[...]
    gate = g_ref[0].reshape(R, D).astype(jnp.float32)
    o_ref[...] = (gate * o_lin).reshape(1, Ti, N, D).astype(o_ref.dtype)


# --------------------------------------------------------------------------- #
# Wrapper
# --------------------------------------------------------------------------- #
@functools.partial(jax.jit, static_argnames=("row_tile", "mxu_dtype"))
def triangular_edge_update(z, params, mask=None, *, row_tile=8,
                           mxu_dtype=jnp.bfloat16):
    """Forward pass of TriangularEdgeUpdate (axis=1).

    mask follows the PyTorch semantics: positions where mask is True have their
    a/b branch contributions zeroed.
    """
    B, N, M, D = z.shape
    assert N == M, "triangular edge update needs a square edge tensor (I == J)"
    C = params["wa"].shape[1]
    assert N % row_tile == 0, "N must be divisible by row_tile"
    Tr = row_tile
    f32 = jnp.float32
    acts_dtype = mxu_dtype

    # ---- fold LayerNorm affines into the neighbouring Linear layers (exact algebra)
    w_all = jnp.concatenate(
        [params["wga"], params["wa"], params["wgb"], params["wb"], params["wgo"]],
        axis=1).astype(f32)                                        # (D, 4C + D)
    b_all = jnp.concatenate(
        [params["bga"], params["ba"], params["bgb"], params["bb"], params["bgo"]],
        axis=1).astype(f32)                                        # (1, 4C + D)
    w_all_eff = (params["gamma_in"].reshape(D, 1) * w_all).astype(mxu_dtype)
    b_all_eff = params["beta_in"].reshape(1, D) @ w_all + b_all    # f32

    wo_eff = (params["gamma_o"].reshape(C, 1)
              * params["wo"].astype(f32)).astype(mxu_dtype)        # (C, D)
    bo_eff = (params["beta_o"].reshape(1, C) @ params["wo"].astype(f32)
              + params["bo"].astype(f32))                          # (1, D) f32

    dim_par2 = pltpu.CompilerParams(
        dimension_semantics=("parallel", "parallel"))
    # NOTE: for production tile sizes (>32 MiB VMEM working set) also set
    # vmem_limit_bytes and consider pipeline_mode=pl.Buffered(3) on the streaming
    # inputs; unnecessary at these block sizes.

    # ---- stage 1: LN + fused projections ------------------------------------
    proj_inputs = [z, w_all_eff, b_all_eff]
    in_specs = [
        pl.BlockSpec((1, Tr, M, D), lambda b, i: (b, i, 0, 0)),
        pl.BlockSpec(w_all_eff.shape, lambda b, i: (0, 0)),
        pl.BlockSpec(b_all_eff.shape, lambda b, i: (0, 0)),
    ]
    use_mask = mask is not None
    if use_mask:
        keep = (1.0 - mask.astype(f32)).reshape(B, N, M, 1)
        proj_inputs.append(keep)
        in_specs.append(pl.BlockSpec((1, Tr, M, 1), lambda b, i: (b, i, 0, 0)))

    a_act, b_act, gate = pl.pallas_call(
        functools.partial(_proj_kernel, use_mask, C),
        out_shape=(
            jax.ShapeDtypeStruct((B, N, M, C), acts_dtype),
            jax.ShapeDtypeStruct((B, N, M, C), acts_dtype),
            jax.ShapeDtypeStruct((B, N, M, D), acts_dtype),
        ),
        grid=(B, N // Tr),
        in_specs=in_specs,
        out_specs=(
            pl.BlockSpec((1, Tr, M, C), lambda b, i: (b, i, 0, 0)),
            pl.BlockSpec((1, Tr, M, C), lambda b, i: (b, i, 0, 0)),
            pl.BlockSpec((1, Tr, M, D), lambda b, i: (b, i, 0, 0)),
        ),
        compiler_params=dim_par2,
    )(*proj_inputs)

    # ---- layout: channel-last -> channel-major for the batched MXU contraction
    aT = jnp.transpose(a_act, (0, 3, 1, 2))   # (B, C, N, M)
    bT = jnp.transpose(b_act, (0, 3, 1, 2))   # (B, C, N, M)

    # ---- stage 2: triangular update + norm_o ---------------------------------
    k_norm = pl.pallas_call(
        _triangle_kernel,
        out_shape=jax.ShapeDtypeStruct((B, C, N, N), acts_dtype),
        grid=(B, N // Tr),
        in_specs=[
            pl.BlockSpec((1, C, Tr, M), lambda b, i: (b, 0, i, 0)),
            pl.BlockSpec((1, C, N, M), lambda b, i: (b, 0, 0, 0)),
        ],
        out_specs=pl.BlockSpec((1, C, Tr, N), lambda b, i: (b, 0, i, 0)),
        compiler_params=dim_par2,
    )(aT, bT)

    kT = jnp.transpose(k_norm, (0, 2, 3, 1))  # (B, N, N, C): channel-last again

    # ---- stage 3: gated output projection ------------------------------------
    out = pl.pallas_call(
        _output_kernel,
        out_shape=jax.ShapeDtypeStruct((B, N, N, D), z.dtype),
        grid=(B, N // Tr),
        in_specs=[
            pl.BlockSpec((1, Tr, N, C), lambda b, i: (b, i, 0, 0)),
            pl.BlockSpec((1, Tr, M, D), lambda b, i: (b, i, 0, 0)),
            pl.BlockSpec(wo_eff.shape, lambda b, i: (0, 0)),
            pl.BlockSpec(bo_eff.shape, lambda b, i: (0, 0)),
        ],
        out_specs=pl.BlockSpec((1, Tr, N, D), lambda b, i: (b, i, 0, 0)),
        compiler_params=dim_par2,
    )(kT, gate, wo_eff, bo_eff)
    return out


# --------------------------------------------------------------------------- #
# Parameters / reference
# --------------------------------------------------------------------------- #
def init_params(key, input_dim, channel_dim):
    # Deterministic synthetic init. NOTE: the PyTorch _reset_parameters zero-inits
    # linear_o (which would make the forward output identically zero); small random
    # weights are used everywhere so the kernel path is actually exercised.
    # A real checkpoint port must transpose nn.Linear weights to (in, out).
    ks = jax.random.split(key, 12)

    def w(k, shape, scale):
        return (scale * jax.random.normal(k, shape)).astype(jnp.float32)

    return {
        "gamma_in": jnp.ones((1, input_dim), jnp.float32),
        "beta_in": jnp.zeros((1, input_dim), jnp.float32),
        "wa": w(ks[0], (input_dim, channel_dim), 0.1),
        "ba": w(ks[1], (1, channel_dim), 0.02),
        "wga": w(ks[2], (input_dim, channel_dim), 0.1),
        "bga": w(ks[3], (1, channel_dim), 0.02),
        "wb": w(ks[4], (input_dim, channel_dim), 0.1),
        "bb": w(ks[5], (1, channel_dim), 0.02),
        "wgb": w(ks[6], (input_dim, channel_dim), 0.1),
        "bgb": w(ks[7], (1, channel_dim), 0.02),
        "gamma_o": jnp.ones((1, channel_dim), jnp.float32),
        "beta_o": jnp.zeros((1, channel_dim), jnp.float32),
        "wo": w(ks[8], (channel_dim, input_dim), 0.1),
        "bo": w(ks[9], (1, input_dim), 0.02),
        "wgo": w(ks[10], (input_dim, input_dim), 0.1),
        "bgo": w(ks[11], (1, input_dim), 0.02),
    }


def reference(z, p, mask=None):
    # Plain-JAX mirror of the PyTorch forward (axis=1).
    zf = z.astype(jnp.float32)
    mu = jnp.mean(zf, -1, keepdims=True)
    var = jnp.mean(jnp.square(zf - mu), -1, keepdims=True)
    zn = (zf - mu) * jax.lax.rsqrt(var + LN_EPS) * p["gamma_in"] + p["beta_in"]

    lin = lambda x, w, b: x @ w + b
    a = jax.nn.sigmoid(lin(zn, p["wga"], p["bga"])) * lin(zn, p["wa"], p["ba"])
    b = jax.nn.sigmoid(lin(zn, p["wgb"], p["bgb"])) * lin(zn, p["wb"], p["bb"])
    if mask is not None:
        m = mask[..., None]
        a = jnp.where(m, 0.0, a)
        b = jnp.where(m, 0.0, b)
    k = jnp.einsum("biko,bjko->bijo", a, b)

    mu2 = jnp.mean(k, -1, keepdims=True)
    var2 = jnp.mean(jnp.square(k - mu2), -1, keepdims=True)
    kn = (k - mu2) * jax.lax.rsqrt(var2 + LN_EPS) * p["gamma_o"] + p["beta_o"]

    out = jax.nn.sigmoid(lin(zn, p["wgo"], p["bgo"])) * lin(kn, p["wo"], p["bo"])
    return out.astype(z.dtype)


if __name__ == "__main__":
    # batch, seq (square edge grid), input_dim, channel_dim (module default C=128)
    B, N, D, C = 2, 16, 128, 128

    key = jax.random.PRNGKey(0)
    k_z, k_p, k_m = jax.random.split(key, 3)
    z = jax.random.normal(k_z, (B, N, N, D), dtype=jnp.float32)
    params = init_params(k_p, D, C)

    ref = jax.block_until_ready(reference(z, params))

    # Strict check: f32 MXU operands / f32 intermediates.
    out_f32 = jax.block_until_ready(
        triangular_edge_update(z, params, mxu_dtype=jnp.float32))
    np.testing.assert_allclose(np.asarray(out_f32), np.asarray(ref),
                               rtol=1e-3, atol=1e-3)

    # Masked path (PyTorch semantics: True -> zero the a/b contributions).
    mask = jax.random.bernoulli(k_m, 0.3, (B, N, N))
    ref_m = jax.block_until_ready(reference(z, params, mask=mask))
    out_m = jax.block_until_ready(
        triangular_edge_update(z, params, mask=mask, mxu_dtype=jnp.float32))
    np.testing.assert_allclose(np.asarray(out_m), np.asarray(ref_m),
                               rtol=1e-3, atol=1e-3)

    # Production path: bf16 MXU operands / bf16 intermediates, f32 accumulation.
    out_bf16 = jax.block_until_ready(triangular_edge_update(z, params))
    mae = float(jnp.mean(jnp.abs(out_bf16.astype(jnp.float32) - ref)))
    assert mae < 5e-2, f"bf16 path mean-abs-error too high: {mae}"

    print("KERNEL_OK")
</pallas_src>

<mosaic_0001>
module attributes {stable_mosaic.version = 11 : i64} {
  func.func @_proj_kernel(%arg0: i32, %arg1: i32, %arg2: memref<1x8x16x128xf32, #tpu.memory_space<vmem>>, %arg3: memref<128x640xf32, #tpu.memory_space<vmem>>, %arg4: memref<1x640xf32, #tpu.memory_space<vmem>>, %arg5: memref<1x8x16x128xf32, #tpu.memory_space<vmem>>, %arg6: memref<1x8x16x128xf32, #tpu.memory_space<vmem>>, %arg7: memref<1x8x16x128xf32, #tpu.memory_space<vmem>>) attributes {dimension_semantics = [#tpu.dimension_semantics<parallel>, #tpu.dimension_semantics<parallel>], iteration_bounds = array<i64: 2, 2>, scalar_prefetch = 0 : i64, scratch_operands = 0 : i64, tpu.core_type = #tpu.core_type<tc>, window_params = [{transform_indices = @transform_0, window_bounds = array<i64: 1, 8, 16, 128>}, {pipeline_mode = #tpu.pipeline_mode<synchronous>, transform_indices = @transform_1, window_bounds = array<i64: 128, 640>}, {pipeline_mode = #tpu.pipeline_mode<synchronous>, transform_indices = @transform_2, window_bounds = array<i64: 1, 640>}, {transform_indices = @transform_3, window_bounds = array<i64: 1, 8, 16, 128>}, {transform_indices = @transform_4, window_bounds = array<i64: 1, 8, 16, 128>}, {transform_indices = @transform_5, window_bounds = array<i64: 1, 8, 16, 128>}]} {
    %c0 = arith.constant 0 : index
    %c0_0 = arith.constant 0 : index
    %c0_1 = arith.constant 0 : index
    %c0_2 = arith.constant 0 : index
    %0 = vector.load %arg2[%c0, %c0_0, %c0_1, %c0_2] : memref<1x8x16x128xf32, #tpu.memory_space<vmem>>, vector<1x8x16x128xf32>
    %1 = vector.shape_cast %0 : vector<1x8x16x128xf32> to vector<8x16x128xf32>
    %2 = vector.shape_cast %1 : vector<8x16x128xf32> to vector<128x128xf32>
    %cst = arith.constant dense<0.000000e+00> : vector<128xf32>
    %3 = vector.multi_reduction <add>, %2, %cst [1] : vector<128x128xf32> to vector<128xf32>
    %4 = vector.shape_cast %3 : vector<128xf32> to vector<128x1xf32>
    %cst_3 = arith.constant 1.280000e+02 : f32
    %5 = vector.broadcast %cst_3 : f32 to vector<128x1xf32>
    %6 = arith.divf %4, %5 : vector<128x1xf32>
    %7 = vector.broadcast %6 : vector<128x1xf32> to vector<128x128xf32>
    %8 = arith.subf %2, %7 : vector<128x128xf32>
    %9 = arith.mulf %8, %8 : vector<128x128xf32>
    %cst_4 = arith.constant dense<0.000000e+00> : vector<128xf32>
    %10 = vector.multi_reduction <add>, %9, %cst_4 [1] : vector<128x128xf32> to vector<128xf32>
    %11 = vector.shape_cast %10 : vector<128xf32> to vector<128x1xf32>
    %cst_5 = arith.constant 1.280000e+02 : f32
    %12 = vector.broadcast %cst_5 : f32 to vector<128x1xf32>
    %13 = arith.divf %11, %12 : vector<128x1xf32>
    %14 = vector.broadcast %6 : vector<128x1xf32> to vector<128x128xf32>
    %15 = arith.subf %2, %14 : vector<128x128xf32>
    %cst_6 = arith.constant 9.99999974E-6 : f32
    %16 = vector.broadcast %cst_6 : f32 to vector<128x1xf32>
    %17 = arith.addf %13, %16 : vector<128x1xf32>
    %18 = math.rsqrt %17 : vector<128x1xf32>
    %19 = vector.broadcast %18 : vector<128x1xf32> to vector<128x128xf32>
    %20 = arith.mulf %15, %19 : vector<128x128xf32>
    %c0_7 = arith.constant 0 : index
    %c0_8 = arith.constant 0 : index
    %21 = vector.load %arg3[%c0_7, %c0_8] : memref<128x640xf32, #tpu.memory_space<vmem>>, vector<128x640xf32>
    %cst_9 = arith.constant dense<0.000000e+00> : vector<128x640xf32>
    %22 = tpu.matmul %20, %21, %cst_9 {dimension_numbers = #tpu.dot_dimension_numbers<[1], [0], [0], [1], [0, 0, 1, 1], [], []>} : vector<128x128xf32>, vector<128x640xf32>, vector<128x640xf32> -> vector<128x640xf32>
    %c0_10 = arith.constant 0 : index
    %c0_11 = arith.constant 0 : index
    %23 = vector.load %arg4[%c0_10, %c0_11] : memref<1x640xf32, #tpu.memory_space<vmem>>, vector<1x640xf32>
    %24 = vector.broadcast %23 : vector<1x640xf32> to vector<128x640xf32>
    %25 = arith.addf %22, %24 : vector<128x640xf32>
    %26 = vector.extract_strided_slice %25 {offsets = [0, 0], sizes = [128, 128], strides = [1, 1]} : vector<128x640xf32> to vector<128x128xf32>
    %27 = arith.negf %26 : vector<128x128xf32>
    %28 = math.exp %27 : vector<128x128xf32>
    %cst_12 = arith.constant 1.000000e+00 : f32
    %29 = vector.broadcast %cst_12 : f32 to vector<128x128xf32>
    %30 = arith.addf %29, %28 : vector<128x128xf32>
    %31 = arith.divf %29, %30 : vector<128x128xf32>
    %32 = vector.extract_strided_slice %25 {offsets = [0, 128], sizes = [128, 128], strides = [1, 1]} : vector<128x640xf32> to vector<128x128xf32>
    %33 = arith.mulf %31, %32 : vector<128x128xf32>
    %34 = vector.extract_strided_slice %25 {offsets = [0, 256], sizes = [128, 128], strides = [1, 1]} : vector<128x640xf32> to vector<128x128xf32>
    %35 = arith.negf %34 : vector<128x128xf32>
    %36 = math.exp %35 : vector<128x128xf32>
    %cst_13 = arith.constant 1.000000e+00 : f32
    %37 = vector.broadcast %cst_13 : f32 to vector<128x128xf32>
    %38 = arith.addf %37, %36 : vector<128x128xf32>
    %39 = arith.divf %37, %38 : vector<128x128xf32>
    %40 = vector.extract_strided_slice %25 {offsets = [0, 384], sizes = [128, 128], strides = [1, 1]} : vector<128x640xf32> to vector<128x128xf32>
    %41 = arith.mulf %39, %40 : vector<128x128xf32>
    %42 = vector.extract_strided_slice %25 {offsets = [0, 512], sizes = [128, 128], strides = [1, 1]} : vector<128x640xf32> to vector<128x128xf32>
    %43 = arith.negf %42 : vector<128x128xf32>
    %44 = math.exp %43 : vector<128x128xf32>
    %cst_14 = arith.constant 1.000000e+00 : f32
    %45 = vector.broadcast %cst_14 : f32 to vector<128x128xf32>
    %46 = arith.addf %45, %44 : vector<128x128xf32>
    %47 = arith.divf %45, %46 : vector<128x128xf32>
    %48 = vector.shape_cast %33 : vector<128x128xf32> to vector<1x8x16x128xf32>
    %c0_15 = arith.constant 0 : index
    %c0_16 = arith.constant 0 : index
    %c0_17 = arith.constant 0 : index
    %c0_18 = arith.constant 0 : index
    %49 = vector.load %arg5[%c0_15, %c0_16, %c0_17, %c0_18] : memref<1x8x16x128xf32, #tpu.memory_space<vmem>>, vector<1x8x16x128xf32>
    tpu.vector_store %arg5[%c0_15, %c0_16, %c0_17, %c0_18], %48 {strides = array<i32>} : memref<1x8x16x128xf32, #tpu.memory_space<vmem>>, vector<1x8x16x128xf32>,
    %50 = vector.shape_cast %41 : vector<128x128xf32> to vector<1x8x16x128xf32>
    %c0_19 = arith.constant 0 : index
    %c0_20 = arith.constant 0 : index
    %c0_21 = arith.constant 0 : index
    %c0_22 = arith.constant 0 : index
    %51 = vector.load %arg6[%c0_19, %c0_20, %c0_21, %c0_22] : memref<1x8x16x128xf32, #tpu.memory_space<vmem>>, vector<1x8x16x128xf32>
    tpu.vector_store %arg6[%c0_19, %c0_20, %c0_21, %c0_22], %50 {strides = array<i32>} : memref<1x8x16x128xf32, #tpu.memory_space<vmem>>, vector<1x8x16x128xf32>,
    %52 = vector.shape_cast %47 : vector<128x128xf32> to vector<1x8x16x128xf32>
    %c0_23 = arith.constant 0 : index
    %c0_24 = arith.constant 0 : index
    %c0_25 = arith.constant 0 : index
    %c0_26 = arith.constant 0 : index
    %53 = vector.load %arg7[%c0_23, %c0_24, %c0_25, %c0_26] : memref<1x8x16x128xf32, #tpu.memory_space<vmem>>, vector<1x8x16x128xf32>
    tpu.vector_store %arg7[%c0_23, %c0_24, %c0_25, %c0_26], %52 {strides = array<i32>} : memref<1x8x16x128xf32, #tpu.memory_space<vmem>>, vector<1x8x16x128xf32>,
    return
  }
  func.func @transform_0(%arg0: i32, %arg1: i32) -> (i32, i32, i32, i32) {
    %c0_i32 = arith.constant 0 : i32
    %c0_i32_0 = arith.constant 0 : i32
    %c0_i32_1 = arith.constant 0 : i32
    return %arg0, %arg1, %c0_i32, %c0_i32_0 : i32, i32, i32, i32
  }
  func.func @transform_1(%arg0: i32, %arg1: i32) -> (i32, i32) {
    %c0_i32 = arith.constant 0 : i32
    %c0_i32_0 = arith.constant 0 : i32
    %c0_i32_1 = arith.constant 0 : i32
    return %c0_i32, %c0_i32_0 : i32, i32
  }
  func.func @transform_2(%arg0: i32, %arg1: i32) -> (i32, i32) {
    %c0_i32 = arith.constant 0 : i32
    %c0_i32_0 = arith.constant 0 : i32
    %c0_i32_1 = arith.constant 0 : i32
    return %c0_i32, %c0_i32_0 : i32, i32
  }
  func.func @transform_3(%arg0: i32, %arg1: i32) -> (i32, i32, i32, i32) {
    %c0_i32 = arith.constant 0 : i32
    %c0_i32_0 = arith.constant 0 : i32
    %c0_i32_1 = arith.constant 0 : i32
    return %arg0, %arg1, %c0_i32, %c0_i32_0 : i32, i32, i32, i32
  }
  func.func @transform_4(%arg0: i32, %arg1: i32) -> (i32, i32, i32, i32) {
    %c0_i32 = arith.constant 0 : i32
    %c0_i32_0 = arith.constant 0 : i32
    %c0_i32_1 = arith.constant 0 : i32
    return %arg0, %arg1, %c0_i32, %c0_i32_0 : i32, i32, i32, i32
  }
  func.func @transform_5(%arg0: i32, %arg1: i32) -> (i32, i32, i32, i32) {
    %c0_i32 = arith.constant 0 : i32
    %c0_i32_0 = arith.constant 0 : i32
    %c0_i32_1 = arith.constant 0 : i32
    return %arg0, %arg1, %c0_i32, %c0_i32_0 : i32, i32, i32, i32
  }
}

module attributes {stable_mosaic.version = 11 : i64} {
  func.func @_triangle_kernel(%arg0: i32, %arg1: i32, %arg2: memref<1x128x8x16xf32, #tpu.memory_space<vmem>>, %arg3: memref<1x128x16x16xf32, #tpu.memory_space<vmem>>, %arg4: memref<1x128x8x16xf32, #tpu.memory_space<vmem>>) attributes {dimension_semantics = [#tpu.dimension_semantics<parallel>, #tpu.dimension_semantics<parallel>], iteration_bounds = array<i64: 2, 2>, scalar_prefetch = 0 : i64, scratch_operands = 0 : i64, tpu.core_type = #tpu.core_type<tc>, window_params = [{transform_indices = @transform_0, window_bounds = array<i64: 1, 128, 8, 16>}, {transform_indices = @transform_1, window_bounds = array<i64: 1, 128, 16, 16>}, {transform_indices = @transform_2, window_bounds = array<i64: 1, 128, 8, 16>}]} {
    %c0 = arith.constant 0 : index
    %c0_0 = arith.constant 0 : index
    %c0_1 = arith.constant 0 : index
    %c0_2 = arith.constant 0 : index
    %0 = vector.load %arg2[%c0, %c0_0, %c0_1, %c0_2] : memref<1x128x8x16xf32, #tpu.memory_space<vmem>>, vector<1x128x8x16xf32>
    %1 = vector.shape_cast %0 : vector<1x128x8x16xf32> to vector<128x8x16xf32>
    %c0_3 = arith.constant 0 : index
    %c0_4 = arith.constant 0 : index
    %c0_5 = arith.constant 0 : index
    %c0_6 = arith.constant 0 : index
    %2 = vector.load %arg3[%c0_3, %c0_4, %c0_5, %c0_6] : memref<1x128x16x16xf32, #tpu.memory_space<vmem>>, vector<1x128x16x16xf32>
    %3 = vector.shape_cast %2 : vector<1x128x16x16xf32> to vector<128x16x16xf32>
    "tpu.trace_start"() <{level = 10 : i32, message = "cim,cjm->cij"}> : () -> ()
    %cst = arith.constant dense<0.000000e+00> : vector<128x8x16xf32>
    %4 = tpu.matmul %1, %3, %cst {dimension_numbers = #tpu.dot_dimension_numbers<[2], [2], [1], [1], [0, 0, 0, 1, 1, 1], [0], [0]>} : vector<128x8x16xf32>, vector<128x16x16xf32>, vector<128x8x16xf32> -> vector<128x8x16xf32>
    "tpu.trace_stop"() : () -> ()
    %cst_7 = arith.constant dense<0.000000e+00> : vector<8x16xf32>
    %5 = vector.multi_reduction <add>, %4, %cst_7 [0] : vector<128x8x16xf32> to vector<8x16xf32>
    %6 = vector.shape_cast %5 : vector<8x16xf32> to vector<1x8x16xf32>
    %cst_8 = arith.constant 1.280000e+02 : f32
    %7 = vector.broadcast %cst_8 : f32 to vector<1x8x16xf32>
    %8 = arith.divf %6, %7 : vector<1x8x16xf32>
    %9 = vector.broadcast %8 : vector<1x8x16xf32> to vector<128x8x16xf32>
    %10 = arith.subf %4, %9 : vector<128x8x16xf32>
    %11 = arith.mulf %10, %10 : vector<128x8x16xf32>
    %cst_9 = arith.constant dense<0.000000e+00> : vector<8x16xf32>
    %12 = vector.multi_reduction <add>, %11, %cst_9 [0] : vector<128x8x16xf32> to vector<8x16xf32>
    %13 = vector.shape_cast %12 : vector<8x16xf32> to vector<1x8x16xf32>
    %cst_10 = arith.constant 1.280000e+02 : f32
    %14 = vector.broadcast %cst_10 : f32 to vector<1x8x16xf32>
    %15 = arith.divf %13, %14 : vector<1x8x16xf32>
    %16 = vector.broadcast %8 : vector<1x8x16xf32> to vector<128x8x16xf32>
    %17 = arith.subf %4, %16 : vector<128x8x16xf32>
    %cst_11 = arith.constant 9.99999974E-6 : f32
    %18 = vector.broadcast %cst_11 : f32 to vector<1x8x16xf32>
    %19 = arith.addf %15, %18 : vector<1x8x16xf32>
    %20 = math.rsqrt %19 : vector<1x8x16xf32>
    %21 = vector.broadcast %20 : vector<1x8x16xf32> to vector<128x8x16xf32>
    %22 = arith.mulf %17, %21 : vector<128x8x16xf32>
    %23 = vector.shape_cast %22 : vector<128x8x16xf32> to vector<1x128x8x16xf32>
    %c0_12 = arith.constant 0 : index
    %c0_13 = arith.constant 0 : index
    %c0_14 = arith.constant 0 : index
    %c0_15 = arith.constant 0 : index
    %24 = vector.load %arg4[%c0_12, %c0_13, %c0_14, %c0_15] : memref<1x128x8x16xf32, #tpu.memory_space<vmem>>, vector<1x128x8x16xf32>
    tpu.vector_store %arg4[%c0_12, %c0_13, %c0_14, %c0_15], %23 {strides = array<i32>} : memref<1x128x8x16xf32, #tpu.memory_space<vmem>>, vector<1x128x8x16xf32>,
    return
  }
  func.func @transform_0(%arg0: i32, %arg1: i32) -> (i32, i32, i32, i32) {
    %c0_i32 = arith.constant 0 : i32
    %c0_i32_0 = arith.constant 0 : i32
    %c0_i32_1 = arith.constant 0 : i32
    return %arg0, %c0_i32, %arg1, %c0_i32_0 : i32, i32, i32, i32
  }
  func.func @transform_1(%arg0: i32, %arg1: i32) -> (i32, i32, i32, i32) {
    %c0_i32 = arith.constant 0 : i32
    %c0_i32_0 = arith.constant 0 : i32
    %c0_i32_1 = arith.constant 0 : i32
    %c0_i32_2 = arith.constant 0 : i32
    return %arg0, %c0_i32, %c0_i32_0, %c0_i32_1 : i32, i32, i32, i32
  }
  func.func @transform_2(%arg0: i32, %arg1: i32) -> (i32, i32, i32, i32) {
    %c0_i32 = arith.constant 0 : i32
    %c0_i32_0 = arith.constant 0 : i32
    %c0_i32_1 = arith.constant 0 : i32
    return %arg0, %c0_i32, %arg1, %c0_i32_0 : i32, i32, i32, i32
  }
}

module attributes {stable_mosaic.version = 11 : i64} {
  func.func @_output_kernel(%arg0: i32, %arg1: i32, %arg2: memref<1x8x16x128xf32, #tpu.memory_space<vmem>>, %arg3: memref<1x8x16x128xf32, #tpu.memory_space<vmem>>, %arg4: memref<128x128xf32, #tpu.memory_space<vmem>>, %arg5: memref<1x128xf32, #tpu.memory_space<vmem>>, %arg6: memref<1x8x16x128xf32, #tpu.memory_space<vmem>>) attributes {dimension_semantics = [#tpu.dimension_semantics<parallel>, #tpu.dimension_semantics<parallel>], iteration_bounds = array<i64: 2, 2>, scalar_prefetch = 0 : i64, scratch_operands = 0 : i64, tpu.core_type = #tpu.core_type<tc>, window_params = [{transform_indices = @transform_0, window_bounds = array<i64: 1, 8, 16, 128>}, {transform_indices = @transform_1, window_bounds = array<i64: 1, 8, 16, 128>}, {pipeline_mode = #tpu.pipeline_mode<synchronous>, transform_indices = @transform_2, window_bounds = array<i64: 128, 128>}, {pipeline_mode = #tpu.pipeline_mode<synchronous>, transform_indices = @transform_3, window_bounds = array<i64: 1, 128>}, {transform_indices = @transform_4, window_bounds = array<i64: 1, 8, 16, 128>}]} {
    %c0 = arith.constant 0 : index
    %c0_0 = arith.constant 0 : index
    %c0_1 = arith.constant 0 : index
    %c0_2 = arith.constant 0 : index
    %0 = vector.load %arg2[%c0, %c0_0, %c0_1, %c0_2] : memref<1x8x16x128xf32, #tpu.memory_space<vmem>>, vector<1x8x16x128xf32>
    %1 = vector.shape_cast %0 : vector<1x8x16x128xf32> to vector<8x16x128xf32>
    %2 = vector.shape_cast %1 : vector<8x16x128xf32> to vector<128x128xf32>
    %c0_3 = arith.constant 0 : index
    %c0_4 = arith.constant 0 : index
    %3 = vector.load %arg4[%c0_3, %c0_4] : memref<128x128xf32, #tpu.memory_space<vmem>>, vector<128x128xf32>
    %cst = arith.constant dense<0.000000e+00> : vector<128x128xf32>
    %4 = tpu.matmul %2, %3, %cst {dimension_numbers = #tpu.dot_dimension_numbers<[1], [0], [0], [1], [0, 0, 1, 1], [], []>} : vector<128x128xf32>, vector<128x128xf32>, vector<128x128xf32> -> vector<128x128xf32>
    %c0_5 = arith.constant 0 : index
    %c0_6 = arith.constant 0 : index
    %5 = vector.load %arg5[%c0_5, %c0_6] : memref<1x128xf32, #tpu.memory_space<vmem>>, vector<1x128xf32>
    %6 = vector.broadcast %5 : vector<1x128xf32> to vector<128x128xf32>
    %7 = arith.addf %4, %6 : vector<128x128xf32>
    %c0_7 = arith.constant 0 : index
    %c0_8 = arith.constant 0 : index
    %c0_9 = arith.constant 0 : index
    %c0_10 = arith.constant 0 : index
    %8 = vector.load %arg3[%c0_7, %c0_8, %c0_9, %c0_10] : memref<1x8x16x128xf32, #tpu.memory_space<vmem>>, vector<1x8x16x128xf32>
    %9 = vector.shape_cast %8 : vector<1x8x16x128xf32> to vector<8x16x128xf32>
    %10 = vector.shape_cast %9 : vector<8x16x128xf32> to vector<128x128xf32>
    %11 = arith.mulf %10, %7 : vector<128x128xf32>
    %12 = vector.shape_cast %11 : vector<128x128xf32> to vector<1x8x16x128xf32>
    %c0_11 = arith.constant 0 : index
    %c0_12 = arith.constant 0 : index
    %c0_13 = arith.constant 0 : index
    %c0_14 = arith.constant 0 : index
    %13 = vector.load %arg6[%c0_11, %c0_12, %c0_13, %c0_14] : memref<1x8x16x128xf32, #tpu.memory_space<vmem>>, vector<1x8x16x128xf32>
    tpu.vector_store %arg6[%c0_11, %c0_12, %c0_13, %c0_14], %12 {strides = array<i32>} : memref<1x8x16x128xf32, #tpu.memory_space<vmem>>, vector<1x8x16x128xf32>,
    return
  }
  func.func @transform_0(%arg0: i32, %arg1: i32) -> (i32, i32, i32, i32) {
    %c0_i32 = arith.constant 0 : i32
    %c0_i32_0 = arith.constant 0 : i32
    %c0_i32_1 = arith.constant 0 : i32
    return %arg0, %arg1, %c0_i32, %c0_i32_0 : i32, i32, i32, i32
  }
  func.func @transform_1(%arg0: i32, %arg1: i32) -> (i32, i32, i32, i32) {
    %c0_i32 = arith.constant 0 : i32
    %c0_i32_0 = arith.constant 0 : i32
    %c0_i32_1 = arith.constant 0 : i32
    return %arg0, %arg1, %c0_i32, %c0_i32_0 : i32, i32, i32, i32
  }
  func.func @transform_2(%arg0: i32, %arg1: i32) -> (i32, i32) {
    %c0_i32 = arith.constant 0 : i32
    %c0_i32_0 = arith.constant 0 : i32
    %c0_i32_1 = arith.constant 0 : i32
    return %c0_i32, %c0_i32_0 : i32, i32
  }
  func.func @transform_3(%arg0: i32, %arg1: i32) -> (i32, i32) {
    %c0_i32 = arith.constant 0 : i32
    %c0_i32_0 = arith.constant 0 : i32
    %c0_i32_1 = arith.constant 0 : i32
    return %c0_i32, %c0_i32_0 : i32, i32
  }
  func.func @transform_4(%arg0: i32, %arg1: i32) -> (i32, i32, i32, i32) {
    %c0_i32 = arith.constant 0 : i32
    %c0_i32_0 = arith.constant 0 : i32
    %c0_i32_1 = arith.constant 0 : i32
    return %arg0, %arg1, %c0_i32, %c0_i32_0 : i32, i32, i32, i32
  }
}

</mosaic_0001>

<bundles_post_ra>
// kernel: triangular_edge_update.3
= control target key start
LH: loop header
LB: loop body
LE: loop exit
PB: predicated region body
PF: predicated region fallthrough
CT: control target
= control target key end

     0   :  { %11 = vsyncpa [#allocation3], 0  ;;  %s3285_s0 = inlined_call_operand.hbm [shape: f32[2,16,16,128], index: 0, kind: input, shape index: {}]   ;;  %s3286_s1 = inlined_call_operand.vmem [shape: f32[128,640], index: 1, kind: input, shape index: {}]   ;;  %s3287_s2 = inlined_call_operand.vmem [shape: f32[1,640], index: 2, kind: input, shape index: {}]   ;;  %s3288_s3 = inlined_call_operand.vmem [shape: f32[2,16,16,128], index: 3, kind: output, shape index: {0}]   ;;  %s3289_s4 = inlined_call_operand.vmem [shape: f32[2,16,16,128], index: 4, kind: output, shape index: {1}]   ;;  %s3290_s5 = inlined_call_operand.vmem [shape: f32[2,16,16,128], index: 5, kind: output, shape index: {2}]  }
   0x1   :  { %13 = vsyncpa [#allocation3 + $0x1], 0  ;;  %s2382_s18 = smov 0   ;;  %s2384_s19 = smov 0  }
   0x2   :  { %s2386_s20 = smov 0   ;;  %s2388_s21 = smov 0  }
   0x3   :  { %s2390_s22 = smov 0   ;;  %s2392_s23 = smov 0  }
   0x4   :  { %s2394_s24 = smov 0   ;;  %s2396_s25 = smov 0  }
   0x5 LB: > { %s1678_s26 = sadd.s32 4294967295, %s2346_s25   ;;  %s28_s27 = sadd.s32 1, %s2338_s23  ;;  %s2346_s25 = sphi %s2396_s25, %s19_s25   ;;  %s2342_s24 = sphi %s2394_s24, %s3307_s24   ;;  %s2338_s23 = sphi %s2392_s23, %s3306_s23   ;;  %s2334_s22 = sphi %s2390_s22, %s3305_s22   ;;  %s2330_s21 = sphi %s2388_s21, %s3304_s21   ;;  %s2326_s20 = sphi %s2386_s20, %s3303_s20   ;;  %s2322_s19 = sphi %s2384_s19, %s3302_s19   ;;  %s2318_s18 = sphi %s2382_s18, %s3301_s18  }
   0x6   : > { %p29_p0 = scmp.ge.s32.totalorder %s28_s27, 2  ;;  %s31_s28 = sadd.s32 1, %s2342_s24 }
   0x7   : > { %s40_s29 = sadd.s32 1, %s2326_s20  ;;  %p47_p1 = scmp.ne.s32.totalorder %s2326_s20, %s2322_s19 }
   0x8   : > { %s3309_s27 = smov (%p29_p0, %s28_s27), 0  ;;  %s3311_s28 = smov (!%p29_p0, %s31_s28), %s2342_s24 }
   0x9   : > { %3293 = sst [smem:[#allocation5_spill]] %s3309_s27  ;;  %s36_s30 = ssub.s32 %s2338_s23, %s3309_s27 }
   0xa   : > { %p48_p2 = scmp.eq.s32.totalorder %s2346_s25, 0  ;;  %p33_p3 = scmp.ge.s32.totalorder %s3311_s28, 2 }
   0xb   : > { %p53_p4 = scmp.ne.s32.totalorder %s2322_s19, %s2318_s18  ;;  %p54_p6 = scmp.eq.s32.totalorder %s1678_s26, 0 }
   0xc   : > { %p2433_p5 = por %p48_p2, %p47_p1  ;;  %s3313_s28 = smov (%p33_p3, %s3311_s28), 0 }
   0xd   : > { %3295 = sst [smem:[#allocation6_spill]] %s3313_s28  ;;  %p2439_p7 = por %p54_p6, %p53_p4 }
   0xe   : > { %s35_s8 = ssub.s32 %s2342_s24, %s3313_s28  ;;  %p1958_p8 = scmp.lt.s32.totalorder %s2346_s25, 4 }
   0xf   : > { %s37_s9 = sor.u32 %s36_s30, %s35_s8  ;;  %s209_s10 = sand.u32 1, %s2326_s20  }
  0x10   : > { %p38_p9 = scmp.eq.s32.totalorder %s37_s9, 0  ;;  %s1682_s11 = sshll.u32 %s209_s10, 7 }
  0x11   : > { %s1751_s12 = sshll.u32 %s2338_s23, 4  ;;  %s1685_s14 = sshll.u32 %s2342_s24, 5 }
  0x12   : > { %s2449_s13 = scalar_select %p38_p9, %s2326_s20, %s40_s29  }
  0x13   : > { %s220_s15 = sadd.s32 %s1751_s12, %s1685_s14  ;;  %s213_s16 = scalar_lea.vmem [#allocation2], %s1682_s11 }
  0x14   : > { %s223_s17 = sshll.u32 %s213_s16, 4  ;;  %s1686_s18 = sshll.u32 %s220_s15, 7  ;;  %s2452_s17 = int_to_ptr.vmem [resolvable:$true] %s223_s17 }
  0x15   : > { %s2457_s28 = scalar_lea.hbm %s3285_s0, %s1686_s18  ;;  %p2463_p10 = pnand %p1958_p8, %p2433_p5 }
  0x16   : > { %s2468_s30 = scalar_lea.sflag [#allocation3], %s209_s10  ;;  %s2250_s8 = scalar_lea.hbm %s2457_s28, 2048 }
  0x17   : > { %p2251_p12 = scmp.ne.s32.totalorder %s2457_s28, %s2250_s8  ;;  %p2252_p13 = pneg %p2463_p10 }
  0x18   : > { %s2255_s9 = scalar_lea.hbm %s3285_s0, 8192  ;;  %p2256_p2 = scmp.lt.u32.totalorder %s2457_s28, %s3285_s0 }
  0x19   : > { %p2253_p0 = pnand %p2252_p13, %p2251_p12  ;;  %p2257_p3 = scmp.lt.u32.totalorder %s2255_s9, %s2250_s8 }
  0x1a   : > { %p2259_p5 = scmp.lt.u32.totalorder %s2250_s8, %s2457_s28 }
  0x1b   : > { %p2254_p1 = pneg %p2253_p0  ;;  %p2258_p4 = por %p2257_p3, %p2256_p2 }
  0x1d   : > { %p2260_p6 = por %p2259_p5, %p2258_p4 }
  0x1f   : > { %p2261_p8 = pnand %p2260_p6, %p2254_p1 }
  0x21   : > { %2264 = shalt.err (!%p2261_p8)
}
  0x22   : > { %s2265_s10 = scalar_lea.vmem %s2452_s17, 2048  ;;  %s2348_s14 = smov [#allocation2]  }
  0x23   : > { %p2266_p9 = scmp.ne.s32.totalorder %s2452_s17, %s2265_s10  ;;  %s2270_s15 = sshll.u32 %s2348_s14, 4  ;;  %s2271_s15 = int_to_ptr.vmem [resolvable:$false] %s2270_s15 }
  0x24   : > { %s2272_s16 = scalar_lea.vmem %s2271_s15, 4096  ;;  %p2273_p11 = scmp.lt.s32.totalorder %s2452_s17, %s2271_s15 }
  0x25   : > { %p2268_p12 = pnand %p2266_p9, %p2252_p13  ;;  %p2274_p2 = scmp.lt.s32.totalorder %s2272_s16, %s2265_s10 }
  0x27   : > { %p2269_p0 = pneg %p2268_p12  ;;  %p2275_p3 = por %p2274_p2, %p2273_p11 }
  0x29   : > { %p2276_p4 = pnand %p2275_p3, %p2269_p0 }
  0x2b   : > { %2279 = shalt.err (!%p2276_p4)
}
  0x2c   : > { %s2349_s18 = smov 128   ;;  %s2350_s26 = smov 8  }
  0x2d   : > { %1957 = dma.hbm_to_vmem [thread:$0]  (!%p2463_p10), %s2457_s28, 2048, %s2452_s17, %s2468_s30, %s2349_s18, %s2349_s18, %s2350_s26  }
  0x2e   : > { %p231_p13 = scmp.lt.s32.totalorder %s2346_s25, 5  ;;  %p3298_p1 = scmp.ge.s32.totalorder %s2346_s25, 1 }
  0x30   : > { %p232_p5 = pnand %p3298_p1, %p231_p13 }
  0x31   : > { %s237_s8 = sand.u32 (!%p232_p5), 1, %s2322_s19  }
  0x32   : > { %235 = sbr.rel (%p232_p5) target bundleno = 702 (0x2be), region = 32  ;;  %s1688_s27 = sshll.u32 (!%p232_p5), %s237_s8, 7 }
  0x33   : > { %s238_s6 = scalar_lea.sflag (!%p232_p5), [#allocation3], %s237_s8  ;;  %s2500_s9 = scalar_lea.vmem (!%p232_p5), [#allocation2], %s1688_s27 }
  0x39   : > { %2313 = dma.done.wait (%p2439_p7), %s238_s6, 2048  }
  0x3a   : > { %2315 = vsyncadd (%p2439_p7), %s238_s6, 4294965248  ;;  %v2507_v0 = vld [vmem:[%s2500_s9] sm:$0xff]  ;;  %v2510_v1 = vld [vmem:[%s2500_s9 + $0x10] sm:$0xff]  ;;  %s1689_s15 = sshll.u32 %s2330_s21, 3  ;;  %p295_p7 = scmp.lt.s32.totalorder %s2334_s22, 1 }
  0x3b   : > { %343 = vadd.xlane.f32.xlu0 %v2507_v0  ;;  %347 = vadd.xlane.f32.xlu1 %v2510_v1  ;;  %v2515_v2 = vld [vmem:[%s2500_s9 + $0x8] sm:$0xff]  ;;  %v2518_v3 = vld [vmem:[%s2500_s9 + $0x18] sm:$0xff]  ;;  %v2523_v4 = vld [vmem:[%s2500_s9 + $0x20] sm:$0xff]  ;;  %p297_p10 = scmp.lt.s32.totalorder %s1689_s15, 15 }
  0x3c   : > { %v2526_v5 = vld [vmem:[%s2500_s9 + $0x28] sm:$0xff]  ;;  %v2531_v6 = vld [vmem:[%s2500_s9 + $0x30] sm:$0xff]  ;;  %v2534_v7 = vld [vmem:[%s2500_s9 + $0x38] sm:$0xff]  ;;  %s3315_s22 = smov (!%p295_p7, %s2334_s22), 1 }
  0x3d   : > { %v2539_v8 = vld [vmem:[%s2500_s9 + $0x40] sm:$0xff]  ;;  %v2542_v9 = vld [vmem:[%s2500_s9 + $0x48] sm:$0xff]  ;;  %v2547_v10 = vld [vmem:[%s2500_s9 + $0x50] sm:$0xff]  ;;  %s3317_s15 = smov (!%p297_p10, %s1689_s15), 15  ;;  %s1691_s16 = sshll.u32 %s3315_s22, 5 }
  0x3e   : > { %v2550_v11 = vld [vmem:[%s2500_s9 + $0x58] sm:$0xff]  ;;  %v2555_v12 = vld [vmem:[%s2500_s9 + $0x60] sm:$0xff]  ;;  %v2558_v13 = vld [vmem:[%s2500_s9 + $0x68] sm:$0xff]  ;;  %s1690_s21 = sshll.u32 %s3317_s15, 1 }
  0x3f   : > { %345 = vadd.xlane.f32.xlu0 %v2515_v2  ;;  %349 = vadd.xlane.f32.xlu1 %v2518_v3  ;;  %v2563_v14 = vld [vmem:[%s2500_s9 + $0x70] sm:$0xff]  ;;  %v2566_v15 = vld [vmem:[%s2500_s9 + $0x78] sm:$0xff]  ;;  %v521_v16 = vld [vmem:[%s3286_s1 + $0x8] sm:$0xff]  ;;  %s301_s22 = sadd.s32 %s1691_s16, %s1690_s21 }
  0x40   : > { %v526_v17 = vld [vmem:[%s3286_s1 + $0x30] sm:$0xff]  ;;  %v523_v18 = vld [vmem:[%s3286_s1 + $0x18] sm:$0xff]  ;;  %v528_v20 = vld [vmem:[%s3286_s1 + $0x40] sm:$0xff]  ;;  %s3046_s18 = sshll.u32 %s301_s22, 3 }
  0x41   : > { %v1840_v19 = vpack.c.bf16 %v526_v17, %v521_v16  ;;  %v520_v21 = vld [vmem:[%s3286_s1] sm:$0xff]  ;;  %v525_v22 = vld [vmem:[%s3286_s1 + $0x28] sm:$0xff]  ;;  %v1872_v23 = vpack.c.bf16 %v528_v20, %v523_v18  ;;  %v522_v25 = vld [vmem:[%s3286_s1 + $0x10] sm:$0xff]  ;;  %s3060_s27 = scalar_lea.vmem %s3288_s3, %s3046_s18  ;;  %s3068_s28 = scalar_lea.vmem %s3289_s4, %s3046_s18 }
  0x42   : > { %v1842_v24 = vpack.c.bf16 %v525_v22, %v520_v21  ;;  %v527_v26 = vld [vmem:[%s3286_s1 + $0x38] sm:$0xff]  ;;  %v536_v29 = vld [vmem:[%s3286_s1 + $0x80] sm:$0xff]  ;;  %v533_v30 = vld [vmem:[%s3286_s1 + $0x68] sm:$0xff]  ;;  %s3241_s29 = scalar_lea.vmem %s3290_s5, %s3046_s18 }
  0x43   : > { %351 = vadd.xlane.f32.xlu0 %v2523_v4  ;;  %353 = vadd.xlane.f32.xlu1 %v2526_v5  ;;  %v531_v27 = vld [vmem:[%s3286_s1 + $0x58] sm:$0xff]  ;;  %v1874_v28 = vpack.c.bf16 %v527_v26, %v522_v25  ;;  %v538_v31 = vld [vmem:[%s3286_s1 + $0x90] sm:$0xff]  ;;  %v532_v36 = vld [vmem:[%s3286_s1 + $0x60] sm:$0xff] }
  0x44   : > { %1841 = vmatprep.subr.bf16.mxu0 %v1840_v19  ;;  %1873 = vmatprep.subr.bf16.mxu1 %v1872_v23  ;;  %v1844_v32 = vpack.c.bf16 %v536_v29, %v531_v27  ;;  %v1876_v33 = vpack.c.bf16 %v538_v31, %v533_v30  ;;  %v530_v34 = vld [vmem:[%s3286_s1 + $0x50] sm:$0xff]  ;;  %v535_v35 = vld [vmem:[%s3286_s1 + $0x78] sm:$0xff]  ;;  %v537_v38 = vld [vmem:[%s3286_s1 + $0x88] sm:$0xff] }
  0x45   : > { %1843 = vmatpush1.bf16.msra.mxu0 %v1842_v24  ;;  %1875 = vmatpush1.bf16.msra.mxu1 %v1874_v28  ;;  %v1846_v37 = vpack.c.bf16 %v535_v35, %v530_v34  ;;  %v541_v39 = vld [vmem:[%s3286_s1 + $0xa8] sm:$0xff]  ;;  %v546_v40 = vld [vmem:[%s3286_s1 + $0xd0] sm:$0xff]  ;;  %v1878_v41 = vpack.c.bf16 %v537_v38, %v532_v36  ;;  %v543_v43 = vld [vmem:[%s3286_s1 + $0xb8] sm:$0xff] }
  0x46   : > { %1845 = vmatprep.subr.bf16.mxu0 %v1844_v32  ;;  %1877 = vmatprep.subr.bf16.mxu1 %v1876_v33  ;;  %v1848_v42 = vpack.c.bf16 %v546_v40, %v541_v39  ;;  %v548_v44 = vld [vmem:[%s3286_s1 + $0xe0] sm:$0xff]  ;;  %v545_v47 = vld [vmem:[%s3286_s1 + $0xc8] sm:$0xff]  ;;  %v542_v48 = vld [vmem:[%s3286_s1 + $0xb0] sm:$0xff] }
  0x47   : > { %355 = vadd.xlane.f32.xlu0 %v2531_v6  ;;  %357 = vadd.xlane.f32.xlu1 %v2534_v7  ;;  %v540_v45 = vld [vmem:[%s3286_s1 + $0xa0] sm:$0xff]  ;;  %v1880_v46 = vpack.c.bf16 %v548_v44, %v543_v43  ;;  %v547_v49 = vld [vmem:[%s3286_s1 + $0xd8] sm:$0xff]  ;;  %v553_v53 = vld [vmem:[%s3286_s1 + $0x108] sm:$0xff] }
  0x48   : > { %v1850_v50 = vpack.c.bf16 %v545_v47, %v540_v45  ;;  %v551_v51 = vld [vmem:[%s3286_s1 + $0xf8] sm:$0xff]  ;;  %v556_v52 = vld [vmem:[%s3286_s1 + $0x120] sm:$0xff]  ;;  %v1882_v54 = vpack.c.bf16 %v547_v49, %v542_v48  ;;  %v558_v56 = vld [vmem:[%s3286_s1 + $0x130] sm:$0xff] }
  0x49   : > { %1847 = vmatpush1.bf16.msra.mxu0 %v1846_v37  ;;  %1879 = vmatpush1.bf16.msra.mxu1 %v1878_v41  ;;  %v1852_v55 = vpack.c.bf16 %v556_v52, %v551_v51  ;;  %v550_v57 = vld [vmem:[%s3286_s1 + $0xf0] sm:$0xff]  ;;  %v555_v58 = vld [vmem:[%s3286_s1 + $0x118] sm:$0xff]  ;;  %v1884_v59 = vpack.c.bf16 %v558_v56, %v553_v53  ;;  %v552_v60 = vld [vmem:[%s3286_s1 + $0x100] sm:$0xff] }
  0x4a   : > { %1849 = vmatprep.subr.bf16.mxu0 %v1848_v42  ;;  %1881 = vmatprep.subr.bf16.mxu1 %v1880_v46  ;;  %v557_v61 = vld [vmem:[%s3286_s1 + $0x128] sm:$0xff]  ;;  %v1854_v62 = vpack.c.bf16 %v555_v58, %v550_v57  ;;  %v566_v47 = vld [vmem:[%s3286_s1 + $0x170] sm:$0xff]  ;;  %v560_v51 = vld [vmem:[%s3286_s1 + $0x140] sm:$0xff] }
  0x4b   : > { %359 = vadd.xlane.f32.xlu0 %v2539_v8  ;;  %361 = vadd.xlane.f32.xlu1 %v2542_v9  ;;  %v1886_v63 = vpack.c.bf16 %v557_v61, %v552_v60  ;;  %v561_v46 = vld [vmem:[%s3286_s1 + $0x148] sm:$0xff]  ;;  %v562_v56 = vld [vmem:[%s3286_s1 + $0x150] sm:$0xff]  ;;  %v567_v57 = vld [vmem:[%s3286_s1 + $0x178] sm:$0xff] }
  0x4c   : > { %v565_v52 = vld [vmem:[%s3286_s1 + $0x168] sm:$0xff]  ;;  %v1890_v60 = vpack.c.bf16 %v567_v57, %v562_v56  ;;  %v590_v56 = vld [vmem:[%s3286_s1 + $0x230] sm:$0xff]  ;;  %v595_v57 = vld [vmem:[%s3286_s1 + $0x258] sm:$0xff] }
  0x4d   : > { %1851 = vmatpush1.bf16.msra.mxu0 %v1850_v50  ;;  %1883 = vmatpush1.bf16.msra.mxu1 %v1882_v54  ;;  %v1856_v50 = vpack.c.bf16 %v566_v47, %v561_v46 }
  0x4e   : > { %1853 = vmatprep.subr.bf16.mxu0 %v1852_v55  ;;  %1885 = vmatprep.subr.bf16.mxu1 %v1884_v59  ;;  %v1858_v59 = vpack.c.bf16 %v565_v52, %v560_v51  ;;  %v591_v52 = vld [vmem:[%s3286_s1 + $0x238] sm:$0xff] }
  0x4f   : > { %363 = vadd.xlane.f32.xlu0 %v2547_v10  ;;  %365 = vadd.xlane.f32.xlu1 %v2550_v11 }
  0x51   : > { %1855 = vmatpush1.bf16.msra.mxu0 %v1854_v62  ;;  %1887 = vmatpush1.bf16.msra.mxu1 %v1886_v63 }
  0x52   : > { %1857 = vmatprep.subr.bf16.mxu0 %v1856_v50 }
  0x53   : > { %367 = vadd.xlane.f32.xlu0 %v2555_v12  ;;  %369 = vadd.xlane.f32.xlu1 %v2558_v13 }
  0x55   : > { %1859 = vmatpush1.bf16.msra.mxu0 %v1858_v59  ;;  %v1870_v59 = vpack.c.bf16 %v595_v57, %v590_v56 }
  0x57   : > { %371 = vadd.xlane.f32.xlu0 %v2563_v14  ;;  %373 = vadd.xlane.f32.xlu1 %v2566_v15 }
  0xc8   : > { %v344_v16 = vpop.xlane.xlu0 %343  ;;  %v348_v17 = vpop.xlane.xlu1 %347 }
  0xc9   : > { %v376_v18 = vmul.f32 0.0078125, %v344_v16  ;;  %v378_v19 = vmul.f32 0.0078125, %v348_v17 }
  0xcb   : > { %v2667_v20 = vsub.f32 %v2507_v0, %v376_v18  ;;  %v2670_v21 = vsub.f32 %v2510_v1, %v378_v19  ;;  %v571_v18 = vld [vmem:[%s3286_s1 + $0x198] sm:$0xff] }
  0xcc   : > { %v346_v22 = vpop.xlane.xlu0 %345  ;;  %v350_v23 = vpop.xlane.xlu1 %349 }
  0xcd   : > { %v377_v24 = vmul.f32 0.0078125, %v346_v22  ;;  %v408_v25 = vmul.f32 %v2667_v20, %v2667_v20  ;;  %v379_v26 = vmul.f32 0.0078125, %v350_v23  ;;  %v410_v0 = vmul.f32 %v2670_v21, %v2670_v21 }
  0xcf   : > { %v2675_v27 = vsub.f32 %v2515_v2, %v377_v24  ;;  %424 = vadd.xlane.f32.xlu0 %v408_v25  ;;  %v2678_v28 = vsub.f32 %v2518_v3, %v379_v26  ;;  %v578_v24 = vld [vmem:[%s3286_s1 + $0x1d0] sm:$0xff]  ;;  %v575_v26 = vld [vmem:[%s3286_s1 + $0x1b8] sm:$0xff] }
  0xd0   : > { %v352_v29 = vpop.xlane.xlu0 %351  ;;  %v354_v1 = vpop.xlane.xlu1 %353  ;;  %v570_v25 = vld [vmem:[%s3286_s1 + $0x190] sm:$0xff] }
  0xd1   : > { %v380_v30 = vmul.f32 0.0078125, %v352_v29  ;;  %v409_v31 = vmul.f32 %v2675_v27, %v2675_v27  ;;  %v381_v32 = vmul.f32 0.0078125, %v354_v1  ;;  %v411_v3 = vmul.f32 %v2678_v28, %v2678_v28 }
  0xd3   : > { %v2685_v33 = vsub.f32 %v2523_v4, %v380_v30  ;;  %428 = vadd.xlane.f32.xlu0 %v410_v0  ;;  %426 = vadd.xlane.f32.xlu1 %v409_v31  ;;  %v2688_v2 = vsub.f32 %v2526_v5, %v381_v32  ;;  %v1862_v30 = vpack.c.bf16 %v575_v26, %v570_v25  ;;  %v572_v31 = vld [vmem:[%s3286_s1 + $0x1a0] sm:$0xff]  ;;  %v577_v32 = vld [vmem:[%s3286_s1 + $0x1c8] sm:$0xff] }
  0xd4   : > { %v356_v34 = vpop.xlane.xlu0 %355  ;;  %v358_v35 = vpop.xlane.xlu1 %357 }
  0xd5   : > { %v382_v36 = vmul.f32 0.0078125, %v356_v34  ;;  %v412_v37 = vmul.f32 %v2685_v33, %v2685_v33  ;;  %v383_v38 = vmul.f32 0.0078125, %v358_v35  ;;  %v413_v5 = vmul.f32 %v2688_v2, %v2688_v2 }
  0xd6   : > { %v1894_v35 = vpack.c.bf16 %v577_v32, %v572_v31 }
  0xd7   : > { %v2695_v39 = vsub.f32 %v2531_v6, %v382_v36  ;;  %430 = vadd.xlane.f32.xlu1 %v411_v3  ;;  %432 = vadd.xlane.f32.xlu0 %v412_v37  ;;  %v2698_v4 = vsub.f32 %v2534_v7, %v383_v38  ;;  %v581_v38 = vld [vmem:[%s3286_s1 + $0x1e8] sm:$0xff] }
  0xd8   : > { %v360_v40 = vpop.xlane.xlu0 %359  ;;  %v362_v41 = vpop.xlane.xlu1 %361 }
  0xd9   : > { %v384_v42 = vmul.f32 0.0078125, %v360_v40  ;;  %v414_v43 = vmul.f32 %v2695_v39, %v2695_v39  ;;  %v385_v44 = vmul.f32 0.0078125, %v362_v41  ;;  %v415_v7 = vmul.f32 %v2698_v4, %v2698_v4 }
  0xdb   : > { %v2705_v45 = vsub.f32 %v2539_v8, %v384_v42  ;;  %434 = vadd.xlane.f32.xlu1 %v413_v5  ;;  %436 = vadd.xlane.f32.xlu0 %v414_v43  ;;  %v2708_v6 = vsub.f32 %v2542_v9, %v385_v44  ;;  %v563_v8 = vld [vmem:[%s3286_s1 + $0x158] sm:$0xff]  ;;  %v568_v9 = vld [vmem:[%s3286_s1 + $0x180] sm:$0xff]  ;;  %v586_v5 = vld [vmem:[%s3286_s1 + $0x210] sm:$0xff] }
  0xdc   : > { %v364_v48 = vpop.xlane.xlu0 %363  ;;  %v366_v49 = vpop.xlane.xlu1 %365  ;;  %v1888_v58 = vpack.c.bf16 %v568_v9, %v563_v8  ;;  %v588_v42 = vld [vmem:[%s3286_s1 + $0x220] sm:$0xff]  ;;  %v585_v44 = vld [vmem:[%s3286_s1 + $0x208] sm:$0xff]  ;;  %v1864_v46 = vpack.c.bf16 %v586_v5, %v581_v38  ;;  %v534_v5 = vld [vmem:[%s3286_s1 + $0x70] sm:$0xff] }
  0xdd   : > { %v386_v53 = vmul.f32 0.0078125, %v364_v48  ;;  %v416_v54 = vmul.f32 %v2705_v45, %v2705_v45  ;;  %v387_v55 = vmul.f32 0.0078125, %v366_v49  ;;  %v417_v63 = vmul.f32 %v2708_v6, %v2708_v6  ;;  %v580_v43 = vld [vmem:[%s3286_s1 + $0x1e0] sm:$0xff]  ;;  %v582_v48 = vld [vmem:[%s3286_s1 + $0x1f0] sm:$0xff]  ;;  %v587_v49 = vld [vmem:[%s3286_s1 + $0x218] sm:$0xff] }
  0xde   : > { %1889 = vmatprep.subr.bf16.mxu1 %v1888_v58  ;;  %v1866_v8 = vpack.c.bf16 %v585_v44, %v580_v43  ;;  %v1898_v51 = vpack.c.bf16 %v587_v49, %v582_v48 }
  0xdf   : > { %v2739_v61 = vsub.f32 %v2547_v10, %v386_v53  ;;  %438 = vadd.xlane.f32.xlu1 %v415_v7  ;;  %440 = vadd.xlane.f32.xlu0 %v416_v54  ;;  %v2742_v62 = vsub.f32 %v2550_v11, %v387_v55  ;;  %v576_v10 = vld [vmem:[%s3286_s1 + $0x1c0] sm:$0xff]  ;;  %v573_v11 = vld [vmem:[%s3286_s1 + $0x1a8] sm:$0xff]  ;;  %v598_v55 = vld [vmem:[%s3286_s1 + $0x270] sm:$0xff] }
  0xe0   : > { %v368_v16 = vpop.xlane.xlu0 %367  ;;  %v370_v17 = vpop.xlane.xlu1 %369  ;;  %1891 = vmatpush1.bf16.msra.mxu1 %v1890_v60  ;;  %v1860_v29 = vpack.c.bf16 %v576_v10, %v571_v18  ;;  %v1892_v1 = vpack.c.bf16 %v578_v24, %v573_v11  ;;  %v596_v53 = vld [vmem:[%s3286_s1 + $0x260] sm:$0xff]  ;;  %v2351_v18 = vmov 0.0   ;;  %v529_v11 = vld [vmem:[%s3286_s1 + $0x48] sm:$0xff] }
  0xe1   : > { %v388_v19 = vmul.f32 0.0078125, %v368_v16  ;;  %v418_v22 = vmul.f32 %v2739_v61, %v2739_v61  ;;  %v389_v23 = vmul.f32 0.0078125, %v370_v17  ;;  %v419_v0 = vmul.f32 %v2742_v62, %v2742_v62  ;;  %v592_v60 = vld [vmem:[%s3286_s1 + $0x240] sm:$0xff]  ;;  %691 = vmatprep.mubr.f32.mxu0 %v2351_v18  ;;  %852 = vmatprep.mubr.f32.mxu1 %v2351_v18 }
  0xe2   : > { %1861 = vmatprep.subr.bf16.mxu0 %v1860_v29  ;;  %1893 = vmatprep.subr.bf16.mxu1 %v1892_v1  ;;  %v524_v10 = vld [vmem:[%s3286_s1 + $0x20] sm:$0xff] }
  0xe3   : > { %v2775_v3 = vsub.f32 %v2555_v12, %v388_v19  ;;  %442 = vadd.xlane.f32.xlu1 %v417_v63  ;;  %444 = vadd.xlane.f32.xlu0 %v418_v22  ;;  %v2778_v34 = vsub.f32 %v2558_v13, %v389_v23  ;;  %v583_v12 = vld [vmem:[%s3286_s1 + $0x1f8] sm:$0xff]  ;;  %v597_v63 = vld [vmem:[%s3286_s1 + $0x268] sm:$0xff]  ;;  %v1904_v19 = vpack.c.bf16 %v529_v11, %v524_v10  ;;  %v574_v11 = vld [vmem:[%s3286_s1 + $0x1b0] sm:$0xff] }
  0xe4   : > { %v372_v36 = vpop.xlane.xlu0 %371  ;;  %v374_v37 = vpop.xlane.xlu1 %373  ;;  %1863 = vmatpush1.bf16.msra.mxu0 %v1862_v30  ;;  %1895 = vmatpush1.bf16.msra.mxu1 %v1894_v35  ;;  %v1896_v47 = vpack.c.bf16 %v588_v42, %v583_v12  ;;  %v1902_v17 = vpack.c.bf16 %v597_v63, %v592_v60  ;;  %v539_v12 = vld [vmem:[%s3286_s1 + $0x98] sm:$0xff] }
  0xe5   : > { %v390_v40 = vmul.f32 0.0078125, %v372_v36  ;;  %v420_v13 = vmul.f32 %v2775_v3, %v2775_v3  ;;  %v391_v41 = vmul.f32 0.0078125, %v374_v37  ;;  %v421_v7 = vmul.f32 %v2778_v34, %v2778_v34  ;;  %1865 = vmatprep.subr.bf16.mxu0 %v1864_v46  ;;  %v549_v46 = vld [vmem:[%s3286_s1 + $0xe8] sm:$0xff] }
  0xe6   : > { %1897 = vmatprep.subr.bf16.mxu1 %v1896_v47  ;;  %v1908_v44 = vpack.c.bf16 %v539_v12, %v534_v5 }
  0xe7   : > { %v2809_v50 = vsub.f32 %v2563_v14, %v390_v40  ;;  %446 = vadd.xlane.f32.xlu1 %v419_v0  ;;  %448 = vadd.xlane.f32.xlu0 %v420_v13  ;;  %v2812_v9 = vsub.f32 %v2566_v15, %v391_v41  ;;  %v593_v14 = vld [vmem:[%s3286_s1 + $0x248] sm:$0xff]  ;;  %v1868_v15 = vpack.c.bf16 %v596_v53, %v591_v52  ;;  %v554_v53 = vld [vmem:[%s3286_s1 + $0x110] sm:$0xff] }
  0xe8   : > { %1867 = vmatpush1.bf16.msra.mxu0 %v1866_v8  ;;  %1899 = vmatpush1.bf16.msra.mxu1 %v1898_v51  ;;  %v1900_v58 = vpack.c.bf16 %v598_v55, %v593_v14  ;;  %v559_v14 = vld [vmem:[%s3286_s1 + $0x138] sm:$0xff] }
  0xe9   : > { %v422_v54 = vmul.f32 %v2809_v50, %v2809_v50  ;;  %v423_v16 = vmul.f32 %v2812_v9, %v2812_v9  ;;  %1869 = vmatprep.subr.bf16.mxu0 %v1868_v15  ;;  %v1916_v57 = vpack.c.bf16 %v559_v14, %v554_v53 }
  0xea   : > { %1901 = vmatprep.subr.bf16.mxu1 %v1900_v58  ;;  %v564_v58 = vld [vmem:[%s3286_s1 + $0x160] sm:$0xff] }
  0xeb   : > { %450 = vadd.xlane.f32.xlu1 %v421_v7  ;;  %452 = vadd.xlane.f32.xlu0 %v422_v54  ;;  %v544_v7 = vld [vmem:[%s3286_s1 + $0xc0] sm:$0xff] }
  0xec   : > { %1871 = vmatpush1.bf16.msra.mxu0 %v1870_v59  ;;  %1903 = vmatpush1.bf16.msra.mxu1 %v1902_v17  ;;  %v1912_v52 = vpack.c.bf16 %v549_v46, %v544_v7  ;;  %v569_v59 = vld [vmem:[%s3286_s1 + $0x188] sm:$0xff] }
  0xed   : > { %1905 = vmatprep.subr.bf16.mxu0 %v1904_v19  ;;  %1936 = vmatprep.subr.bf16.mxu1 %v1904_v19  ;;  %v1920_v10 = vpack.c.bf16 %v569_v59, %v564_v58 }
  0xef   : > { %454 = vadd.xlane.f32.xlu1 %v423_v16 }
 0x15c   : > { %v425_v22 = vpop.xlane.xlu0 %424 }
 0x15d   : > { %v456_v23 = vmul.f32 0.0078125, %v425_v22 }
 0x15f   : > { %v472_v24 = vadd.f32 1e-05, %v456_v23 }
 0x160   : > { %v427_v25 = vpop.xlane.xlu1 %426  ;;  %v429_v26 = vpop.xlane.xlu0 %428 }
 0x161   : > { %2026 = vrsqrt.f32 %v472_v24  ;;  %v457_v0 = vmul.f32 0.0078125, %v427_v25  ;;  %v458_v29 = vmul.f32 0.0078125, %v429_v26 }
 0x163   : > { %v473_v1 = vadd.f32 1e-05, %v457_v0  ;;  %v474_v30 = vadd.f32 1e-05, %v458_v29  ;;  %v584_v0 = vld [vmem:[%s3286_s1 + $0x200] sm:$0xff]  ;;  %v589_v29 = vld [vmem:[%s3286_s1 + $0x228] sm:$0xff] }
 0x164   : > { %v431_v31 = vpop.xlane.xlu1 %430  ;;  %v433_v32 = vpop.xlane.xlu0 %432 }
 0x165   : > { %2028 = vrsqrt.f32 %v473_v1  ;;  %v459_v35 = vmul.f32 0.0078125, %v431_v31  ;;  %v460_v37 = vmul.f32 0.0078125, %v433_v32 }
 0x166   : > { %2030 = vrsqrt.f32 %v474_v30 }
 0x167   : > { %v475_v36 = vadd.f32 1e-05, %v459_v35  ;;  %v476_v13 = vadd.f32 1e-05, %v460_v37  ;;  %v1928_v35 = vpack.c.bf16 %v589_v29, %v584_v0  ;;  %v599_v37 = vld [vmem:[%s3286_s1 + $0x278] sm:$0xff] }
 0x168   : > { %v435_v38 = vpop.xlane.xlu1 %434  ;;  %v437_v42 = vpop.xlane.xlu0 %436 }
 0x169   : > { %2032 = vrsqrt.f32 %v475_v36  ;;  %v461_v41 = vmul.f32 0.0078125, %v435_v38  ;;  %v462_v48 = vmul.f32 0.0078125, %v437_v42  ;;  %v594_v36 = vld [vmem:[%s3286_s1 + $0x250] sm:$0xff] }
 0x16a   : > { %2034 = vrsqrt.f32 %v476_v13  ;;  %v1932_v13 = vpack.c.bf16 %v599_v37, %v594_v36 }
 0x16b   : > { %v2027_v40 = vpop.eup %2026  ;;  %v477_v8 = vadd.f32 1e-05, %v461_v41  ;;  %v478_v54 = vadd.f32 1e-05, %v462_v48 }
 0x16c   : > { %v2857_v43 = vmul.f32 %v2027_v40, %v2667_v20  ;;  %v439_v20 = vpop.xlane.xlu1 %438  ;;  %v441_v15 = vpop.xlane.xlu0 %440 }
 0x16d   : > { %2036 = vrsqrt.f32 %v477_v8  ;;  %v464_v60 = vmul.f32 0.0078125, %v441_v15 }
 0x16e   : > { %692 = vmatmul.mubr.f32.vlgmr.msra.gmra.mrb[0].mxu0 %v2857_v43  ;;  %853 = vmatmul.mubr.f32.vlgmr.msra.gmra.mrb[0].mxu1 %v2857_v43  ;;  %2038 = vrsqrt.f32 %v478_v54 }
 0x16f   : > { %v2029_v47 = vpop.eup %2028  ;;  %1907 = vmatpush3.bf16.msra.mxu0 %v1904_v19  ;;  %1944 = vmatpush3.bf16.msra.mxu1 %v1904_v19  ;;  %v579_v19 = vld [vmem:[%s3286_s1 + $0x1d8] sm:$0xff] }
 0x170   : > { %697 = vmatprep.mubr.f32.mxu0 %v2351_v18  ;;  %858 = vmatprep.mubr.f32.mxu1 %v2351_v18  ;;  %v2870_v49 = vmul.f32 %v2029_v47, %v2675_v27  ;;  %v2031_v51 = vpop.eup %2030  ;;  %v463_v27 = vmul.f32 0.0078125, %v439_v20  ;;  %v443_v63 = vpop.xlane.xlu1 %442  ;;  %v1924_v26 = vpack.c.bf16 %v579_v19, %v574_v11 }
 0x171   : > { %1909 = vmatprep.subr.bf16.mxu0 %v1908_v44  ;;  %1937 = vmatprep.subr.bf16.mxu1 %v1908_v44  ;;  %v2883_v55 = vmul.f32 %v2031_v51, %v2670_v21  ;;  %v465_v22 = vmul.f32 0.0078125, %v443_v63  ;;  %v445_v23 = vpop.xlane.xlu0 %444 }
 0x172   : > { %698 = vmatmul.mubr.f32.gmra.mrb[2].mxu0 %v2870_v49  ;;  %859 = vmatmul.mubr.f32.gmra.mrb[2].mxu1 %v2870_v49  ;;  %v479_v21 = vadd.f32 1e-05, %v463_v27  ;;  %v466_v1 = vmul.f32 0.0078125, %v445_v23 }
 0x173   : > { %703 = vmatprep.mubr.f32.mxu0 %v2351_v18  ;;  %864 = vmatprep.mubr.f32.mxu1 %v2351_v18  ;;  %v2033_v56 = vpop.eup %2032 }
 0x174   : > { %1911 = vmatpush3.bf16.msra.mxu0 %v1908_v44  ;;  %1945 = vmatpush3.bf16.msra.mxu1 %v1908_v44  ;;  %v2896_v16 = vmul.f32 %v2033_v56, %v2678_v28  ;;  %v2035_v17 = vpop.eup %2034  ;;  %2040 = vrsqrt.f32 %v479_v21  ;;  %v480_v28 = vadd.f32 1e-05, %v464_v60  ;;  %v447_v30 = vpop.xlane.xlu1 %446 }
 0x175   : > { %1913 = vmatprep.subr.bf16.mxu0 %v1912_v52  ;;  %1938 = vmatprep.subr.bf16.mxu1 %v1912_v52  ;;  %v2909_v24 = vmul.f32 %v2035_v17, %v2685_v33  ;;  %v481_v33 = vadd.f32 1e-05, %v465_v22  ;;  %v467_v38 = vmul.f32 0.0078125, %v447_v30  ;;  %v449_v5 = vpop.xlane.xlu0 %448 }
 0x176   : > { %704 = vmatmul.mubr.f32.gmra.mrb[4].mxu0 %v2883_v55  ;;  %865 = vmatmul.mubr.f32.gmra.mrb[4].mxu1 %v2883_v55  ;;  %2042 = vrsqrt.f32 %v480_v28  ;;  %v468_v42 = vmul.f32 0.0078125, %v449_v5 }
 0x177   : > { %709 = vmatprep.mubr.f32.mxu0 %v2351_v18  ;;  %870 = vmatprep.mubr.f32.mxu1 %v2351_v18  ;;  %v2037_v25 = vpop.eup %2036  ;;  %2044 = vrsqrt.f32 %v481_v33  ;;  %v483_v41 = vadd.f32 1e-05, %v467_v38 }
 0x178   : > { %1915 = vmatpush3.bf16.msra.mxu0 %v1912_v52  ;;  %1946 = vmatpush3.bf16.msra.mxu1 %v1912_v52  ;;  %v2922_v31 = vmul.f32 %v2037_v25, %v2688_v2  ;;  %v2039_v32 = vpop.eup %2038  ;;  %v482_v2 = vadd.f32 1e-05, %v466_v1  ;;  %v451_v44 = vpop.xlane.xlu1 %450  ;;  %v484_v46 = vadd.f32 1e-05, %v468_v42 }
 0x179   : > { %1917 = vmatprep.subr.bf16.mxu0 %v1916_v57  ;;  %1939 = vmatprep.subr.bf16.mxu1 %v1916_v57  ;;  %v2935_v12 = vmul.f32 %v2039_v32, %v2695_v39  ;;  %v469_v47 = vmul.f32 0.0078125, %v451_v44  ;;  %v453_v8 = vpop.xlane.xlu0 %452 }
 0x17a   : > { %710 = vmatmul.mubr.f32.gmra.mrb[6].mxu0 %v2896_v16  ;;  %871 = vmatmul.mubr.f32.gmra.mrb[6].mxu1 %v2896_v16  ;;  %2046 = vrsqrt.f32 %v482_v2  ;;  %v470_v51 = vmul.f32 0.0078125, %v453_v8 }
 0x17b   : > { %715 = vmatprep.mubr.f32.mxu0 %v2351_v18  ;;  %876 = vmatprep.mubr.f32.mxu1 %v2351_v18  ;;  %2048 = vrsqrt.f32 %v483_v41  ;;  %v485_v20 = vadd.f32 1e-05, %v469_v47 }
 0x17c   : > { %1919 = vmatpush3.bf16.msra.mxu0 %v1916_v57  ;;  %1947 = vmatpush3.bf16.msra.mxu1 %v1916_v57  ;;  %2050 = vrsqrt.f32 %v484_v46  ;;  %v455_v52 = vpop.xlane.xlu1 %454 }
 0x17d   : > { %1921 = vmatprep.subr.bf16.mxu0 %v1920_v10  ;;  %1940 = vmatprep.subr.bf16.mxu1 %v1920_v10  ;;  %2052 = vrsqrt.f32 %v485_v20  ;;  %v471_v54 = vmul.f32 0.0078125, %v455_v52 }
 0x17e   : > { %716 = vmatmul.mubr.f32.gmra.mrb[8].mxu0 %v2909_v24  ;;  %877 = vmatmul.mubr.f32.gmra.mrb[8].mxu1 %v2909_v24  ;;  %v2041_v40 = vpop.eup %2040 }
 0x17f   : > { %721 = vmatprep.mubr.f32.mxu0 %v2351_v18  ;;  %882 = vmatprep.mubr.f32.mxu1 %v2351_v18  ;;  %v2942_v39 = vmul.f32 %v2041_v40, %v2698_v4  ;;  %v487_v56 = vadd.f32 1e-05, %v471_v54 }
 0x180   : > { %1923 = vmatpush3.bf16.msra.mxu0 %v1920_v10  ;;  %1948 = vmatpush3.bf16.msra.mxu1 %v1920_v10  ;;  %v2043_v7 = vpop.eup %2042 }
 0x181   : > { %1925 = vmatprep.subr.bf16.mxu0 %v1924_v26  ;;  %1941 = vmatprep.subr.bf16.mxu1 %v1924_v26  ;;  %v512_v4 = vmul.f32 %v2043_v7, %v2705_v45  ;;  %v2045_v48 = vpop.eup %2044  ;;  %v486_v45 = vadd.f32 1e-05, %v470_v51 }
 0x182   : > { %722 = vmatmul.mubr.f32.gmra.mrb[10].mxu0 %v2922_v31  ;;  %883 = vmatmul.mubr.f32.gmra.mrb[10].mxu1 %v2922_v31  ;;  %v513_v53 = vmul.f32 %v2045_v48, %v2708_v6 }
 0x183   : > { %727 = vmatprep.mubr.f32.mxu0 %v2351_v18  ;;  %888 = vmatprep.mubr.f32.mxu1 %v2351_v18  ;;  %2054 = vrsqrt.f32 %v486_v45 }
 0x184   : > { %1927 = vmatpush3.bf16.msra.mxu0 %v1924_v26  ;;  %1949 = vmatpush3.bf16.msra.mxu1 %v1924_v26  ;;  %v2047_v14 = vpop.eup %2046  ;;  %2056 = vrsqrt.f32 %v487_v56 }
 0x185   : > { %1929 = vmatprep.subr.bf16.mxu0 %v1928_v35  ;;  %1942 = vmatprep.subr.bf16.mxu1 %v1928_v35  ;;  %v514_v27 = vmul.f32 %v2047_v14, %v2739_v61  ;;  %v2049_v15 = vpop.eup %2048 }
 0x186   : > { %728 = vmatmul.mubr.f32.gmra.mrb[12].mxu0 %v2935_v12  ;;  %889 = vmatmul.mubr.f32.gmra.mrb[12].mxu1 %v2935_v12  ;;  %v515_v6 = vmul.f32 %v2049_v15, %v2742_v62  ;;  %v2051_v57 = vpop.eup %2050 }
 0x187   : > { %733 = vmatprep.mubr.f32.mxu0 %v2351_v18  ;;  %894 = vmatprep.mubr.f32.mxu1 %v2351_v18  ;;  %v516_v61 = vmul.f32 %v2051_v57, %v2775_v3  ;;  %v2053_v58 = vpop.eup %2052 }
 0x188   : > { %1931 = vmatpush3.bf16.msra.mxu0 %v1928_v35  ;;  %1950 = vmatpush3.bf16.msra.mxu1 %v1928_v35  ;;  %v517_v59 = vmul.f32 %v2053_v58, %v2778_v34  ;;  %v602_v34 = vlaneseq }
 0x189   : > { %1933 = vmatprep.subr.bf16.mxu0 %v1932_v13  ;;  %1943 = vmatprep.subr.bf16.mxu1 %v1932_v13 }
 0x18a   : > { %734 = vmatmul.mubr.f32.gmra.mrb[14].mxu0 %v2942_v39  ;;  %895 = vmatmul.mubr.f32.gmra.mrb[14].mxu1 %v2942_v39 }
 0x18b   : > { %739 = vmatprep.mubr.f32.mxu0 %v2351_v18  ;;  %900 = vmatprep.mubr.f32.mxu1 %v2351_v18 }
 0x18c   : > { %1935 = vmatpush3.bf16.msra.mxu0 %v1932_v13  ;;  %1951 = vmatpush3.bf16.msra.mxu1 %v1932_v13 }
 0x18d   : > { %v2055_v62 = vpop.eup %2054 }
 0x18e   : > { %740 = vmatmul.mubr.f32.gmra.mrb[16].mxu0 %v512_v4  ;;  %901 = vmatmul.mubr.f32.gmra.mrb[16].mxu1 %v512_v4  ;;  %v518_v21 = vmul.f32 %v2055_v62, %v2809_v50  ;;  %v2057_v60 = vpop.eup %2056  ;;  %v2978_v50 = vshrl.u32 %v602_v34, 7 }
 0x18f   : > { %745 = vmatprep.mubr.f32.mxu0 %v2351_v18  ;;  %906 = vmatprep.mubr.f32.mxu1 %v2351_v18  ;;  %v519_v3 = vmul.f32 %v2057_v60, %v2812_v9 }
 0x190   : > { %v604_v9 = vsub.s32 0, %v2978_v50  ;;  %v608_v45 = vsub.s32 1, %v2978_v50  ;;  %v616_v15 = vsub.s32 3, %v2978_v50 }
 0x192   : > { %746 = vmatmul.mubr.f32.gmra.mrb[18].mxu0 %v513_v53  ;;  %907 = vmatmul.mubr.f32.gmra.mrb[18].mxu1 %v513_v53 }
 0x193   : > { %751 = vmatprep.mubr.f32.mxu0 %v2351_v18  ;;  %912 = vmatprep.mubr.f32.mxu1 %v2351_v18 }
 0x196   : > { %752 = vmatmul.mubr.f32.gmra.mrb[20].mxu0 %v514_v27  ;;  %913 = vmatmul.mubr.f32.gmra.mrb[20].mxu1 %v514_v27 }
 0x197   : > { %757 = vmatprep.mubr.f32.mxu0 %v2351_v18  ;;  %918 = vmatprep.mubr.f32.mxu1 %v2351_v18 }
 0x19a   : > { %758 = vmatmul.mubr.f32.gmra.mrb[22].mxu0 %v515_v6  ;;  %919 = vmatmul.mubr.f32.gmra.mrb[22].mxu1 %v515_v6 }
 0x19b   : > { %763 = vmatprep.mubr.f32.mxu0 %v2351_v18  ;;  %924 = vmatprep.mubr.f32.mxu1 %v2351_v18 }
 0x19e   : > { %764 = vmatmul.mubr.f32.gmra.mrb[24].mxu0 %v516_v61  ;;  %925 = vmatmul.mubr.f32.gmra.mrb[24].mxu1 %v516_v61 }
 0x19f   : > { %769 = vmatprep.mubr.f32.mxu0 %v2351_v18  ;;  %930 = vmatprep.mubr.f32.mxu1 %v2351_v18 }
 0x1a2   : > { %770 = vmatmul.mubr.f32.gmra.mrb[26].mxu0 %v517_v59  ;;  %931 = vmatmul.mubr.f32.gmra.mrb[26].mxu1 %v517_v59 }
 0x1a3   : > { %775 = vmatprep.mubr.f32.mxu0 %v2351_v18  ;;  %936 = vmatprep.mubr.f32.mxu1 %v2351_v18 }
 0x1a6   : > { %776 = vmatmul.mubr.f32.gmra.mrb[28].mxu0 %v518_v21  ;;  %937 = vmatmul.mubr.f32.gmra.mrb[28].mxu1 %v518_v21 }
 0x1a7   : > { %781 = vmatprep.mubr.f32.mxu0 %v2351_v18  ;;  %942 = vmatprep.mubr.f32.mxu1 %v2351_v18  ;;  %v612_v18 = vsub.s32 2, %v2978_v50 }
 0x1aa   : > { %782 = vmatmul.mubr.f32.gmra.mrb[30].mxu0 %v519_v3  ;;  %943 = vmatmul.mubr.f32.gmra.mrb[30].mxu1 %v519_v3 }
 0x1ab   : > { %1816 = vmatprep.mubr.f32.mxu0 %v2857_v43  ;;  %1828 = vmatprep.mubr.f32.mxu1 %v512_v4  ;;  %v2985_v43 = vld [vmem:[%s3287_s2] sm:$0x1f] }
 0x1ac   : > { %v3041_v34 = vrot.slane %v2985_v43, %v608_v45 }
 0x1ae   : > { %1817 = vmatmul.mubr.f32.vlgmr.msra.gmra.mrb[32].mxu0 %v2870_v49  ;;  %1829 = vmatmul.mubr.f32.vlgmr.msra.gmra.mrb[32].mxu1 %v513_v53  ;;  %v2988_v49 = vrot.slane %v2985_v43, %v604_v9 }
 0x1af   : > { %1819 = vmatprep.mubr.f32.mxu0 %v2883_v55  ;;  %1831 = vmatprep.mubr.f32.mxu1 %v514_v27  ;;  %v2991_v55 = vrot.slane %v2985_v43, %v612_v18 }
 0x1b2   : > { %1820 = vmatmul.mubr.f32.gmra.mrb[34].mxu0 %v2896_v16  ;;  %1832 = vmatmul.mubr.f32.gmra.mrb[34].mxu1 %v515_v6 }
 0x1b3   : > { %1822 = vmatprep.mubr.f32.mxu0 %v2909_v24  ;;  %1834 = vmatprep.mubr.f32.mxu1 %v516_v61 }
 0x1b6   : > { %1823 = vmatmul.mubr.f32.gmra.mrb[36].mxu0 %v2922_v31  ;;  %1835 = vmatmul.mubr.f32.gmra.mrb[36].mxu1 %v517_v59 }
 0x1b7   : > { %1825 = vmatprep.mubr.f32.mxu0 %v2935_v12  ;;  %1837 = vmatprep.mubr.f32.mxu1 %v518_v21 }
 0x1ba   : > { %1826 = vmatmul.mubr.f32.gmra.mrb[38].mxu0 %v2942_v39  ;;  %1838 = vmatmul.mubr.f32.gmra.mrb[38].mxu1 %v519_v3 }
 0x241   : > { %v693_v63 = vpop.f32.mrb[0].mxu0  ;;  %v854_v16 = vpop.f32.mrb[0].mxu1 }
 0x242   : > { %v694_v17 = vadd.f32 %v693_v63, %v2988_v49  ;;  %v855_v10 = vadd.f32 %v854_v16, %v2991_v55  ;;  %v2995_v11 = vpop.f32.mrb[1].mxu0  ;;  %v2997_v19 = vpop.f32.mrb[1].mxu1  ;;  %v3044_v63 = vrot.slane %v2985_v43, %v616_v15 }
 0x244   : > { %v1701_v28 = vmul.f32 -1.442695, %v694_v17  ;;  %v1717_v22 = vmul.f32 -1.442695, %v855_v10 }
 0x245   : > { %v699_v23 = vpop.f32.mrb[2].mxu0  ;;  %v860_v24 = vpop.f32.mrb[2].mxu1 }
 0x246   : > { %2058 = vpow2.f32 %v1701_v28  ;;  %v700_v25 = vadd.f32 %v699_v23, %v2988_v49  ;;  %v861_v26 = vadd.f32 %v860_v24, %v2991_v55  ;;  %v3001_v0 = vpop.f32.mrb[3].mxu0  ;;  %v3003_v29 = vpop.f32.mrb[3].mxu1 }
 0x247   : > { %2060 = vpow2.f32 %v1717_v22 }
 0x248   : > { %v1702_v33 = vmul.f32 -1.442695, %v700_v25  ;;  %v1718_v1 = vmul.f32 -1.442695, %v861_v26 }
 0x249   : > { %v705_v30 = vpop.f32.mrb[4].mxu0  ;;  %v866_v31 = vpop.f32.mrb[4].mxu1 }
 0x24a   : > { %2062 = vpow2.f32 %v1702_v33  ;;  %v706_v32 = vadd.f32 %v705_v30, %v2988_v49  ;;  %v867_v35 = vadd.f32 %v866_v31, %v2991_v55  ;;  %v3008_v36 = vpop.f32.mrb[5].mxu0  ;;  %v3010_v37 = vpop.f32.mrb[5].mxu1 }
 0x24b   : > { %2064 = vpow2.f32 %v1718_v1  ;;  %v696_v1 = vadd.f32 %v2995_v11, %v3041_v34 }
 0x24c   : > { %v1703_v2 = vmul.f32 -1.442695, %v706_v32  ;;  %v1719_v38 = vmul.f32 -1.442695, %v867_v35  ;;  %v857_v35 = vadd.f32 %v2997_v19, %v3044_v63 }
 0x24d   : > { %v711_v5 = vpop.f32.mrb[6].mxu0  ;;  %v872_v12 = vpop.f32.mrb[6].mxu1 }
 0x24e   : > { %2066 = vpow2.f32 %v1703_v2  ;;  %v712_v40 = vadd.f32 %v711_v5, %v2988_v49  ;;  %v873_v13 = vadd.f32 %v872_v12, %v2991_v55  ;;  %v3015_v41 = vpop.f32.mrb[7].mxu0  ;;  %v3017_v42 = vpop.f32.mrb[7].mxu1 }
 0x24f   : > { %2068 = vpow2.f32 %v1719_v38 }
 0x250   : > { %v2059_v44 = vpop.eup %2058  ;;  %v1704_v39 = vmul.f32 -1.442695, %v712_v40  ;;  %v1720_v47 = vmul.f32 -1.442695, %v873_v13 }
 0x251   : > { %v2061_v7 = vpop.eup %2060  ;;  %v1142_v46 = vadd.f32 1.0, %v2059_v44  ;;  %v717_v8 = vpop.f32.mrb[8].mxu0 }
 0x252   : > { %v878_v4 = vpop.f32.mrb[8].mxu1  ;;  %v1254_v48 = vadd.f32 1.0, %v2061_v7  ;;  %2070 = vpow2.f32 %v1704_v39  ;;  %v718_v20 = vadd.f32 %v717_v8, %v2988_v49  ;;  %v3026_v52 = vpop.f32.mrb[9].mxu0 }
 0x253   : > { %v879_v51 = vadd.f32 %v878_v4, %v2991_v55  ;;  %v3028_v53 = vpop.f32.mrb[9].mxu1  ;;  %2072 = vrcp.f32 %v1142_v46 }
 0x254   : > { %v2063_v14 = vpop.eup %2062  ;;  %2074 = vrcp.f32 %v1254_v48  ;;  %v1705_v54 = vmul.f32 -1.442695, %v718_v20  ;;  %v863_v20 = vadd.f32 %v3003_v29, %v3044_v63 }
 0x255   : > { %v2065_v27 = vpop.eup %2064  ;;  %v1143_v56 = vadd.f32 1.0, %v2063_v14  ;;  %2076 = vpow2.f32 %v1720_v47  ;;  %v1721_v6 = vmul.f32 -1.442695, %v879_v51  ;;  %v723_v57 = vpop.f32.mrb[10].mxu0  ;;  %v702_v47 = vadd.f32 %v3001_v0, %v3041_v34 }
 0x256   : > { %v884_v61 = vpop.f32.mrb[10].mxu1  ;;  %v1255_v58 = vadd.f32 1.0, %v2065_v27  ;;  %2078 = vpow2.f32 %v1705_v54  ;;  %v724_v59 = vadd.f32 %v723_v57, %v2988_v49  ;;  %v3036_v21 = vpop.f32.mrb[11].mxu0 }
 0x257   : > { %v885_v62 = vadd.f32 %v884_v61, %v2991_v55  ;;  %v3038_v60 = vpop.f32.mrb[11].mxu1  ;;  %2080 = vrcp.f32 %v1143_v56 }
 0x258   : > { %v2067_v3 = vpop.eup %2066  ;;  %2082 = vrcp.f32 %v1255_v58  ;;  %v1706_v9 = vmul.f32 -1.442695, %v724_v59  ;;  %v708_v59 = vadd.f32 %v3008_v36, %v3041_v34 }
 0x259   : > { %v2069_v18 = vpop.eup %2068  ;;  %v1144_v16 = vadd.f32 1.0, %v2067_v3  ;;  %2084 = vpow2.f32 %v1721_v6  ;;  %v1722_v17 = vmul.f32 -1.442695, %v885_v62  ;;  %v729_v10 = vpop.f32.mrb[12].mxu0 }
 0x25a   : > { %v890_v28 = vpop.f32.mrb[12].mxu1  ;;  %v1256_v22 = vadd.f32 1.0, %v2069_v18  ;;  %2086 = vpow2.f32 %v1706_v9  ;;  %v730_v23 = vadd.f32 %v729_v10, %v2988_v49  ;;  %v3050_v25 = vpop.f32.mrb[13].mxu0  ;;  %v869_v18 = vadd.f32 %v3010_v37, %v3044_v63 }
 0x25b   : > { %v891_v24 = vadd.f32 %v890_v28, %v2991_v55  ;;  %v3052_v26 = vpop.f32.mrb[13].mxu1  ;;  %2088 = vrcp.f32 %v1144_v16 }
 0x25c   : > { %v2071_v33 = vpop.eup %2070  ;;  %2090 = vrcp.f32 %v1256_v22  ;;  %v1707_v30 = vmul.f32 -1.442695, %v730_v23 }
 0x25d   : > { %v1723_v31 = vmul.f32 -1.442695, %v891_v24  ;;  %v2073_v32 = vpop.eup %2072  ;;  %v1145_v2 = vadd.f32 1.0, %v2071_v33  ;;  %2092 = vpow2.f32 %v1722_v17  ;;  %v735_v38 = vpop.f32.mrb[14].mxu0 }
 0x25e   : > { %v896_v5 = vpop.f32.mrb[14].mxu1  ;;  %v2075_v12 = vpop.eup %2074  ;;  %v1190_v40 = vmul.f32 %v2073_v32, %v696_v1  ;;  %2094 = vpow2.f32 %v1707_v30  ;;  %v736_v11 = vadd.f32 %v735_v38, %v2988_v49  ;;  %v714_v32 = vadd.f32 %v3015_v41, %v3041_v34 }
 0x25f   : > { %v897_v13 = vadd.f32 %v896_v5, %v2991_v55  ;;  %v3072_v44 = vpop.f32.mrb[15].mxu0  ;;  %v3074_v19 = vpop.f32.mrb[15].mxu1  ;;  %v1302_v7 = vmul.f32 %v2075_v12, %v857_v35  ;;  %2096 = vrcp.f32 %v1145_v2 }
 0x260   : > { %v2077_v39 = vpop.eup %2076  ;;  %1414 = vst [vmem:[%s3060_s27] sm:$0xff] %v1190_v40  ;;  %2098 = vpow2.f32 %v1723_v31  ;;  %v1708_v4 = vmul.f32 -1.442695, %v736_v11 }
 0x261   : > { %v2079_v46 = vpop.eup %2078  ;;  %v1257_v8 = vadd.f32 1.0, %v2077_v39  ;;  %1430 = vst [vmem:[%s3068_s28] sm:$0xff] %v1302_v7  ;;  %v1724_v14 = vmul.f32 -1.442695, %v897_v13  ;;  %v741_v45 = vpop.f32.mrb[16].mxu0 }
 0x262   : > { %v2081_v48 = vpop.eup %2080  ;;  %v1146_v51 = vadd.f32 1.0, %v2079_v46  ;;  %v902_v54 = vpop.f32.mrb[16].mxu1  ;;  %v742_v56 = vadd.f32 %v741_v45, %v2988_v49 }
 0x263   : > { %v2083_v27 = vpop.eup %2082  ;;  %v1191_v15 = vmul.f32 %v2081_v48, %v702_v47  ;;  %2100 = vrcp.f32 %v1257_v8  ;;  %v903_v0 = vadd.f32 %v902_v54, %v2991_v55  ;;  %v3084_v6 = vpop.f32.mrb[17].mxu0  ;;  %v875_v8 = vadd.f32 %v3017_v42, %v3044_v63 }
 0x264   : > { %v3086_v57 = vpop.f32.mrb[17].mxu1  ;;  %v2085_v61 = vpop.eup %2084  ;;  %v1303_v58 = vmul.f32 %v2083_v27, %v863_v20  ;;  %2102 = vrcp.f32 %v1146_v51  ;;  %v1709_v3 = vmul.f32 -1.442695, %v742_v56  ;;  %v720_v20 = vadd.f32 %v3026_v52, %v3041_v34 }
 0x265   : > { %v2087_v29 = vpop.eup %2086  ;;  %1415 = vst [vmem:[%s3060_s27 + $0x8] sm:$0xff] %v1191_v15  ;;  %v1258_v62 = vadd.f32 1.0, %v2085_v61  ;;  %2104 = vpow2.f32 %v1708_v4  ;;  %v1725_v17 = vmul.f32 -1.442695, %v903_v0  ;;  %v747_v10 = vpop.f32.mrb[18].mxu0 }
 0x266   : > { %v2089_v9 = vpop.eup %2088  ;;  %1431 = vst [vmem:[%s3068_s28 + $0x8] sm:$0xff] %v1303_v58  ;;  %v1147_v16 = vadd.f32 1.0, %v2087_v29  ;;  %2106 = vpow2.f32 %v1724_v14  ;;  %v908_v28 = vpop.f32.mrb[18].mxu1  ;;  %v748_v36 = vadd.f32 %v747_v10, %v2988_v49 }
 0x267   : > { %v2091_v22 = vpop.eup %2090  ;;  %v1192_v23 = vmul.f32 %v2089_v9, %v708_v59  ;;  %2108 = vrcp.f32 %v1258_v62  ;;  %v909_v24 = vadd.f32 %v908_v28, %v2991_v55  ;;  %v3096_v33 = vpop.f32.mrb[19].mxu0  ;;  %v881_v59 = vadd.f32 %v3028_v53, %v3044_v63 }
 0x268   : > { %v3098_v1 = vpop.f32.mrb[19].mxu1  ;;  %v2093_v30 = vpop.eup %2092  ;;  %v1304_v37 = vmul.f32 %v2091_v22, %v869_v18  ;;  %2110 = vrcp.f32 %v1147_v16  ;;  %v1710_v2 = vmul.f32 -1.442695, %v748_v36  ;;  %v726_v62 = vadd.f32 %v3036_v21, %v3041_v34 }
 0x269   : > { %v2095_v31 = vpop.eup %2094  ;;  %1416 = vst [vmem:[%s3060_s27 + $0x10] sm:$0xff] %v1192_v23  ;;  %v1259_v35 = vadd.f32 1.0, %v2093_v30  ;;  %2112 = vpow2.f32 %v1709_v3  ;;  %v1726_v12 = vmul.f32 -1.442695, %v909_v24  ;;  %v753_v40 = vpop.f32.mrb[20].mxu0 }
 0x26a   : > { %v2097_v38 = vpop.eup %2096  ;;  %1432 = vst [vmem:[%s3068_s28 + $0x10] sm:$0xff] %v1304_v37  ;;  %v1148_v5 = vadd.f32 1.0, %v2095_v31  ;;  %2114 = vpow2.f32 %v1725_v17  ;;  %v914_v11 = vpop.f32.mrb[20].mxu1  ;;  %v754_v7 = vadd.f32 %v753_v40, %v2988_v49 }
 0x26b   : > { %v2099_v13 = vpop.eup %2098  ;;  %v1193_v39 = vmul.f32 %v2097_v38, %v714_v32  ;;  %2116 = vrcp.f32 %v1259_v35  ;;  %v915_v46 = vadd.f32 %v914_v11, %v2991_v55  ;;  %v3106_v47 = vpop.f32.mrb[21].mxu0  ;;  %v887_v32 = vadd.f32 %v3038_v60, %v3044_v63 }
 0x26c   : > { %v3108_v41 = vpop.f32.mrb[21].mxu1  ;;  %2118 = vrcp.f32 %v1148_v5  ;;  %v1260_v4 = vadd.f32 1.0, %v2099_v13  ;;  %v1711_v51 = vmul.f32 -1.442695, %v754_v7  ;;  %v732_v35 = vadd.f32 %v3050_v25, %v3041_v34 }
 0x26d   : > { %v2101_v48 = vpop.eup %2100  ;;  %1417 = vst [vmem:[%s3060_s27 + $0x18] sm:$0xff] %v1193_v39  ;;  %2120 = vpow2.f32 %v1710_v2  ;;  %v1727_v14 = vmul.f32 -1.442695, %v915_v46  ;;  %v759_v27 = vpop.f32.mrb[22].mxu0  ;;  %v893_v39 = vadd.f32 %v3052_v26, %v3044_v63 }
 0x26e   : > { %v2103_v45 = vpop.eup %2102  ;;  %v1305_v54 = vmul.f32 %v2101_v48, %v875_v8  ;;  %2122 = vrcp.f32 %v1260_v4  ;;  %v920_v15 = vpop.f32.mrb[22].mxu1  ;;  %v760_v42 = vadd.f32 %v759_v27, %v2988_v49  ;;  %v620_v27 = vsub.s32 4, %v2978_v50 }
 0x26f   : > { %v2105_v56 = vpop.eup %2104  ;;  %v1194_v0 = vmul.f32 %v2103_v45, %v720_v20  ;;  %2124 = vpow2.f32 %v1726_v12  ;;  %v921_v61 = vadd.f32 %v920_v15, %v2991_v55  ;;  %v3117_v58 = vpop.f32.mrb[23].mxu0 }
 0x270   : > { %v3119_v52 = vpop.f32.mrb[23].mxu1  ;;  %v2107_v29 = vpop.eup %2106  ;;  %1433 = vst [vmem:[%s3068_s28 + $0x18] sm:$0xff] %v1305_v54  ;;  %v1149_v3 = vadd.f32 1.0, %v2105_v56  ;;  %2126 = vpow2.f32 %v1711_v51  ;;  %v1712_v16 = vmul.f32 -1.442695, %v760_v42  ;;  %v738_v56 = vadd.f32 %v3072_v44, %v3041_v34 }
 0x271   : > { %v2109_v9 = vpop.eup %2108  ;;  %1418 = vst [vmem:[%s3060_s27 + $0x20] sm:$0xff] %v1194_v0  ;;  %v1261_v18 = vadd.f32 1.0, %v2107_v29  ;;  %2128 = vpow2.f32 %v1727_v14  ;;  %v1728_v17 = vmul.f32 -1.442695, %v921_v61  ;;  %v765_v22 = vpop.f32.mrb[24].mxu0  ;;  %v899_v44 = vadd.f32 %v3074_v19, %v3044_v63 }
 0x272   : > { %v2111_v10 = vpop.eup %2110  ;;  %v1306_v28 = vmul.f32 %v2109_v9, %v881_v59  ;;  %2130 = vrcp.f32 %v1149_v3  ;;  %v926_v23 = vpop.f32.mrb[24].mxu1  ;;  %v766_v21 = vadd.f32 %v765_v22, %v2988_v49 }
 0x273   : > { %v2113_v36 = vpop.eup %2112  ;;  %v1195_v53 = vmul.f32 %v2111_v10, %v726_v62  ;;  %2132 = vrcp.f32 %v1261_v18  ;;  %v927_v24 = vadd.f32 %v926_v23, %v2991_v55  ;;  %v3129_v30 = vpop.f32.mrb[25].mxu0  ;;  %v3162_v23 = vrot.slane %v2985_v43, %v620_v27 }
 0x274   : > { %v3131_v37 = vpop.f32.mrb[25].mxu1  ;;  %v2115_v31 = vpop.eup %2114  ;;  %1434 = vst [vmem:[%s3068_s28 + $0x20] sm:$0xff] %v1306_v28  ;;  %v1150_v2 = vadd.f32 1.0, %v2113_v36  ;;  %2134 = vpow2.f32 %v1712_v16  ;;  %v1713_v12 = vmul.f32 -1.442695, %v766_v21  ;;  %v744_v21 = vadd.f32 %v3084_v6, %v3041_v34 }
 0x275   : > { %v2117_v38 = vpop.eup %2116  ;;  %1419 = vst [vmem:[%s3060_s27 + $0x28] sm:$0xff] %v1195_v53  ;;  %v1262_v5 = vadd.f32 1.0, %v2115_v31  ;;  %2136 = vpow2.f32 %v1728_v17  ;;  %v1729_v40 = vmul.f32 -1.442695, %v927_v24  ;;  %v771_v60 = vpop.f32.mrb[26].mxu0  ;;  %v905_v6 = vadd.f32 %v3086_v57, %v3044_v63 }
 0x276   : > { %v2119_v11 = vpop.eup %2118  ;;  %v1307_v13 = vmul.f32 %v2117_v38, %v887_v32  ;;  %2138 = vrcp.f32 %v1150_v2  ;;  %v932_v7 = vpop.f32.mrb[26].mxu1  ;;  %v772_v8 = vadd.f32 %v771_v60, %v2988_v49  ;;  %v756_v27 = vadd.f32 %v3106_v47, %v3041_v34 }
 0x277   : > { %v2121_v46 = vpop.eup %2120  ;;  %v1196_v25 = vmul.f32 %v2119_v11, %v732_v35  ;;  %2140 = vrcp.f32 %v1262_v5  ;;  %v933_v4 = vadd.f32 %v932_v7, %v2991_v55  ;;  %v3143_v48 = vpop.f32.mrb[27].mxu0 }
 0x278   : > { %v3145_v20 = vpop.f32.mrb[27].mxu1  ;;  %v2123_v51 = vpop.eup %2122  ;;  %1435 = vst [vmem:[%s3068_s28 + $0x28] sm:$0xff] %v1307_v13  ;;  %v1151_v14 = vadd.f32 1.0, %v2121_v46  ;;  %2142 = vpow2.f32 %v1713_v12  ;;  %v1714_v54 = vmul.f32 -1.442695, %v772_v8  ;;  %v911_v46 = vadd.f32 %v3098_v1, %v3044_v63 }
 0x279   : > { %v2125_v26 = vpop.eup %2124  ;;  %1420 = vst [vmem:[%s3060_s27 + $0x30] sm:$0xff] %v1196_v25  ;;  %v1308_v45 = vmul.f32 %v2123_v51, %v893_v39  ;;  %2144 = vpow2.f32 %v1729_v40  ;;  %v1730_v42 = vmul.f32 -1.442695, %v933_v4  ;;  %v777_v61 = vpop.f32.mrb[28].mxu0 }
 0x27a   : > { %v2127_v15 = vpop.eup %2126  ;;  %2146 = vrcp.f32 %v1151_v14  ;;  %v1263_v0 = vadd.f32 1.0, %v2125_v26  ;;  %v938_v29 = vpop.f32.mrb[28].mxu1  ;;  %v778_v3 = vadd.f32 %v777_v61, %v2988_v49 }
 0x27b   : > { %v2129_v59 = vpop.eup %2128  ;;  %1436 = vst [vmem:[%s3068_s28 + $0x30] sm:$0xff] %v1308_v45  ;;  %v1152_v62 = vadd.f32 1.0, %v2127_v15  ;;  %2148 = vpow2.f32 %v1714_v54  ;;  %v939_v9 = vadd.f32 %v938_v29, %v2991_v55  ;;  %v3155_v18 = vpop.f32.mrb[29].mxu0 }
 0x27c   : > { %v3157_v50 = vpop.f32.mrb[29].mxu1  ;;  %v2131_v16 = vpop.eup %2130  ;;  %2150 = vrcp.f32 %v1263_v0  ;;  %v1264_v17 = vadd.f32 1.0, %v2129_v59  ;;  %v1715_v22 = vmul.f32 -1.442695, %v778_v3 }
 0x27d   : > { %v2133_v10 = vpop.eup %2132  ;;  %v1197_v28 = vmul.f32 %v2131_v16, %v738_v56  ;;  %2152 = vrcp.f32 %v1152_v62  ;;  %v1731_v24 = vmul.f32 -1.442695, %v939_v9  ;;  %v783_v31 = vpop.f32.mrb[30].mxu0 }
 0x27e   : > { %v2135_v36 = vpop.eup %2134  ;;  %v1309_v53 = vmul.f32 %v2133_v10, %v899_v44  ;;  %2154 = vrcp.f32 %v1264_v17  ;;  %v944_v19 = vpop.f32.mrb[30].mxu1  ;;  %v784_v2 = vadd.f32 %v783_v31, %v2988_v49  ;;  %v750_v49 = vadd.f32 %v3096_v33, %v3041_v34 }
 0x27f   : > { %v2137_v32 = vpop.eup %2136  ;;  %1421 = vst [vmem:[%s3060_s27 + $0x38] sm:$0xff] %v1197_v28  ;;  %v1153_v35 = vadd.f32 1.0, %v2135_v36  ;;  %2156 = vpow2.f32 %v1730_v42  ;;  %v945_v38 = vadd.f32 %v944_v19, %v2991_v55  ;;  %v3169_v43 = vpop.f32.mrb[31].mxu0  ;;  %v917_v42 = vadd.f32 %v3108_v41, %v3044_v63 }
 0x280   : > { %v946_v5 = vpop.f32.mrb[31].mxu1  ;;  %v2139_v12 = vpop.eup %2138  ;;  %1437 = vst [vmem:[%s3068_s28 + $0x38] sm:$0xff] %v1309_v53  ;;  %v1265_v40 = vadd.f32 1.0, %v2137_v32  ;;  %2158 = vpow2.f32 %v1715_v22  ;;  %v1716_v55 = vmul.f32 -1.442695, %v784_v2  ;;  %v923_v31 = vadd.f32 %v3119_v52, %v3044_v63 }
 0x281   : > { %v3175_v11 = vadd.f32 %v946_v5, %v3044_v63  ;;  %v2141_v13 = vpop.eup %2140  ;;  %v1198_v39 = vmul.f32 %v2139_v12, %v744_v21  ;;  %2160 = vrcp.f32 %v1153_v35  ;;  %v1732_v57 = vmul.f32 -1.442695, %v945_v38  ;;  %v1818_v25 = vpop.f32.mrb[32].mxu0 }
 0x282   : > { %v2143_v60 = vpop.eup %2142  ;;  %v1310_v7 = vmul.f32 %v2141_v13, %v905_v6  ;;  %2162 = vrcp.f32 %v1265_v40  ;;  %v1830_v8 = vpop.f32.mrb[32].mxu1  ;;  %v1021_v14 = vadd.f32 %v1818_v25, %v3162_v23 }
 0x283   : > { %v2145_v4 = vpop.eup %2144  ;;  %1422 = vst [vmem:[%s3060_s27 + $0x40] sm:$0xff] %v1198_v39  ;;  %v1154_v51 = vadd.f32 1.0, %v2143_v60  ;;  %2164 = vpow2.f32 %v1731_v24  ;;  %v1061_v33 = vadd.f32 %v1830_v8, %v3162_v23  ;;  %v1015_v26 = vpop.f32.mrb[33].mxu0  ;;  %v762_v24 = vadd.f32 %v3117_v58, %v3041_v34 }
 0x284   : > { %v1055_v45 = vpop.f32.mrb[33].mxu1  ;;  %v2147_v54 = vpop.eup %2146  ;;  %1438 = vst [vmem:[%s3068_s28 + $0x40] sm:$0xff] %v1310_v7  ;;  %v1266_v1 = vadd.f32 1.0, %v2145_v4  ;;  %2166 = vpow2.f32 %v1716_v55  ;;  %v1016_v15 = vadd.f32 %v1015_v26, %v3162_v23  ;;  %v1734_v61 = vmul.f32 -1.442695, %v1021_v14 }
 0x285   : > { %v2149_v56 = vpop.eup %2148  ;;  %v1199_v0 = vmul.f32 %v2147_v54, %v750_v49  ;;  %2168 = vrcp.f32 %v1154_v51  ;;  %v1742_v62 = vmul.f32 -1.442695, %v1061_v33  ;;  %v1056_v3 = vadd.f32 %v1055_v45, %v3162_v23  ;;  %v1821_v47 = vpop.f32.mrb[34].mxu0 }
 0x286   : > { %v2151_v29 = vpop.eup %2150  ;;  %2170 = vrcp.f32 %v1266_v1  ;;  %v1155_v59 = vadd.f32 1.0, %v2149_v56  ;;  %v1733_v44 = vmul.f32 -1.442695, %v1016_v15  ;;  %v1031_v17 = vadd.f32 %v1821_v47, %v3162_v23  ;;  %v1833_v10 = vpop.f32.mrb[34].mxu1 }
 0x287   : > { %v2153_v9 = vpop.eup %2152  ;;  %1423 = vst [vmem:[%s3060_s27 + $0x48] sm:$0xff] %v1199_v0  ;;  %v1311_v16 = vmul.f32 %v2151_v29, %v911_v46  ;;  %2172 = vpow2.f32 %v1732_v57  ;;  %v1025_v41 = vpop.f32.mrb[35].mxu0  ;;  %v1741_v35 = vmul.f32 -1.442695, %v1056_v3  ;;  %v1071_v2 = vadd.f32 %v1833_v10, %v3162_v23 }
 0x288   : > { %v2155_v28 = vpop.eup %2154  ;;  %v1200_v22 = vmul.f32 %v2153_v9, %v756_v27  ;;  %2174 = vrcp.f32 %v1155_v59  ;;  %v1065_v36 = vpop.f32.mrb[35].mxu1  ;;  %v1736_v6 = vmul.f32 -1.442695, %v1031_v17  ;;  %v1026_v58 = vadd.f32 %v1025_v41, %v3162_v23 }
 0x289   : > { %v2157_v53 = vpop.eup %2156  ;;  %1439 = vst [vmem:[%s3068_s28 + $0x48] sm:$0xff] %v1311_v16  ;;  %v1312_v21 = vmul.f32 %v2155_v28, %v917_v42  ;;  %2176 = vpow2.f32 %v1734_v61  ;;  %v1824_v38 = vpop.f32.mrb[36].mxu0  ;;  %v1066_v7 = vadd.f32 %v1065_v36, %v3162_v23  ;;  %v768_v57 = vadd.f32 %v3129_v30, %v3041_v34 }
 0x28a   : > { %v2159_v19 = vpop.eup %2158  ;;  %1424 = vst [vmem:[%s3060_s27 + $0x50] sm:$0xff] %v1200_v22  ;;  %v1267_v32 = vadd.f32 1.0, %v2157_v53  ;;  %2178 = vpow2.f32 %v1742_v62  ;;  %v1836_v40 = vpop.f32.mrb[36].mxu1  ;;  %v1744_v8 = vmul.f32 -1.442695, %v1071_v2  ;;  %v929_v14 = vadd.f32 %v3131_v37, %v3044_v63 }
 0x28b   : > { %v2161_v5 = vpop.eup %2160  ;;  %1440 = vst [vmem:[%s3068_s28 + $0x50] sm:$0xff] %v1312_v21  ;;  %v1156_v12 = vadd.f32 1.0, %v2159_v19  ;;  %2180 = vpow2.f32 %v1733_v44  ;;  %v1035_v13 = vpop.f32.mrb[37].mxu0  ;;  %v1735_v26 = vmul.f32 -1.442695, %v1026_v58  ;;  %v774_v30 = vadd.f32 %v3143_v48, %v3041_v34 }
 0x28c   : > { %v2163_v52 = vpop.eup %2162  ;;  %v1201_v39 = vmul.f32 %v2161_v5, %v762_v24  ;;  %2182 = vrcp.f32 %v1267_v32  ;;  %v1075_v49 = vpop.f32.mrb[37].mxu1  ;;  %v1743_v42 = vmul.f32 -1.442695, %v1066_v7  ;;  %v1041_v37 = vadd.f32 %v1824_v38, %v3162_v23 }
 0x28d   : > { %v2165_v55 = vpop.eup %2164  ;;  %v1313_v60 = vmul.f32 %v2163_v52, %v923_v31  ;;  %2184 = vrcp.f32 %v1156_v12  ;;  %v1827_v4 = vpop.f32.mrb[38].mxu0  ;;  %v1081_v59 = vadd.f32 %v1836_v40, %v3162_v23  ;;  %v935_v47 = vadd.f32 %v3145_v20, %v3044_v63 }
 0x28e   : > { %v2167_v46 = vpop.eup %2166  ;;  %1425 = vst [vmem:[%s3060_s27 + $0x58] sm:$0xff] %v1201_v39  ;;  %v1268_v25 = vadd.f32 1.0, %v2165_v55  ;;  %2186 = vpow2.f32 %v1741_v35  ;;  %v1839_v45 = vpop.f32.mrb[38].mxu1  ;;  %v780_v9 = vadd.f32 %v3155_v18, %v3041_v34  ;;  %v1738_v10 = vmul.f32 -1.442695, %v1041_v37 }
 0x28f   : > { %v2169_v51 = vpop.eup %2168  ;;  %1441 = vst [vmem:[%s3068_s28 + $0x58] sm:$0xff] %v1313_v60  ;;  %v1157_v33 = vadd.f32 1.0, %v2167_v46  ;;  %2188 = vpow2.f32 %v1736_v6  ;;  %v1045_v54 = vpop.f32.mrb[39].mxu0  ;;  %v1036_v41 = vadd.f32 %v1035_v13, %v3162_v23  ;;  %v1746_v36 = vmul.f32 -1.442695, %v1081_v59 }
 0x290   : > { %v2171_v27 = vpop.eup %2170  ;;  %v1202_v1 = vmul.f32 %v2169_v51, %v768_v57  ;;  %2190 = vrcp.f32 %v1268_v25  ;;  %v3211_v15 = vpop.f32.mrb[39].mxu1  ;;  %v1076_v20 = vadd.f32 %v1075_v49, %v3162_v23  ;;  %v941_v31 = vadd.f32 %v3157_v50, %v3044_v63 }
 0x291   : > { %v2173_v56 = vpop.eup %2172  ;;  %v1314_v0 = vmul.f32 %v2171_v27, %v929_v14  ;;  %2192 = vrcp.f32 %v1157_v33  ;;  %v1737_v35 = vmul.f32 -1.442695, %v1036_v41  ;;  %v1051_v2 = vadd.f32 %v1827_v4, %v3162_v23 }
 0x292   : > { %v2175_v61 = vpop.eup %2174  ;;  %1426 = vst [vmem:[%s3060_s27 + $0x60] sm:$0xff] %v1202_v1  ;;  %v1269_v29 = vadd.f32 1.0, %v2173_v56  ;;  %2194 = vpow2.f32 %v1744_v8  ;;  %v786_v5 = vadd.f32 %v3169_v43, %v3041_v34  ;;  %v1745_v6 = vmul.f32 -1.442695, %v1076_v20 }
 0x293   : > { %v2177_v62 = vpop.eup %2176  ;;  %1442 = vst [vmem:[%s3068_s28 + $0x60] sm:$0xff] %v1314_v0  ;;  %v1203_v3 = vmul.f32 %v2175_v61, %v774_v30  ;;  %2196 = vpow2.f32 %v1735_v26  ;;  %v1091_v50 = vadd.f32 %v1839_v45, %v3162_v23  ;;  %v1046_v52 = vadd.f32 %v1045_v54, %v3162_v23 }
 0x294   : > { %v2179_v48 = vpop.eup %2178  ;;  %2198 = vrcp.f32 %v1269_v29  ;;  %v1367_v16 = vadd.f32 1.0, %v2177_v62  ;;  %v1740_v34 = vmul.f32 -1.442695, %v1051_v2  ;;  %v1086_v43 = vadd.f32 %v3211_v15, %v3162_v23 }
 0x295   : > { %v2181_v44 = vpop.eup %2180  ;;  %1427 = vst [vmem:[%s3060_s27 + $0x68] sm:$0xff] %v1203_v3  ;;  %v1375_v17 = vadd.f32 1.0, %v2179_v48  ;;  %2200 = vpow2.f32 %v1743_v42  ;;  %v1748_v57 = vmul.f32 -1.442695, %v1091_v50  ;;  %v1739_v8 = vmul.f32 -1.442695, %v1046_v52 }
 0x296   : > { %v2183_v28 = vpop.eup %2182  ;;  %2202 = vrcp.f32 %v1367_v16  ;;  %v1366_v22 = vadd.f32 1.0, %v2181_v44  ;;  %v1747_v51 = vmul.f32 -1.442695, %v1086_v43 }
 0x297   : > { %v2185_v53 = vpop.eup %2184  ;;  %v1315_v21 = vmul.f32 %v2183_v28, %v935_v47  ;;  %2204 = vrcp.f32 %v1375_v17 }
 0x298   : > { %v2187_v18 = vpop.eup %2186  ;;  %v1204_v24 = vmul.f32 %v2185_v53, %v780_v9  ;;  %2206 = vrcp.f32 %v1366_v22 }
 0x299   : > { %v2189_v19 = vpop.eup %2188  ;;  %1443 = vst [vmem:[%s3068_s28 + $0x68] sm:$0xff] %v1315_v21  ;;  %v1374_v32 = vadd.f32 1.0, %v2187_v18  ;;  %2208 = vpow2.f32 %v1738_v10 }
 0x29a   : > { %v2191_v38 = vpop.eup %2190  ;;  %1428 = vst [vmem:[%s3060_s27 + $0x70] sm:$0xff] %v1204_v24  ;;  %v1369_v12 = vadd.f32 1.0, %v2189_v19  ;;  %2210 = vpow2.f32 %v1746_v36 }
 0x29b   : > { %v2193_v58 = vpop.eup %2192  ;;  %v1316_v63 = vmul.f32 %v2191_v38, %v941_v31  ;;  %2212 = vrcp.f32 %v1374_v32 }
 0x29c   : > { %v2195_v40 = vpop.eup %2194  ;;  %v1205_v13 = vmul.f32 %v2193_v58, %v786_v5  ;;  %2214 = vrcp.f32 %v1369_v12 }
 0x29d   : > { %v2197_v39 = vpop.eup %2196  ;;  %1444 = vst [vmem:[%s3068_s28 + $0x70] sm:$0xff] %v1316_v63  ;;  %v1377_v49 = vadd.f32 1.0, %v2195_v40  ;;  %2216 = vpow2.f32 %v1737_v35 }
 0x29e   : > { %v2199_v55 = vpop.eup %2198  ;;  %1429 = vst [vmem:[%s3060_s27 + $0x78] sm:$0xff] %v1205_v13  ;;  %v1368_v60 = vadd.f32 1.0, %v2197_v39  ;;  %2218 = vpow2.f32 %v1745_v6 }
 0x29f   : > { %v2201_v7 = vpop.eup %2200  ;;  %v1317_v46 = vmul.f32 %v2199_v55, %v3175_v11  ;;  %2220 = vrcp.f32 %v1377_v49 }
 0x2a0   : > { %v2203_v25 = vpop.eup %2202  ;;  %2222 = vrcp.f32 %v1368_v60  ;;  %v1376_v23 = vadd.f32 1.0, %v2201_v7 }
 0x2a1   : > { %v2205_v4 = vpop.eup %2204  ;;  %1445 = vst [vmem:[%s3068_s28 + $0x78] sm:$0xff] %v1317_v46  ;;  %1447 = vst [vmem:[%s3241_s29 + $0x8] sm:$0xff] %v2203_v25  ;;  %2224 = vpow2.f32 %v1740_v34 }
 0x2a2   : > { %v2207_v14 = vpop.eup %2206  ;;  %1455 = vst [vmem:[%s3241_s29 + $0x48] sm:$0xff] %v2205_v4  ;;  %2226 = vrcp.f32 %v1376_v23 }
 0x2a3   : > { %v2209_v33 = vpop.eup %2208  ;;  %1446 = vst [vmem:[%s3241_s29] sm:$0xff] %v2207_v14  ;;  %2228 = vpow2.f32 %v1748_v57 }
 0x2a4   : > { %v2211_v11 = vpop.eup %2210  ;;  %v1371_v26 = vadd.f32 1.0, %v2209_v33  ;;  %2230 = vpow2.f32 %v1739_v8 }
 0x2a5   : > { %v2213_v45 = vpop.eup %2212  ;;  %v1379_v54 = vadd.f32 1.0, %v2211_v11  ;;  %2232 = vpow2.f32 %v1747_v51 }
 0x2a6   : > { %v2215_v27 = vpop.eup %2214  ;;  %1454 = vst [vmem:[%s3241_s29 + $0x40] sm:$0xff] %v2213_v45  ;;  %2234 = vrcp.f32 %v1371_v26 }
 0x2a7   : > { %v2217_v1 = vpop.eup %2216  ;;  %1449 = vst [vmem:[%s3241_s29 + $0x18] sm:$0xff] %v2215_v27  ;;  %2236 = vrcp.f32 %v1379_v54 }
 0x2a8   : > { %v2219_v30 = vpop.eup %2218  ;;  %v1370_v15 = vadd.f32 1.0, %v2217_v1 }
 0x2a9   : > { %v2221_v56 = vpop.eup %2220  ;;  %v1378_v0 = vadd.f32 1.0, %v2219_v30 }
 0x2aa   : > { %v2223_v42 = vpop.eup %2222  ;;  %1457 = vst [vmem:[%s3241_s29 + $0x58] sm:$0xff] %v2221_v56  ;;  %2238 = vrcp.f32 %v1370_v15 }
 0x2ab   : > { %v2225_v37 = vpop.eup %2224  ;;  %1448 = vst [vmem:[%s3241_s29 + $0x10] sm:$0xff] %v2223_v42  ;;  %2240 = vrcp.f32 %v1378_v0 }
 0x2ac   : > { %v2227_v61 = vpop.eup %2226  ;;  %v1373_v29 = vadd.f32 1.0, %v2225_v37 }
 0x2ad   : > { %v2229_v59 = vpop.eup %2228  ;;  %1456 = vst [vmem:[%s3241_s29 + $0x50] sm:$0xff] %v2227_v61 }
 0x2ae   : > { %v2231_v62 = vpop.eup %2230  ;;  %2242 = vrcp.f32 %v1373_v29  ;;  %v1381_v3 = vadd.f32 1.0, %v2229_v59 }
 0x2af   : > { %v2233_v48 = vpop.eup %2232  ;;  %v1372_v47 = vadd.f32 1.0, %v2231_v62 }
 0x2b0   : > { %v2235_v9 = vpop.eup %2234  ;;  %2244 = vrcp.f32 %v1381_v3  ;;  %v1380_v16 = vadd.f32 1.0, %v2233_v48 }
 0x2b1   : > { %v2237_v44 = vpop.eup %2236  ;;  %1451 = vst [vmem:[%s3241_s29 + $0x28] sm:$0xff] %v2235_v9  ;;  %2246 = vrcp.f32 %v1372_v47 }
 0x2b2   : > { %1459 = vst [vmem:[%s3241_s29 + $0x68] sm:$0xff] %v2237_v44  ;;  %2248 = vrcp.f32 %v1380_v16 }
 0x2b4   : > { %v2239_v17 = vpop.eup %2238 }
 0x2b5   : > { %v2241_v10 = vpop.eup %2240  ;;  %1450 = vst [vmem:[%s3241_s29 + $0x20] sm:$0xff] %v2239_v17 }
 0x2b6   : > { %1458 = vst [vmem:[%s3241_s29 + $0x60] sm:$0xff] %v2241_v10 }
 0x2b8   : > { %v2243_v41 = vpop.eup %2242 }
 0x2b9   : > { %1453 = vst [vmem:[%s3241_s29 + $0x38] sm:$0xff] %v2243_v41 }
 0x2ba   : > { %v2245_v28 = vpop.eup %2244 }
 0x2bb   : > { %v2247_v22 = vpop.eup %2246  ;;  %1461 = vst [vmem:[%s3241_s29 + $0x78] sm:$0xff] %v2245_v28 }
 0x2bc   : > { %v2249_v36 = vpop.eup %2248  ;;  %1452 = vst [vmem:[%s3241_s29 + $0x30] sm:$0xff] %v2247_v22 }
 0x2bd   : > { %1460 = vst [vmem:[%s3241_s29 + $0x70] sm:$0xff] %v2249_v36 }
 0x2be PF: > { %s19_s25 = sadd.s32 1, %s2346_s25   ;;  %s3299_s30 = sld [smem:[#allocation5_spill]] }
 0x2bf   : > { %p16_p11 = scmp.ge.s32.totalorder %s19_s25, 6   ;;  %s3300_s11 = sld [smem:[#allocation6_spill]] }
 0x2c0   : > { %s3301_s18 = smov %s2322_s19  ;;  %s3302_s19 = smov %s2326_s20 }
 0x2c1   : > { %s3303_s20 = smov %s2449_s13  ;;  %s3304_s21 = smov %s2338_s23 }
 0x2c2   : > { %s3305_s22 = smov %s2342_s24  ;;  %18 = sbr.rel (!%p16_p11) target bundleno = 5 (0x5), region = 96 }
 0x2c4   : > { %s3306_s23 = smov %s3299_s30 }
 0x2c5   : > { %s3307_s24 = smov %s3300_s11 }
 0x2c9   :  { %1548 = vsyncpa [#allocation3], 1 }
 0x2ca   :  { %1550 = vsyncpa [#allocation3 + $0x1], 1 }

// kernel: triangular_edge_update.5
= control target key start
LH: loop header
LB: loop body
LE: loop exit
PB: predicated region body
PF: predicated region fallthrough
CT: control target
= control target key end

     0   :  { %9 = vsyncpa [#allocation3], 0  ;;  %s1260_s0 = inlined_call_operand.vmem [shape: f32[2,16,16,128], index: 0, kind: input, shape index: {}]   ;;  %s1261_s1 = inlined_call_operand.vmem [shape: f32[2,16,16,128], index: 1, kind: input, shape index: {}]   ;;  %s1262_s2 = inlined_call_operand.vmem [shape: f32[128,128], index: 2, kind: input, shape index: {}]   ;;  %s1263_s3 = inlined_call_operand.vmem [shape: f32[1,128], index: 3, kind: input, shape index: {}]   ;;  %s1264_s4 = inlined_call_operand.hbm [shape: f32[2,16,16,128], index: 4, kind: output, shape index: {}]  }
   0x1   :  { %11 = vsyncpa [#allocation3 + $0x1], 0  ;;  %s980_s15 = smov 0   ;;  %s982_s16 = smov 0  }
   0x2   :  { %s984_s17 = smov 0   ;;  %s986_s18 = smov 0  }
   0x3   :  { %s988_s19 = smov 0   ;;  %s990_s20 = smov 0  }
   0x4   :  { %s992_s21 = smov 0   ;;  %s994_s22 = smov 0  }
   0x5 LB: > { %s624_s23 = sadd.s32 4294967295, %s950_s22   ;;  %s625_s24 = sadd.s32 4294967294, %s950_s22   ;;  %s950_s22 = sphi %s994_s22, %s17_s22   ;;  %s946_s21 = sphi %s992_s21, %s1273_s21   ;;  %s942_s20 = sphi %s990_s20, %s1272_s20   ;;  %s938_s19 = sphi %s988_s19, %s1271_s19   ;;  %s934_s18 = sphi %s986_s18, %s1270_s18   ;;  %s930_s17 = sphi %s984_s17, %s1269_s17   ;;  %s926_s16 = sphi %s982_s16, %s1268_s16   ;;  %s922_s15 = sphi %s980_s15, %s1267_s15  }
   0x6   : > { %s26_s25 = sadd.s32 1, %s942_s20  ;;  %s29_s26 = sadd.s32 1, %s946_s21 }
   0x7   : > { %p27_p0 = scmp.ge.s32.totalorder %s26_s25, 2  ;;  %p146_p1 = scmp.ne.s32.totalorder %s930_s17, %s926_s16 }
   0x8   : > { %p147_p2 = scmp.eq.s32.totalorder %s624_s23, 3  ;;  %p152_p5 = scmp.ne.s32.totalorder %s926_s16, %s922_s15 }
   0x9   : > { %s1275_s25 = smov (%p27_p0, %s26_s25), 0  ;;  %s1277_s26 = smov (!%p27_p0, %s29_s26), %s946_s21 }
   0xa   : > { %s132_s27 = ssub.s32 %s942_s20, %s1275_s25  ;;  %p1031_p3 = por %p147_p2, %p146_p1 }
   0xb   : > { %p31_p4 = scmp.ge.s32.totalorder %s1277_s26, 2  ;;  %p153_p6 = scmp.eq.s32.totalorder %s625_s24, 3 }
   0xc   : > { %p628_p7 = scmp.ge.s32.totalorder %s950_s22, 1  ;;  %p205_p9 = scmp.lt.s32.totalorder %s950_s22, 5 }
   0xd   : > { %s1279_s26 = smov (%p31_p4, %s1277_s26), 0  ;;  %p1040_p8 = por %p153_p6, %p152_p5 }
   0xe   : > { %s131_s30 = ssub.s32 %s946_s21, %s1279_s26  ;;  %s136_s5 = sadd.s32 1, %s930_s17 }
   0xf   : > { %s133_s6 = sor.u32 %s132_s27, %s131_s30  ;;  %p206_p10 = pnand %p628_p7, %p205_p9 }
  0x10   : > { %p134_p11 = scmp.eq.s32.totalorder %s133_s6, 0  ;;  %v285_v0 = vld [vmem:[%s1262_s2] sm:$0xff] (!%p206_p10)  ;;  %v286_v1 = vld [vmem:[%s1262_s2 + $0x8] sm:$0xff] (!%p206_p10)  ;;  %v287_v2 = vld [vmem:[%s1262_s2 + $0x10] sm:$0xff] (!%p206_p10)  ;;  %s630_s14 = sshll.u32 (!%p206_p10), %s934_s18, 3 }
  0x11   : > { %209 = sbr.rel (%p206_p10) target bundleno = 296 (0x128), region = 36  ;;  %p247_p12 = scmp.lt.s32.totalorder (!%p206_p10), %s938_s19, 1  ;;  %v735_v3 = vpack.c.bf16 (!%p206_p10), %v286_v1, %v285_v0  ;;  %v288_v4 = vld [vmem:[%s1262_s2 + $0x18] sm:$0xff] (!%p206_p10)  ;;  %v289_v6 = vld [vmem:[%s1262_s2 + $0x20] sm:$0xff] (!%p206_p10)  ;;  %v290_v7 = vld [vmem:[%s1262_s2 + $0x28] sm:$0xff] (!%p206_p10) }
  0x12   : > { %s1049_s7 = scalar_select %p134_p11, %s930_s17, %s136_s5  }
  0x13   : > { %p249_p13 = scmp.lt.s32.totalorder (!%p206_p10), %s630_s14, 15  ;;  %v739_v5 = vpack.c.bf16 (!%p206_p10), %v288_v4, %v287_v2  ;;  %736 = vmatprep.subr.bf16.mxu0 (!%p206_p10), %v735_v3  ;;  %767 = vmatprep.subr.bf16.mxu1 (!%p206_p10), %v735_v3  ;;  %v743_v8 = vpack.c.bf16 (!%p206_p10), %v290_v7, %v289_v6  ;;  %v291_v9 = vld [vmem:[%s1262_s2 + $0x30] sm:$0xff] (!%p206_p10)  ;;  %v292_v10 = vld [vmem:[%s1262_s2 + $0x38] sm:$0xff] (!%p206_p10)  ;;  %v293_v14 = vld [vmem:[%s1262_s2 + $0x40] sm:$0xff] (!%p206_p10)  ;;  %s243_s13 = sand.u32 (!%p206_p10), 1, %s926_s16  }
  0x14   : > { %738 = vmatpush3.bf16.msra.mxu0 (!%p206_p10), %v735_v3  ;;  %775 = vmatpush3.bf16.msra.mxu1 (!%p206_p10), %v735_v3  ;;  %v747_v11 = vpack.c.bf16 (!%p206_p10), %v292_v10, %v291_v9  ;;  %v294_v15 = vld [vmem:[%s1262_s2 + $0x48] sm:$0xff] (!%p206_p10)  ;;  %v295_v17 = vld [vmem:[%s1262_s2 + $0x50] sm:$0xff] (!%p206_p10)  ;;  %v296_v18 = vld [vmem:[%s1262_s2 + $0x58] sm:$0xff] (!%p206_p10)  ;;  %s1208_s30 = scalar_lea.sflag (!%p206_p10), [#allocation3], %s243_s13  ;;  %s952_s6 = smov (!%p206_p10), [#allocation2]  }
  0x15   : > { %740 = vmatprep.subr.bf16.mxu0 (!%p206_p10), %v739_v5  ;;  %768 = vmatprep.subr.bf16.mxu1 (!%p206_p10), %v739_v5  ;;  %v751_v16 = vpack.c.bf16 (!%p206_p10), %v294_v15, %v293_v14  ;;  %v755_v19 = vpack.c.bf16 (!%p206_p10), %v296_v18, %v295_v17  ;;  %v297_v20 = vld [vmem:[%s1262_s2 + $0x60] sm:$0xff] (!%p206_p10)  ;;  %v298_v21 = vld [vmem:[%s1262_s2 + $0x68] sm:$0xff] (!%p206_p10)  ;;  %v299_v23 = vld [vmem:[%s1262_s2 + $0x70] sm:$0xff] (!%p206_p10) }
  0x16   : > { %v759_v22 = vpack.c.bf16 (!%p206_p10), %v298_v21, %v297_v20  ;;  %v300_v24 = vld [vmem:[%s1262_s2 + $0x78] sm:$0xff] (!%p206_p10)  ;;  %v1139_v40 = vld [vmem:[%s1263_s3] ss:$0 sm:$0xff] (!%p206_p10) }
  0x17   : > { %v763_v25 = vpack.c.bf16 (!%p206_p10), %v300_v24, %v299_v23 }
  0x18   : > { %s248_s8 = scalar_select %p247_p12, %s938_s19, 1  ;;  %742 = vmatpush3.bf16.msra.mxu0 %v739_v5  ;;  %776 = vmatpush3.bf16.msra.mxu1 %v739_v5 }
  0x19   : > { %s1281_s14 = smov (!%p249_p13, %s630_s14), 15  ;;  %744 = vmatprep.subr.bf16.mxu0 %v743_v8  ;;  %769 = vmatprep.subr.bf16.mxu1 %v743_v8 }
  0x1a   : > { %s632_s9 = sshll.u32 %s248_s8, 5  ;;  %s631_s10 = sshll.u32 %s1281_s14, 1 }
  0x1b   : > { %s1078_s24 = sadd.s32 %s632_s9, %s631_s10  ;;  %s642_s9 = sshll.u32 %s938_s19, 5 }
  0x1c   : > { %s633_s27 = sshll.u32 %s1078_s24, 3  ;;  %746 = vmatpush3.bf16.msra.mxu0 %v743_v8  ;;  %777 = vmatpush3.bf16.msra.mxu1 %v743_v8  ;;  %s860_s8 = sshll.u32 %s952_s6, 4  ;;  %s861_s8 = int_to_ptr.vmem [resolvable:$false] %s860_s8 }
  0x1d   : > { %s1086_s14 = scalar_lea.vmem %s1260_s0, %s633_s27  ;;  %748 = vmatprep.subr.bf16.mxu0 %v747_v11  ;;  %770 = vmatprep.subr.bf16.mxu1 %v747_v11  ;;  %s1134_s5 = scalar_lea.vmem %s1261_s1, %s633_s27 }
  0x1e   : > { %v269_v12 = vld [vmem:[%s1086_s14] sm:$0xff]  ;;  %v270_v26 = vld [vmem:[%s1086_s14 + $0x8] sm:$0xff]  ;;  %v271_v28 = vld [vmem:[%s1086_s14 + $0x10] sm:$0xff]  ;;  %s646_s27 = sshll.u32 %s934_s18, 4 }
  0x1f   : > { %v277_v13 = vld [vmem:[%s1086_s14 + $0x40] sm:$0xff]  ;;  %711 = vmatprep.mubr.f32.mxu0 %v269_v12  ;;  %v278_v27 = vld [vmem:[%s1086_s14 + $0x48] sm:$0xff]  ;;  %v279_v29 = vld [vmem:[%s1086_s14 + $0x50] sm:$0xff]  ;;  %s1175_s18 = sadd.s32 %s646_s27, %s642_s9 }
  0x20   : > { %723 = vmatprep.mubr.f32.mxu1 %v277_v13  ;;  %750 = vmatpush3.bf16.msra.mxu0 %v747_v11  ;;  %v272_v30 = vld [vmem:[%s1086_s14 + $0x18] sm:$0xff]  ;;  %v273_v32 = vld [vmem:[%s1086_s14 + $0x20] sm:$0xff]  ;;  %v274_v34 = vld [vmem:[%s1086_s14 + $0x28] sm:$0xff]  ;;  %s643_s19 = sshll.u32 %s1175_s18, 7 }
  0x21   : > { %778 = vmatpush3.bf16.msra.mxu1 %v747_v11  ;;  %752 = vmatprep.subr.bf16.mxu0 %v751_v16  ;;  %v280_v31 = vld [vmem:[%s1086_s14 + $0x58] sm:$0xff]  ;;  %v281_v33 = vld [vmem:[%s1086_s14 + $0x60] sm:$0xff]  ;;  %v282_v35 = vld [vmem:[%s1086_s14 + $0x68] sm:$0xff]  ;;  %s1198_s23 = scalar_lea.hbm %s1264_s4, %s643_s19 }
  0x22   : > { %771 = vmatprep.subr.bf16.mxu1 %v751_v16  ;;  %v275_v36 = vld [vmem:[%s1086_s14 + $0x30] sm:$0xff]  ;;  %v276_v38 = vld [vmem:[%s1086_s14 + $0x38] sm:$0xff]  ;;  %v454_v42 = vld [vmem:[%s1134_s5 + $0x8] sm:$0xff] }
  0x23   : > { %v283_v37 = vld [vmem:[%s1086_s14 + $0x70] sm:$0xff]  ;;  %v284_v39 = vld [vmem:[%s1086_s14 + $0x78] sm:$0xff]  ;;  %s629_s14 = sshll.u32 %s243_s13, 7  ;;  %v462_v44 = vld [vmem:[%s1134_s5 + $0x48] sm:$0xff] }
  0x24   : > { %754 = vmatpush3.bf16.msra.mxu0 %v751_v16  ;;  %v453_v48 = vld [vmem:[%s1134_s5] sm:$0xff]  ;;  %v456_v58 = vld [vmem:[%s1134_s5 + $0x18] sm:$0xff]  ;;  %s1153_s24 = scalar_lea.vmem [#allocation2], %s629_s14  ;;  %v455_v0 = vld [vmem:[%s1134_s5 + $0x10] sm:$0xff]  ;;  %s862_s14 = scalar_lea.vmem %s861_s8, 4096 }
  0x25   : > { %779 = vmatpush3.bf16.msra.mxu1 %v751_v16  ;;  %756 = vmatprep.subr.bf16.mxu0 %v755_v19  ;;  %v461_v50 = vld [vmem:[%s1134_s5 + $0x40] sm:$0xff]  ;;  %v464_v60 = vld [vmem:[%s1134_s5 + $0x58] sm:$0xff]  ;;  %v463_v2 = vld [vmem:[%s1134_s5 + $0x50] sm:$0xff]  ;;  %s518_s10 = sshll.u32 %s1153_s24, 4  ;;  %s1200_s10 = int_to_ptr.vmem [resolvable:$true] %s518_s10 }
  0x26   : > { %772 = vmatprep.subr.bf16.mxu1 %v755_v19  ;;  %v458_v10 = vld [vmem:[%s1134_s5 + $0x28] sm:$0xff]  ;;  %v457_v16 = vld [vmem:[%s1134_s5 + $0x20] sm:$0xff]  ;;  %p863_p4 = scmp.lt.s32.totalorder %s1200_s10, %s861_s8 }
  0x27   : > { %v466_v12 = vld [vmem:[%s1134_s5 + $0x68] sm:$0xff]  ;;  %v465_v18 = vld [vmem:[%s1134_s5 + $0x60] sm:$0xff] }
  0x28   : > { %758 = vmatpush3.bf16.msra.mxu0 %v755_v19 }
  0x29   : > { %780 = vmatpush3.bf16.msra.mxu1 %v755_v19  ;;  %760 = vmatprep.subr.bf16.mxu0 %v759_v22 }
  0x2a   : > { %773 = vmatprep.subr.bf16.mxu1 %v759_v22 }
  0x2c   : > { %762 = vmatpush3.bf16.msra.mxu0 %v759_v22 }
  0x2d   : > { %781 = vmatpush3.bf16.msra.mxu1 %v759_v22  ;;  %764 = vmatprep.subr.bf16.mxu0 %v763_v25 }
  0x2e   : > { %774 = vmatprep.subr.bf16.mxu1 %v763_v25 }
  0x30   : > { %766 = vmatpush3.bf16.msra.mxu0 %v763_v25 }
  0x31   : > { %782 = vmatpush3.bf16.msra.mxu1 %v763_v25 }
  0x33   : > { %712 = vmatmul.mubr.f32.vlgmr.msra.gmra.mrb[0].mxu0 %v270_v26  ;;  %v460_v26 = vld [vmem:[%s1134_s5 + $0x38] sm:$0xff] }
  0x34   : > { %724 = vmatmul.mubr.f32.vlgmr.msra.gmra.mrb[0].mxu1 %v278_v27  ;;  %714 = vmatprep.mubr.f32.mxu0 %v271_v28  ;;  %v468_v28 = vld [vmem:[%s1134_s5 + $0x78] sm:$0xff] }
  0x35   : > { %726 = vmatprep.mubr.f32.mxu1 %v279_v29 }
  0x37   : > { %715 = vmatmul.mubr.f32.gmra.mrb[2].mxu0 %v272_v30 }
  0x38   : > { %727 = vmatmul.mubr.f32.gmra.mrb[2].mxu1 %v280_v31  ;;  %717 = vmatprep.mubr.f32.mxu0 %v273_v32  ;;  %v459_v32 = vld [vmem:[%s1134_s5 + $0x30] sm:$0xff] }
  0x39   : > { %729 = vmatprep.mubr.f32.mxu1 %v281_v33 }
  0x3b   : > { %718 = vmatmul.mubr.f32.gmra.mrb[4].mxu0 %v274_v34  ;;  %v467_v34 = vld [vmem:[%s1134_s5 + $0x70] sm:$0xff]  ;;  %s856_s5 = scalar_lea.vmem %s1200_s10, 2048 }
  0x3c   : > { %730 = vmatmul.mubr.f32.gmra.mrb[4].mxu1 %v282_v35  ;;  %720 = vmatprep.mubr.f32.mxu0 %v275_v36  ;;  %p857_p0 = scmp.ne.s32.totalorder %s1200_s10, %s856_s5  ;;  %p864_p5 = scmp.lt.s32.totalorder %s862_s14, %s856_s5 }
  0x3d   : > { %732 = vmatprep.mubr.f32.mxu1 %v283_v37 }
  0x3e   : > { %p858_p1 = pnand %p857_p0, %p1031_p3  ;;  %p865_p6 = por %p864_p5, %p863_p4 }
  0x3f   : > { %721 = vmatmul.mubr.f32.gmra.mrb[6].mxu0 %v276_v38 }
  0x40   : > { %733 = vmatmul.mubr.f32.gmra.mrb[6].mxu1 %v284_v39  ;;  %p859_p2 = pneg %p858_p1 }
  0x42   : > { %p866_p7 = pnand %p865_p6, %p859_p2 }
 0x106   : > { %v713_v41 = vpop.f32.mrb[0].mxu0 }
 0x107   : > { %v725_v43 = vpop.f32.mrb[0].mxu1  ;;  %v380_v45 = vadd.f32 %v713_v41, %v1139_v40  ;;  %v374_v47 = vpop.f32.mrb[1].mxu0 }
 0x108   : > { %v420_v46 = vadd.f32 %v725_v43, %v1139_v40  ;;  %v414_v49 = vpop.f32.mrb[1].mxu1  ;;  %v375_v51 = vadd.f32 %v1139_v40, %v374_v47 }
 0x109   : > { %v415_v52 = vadd.f32 %v1139_v40, %v414_v49  ;;  %v470_v53 = vmul.f32 %v454_v42, %v380_v45 }
 0x10a   : > { %v478_v54 = vmul.f32 %v462_v44, %v420_v46  ;;  %v469_v55 = vmul.f32 %v453_v48, %v375_v51  ;;  %v716_v57 = vpop.f32.mrb[2].mxu0 }
 0x10b   : > { %v477_v56 = vmul.f32 %v461_v50, %v415_v52  ;;  %v728_v59 = vpop.f32.mrb[2].mxu1  ;;  %486 = vst [vmem:[%s1153_s24 + $0x8] sm:$0xff] %v470_v53  ;;  %v390_v61 = vadd.f32 %v716_v57, %v1139_v40  ;;  %v384_v63 = vpop.f32.mrb[3].mxu0 }
 0x10c   : > { %494 = vst [vmem:[%s1153_s24 + $0x48] sm:$0xff] %v478_v54  ;;  %v430_v62 = vadd.f32 %v728_v59, %v1139_v40  ;;  %v424_v1 = vpop.f32.mrb[3].mxu1  ;;  %485 = vst [vmem:[%s1153_s24] sm:$0xff] %v469_v55  ;;  %v385_v3 = vadd.f32 %v1139_v40, %v384_v63 }
 0x10d   : > { %493 = vst [vmem:[%s1153_s24 + $0x40] sm:$0xff] %v477_v56  ;;  %v425_v4 = vadd.f32 %v1139_v40, %v424_v1  ;;  %v472_v5 = vmul.f32 %v456_v58, %v390_v61 }
 0x10e   : > { %v480_v6 = vmul.f32 %v464_v60, %v430_v62  ;;  %v471_v7 = vmul.f32 %v455_v0, %v385_v3  ;;  %v719_v9 = vpop.f32.mrb[4].mxu0 }
 0x10f   : > { %v479_v8 = vmul.f32 %v463_v2, %v425_v4  ;;  %v731_v11 = vpop.f32.mrb[4].mxu1  ;;  %488 = vst [vmem:[%s1153_s24 + $0x18] sm:$0xff] %v472_v5  ;;  %v400_v13 = vadd.f32 %v719_v9, %v1139_v40  ;;  %v394_v15 = vpop.f32.mrb[5].mxu0 }
 0x110   : > { %496 = vst [vmem:[%s1153_s24 + $0x58] sm:$0xff] %v480_v6  ;;  %v440_v14 = vadd.f32 %v731_v11, %v1139_v40  ;;  %v434_v17 = vpop.f32.mrb[5].mxu1  ;;  %487 = vst [vmem:[%s1153_s24 + $0x10] sm:$0xff] %v471_v7  ;;  %v395_v19 = vadd.f32 %v1139_v40, %v394_v15 }
 0x111   : > { %495 = vst [vmem:[%s1153_s24 + $0x50] sm:$0xff] %v479_v8  ;;  %v435_v20 = vadd.f32 %v1139_v40, %v434_v17  ;;  %v474_v21 = vmul.f32 %v458_v10, %v400_v13 }
 0x112   : > { %v482_v22 = vmul.f32 %v466_v12, %v440_v14  ;;  %v473_v23 = vmul.f32 %v457_v16, %v395_v19  ;;  %v722_v25 = vpop.f32.mrb[6].mxu0 }
 0x113   : > { %v481_v24 = vmul.f32 %v465_v18, %v435_v20  ;;  %v734_v27 = vpop.f32.mrb[6].mxu1  ;;  %490 = vst [vmem:[%s1153_s24 + $0x28] sm:$0xff] %v474_v21  ;;  %v410_v29 = vadd.f32 %v722_v25, %v1139_v40  ;;  %v404_v31 = vpop.f32.mrb[7].mxu0 }
 0x114   : > { %498 = vst [vmem:[%s1153_s24 + $0x68] sm:$0xff] %v482_v22  ;;  %v450_v30 = vadd.f32 %v734_v27, %v1139_v40  ;;  %v444_v33 = vpop.f32.mrb[7].mxu1  ;;  %489 = vst [vmem:[%s1153_s24 + $0x20] sm:$0xff] %v473_v23  ;;  %v405_v35 = vadd.f32 %v1139_v40, %v404_v31 }
 0x115   : > { %497 = vst [vmem:[%s1153_s24 + $0x60] sm:$0xff] %v481_v24  ;;  %v445_v36 = vadd.f32 %v1139_v40, %v444_v33  ;;  %v476_v37 = vmul.f32 %v460_v26, %v410_v29 }
 0x116   : > { %v484_v38 = vmul.f32 %v468_v28, %v450_v30  ;;  %v475_v39 = vmul.f32 %v459_v32, %v405_v35 }
 0x117   : > { %v483_v41 = vmul.f32 %v467_v34, %v445_v36  ;;  %492 = vst [vmem:[%s1153_s24 + $0x38] sm:$0xff] %v476_v37 }
 0x118   : > { %500 = vst [vmem:[%s1153_s24 + $0x78] sm:$0xff] %v484_v38  ;;  %491 = vst [vmem:[%s1153_s24 + $0x30] sm:$0xff] %v475_v39 }
 0x119   : > { %499 = vst [vmem:[%s1153_s24 + $0x70] sm:$0xff] %v483_v41 }
 0x11a   : > { %869 = shalt.err (!%p866_p7)
}
 0x11b   : > { %s870_s13 = scalar_lea.hbm %s1198_s23, 2048  ;;  %s874_s9 = scalar_lea.hbm %s1264_s4, 8192 }
 0x11c   : > { %p871_p9 = scmp.ne.s32.totalorder %s1198_s23, %s870_s13  ;;  %p875_p12 = scmp.lt.u32.totalorder %s1198_s23, %s1264_s4 }
 0x11d   : > { %p876_p13 = scmp.lt.u32.totalorder %s874_s9, %s870_s13  ;;  %p878_p1 = scmp.lt.u32.totalorder %s870_s13, %s1198_s23 }
 0x11e   : > { %p872_p10 = pnand %p871_p9, %p1031_p3 }
 0x11f   : > { %p877_p0 = por %p876_p13, %p875_p12 }
 0x120   : > { %p873_p11 = pneg %p872_p10 }
 0x121   : > { %p879_p2 = por %p878_p1, %p877_p0 }
 0x123   : > { %p880_p4 = pnand %p879_p2, %p873_p11 }
 0x125   : > { %883 = shalt.err (!%p880_p4)
}
 0x126   : > { %s953_s11 = smov 128   ;;  %s954_s12 = smov 8  }
 0x127   : > { %783 = dma.vmem_to_hbm [thread:$0]  (%p1031_p3), %s1200_s10, 2048, %s1198_s23, %s1208_s30, %s953_s11, %s953_s11, %s954_s12  }
 0x128 PF: > { %p789_p5 = scmp.ge.s32.totalorder %s950_s22, 2  ;;  %s533_s5 = sand.u32 1, %s922_s15  }
 0x129   : > { %s534_s6 = scalar_lea.sflag [#allocation3], %s533_s5 }
 0x12a   : > { %p786_p6 = pnand %p789_p5, %p1040_p8 }
 0x12c   : > { %917 = dma.done.wait (!%p786_p6), %s534_s6, 2048  }
 0x12d   : > { %919 = vsyncadd (!%p786_p6), %s534_s6, 4294965248  ;;  %s17_s22 = sadd.s32 1, %s950_s22   ;;  %s1267_s15 = smov %s926_s16 }
 0x12e   : > { %p14_p7 = scmp.ge.s32.totalorder %s17_s22, 6   ;;  %s1268_s16 = smov %s930_s17 }
 0x12f   : > { %s1269_s17 = smov %s1049_s7  ;;  %s1270_s18 = smov %s942_s20 }
 0x130   : > { %s1271_s19 = smov %s946_s21  ;;  %s1272_s20 = smov %s1275_s25 }
 0x131   : > { %s1273_s21 = smov %s1279_s26  ;;  %16 = sbr.rel (!%p14_p7) target bundleno = 5 (0x5), region = 74 }
 0x138   :  { %539 = vsyncpa [#allocation3], 1 }
 0x139   :  { %541 = vsyncpa [#allocation3 + $0x1], 1 }

// kernel: triangular_edge_update.4
= control target key start
LH: loop header
LB: loop body
LE: loop exit
PB: predicated region body
PF: predicated region fallthrough
CT: control target
= control target key end

     0   :  { %s15206_s9 = smov 0   ;;  %s15208_s10 = smov 0   ;;  %s18917_s0 = inlined_call_operand.vmem [shape: f32[2,128,16,16], index: 0, kind: input, shape index: {}]   ;;  %s18918_s1 = inlined_call_operand.vmem [shape: f32[2,128,16,16], index: 1, kind: input, shape index: {}]   ;;  %s18919_s2 = inlined_call_operand.vmem [shape: f32[2,128,16,16], index: 2, kind: output, shape index: {}]  }
   0x1   :  { %s15210_s11 = smov 0   ;;  %s15212_s12 = smov 0  }
   0x2   :  { %s15214_s13 = smov 0   ;;  %s15216_s14 = smov 0  }
   0x3   :  { %s15218_s15 = smov 0  }
   0x4 LB: > { %s21_s16 = sadd.s32 1, %s15178_s13  ;;  %s24_s17 = sadd.s32 1, %s15182_s14  ;;  %s15186_s15 = sphi %s15218_s15, %s12_s15   ;;  %s15182_s14 = sphi %s15216_s14, %s19491_s14   ;;  %s15178_s13 = sphi %s15214_s13, %s19490_s13   ;;  %s15174_s12 = sphi %s15212_s12, %s19489_s12   ;;  %s15170_s11 = sphi %s15210_s11, %s19488_s11   ;;  %s15166_s10 = sphi %s15208_s10, %s19487_s10   ;;  %s15162_s9 = sphi %s15206_s9, %s19486_s9  }
   0x5   : > { %p22_p0 = scmp.ge.s32.totalorder %s21_s16, 2  ;;  %s12877_s18 = sadd.s32 4294967295, %s15186_s15  }
   0x6   : > { %p40_p1 = scmp.ne.s32.totalorder %s15166_s10, %s15162_s9  ;;  %p41_p2 = scmp.eq.s32.totalorder %s15186_s15, 0 }
   0x7   : > { %s19493_s16 = smov (%p22_p0, %s21_s16), 0  ;;  %s19495_s17 = smov (!%p22_p0, %s24_s17), %s15182_s14 }
   0x8   : > { %p26_p3 = scmp.ge.s32.totalorder %s19495_s17, 2  ;;  %p98_p4 = scmp.eq.s32.totalorder %s12877_s18, 3 }
   0x9   : > { %s29_s19 = ssub.s32 %s15178_s13, %s19493_s16  ;;  %p42_p5 = por %p41_p2, %p40_p1 }
   0xa   : > { %s19497_s17 = smov (%p26_p3, %s19495_s17), 0  ;;  %p15254_p6 = por %p98_p4, %p40_p1 }
   0xb   : > { %s28_s21 = ssub.s32 %s15182_s14, %s19497_s17  ;;  %s33_s23 = sadd.s32 1, %s15166_s10 }
   0xc   : > { %s30_s22 = sor.u32 %s29_s19, %s28_s21  ;;  %p12880_p8 = scmp.ge.s32.totalorder %s15186_s15, 4 }
   0xd   : > { %p31_p7 = scmp.eq.s32.totalorder %s30_s22, 0 }
   0xe   : > { %120 = sbr.rel (%p12880_p8) target bundleno = 91 (0x5b), region = 16 }
   0xf   : > { %s15262_s24 = scalar_select %p31_p7, %s15166_s10, %s33_s23  }
  0x15   : > { %123 = sbr.rel (!%p42_p5) target bundleno = 91 (0x5b), region = 20  ;;  %s125_s25 = sand.u32 (%p42_p5), 1, %s15166_s10  }
  0x16   : > { %s12882_s26 = sshll.u32 (%p42_p5), %s15182_s14, 8  ;;  %s12881_s27 = sshll.u32 (%p42_p5), %s125_s25, 10 }
  0x17   : > { %s129_s28 = sadd.s32 (%p42_p5), %s15178_s13, %s12882_s26  ;;  %s15276_s5 = scalar_lea.vmem (%p42_p5), [#allocation2], %s12881_s27 }
  0x18   : > { %s12883_s29 = sshll.u32 (%p42_p5), %s129_s28, 3 }
  0x19   : > { %s15271_s4 = scalar_lea.vmem (%p42_p5), %s18917_s0, %s12883_s29 }
  0x1a   : > { %v413_v0 = vld [vmem:[%s15271_s4] sm:$0xff] (%p42_p5)  ;;  %v415_v1 = vld [vmem:[%s15271_s4 + $0x10] sm:$0xff] (%p42_p5) }
  0x1b   : > { %v417_v2 = vld [vmem:[%s15271_s4 + $0x20] sm:$0xff] (%p42_p5)  ;;  %414 = vst [vmem:[%s15276_s5] sm:$0xff] (%p42_p5), %v413_v0  ;;  %416 = vst [vmem:[%s15276_s5 + $0x8] sm:$0xff] (%p42_p5), %v415_v1  ;;  %v419_v3 = vld [vmem:[%s15271_s4 + $0x30] sm:$0xff] (%p42_p5) }
  0x1c   : > { %418 = vst [vmem:[%s15276_s5 + $0x10] sm:$0xff] %v417_v2  ;;  %v421_v4 = vld [vmem:[%s15271_s4 + $0x40] sm:$0xff]  ;;  %v423_v5 = vld [vmem:[%s15271_s4 + $0x50] sm:$0xff]  ;;  %420 = vst [vmem:[%s15276_s5 + $0x18] sm:$0xff] %v419_v3 }
  0x1d   : > { %422 = vst [vmem:[%s15276_s5 + $0x20] sm:$0xff] %v421_v4  ;;  %424 = vst [vmem:[%s15276_s5 + $0x28] sm:$0xff] %v423_v5  ;;  %v425_v6 = vld [vmem:[%s15271_s4 + $0x60] sm:$0xff]  ;;  %v427_v7 = vld [vmem:[%s15271_s4 + $0x70] sm:$0xff] }
  0x1e   : > { %v429_v8 = vld [vmem:[%s15271_s4 + $0x80] sm:$0xff]  ;;  %426 = vst [vmem:[%s15276_s5 + $0x30] sm:$0xff] %v425_v6  ;;  %428 = vst [vmem:[%s15276_s5 + $0x38] sm:$0xff] %v427_v7  ;;  %v431_v9 = vld [vmem:[%s15271_s4 + $0x90] sm:$0xff] }
  0x1f   : > { %430 = vst [vmem:[%s15276_s5 + $0x40] sm:$0xff] %v429_v8  ;;  %v433_v10 = vld [vmem:[%s15271_s4 + $0xa0] sm:$0xff]  ;;  %v435_v11 = vld [vmem:[%s15271_s4 + $0xb0] sm:$0xff]  ;;  %432 = vst [vmem:[%s15276_s5 + $0x48] sm:$0xff] %v431_v9 }
  0x20   : > { %434 = vst [vmem:[%s15276_s5 + $0x50] sm:$0xff] %v433_v10  ;;  %436 = vst [vmem:[%s15276_s5 + $0x58] sm:$0xff] %v435_v11  ;;  %v437_v12 = vld [vmem:[%s15271_s4 + $0xc0] sm:$0xff]  ;;  %v439_v13 = vld [vmem:[%s15271_s4 + $0xd0] sm:$0xff] }
  0x21   : > { %v441_v14 = vld [vmem:[%s15271_s4 + $0xe0] sm:$0xff]  ;;  %438 = vst [vmem:[%s15276_s5 + $0x60] sm:$0xff] %v437_v12  ;;  %440 = vst [vmem:[%s15276_s5 + $0x68] sm:$0xff] %v439_v13  ;;  %v443_v15 = vld [vmem:[%s15271_s4 + $0xf0] sm:$0xff] }
  0x22   : > { %442 = vst [vmem:[%s15276_s5 + $0x70] sm:$0xff] %v441_v14  ;;  %v445_v16 = vld [vmem:[%s15271_s4 + $0x100] sm:$0xff]  ;;  %v447_v17 = vld [vmem:[%s15271_s4 + $0x110] sm:$0xff]  ;;  %444 = vst [vmem:[%s15276_s5 + $0x78] sm:$0xff] %v443_v15 }
  0x23   : > { %446 = vst [vmem:[%s15276_s5 + $0x80] sm:$0xff] %v445_v16  ;;  %448 = vst [vmem:[%s15276_s5 + $0x88] sm:$0xff] %v447_v17  ;;  %v449_v18 = vld [vmem:[%s15271_s4 + $0x120] sm:$0xff]  ;;  %v451_v19 = vld [vmem:[%s15271_s4 + $0x130] sm:$0xff] }
  0x24   : > { %v453_v20 = vld [vmem:[%s15271_s4 + $0x140] sm:$0xff]  ;;  %450 = vst [vmem:[%s15276_s5 + $0x90] sm:$0xff] %v449_v18  ;;  %452 = vst [vmem:[%s15276_s5 + $0x98] sm:$0xff] %v451_v19  ;;  %v455_v21 = vld [vmem:[%s15271_s4 + $0x150] sm:$0xff] }
  0x25   : > { %454 = vst [vmem:[%s15276_s5 + $0xa0] sm:$0xff] %v453_v20  ;;  %v457_v22 = vld [vmem:[%s15271_s4 + $0x160] sm:$0xff]  ;;  %v459_v23 = vld [vmem:[%s15271_s4 + $0x170] sm:$0xff]  ;;  %456 = vst [vmem:[%s15276_s5 + $0xa8] sm:$0xff] %v455_v21 }
  0x26   : > { %458 = vst [vmem:[%s15276_s5 + $0xb0] sm:$0xff] %v457_v22  ;;  %460 = vst [vmem:[%s15276_s5 + $0xb8] sm:$0xff] %v459_v23  ;;  %v461_v24 = vld [vmem:[%s15271_s4 + $0x180] sm:$0xff]  ;;  %v463_v25 = vld [vmem:[%s15271_s4 + $0x190] sm:$0xff] }
  0x27   : > { %v465_v26 = vld [vmem:[%s15271_s4 + $0x1a0] sm:$0xff]  ;;  %462 = vst [vmem:[%s15276_s5 + $0xc0] sm:$0xff] %v461_v24  ;;  %464 = vst [vmem:[%s15276_s5 + $0xc8] sm:$0xff] %v463_v25  ;;  %v467_v27 = vld [vmem:[%s15271_s4 + $0x1b0] sm:$0xff] }
  0x28   : > { %466 = vst [vmem:[%s15276_s5 + $0xd0] sm:$0xff] %v465_v26  ;;  %v469_v28 = vld [vmem:[%s15271_s4 + $0x1c0] sm:$0xff]  ;;  %v471_v29 = vld [vmem:[%s15271_s4 + $0x1d0] sm:$0xff]  ;;  %468 = vst [vmem:[%s15276_s5 + $0xd8] sm:$0xff] %v467_v27 }
  0x29   : > { %470 = vst [vmem:[%s15276_s5 + $0xe0] sm:$0xff] %v469_v28  ;;  %472 = vst [vmem:[%s15276_s5 + $0xe8] sm:$0xff] %v471_v29  ;;  %v473_v30 = vld [vmem:[%s15271_s4 + $0x1e0] sm:$0xff]  ;;  %v475_v31 = vld [vmem:[%s15271_s4 + $0x1f0] sm:$0xff] }
  0x2a   : > { %v477_v32 = vld [vmem:[%s15271_s4 + $0x200] sm:$0xff]  ;;  %474 = vst [vmem:[%s15276_s5 + $0xf0] sm:$0xff] %v473_v30  ;;  %476 = vst [vmem:[%s15276_s5 + $0xf8] sm:$0xff] %v475_v31  ;;  %v479_v33 = vld [vmem:[%s15271_s4 + $0x210] sm:$0xff] }
  0x2b   : > { %478 = vst [vmem:[%s15276_s5 + $0x100] sm:$0xff] %v477_v32  ;;  %v481_v34 = vld [vmem:[%s15271_s4 + $0x220] sm:$0xff]  ;;  %v483_v35 = vld [vmem:[%s15271_s4 + $0x230] sm:$0xff]  ;;  %480 = vst [vmem:[%s15276_s5 + $0x108] sm:$0xff] %v479_v33 }
  0x2c   : > { %482 = vst [vmem:[%s15276_s5 + $0x110] sm:$0xff] %v481_v34  ;;  %484 = vst [vmem:[%s15276_s5 + $0x118] sm:$0xff] %v483_v35  ;;  %v485_v36 = vld [vmem:[%s15271_s4 + $0x240] sm:$0xff]  ;;  %v487_v37 = vld [vmem:[%s15271_s4 + $0x250] sm:$0xff] }
  0x2d   : > { %v489_v38 = vld [vmem:[%s15271_s4 + $0x260] sm:$0xff]  ;;  %486 = vst [vmem:[%s15276_s5 + $0x120] sm:$0xff] %v485_v36  ;;  %488 = vst [vmem:[%s15276_s5 + $0x128] sm:$0xff] %v487_v37  ;;  %v491_v39 = vld [vmem:[%s15271_s4 + $0x270] sm:$0xff] }
  0x2e   : > { %490 = vst [vmem:[%s15276_s5 + $0x130] sm:$0xff] %v489_v38  ;;  %v493_v40 = vld [vmem:[%s15271_s4 + $0x280] sm:$0xff]  ;;  %v495_v41 = vld [vmem:[%s15271_s4 + $0x290] sm:$0xff]  ;;  %492 = vst [vmem:[%s15276_s5 + $0x138] sm:$0xff] %v491_v39 }
  0x2f   : > { %494 = vst [vmem:[%s15276_s5 + $0x140] sm:$0xff] %v493_v40  ;;  %496 = vst [vmem:[%s15276_s5 + $0x148] sm:$0xff] %v495_v41  ;;  %v497_v42 = vld [vmem:[%s15271_s4 + $0x2a0] sm:$0xff]  ;;  %v499_v43 = vld [vmem:[%s15271_s4 + $0x2b0] sm:$0xff] }
  0x30   : > { %v501_v44 = vld [vmem:[%s15271_s4 + $0x2c0] sm:$0xff]  ;;  %498 = vst [vmem:[%s15276_s5 + $0x150] sm:$0xff] %v497_v42  ;;  %500 = vst [vmem:[%s15276_s5 + $0x158] sm:$0xff] %v499_v43  ;;  %v503_v45 = vld [vmem:[%s15271_s4 + $0x2d0] sm:$0xff] }
  0x31   : > { %502 = vst [vmem:[%s15276_s5 + $0x160] sm:$0xff] %v501_v44  ;;  %v505_v46 = vld [vmem:[%s15271_s4 + $0x2e0] sm:$0xff]  ;;  %v507_v47 = vld [vmem:[%s15271_s4 + $0x2f0] sm:$0xff]  ;;  %504 = vst [vmem:[%s15276_s5 + $0x168] sm:$0xff] %v503_v45 }
  0x32   : > { %506 = vst [vmem:[%s15276_s5 + $0x170] sm:$0xff] %v505_v46  ;;  %508 = vst [vmem:[%s15276_s5 + $0x178] sm:$0xff] %v507_v47  ;;  %v509_v48 = vld [vmem:[%s15271_s4 + $0x300] sm:$0xff]  ;;  %v511_v49 = vld [vmem:[%s15271_s4 + $0x310] sm:$0xff] }
  0x33   : > { %v513_v50 = vld [vmem:[%s15271_s4 + $0x320] sm:$0xff]  ;;  %510 = vst [vmem:[%s15276_s5 + $0x180] sm:$0xff] %v509_v48  ;;  %512 = vst [vmem:[%s15276_s5 + $0x188] sm:$0xff] %v511_v49  ;;  %v515_v51 = vld [vmem:[%s15271_s4 + $0x330] sm:$0xff] }
  0x34   : > { %514 = vst [vmem:[%s15276_s5 + $0x190] sm:$0xff] %v513_v50  ;;  %v517_v52 = vld [vmem:[%s15271_s4 + $0x340] sm:$0xff]  ;;  %v519_v53 = vld [vmem:[%s15271_s4 + $0x350] sm:$0xff]  ;;  %516 = vst [vmem:[%s15276_s5 + $0x198] sm:$0xff] %v515_v51 }
  0x35   : > { %518 = vst [vmem:[%s15276_s5 + $0x1a0] sm:$0xff] %v517_v52  ;;  %520 = vst [vmem:[%s15276_s5 + $0x1a8] sm:$0xff] %v519_v53  ;;  %v521_v54 = vld [vmem:[%s15271_s4 + $0x360] sm:$0xff]  ;;  %v523_v55 = vld [vmem:[%s15271_s4 + $0x370] sm:$0xff] }
  0x36   : > { %v525_v56 = vld [vmem:[%s15271_s4 + $0x380] sm:$0xff]  ;;  %522 = vst [vmem:[%s15276_s5 + $0x1b0] sm:$0xff] %v521_v54  ;;  %524 = vst [vmem:[%s15276_s5 + $0x1b8] sm:$0xff] %v523_v55  ;;  %v527_v57 = vld [vmem:[%s15271_s4 + $0x390] sm:$0xff] }
  0x37   : > { %526 = vst [vmem:[%s15276_s5 + $0x1c0] sm:$0xff] %v525_v56  ;;  %v529_v58 = vld [vmem:[%s15271_s4 + $0x3a0] sm:$0xff]  ;;  %v531_v59 = vld [vmem:[%s15271_s4 + $0x3b0] sm:$0xff]  ;;  %528 = vst [vmem:[%s15276_s5 + $0x1c8] sm:$0xff] %v527_v57 }
  0x38   : > { %530 = vst [vmem:[%s15276_s5 + $0x1d0] sm:$0xff] %v529_v58  ;;  %532 = vst [vmem:[%s15276_s5 + $0x1d8] sm:$0xff] %v531_v59  ;;  %v533_v60 = vld [vmem:[%s15271_s4 + $0x3c0] sm:$0xff]  ;;  %v535_v61 = vld [vmem:[%s15271_s4 + $0x3d0] sm:$0xff] }
  0x39   : > { %v537_v62 = vld [vmem:[%s15271_s4 + $0x3e0] sm:$0xff]  ;;  %534 = vst [vmem:[%s15276_s5 + $0x1e0] sm:$0xff] %v533_v60  ;;  %536 = vst [vmem:[%s15276_s5 + $0x1e8] sm:$0xff] %v535_v61  ;;  %v539_v63 = vld [vmem:[%s15271_s4 + $0x3f0] sm:$0xff] }
  0x3a   : > { %538 = vst [vmem:[%s15276_s5 + $0x1f0] sm:$0xff] %v537_v62  ;;  %v541_v0 = vld [vmem:[%s15271_s4 + $0x400] sm:$0xff]  ;;  %v543_v1 = vld [vmem:[%s15271_s4 + $0x410] sm:$0xff]  ;;  %540 = vst [vmem:[%s15276_s5 + $0x1f8] sm:$0xff] %v539_v63 }
  0x3b   : > { %542 = vst [vmem:[%s15276_s5 + $0x200] sm:$0xff] %v541_v0  ;;  %544 = vst [vmem:[%s15276_s5 + $0x208] sm:$0xff] %v543_v1  ;;  %v545_v2 = vld [vmem:[%s15271_s4 + $0x420] sm:$0xff]  ;;  %v547_v3 = vld [vmem:[%s15271_s4 + $0x430] sm:$0xff] }
  0x3c   : > { %v549_v4 = vld [vmem:[%s15271_s4 + $0x440] sm:$0xff]  ;;  %546 = vst [vmem:[%s15276_s5 + $0x210] sm:$0xff] %v545_v2  ;;  %548 = vst [vmem:[%s15276_s5 + $0x218] sm:$0xff] %v547_v3  ;;  %v551_v5 = vld [vmem:[%s15271_s4 + $0x450] sm:$0xff] }
  0x3d   : > { %550 = vst [vmem:[%s15276_s5 + $0x220] sm:$0xff] %v549_v4  ;;  %v553_v6 = vld [vmem:[%s15271_s4 + $0x460] sm:$0xff]  ;;  %v555_v7 = vld [vmem:[%s15271_s4 + $0x470] sm:$0xff]  ;;  %552 = vst [vmem:[%s15276_s5 + $0x228] sm:$0xff] %v551_v5 }
  0x3e   : > { %554 = vst [vmem:[%s15276_s5 + $0x230] sm:$0xff] %v553_v6  ;;  %556 = vst [vmem:[%s15276_s5 + $0x238] sm:$0xff] %v555_v7  ;;  %v557_v8 = vld [vmem:[%s15271_s4 + $0x480] sm:$0xff]  ;;  %v559_v9 = vld [vmem:[%s15271_s4 + $0x490] sm:$0xff] }
  0x3f   : > { %v561_v10 = vld [vmem:[%s15271_s4 + $0x4a0] sm:$0xff]  ;;  %558 = vst [vmem:[%s15276_s5 + $0x240] sm:$0xff] %v557_v8  ;;  %560 = vst [vmem:[%s15276_s5 + $0x248] sm:$0xff] %v559_v9  ;;  %v563_v11 = vld [vmem:[%s15271_s4 + $0x4b0] sm:$0xff] }
  0x40   : > { %562 = vst [vmem:[%s15276_s5 + $0x250] sm:$0xff] %v561_v10  ;;  %v565_v12 = vld [vmem:[%s15271_s4 + $0x4c0] sm:$0xff]  ;;  %v567_v13 = vld [vmem:[%s15271_s4 + $0x4d0] sm:$0xff]  ;;  %564 = vst [vmem:[%s15276_s5 + $0x258] sm:$0xff] %v563_v11 }
  0x41   : > { %566 = vst [vmem:[%s15276_s5 + $0x260] sm:$0xff] %v565_v12  ;;  %568 = vst [vmem:[%s15276_s5 + $0x268] sm:$0xff] %v567_v13  ;;  %v569_v14 = vld [vmem:[%s15271_s4 + $0x4e0] sm:$0xff]  ;;  %v571_v15 = vld [vmem:[%s15271_s4 + $0x4f0] sm:$0xff] }
  0x42   : > { %v573_v16 = vld [vmem:[%s15271_s4 + $0x500] sm:$0xff]  ;;  %570 = vst [vmem:[%s15276_s5 + $0x270] sm:$0xff] %v569_v14  ;;  %572 = vst [vmem:[%s15276_s5 + $0x278] sm:$0xff] %v571_v15  ;;  %v575_v17 = vld [vmem:[%s15271_s4 + $0x510] sm:$0xff] }
  0x43   : > { %574 = vst [vmem:[%s15276_s5 + $0x280] sm:$0xff] %v573_v16  ;;  %v577_v18 = vld [vmem:[%s15271_s4 + $0x520] sm:$0xff]  ;;  %v579_v19 = vld [vmem:[%s15271_s4 + $0x530] sm:$0xff]  ;;  %576 = vst [vmem:[%s15276_s5 + $0x288] sm:$0xff] %v575_v17 }
  0x44   : > { %578 = vst [vmem:[%s15276_s5 + $0x290] sm:$0xff] %v577_v18  ;;  %580 = vst [vmem:[%s15276_s5 + $0x298] sm:$0xff] %v579_v19  ;;  %v581_v20 = vld [vmem:[%s15271_s4 + $0x540] sm:$0xff]  ;;  %v583_v21 = vld [vmem:[%s15271_s4 + $0x550] sm:$0xff] }
  0x45   : > { %v585_v22 = vld [vmem:[%s15271_s4 + $0x560] sm:$0xff]  ;;  %582 = vst [vmem:[%s15276_s5 + $0x2a0] sm:$0xff] %v581_v20  ;;  %584 = vst [vmem:[%s15276_s5 + $0x2a8] sm:$0xff] %v583_v21  ;;  %v587_v23 = vld [vmem:[%s15271_s4 + $0x570] sm:$0xff] }
  0x46   : > { %586 = vst [vmem:[%s15276_s5 + $0x2b0] sm:$0xff] %v585_v22  ;;  %v589_v24 = vld [vmem:[%s15271_s4 + $0x580] sm:$0xff]  ;;  %v591_v25 = vld [vmem:[%s15271_s4 + $0x590] sm:$0xff]  ;;  %588 = vst [vmem:[%s15276_s5 + $0x2b8] sm:$0xff] %v587_v23 }
  0x47   : > { %590 = vst [vmem:[%s15276_s5 + $0x2c0] sm:$0xff] %v589_v24  ;;  %592 = vst [vmem:[%s15276_s5 + $0x2c8] sm:$0xff] %v591_v25  ;;  %v593_v26 = vld [vmem:[%s15271_s4 + $0x5a0] sm:$0xff]  ;;  %v595_v27 = vld [vmem:[%s15271_s4 + $0x5b0] sm:$0xff] }
  0x48   : > { %v597_v28 = vld [vmem:[%s15271_s4 + $0x5c0] sm:$0xff]  ;;  %594 = vst [vmem:[%s15276_s5 + $0x2d0] sm:$0xff] %v593_v26  ;;  %596 = vst [vmem:[%s15276_s5 + $0x2d8] sm:$0xff] %v595_v27  ;;  %v599_v29 = vld [vmem:[%s15271_s4 + $0x5d0] sm:$0xff] }
  0x49   : > { %598 = vst [vmem:[%s15276_s5 + $0x2e0] sm:$0xff] %v597_v28  ;;  %v601_v30 = vld [vmem:[%s15271_s4 + $0x5e0] sm:$0xff]  ;;  %v603_v31 = vld [vmem:[%s15271_s4 + $0x5f0] sm:$0xff]  ;;  %600 = vst [vmem:[%s15276_s5 + $0x2e8] sm:$0xff] %v599_v29 }
  0x4a   : > { %602 = vst [vmem:[%s15276_s5 + $0x2f0] sm:$0xff] %v601_v30  ;;  %604 = vst [vmem:[%s15276_s5 + $0x2f8] sm:$0xff] %v603_v31  ;;  %v605_v32 = vld [vmem:[%s15271_s4 + $0x600] sm:$0xff]  ;;  %v607_v33 = vld [vmem:[%s15271_s4 + $0x610] sm:$0xff] }
  0x4b   : > { %v609_v34 = vld [vmem:[%s15271_s4 + $0x620] sm:$0xff]  ;;  %606 = vst [vmem:[%s15276_s5 + $0x300] sm:$0xff] %v605_v32  ;;  %608 = vst [vmem:[%s15276_s5 + $0x308] sm:$0xff] %v607_v33  ;;  %v611_v35 = vld [vmem:[%s15271_s4 + $0x630] sm:$0xff] }
  0x4c   : > { %610 = vst [vmem:[%s15276_s5 + $0x310] sm:$0xff] %v609_v34  ;;  %v613_v36 = vld [vmem:[%s15271_s4 + $0x640] sm:$0xff]  ;;  %v615_v37 = vld [vmem:[%s15271_s4 + $0x650] sm:$0xff]  ;;  %612 = vst [vmem:[%s15276_s5 + $0x318] sm:$0xff] %v611_v35 }
  0x4d   : > { %614 = vst [vmem:[%s15276_s5 + $0x320] sm:$0xff] %v613_v36  ;;  %616 = vst [vmem:[%s15276_s5 + $0x328] sm:$0xff] %v615_v37  ;;  %v617_v38 = vld [vmem:[%s15271_s4 + $0x660] sm:$0xff]  ;;  %v619_v39 = vld [vmem:[%s15271_s4 + $0x670] sm:$0xff] }
  0x4e   : > { %v621_v40 = vld [vmem:[%s15271_s4 + $0x680] sm:$0xff]  ;;  %618 = vst [vmem:[%s15276_s5 + $0x330] sm:$0xff] %v617_v38  ;;  %620 = vst [vmem:[%s15276_s5 + $0x338] sm:$0xff] %v619_v39  ;;  %v623_v41 = vld [vmem:[%s15271_s4 + $0x690] sm:$0xff] }
  0x4f   : > { %622 = vst [vmem:[%s15276_s5 + $0x340] sm:$0xff] %v621_v40  ;;  %v625_v42 = vld [vmem:[%s15271_s4 + $0x6a0] sm:$0xff]  ;;  %v627_v43 = vld [vmem:[%s15271_s4 + $0x6b0] sm:$0xff]  ;;  %624 = vst [vmem:[%s15276_s5 + $0x348] sm:$0xff] %v623_v41 }
  0x50   : > { %626 = vst [vmem:[%s15276_s5 + $0x350] sm:$0xff] %v625_v42  ;;  %628 = vst [vmem:[%s15276_s5 + $0x358] sm:$0xff] %v627_v43  ;;  %v629_v44 = vld [vmem:[%s15271_s4 + $0x6c0] sm:$0xff]  ;;  %v631_v45 = vld [vmem:[%s15271_s4 + $0x6d0] sm:$0xff] }
  0x51   : > { %v633_v46 = vld [vmem:[%s15271_s4 + $0x6e0] sm:$0xff]  ;;  %630 = vst [vmem:[%s15276_s5 + $0x360] sm:$0xff] %v629_v44  ;;  %632 = vst [vmem:[%s15276_s5 + $0x368] sm:$0xff] %v631_v45  ;;  %v635_v47 = vld [vmem:[%s15271_s4 + $0x6f0] sm:$0xff] }
  0x52   : > { %634 = vst [vmem:[%s15276_s5 + $0x370] sm:$0xff] %v633_v46  ;;  %v637_v48 = vld [vmem:[%s15271_s4 + $0x700] sm:$0xff]  ;;  %v639_v49 = vld [vmem:[%s15271_s4 + $0x710] sm:$0xff]  ;;  %636 = vst [vmem:[%s15276_s5 + $0x378] sm:$0xff] %v635_v47 }
  0x53   : > { %638 = vst [vmem:[%s15276_s5 + $0x380] sm:$0xff] %v637_v48  ;;  %640 = vst [vmem:[%s15276_s5 + $0x388] sm:$0xff] %v639_v49  ;;  %v641_v50 = vld [vmem:[%s15271_s4 + $0x720] sm:$0xff]  ;;  %v643_v51 = vld [vmem:[%s15271_s4 + $0x730] sm:$0xff] }
  0x54   : > { %v645_v52 = vld [vmem:[%s15271_s4 + $0x740] sm:$0xff]  ;;  %642 = vst [vmem:[%s15276_s5 + $0x390] sm:$0xff] %v641_v50  ;;  %644 = vst [vmem:[%s15276_s5 + $0x398] sm:$0xff] %v643_v51  ;;  %v647_v53 = vld [vmem:[%s15271_s4 + $0x750] sm:$0xff] }
  0x55   : > { %646 = vst [vmem:[%s15276_s5 + $0x3a0] sm:$0xff] %v645_v52  ;;  %v649_v54 = vld [vmem:[%s15271_s4 + $0x760] sm:$0xff]  ;;  %v651_v55 = vld [vmem:[%s15271_s4 + $0x770] sm:$0xff]  ;;  %648 = vst [vmem:[%s15276_s5 + $0x3a8] sm:$0xff] %v647_v53 }
  0x56   : > { %650 = vst [vmem:[%s15276_s5 + $0x3b0] sm:$0xff] %v649_v54  ;;  %652 = vst [vmem:[%s15276_s5 + $0x3b8] sm:$0xff] %v651_v55  ;;  %v653_v56 = vld [vmem:[%s15271_s4 + $0x780] sm:$0xff]  ;;  %v655_v57 = vld [vmem:[%s15271_s4 + $0x790] sm:$0xff] }
  0x57   : > { %v657_v58 = vld [vmem:[%s15271_s4 + $0x7a0] sm:$0xff]  ;;  %654 = vst [vmem:[%s15276_s5 + $0x3c0] sm:$0xff] %v653_v56  ;;  %656 = vst [vmem:[%s15276_s5 + $0x3c8] sm:$0xff] %v655_v57  ;;  %v659_v59 = vld [vmem:[%s15271_s4 + $0x7b0] sm:$0xff] }
  0x58   : > { %658 = vst [vmem:[%s15276_s5 + $0x3d0] sm:$0xff] %v657_v58  ;;  %v661_v60 = vld [vmem:[%s15271_s4 + $0x7c0] sm:$0xff]  ;;  %v663_v61 = vld [vmem:[%s15271_s4 + $0x7d0] sm:$0xff]  ;;  %660 = vst [vmem:[%s15276_s5 + $0x3d8] sm:$0xff] %v659_v59 }
  0x59   : > { %662 = vst [vmem:[%s15276_s5 + $0x3e0] sm:$0xff] %v661_v60  ;;  %664 = vst [vmem:[%s15276_s5 + $0x3e8] sm:$0xff] %v663_v61  ;;  %v665_v62 = vld [vmem:[%s15271_s4 + $0x7e0] sm:$0xff]  ;;  %v667_v63 = vld [vmem:[%s15271_s4 + $0x7f0] sm:$0xff] }
  0x5a   : > { %666 = vst [vmem:[%s15276_s5 + $0x3f0] sm:$0xff] %v665_v62  ;;  %668 = vst [vmem:[%s15276_s5 + $0x3f8] sm:$0xff] %v667_v63 }
  0x5b PF: > { %p12884_p9 = scmp.ge.s32.totalorder %s15186_s15, 1  ;;  %p681_p10 = scmp.lt.s32.totalorder %s15186_s15, 5 }
  0x5d   : > { %p682_p11 = pnand %p12884_p9, %p681_p10 }
  0x5f   : > { %685 = sbr.rel (%p682_p11) target bundleno = 1297 (0x511), region = 62 }
  0x66   : > { %p713_p12 = scmp.lt.s32.totalorder %s15174_s12, 1  ;;  %v15188_v0 = vmov 0.0|0.0   ;;  %vm1102_vm0 = vcmask 130048   ;;  %vm15189_vm1 = vmmov 0   ;;  %v18920_v1 = vmov 0.0   ;;  %s688_s8 = sand.u32 1, %s15162_s9  }
  0x67   : > { %14559 = vmatprep.subr.bf16.mxu0 %v15188_v0  ;;  %14563 = vmatprep.subr.bf16.mxu1 %v15188_v0  ;;  %vm15549_vm2 = vmpackc.low %vm1102_vm0, %vm1102_vm0  ;;  %s15557_s9 = sshll.u32 %s688_s8, 10  ;;  %s13274_s25 = sshll.u32 (%p15254_p6), %s15174_s12, 8 }
  0x68   : > { %s714_s6 = scalar_select %p713_p12, %s15174_s12, 1  ;;  %13667 = vmatprep.mubr.msk.f32.mxu0 %vm15189_vm1, %v18920_v1  ;;  %13674 = vmatprep.mubr.msk.f32.mxu1 %vm15189_vm1, %v18920_v1 }
  0x69   : > { %s15570_s22 = scalar_lea.vmem [#allocation2], %s15557_s9  ;;  %s18141_s23 = scalar_lea.vmem [#allocation3], %s15557_s9 }
  0x6a   : > { %s13278_s7 = sshll.u32 %s714_s6, 11  ;;  %v718_v13 = vld [vmem:[%s15570_s22] sm:$0xff]  ;;  %v719_v15 = vld [vmem:[%s15570_s22 + $0x8] sm:$0xff]  ;;  %v720_v21 = vld [vmem:[%s15570_s22 + $0x10] sm:$0xff]  ;;  %s12250_s20 = sadd.s32 (%p15254_p6), %s15170_s11, %s13274_s25 }
  0x6b   : > { %s15545_s21 = scalar_lea.vmem %s18918_s1, %s13278_s7  ;;  %v721_v23 = vld [vmem:[%s15570_s22 + $0x18] sm:$0xff]  ;;  %v722_v29 = vld [vmem:[%s15570_s22 + $0x20] sm:$0xff]  ;;  %v723_v31 = vld [vmem:[%s15570_s22 + $0x28] sm:$0xff]  ;;  %s13275_s26 = sshll.u32 (%p15254_p6), %s12250_s20, 3 }
  0x6c   : > { %v846_v3 = vld [vmem:[%s15545_s21] sm:$0xff]  ;;  %v847_v4 = vld [vmem:[%s15545_s21 + $0x8] sm:$0xff]  ;;  %v848_v5 = vld [vmem:[%s15545_s21 + $0x10] sm:$0xff]  ;;  %s18647_s29 = scalar_lea.vmem (%p15254_p6), %s18919_s2, %s13275_s26 }
  0x6d   : > { %v14560_v6 = vpack.c.bf16 %v847_v4, %v846_v3  ;;  %v849_v7 = vld [vmem:[%s15545_s21 + $0x18] sm:$0xff]  ;;  %v850_v9 = vld [vmem:[%s15545_s21 + $0x20] sm:$0xff]  ;;  %v851_v10 = vld [vmem:[%s15545_s21 + $0x28] sm:$0xff] }
  0x6e   : > { %v14564_v8 = vpack.c.bf16 %v849_v7, %v848_v5  ;;  %v852_v11 = vld [vmem:[%s15545_s21 + $0x30] sm:$0xff]  ;;  %v853_v12 = vld [vmem:[%s15545_s21 + $0x38] sm:$0xff]  ;;  %v14568_v14 = vpack.c.bf16 %v851_v10, %v850_v9  ;;  %v854_v17 = vld [vmem:[%s15545_s21 + $0x40] sm:$0xff] }
  0x6f   : > { %14562 = vmatpush3.bf16.xpose.msk.msra.mxu0 %vm15549_vm2, %v14560_v6  ;;  %v14572_v16 = vpack.c.bf16 %v853_v12, %v852_v11  ;;  %v855_v18 = vld [vmem:[%s15545_s21 + $0x48] sm:$0xff]  ;;  %v856_v19 = vld [vmem:[%s15545_s21 + $0x50] sm:$0xff]  ;;  %v857_v20 = vld [vmem:[%s15545_s21 + $0x58] sm:$0xff] }
  0x70   : > { %14566 = vmatpush3.bf16.xpose.msk.msra.mxu1 %vm15549_vm2, %v14564_v8  ;;  %14567 = vmatprep.subr.bf16.mxu0 %v15188_v0  ;;  %v14576_v22 = vpack.c.bf16 %v855_v18, %v854_v17  ;;  %v14580_v24 = vpack.c.bf16 %v857_v20, %v856_v19  ;;  %v858_v25 = vld [vmem:[%s15545_s21 + $0x60] sm:$0xff]  ;;  %v859_v26 = vld [vmem:[%s15545_s21 + $0x68] sm:$0xff]  ;;  %v860_v27 = vld [vmem:[%s15545_s21 + $0x70] sm:$0xff] }
  0x71   : > { %14571 = vmatprep.subr.bf16.mxu1 %v15188_v0  ;;  %v861_v28 = vld [vmem:[%s15545_s21 + $0x78] sm:$0xff]  ;;  %v14584_v30 = vpack.c.bf16 %v859_v26, %v858_v25  ;;  %v862_v33 = vld [vmem:[%s15545_s21 + $0x80] sm:$0xff]  ;;  %v863_v34 = vld [vmem:[%s15545_s21 + $0x88] sm:$0xff] }
  0x72   : > { %v14588_v32 = vpack.c.bf16 %v861_v28, %v860_v27  ;;  %v864_v35 = vld [vmem:[%s15545_s21 + $0x90] sm:$0xff]  ;;  %v865_v36 = vld [vmem:[%s15545_s21 + $0x98] sm:$0xff]  ;;  %v14592_v38 = vpack.c.bf16 %v863_v34, %v862_v33  ;;  %v866_v41 = vld [vmem:[%s15545_s21 + $0xa0] sm:$0xff] }
  0x73   : > { %v724_v37 = vld [vmem:[%s15570_s22 + $0x30] sm:$0xff]  ;;  %v725_v39 = vld [vmem:[%s15570_s22 + $0x38] sm:$0xff]  ;;  %v14596_v40 = vpack.c.bf16 %v865_v36, %v864_v35  ;;  %v867_v42 = vld [vmem:[%s15545_s21 + $0xa8] sm:$0xff] }
  0x74   : > { %v868_v43 = vld [vmem:[%s15545_s21 + $0xb0] sm:$0xff]  ;;  %v869_v44 = vld [vmem:[%s15545_s21 + $0xb8] sm:$0xff]  ;;  %v726_v45 = vld [vmem:[%s15570_s22 + $0x40] sm:$0xff]  ;;  %v14600_v46 = vpack.c.bf16 %v867_v42, %v866_v41 }
  0x75   : > { %v727_v47 = vld [vmem:[%s15570_s22 + $0x48] sm:$0xff]  ;;  %v14604_v48 = vpack.c.bf16 %v869_v44, %v868_v43  ;;  %v870_v49 = vld [vmem:[%s15545_s21 + $0xc0] sm:$0xff]  ;;  %v872_v51 = vld [vmem:[%s15545_s21 + $0xd0] sm:$0xff] }
  0x76   : > { %13668 = vmatmul.mubr.msk.f32.vlgmr.msra.gmra.mrb[0].mxu0 %vm1102_vm0, %v718_v13  ;;  %v871_v50 = vld [vmem:[%s15545_s21 + $0xc8] sm:$0xff]  ;;  %v873_v52 = vld [vmem:[%s15545_s21 + $0xd8] sm:$0xff]  ;;  %v728_v53 = vld [vmem:[%s15570_s22 + $0x50] sm:$0xff] }
  0x77   : > { %13675 = vmatmul.mubr.msk.f32.vlgmr.msra.gmra.mrb[0].mxu1 %vm1102_vm0, %v719_v15  ;;  %14570 = vmatpush3.bf16.xpose.msk.msra.mxu0 %vm15549_vm2, %v14568_v14  ;;  %v14608_v54 = vpack.c.bf16 %v871_v50, %v870_v49  ;;  %v729_v55 = vld [vmem:[%s15570_s22 + $0x58] sm:$0xff]  ;;  %v14612_v56 = vpack.c.bf16 %v873_v52, %v872_v51  ;;  %v874_v57 = vld [vmem:[%s15545_s21 + $0xe0] sm:$0xff]  ;;  %v875_v58 = vld [vmem:[%s15545_s21 + $0xe8] sm:$0xff] }
  0x78   : > { %14574 = vmatpush3.bf16.xpose.msk.msra.mxu1 %vm15549_vm2, %v14572_v16  ;;  %13681 = vmatprep.mubr.msk.f32.mxu0 %vm15189_vm1, %v18920_v1  ;;  %v876_v59 = vld [vmem:[%s15545_s21 + $0xf0] sm:$0xff]  ;;  %v877_v60 = vld [vmem:[%s15545_s21 + $0xf8] sm:$0xff]  ;;  %v730_v61 = vld [vmem:[%s15570_s22 + $0x60] sm:$0xff]  ;;  %v14616_v62 = vpack.c.bf16 %v875_v58, %v874_v57 }
  0x79   : > { %14575 = vmatprep.subr.bf16.mxu0 %v15188_v0  ;;  %13688 = vmatprep.mubr.msk.f32.mxu1 %vm15189_vm1, %v18920_v1  ;;  %v731_v63 = vld [vmem:[%s15570_s22 + $0x68] sm:$0xff]  ;;  %v14620_v3 = vpack.c.bf16 %v877_v60, %v876_v59  ;;  %v878_v4 = vld [vmem:[%s15545_s21 + $0x100] sm:$0xff]  ;;  %v880_v6 = vld [vmem:[%s15545_s21 + $0x110] sm:$0xff] }
  0x7a   : > { %14579 = vmatprep.subr.bf16.mxu1 %v15188_v0  ;;  %v879_v5 = vld [vmem:[%s15545_s21 + $0x108] sm:$0xff]  ;;  %v881_v7 = vld [vmem:[%s15545_s21 + $0x118] sm:$0xff]  ;;  %v732_v8 = vld [vmem:[%s15570_s22 + $0x70] sm:$0xff] }
  0x7b   : > { %v14624_v9 = vpack.c.bf16 %v879_v5, %v878_v4  ;;  %v733_v10 = vld [vmem:[%s15570_s22 + $0x78] sm:$0xff]  ;;  %v14628_v11 = vpack.c.bf16 %v881_v7, %v880_v6  ;;  %v882_v12 = vld [vmem:[%s15545_s21 + $0x120] sm:$0xff]  ;;  %v883_v13 = vld [vmem:[%s15545_s21 + $0x128] sm:$0xff] }
  0x7c   : > { %v884_v14 = vld [vmem:[%s15545_s21 + $0x130] sm:$0xff]  ;;  %v885_v15 = vld [vmem:[%s15545_s21 + $0x138] sm:$0xff]  ;;  %v734_v16 = vld [vmem:[%s15570_s22 + $0x80] sm:$0xff]  ;;  %v14632_v17 = vpack.c.bf16 %v883_v13, %v882_v12 }
  0x7d   : > { %v735_v18 = vld [vmem:[%s15570_s22 + $0x88] sm:$0xff]  ;;  %v14636_v19 = vpack.c.bf16 %v885_v15, %v884_v14  ;;  %v886_v20 = vld [vmem:[%s15545_s21 + $0x140] sm:$0xff]  ;;  %v737_v26 = vld [vmem:[%s15570_s22 + $0x98] sm:$0xff] }
  0x7e   : > { %13682 = vmatmul.mubr.msk.f32.vlgmr.msra.gmra.mrb[2].mxu0 %vm1102_vm0, %v720_v21  ;;  %v887_v21 = vld [vmem:[%s15545_s21 + $0x148] sm:$0xff]  ;;  %v890_v28 = vld [vmem:[%s15545_s21 + $0x160] sm:$0xff]  ;;  %v741_v42 = vld [vmem:[%s15570_s22 + $0xb8] sm:$0xff] }
  0x7f   : > { %14578 = vmatpush3.bf16.xpose.msk.msra.mxu0 %vm15549_vm2, %v14576_v22  ;;  %13689 = vmatmul.mubr.msk.f32.vlgmr.msra.gmra.mrb[2].mxu1 %vm1102_vm0, %v721_v23  ;;  %v888_v22 = vld [vmem:[%s15545_s21 + $0x150] sm:$0xff]  ;;  %v889_v23 = vld [vmem:[%s15545_s21 + $0x158] sm:$0xff]  ;;  %v14640_v25 = vpack.c.bf16 %v887_v21, %v886_v20  ;;  %v739_v34 = vld [vmem:[%s15570_s22 + $0xa8] sm:$0xff] }
  0x80   : > { %14582 = vmatpush3.bf16.xpose.msk.msra.mxu1 %vm15549_vm2, %v14580_v24  ;;  %13695 = vmatprep.mubr.msk.f32.mxu0 %vm15189_vm1, %v18920_v1  ;;  %v736_v24 = vld [vmem:[%s15570_s22 + $0x90] sm:$0xff]  ;;  %v14644_v27 = vpack.c.bf16 %v889_v23, %v888_v22  ;;  %v894_v36 = vld [vmem:[%s15545_s21 + $0x180] sm:$0xff]  ;;  %v743_v50 = vld [vmem:[%s15570_s22 + $0xc8] sm:$0xff] }
  0x81   : > { %14583 = vmatprep.subr.bf16.mxu0 %v15188_v0  ;;  %13702 = vmatprep.mubr.msk.f32.mxu1 %vm15189_vm1, %v18920_v1  ;;  %v898_v44 = vld [vmem:[%s15545_s21 + $0x1a0] sm:$0xff]  ;;  %v745_v58 = vld [vmem:[%s15570_s22 + $0xd8] sm:$0xff]  ;;  %v747_v5 = vld [vmem:[%s15570_s22 + $0xe8] sm:$0xff] }
  0x82   : > { %14587 = vmatprep.subr.bf16.mxu1 %v15188_v0  ;;  %v902_v52 = vld [vmem:[%s15545_s21 + $0x1c0] sm:$0xff]  ;;  %v749_v13 = vld [vmem:[%s15570_s22 + $0xf8] sm:$0xff]  ;;  %v751_v21 = vld [vmem:[%s15570_s22 + $0x108] sm:$0xff] }
  0x83   : > { %v906_v60 = vld [vmem:[%s15545_s21 + $0x1e0] sm:$0xff] }
  0x84   : > { %v910_v7 = vld [vmem:[%s15545_s21 + $0x200] sm:$0xff] }
  0x85   : > { %v914_v15 = vld [vmem:[%s15545_s21 + $0x220] sm:$0xff] }
  0x86   : > { %13696 = vmatmul.mubr.msk.f32.vlgmr.msra.gmra.mrb[4].mxu0 %vm1102_vm0, %v722_v29  ;;  %v891_v29 = vld [vmem:[%s15545_s21 + $0x168] sm:$0xff]  ;;  %v918_v23 = vld [vmem:[%s15545_s21 + $0x240] sm:$0xff] }
  0x87   : > { %14586 = vmatpush3.bf16.xpose.msk.msra.mxu0 %vm15549_vm2, %v14584_v30  ;;  %13703 = vmatmul.mubr.msk.f32.vlgmr.msra.gmra.mrb[4].mxu1 %vm1102_vm0, %v723_v31  ;;  %v892_v30 = vld [vmem:[%s15545_s21 + $0x170] sm:$0xff]  ;;  %v893_v31 = vld [vmem:[%s15545_s21 + $0x178] sm:$0xff]  ;;  %v14648_v33 = vpack.c.bf16 %v891_v29, %v890_v28 }
  0x88   : > { %14590 = vmatpush3.bf16.xpose.msk.msra.mxu1 %vm15549_vm2, %v14588_v32  ;;  %13709 = vmatprep.mubr.msk.f32.mxu0 %vm15189_vm1, %v18920_v1  ;;  %v738_v32 = vld [vmem:[%s15570_s22 + $0xa0] sm:$0xff]  ;;  %v14652_v35 = vpack.c.bf16 %v893_v31, %v892_v30  ;;  %v753_v29 = vld [vmem:[%s15570_s22 + $0x118] sm:$0xff] }
  0x89   : > { %14591 = vmatprep.subr.bf16.mxu0 %v15188_v0  ;;  %13716 = vmatprep.mubr.msk.f32.mxu1 %vm15189_vm1, %v18920_v1  ;;  %v922_v31 = vld [vmem:[%s15545_s21 + $0x260] sm:$0xff] }
  0x8a   : > { %14595 = vmatprep.subr.bf16.mxu1 %v15188_v0 }
  0x8e   : > { %13710 = vmatmul.mubr.msk.f32.vlgmr.msra.gmra.mrb[6].mxu0 %vm1102_vm0, %v724_v37  ;;  %v895_v37 = vld [vmem:[%s15545_s21 + $0x188] sm:$0xff] }
  0x8f   : > { %14594 = vmatpush3.bf16.xpose.msk.msra.mxu0 %vm15549_vm2, %v14592_v38  ;;  %13717 = vmatmul.mubr.msk.f32.vlgmr.msra.gmra.mrb[6].mxu1 %vm1102_vm0, %v725_v39  ;;  %v896_v38 = vld [vmem:[%s15545_s21 + $0x190] sm:$0xff]  ;;  %v897_v39 = vld [vmem:[%s15545_s21 + $0x198] sm:$0xff]  ;;  %v14656_v41 = vpack.c.bf16 %v895_v37, %v894_v36  ;;  %v755_v37 = vld [vmem:[%s15570_s22 + $0x128] sm:$0xff] }
  0x90   : > { %14598 = vmatpush3.bf16.xpose.msk.msra.mxu1 %vm15549_vm2, %v14596_v40  ;;  %13723 = vmatprep.mubr.msk.f32.mxu0 %vm15189_vm1, %v18920_v1  ;;  %v740_v40 = vld [vmem:[%s15570_s22 + $0xb0] sm:$0xff]  ;;  %v14660_v43 = vpack.c.bf16 %v897_v39, %v896_v38  ;;  %v926_v39 = vld [vmem:[%s15545_s21 + $0x280] sm:$0xff] }
  0x91   : > { %14599 = vmatprep.subr.bf16.mxu0 %v15188_v0  ;;  %13730 = vmatprep.mubr.msk.f32.mxu1 %vm15189_vm1, %v18920_v1 }
  0x92   : > { %14603 = vmatprep.subr.bf16.mxu1 %v15188_v0 }
  0x96   : > { %13724 = vmatmul.mubr.msk.f32.vlgmr.msra.gmra.mrb[8].mxu0 %vm1102_vm0, %v726_v45  ;;  %v899_v45 = vld [vmem:[%s15545_s21 + $0x1a8] sm:$0xff] }
  0x97   : > { %14602 = vmatpush3.bf16.xpose.msk.msra.mxu0 %vm15549_vm2, %v14600_v46  ;;  %13731 = vmatmul.mubr.msk.f32.vlgmr.msra.gmra.mrb[8].mxu1 %vm1102_vm0, %v727_v47  ;;  %v900_v46 = vld [vmem:[%s15545_s21 + $0x1b0] sm:$0xff]  ;;  %v901_v47 = vld [vmem:[%s15545_s21 + $0x1b8] sm:$0xff]  ;;  %v14664_v49 = vpack.c.bf16 %v899_v45, %v898_v44 }
  0x98   : > { %14606 = vmatpush3.bf16.xpose.msk.msra.mxu1 %vm15549_vm2, %v14604_v48  ;;  %13737 = vmatprep.mubr.msk.f32.mxu0 %vm15189_vm1, %v18920_v1  ;;  %v742_v48 = vld [vmem:[%s15570_s22 + $0xc0] sm:$0xff]  ;;  %v14668_v51 = vpack.c.bf16 %v901_v47, %v900_v46  ;;  %v757_v45 = vld [vmem:[%s15570_s22 + $0x138] sm:$0xff] }
  0x99   : > { %14607 = vmatprep.subr.bf16.mxu0 %v15188_v0  ;;  %13744 = vmatprep.mubr.msk.f32.mxu1 %vm15189_vm1, %v18920_v1  ;;  %v930_v47 = vld [vmem:[%s15545_s21 + $0x2a0] sm:$0xff] }
  0x9a   : > { %14611 = vmatprep.subr.bf16.mxu1 %v15188_v0 }
  0x9e   : > { %13738 = vmatmul.mubr.msk.f32.vlgmr.msra.gmra.mrb[10].mxu0 %vm1102_vm0, %v728_v53  ;;  %v903_v53 = vld [vmem:[%s15545_s21 + $0x1c8] sm:$0xff] }
  0x9f   : > { %14610 = vmatpush3.bf16.xpose.msk.msra.mxu0 %vm15549_vm2, %v14608_v54  ;;  %13745 = vmatmul.mubr.msk.f32.vlgmr.msra.gmra.mrb[10].mxu1 %vm1102_vm0, %v729_v55  ;;  %v904_v54 = vld [vmem:[%s15545_s21 + $0x1d0] sm:$0xff]  ;;  %v905_v55 = vld [vmem:[%s15545_s21 + $0x1d8] sm:$0xff]  ;;  %v14672_v57 = vpack.c.bf16 %v903_v53, %v902_v52  ;;  %v759_v53 = vld [vmem:[%s15570_s22 + $0x148] sm:$0xff] }
  0xa0   : > { %14614 = vmatpush3.bf16.xpose.msk.msra.mxu1 %vm15549_vm2, %v14612_v56  ;;  %13751 = vmatprep.mubr.msk.f32.mxu0 %vm15189_vm1, %v18920_v1  ;;  %v744_v56 = vld [vmem:[%s15570_s22 + $0xd0] sm:$0xff]  ;;  %v14676_v59 = vpack.c.bf16 %v905_v55, %v904_v54  ;;  %v934_v55 = vld [vmem:[%s15545_s21 + $0x2c0] sm:$0xff] }
  0xa1   : > { %14615 = vmatprep.subr.bf16.mxu0 %v15188_v0  ;;  %13758 = vmatprep.mubr.msk.f32.mxu1 %vm15189_vm1, %v18920_v1 }
  0xa2   : > { %14619 = vmatprep.subr.bf16.mxu1 %v15188_v0 }
  0xa6   : > { %13752 = vmatmul.mubr.msk.f32.vlgmr.msra.gmra.mrb[12].mxu0 %vm1102_vm0, %v730_v61  ;;  %v907_v61 = vld [vmem:[%s15545_s21 + $0x1e8] sm:$0xff] }
  0xa7   : > { %14618 = vmatpush3.bf16.xpose.msk.msra.mxu0 %vm15549_vm2, %v14616_v62  ;;  %13759 = vmatmul.mubr.msk.f32.vlgmr.msra.gmra.mrb[12].mxu1 %vm1102_vm0, %v731_v63  ;;  %v908_v62 = vld [vmem:[%s15545_s21 + $0x1f0] sm:$0xff]  ;;  %v909_v63 = vld [vmem:[%s15545_s21 + $0x1f8] sm:$0xff]  ;;  %v14680_v4 = vpack.c.bf16 %v907_v61, %v906_v60 }
  0xa8   : > { %14622 = vmatpush3.bf16.xpose.msk.msra.mxu1 %vm15549_vm2, %v14620_v3  ;;  %13765 = vmatprep.mubr.msk.f32.mxu0 %vm15189_vm1, %v18920_v1  ;;  %v746_v3 = vld [vmem:[%s15570_s22 + $0xe0] sm:$0xff]  ;;  %v14684_v6 = vpack.c.bf16 %v909_v63, %v908_v62  ;;  %v761_v61 = vld [vmem:[%s15570_s22 + $0x158] sm:$0xff] }
  0xa9   : > { %14623 = vmatprep.subr.bf16.mxu0 %v15188_v0  ;;  %13772 = vmatprep.mubr.msk.f32.mxu1 %vm15189_vm1, %v18920_v1  ;;  %v938_v63 = vld [vmem:[%s15545_s21 + $0x2e0] sm:$0xff] }
  0xaa   : > { %14627 = vmatprep.subr.bf16.mxu1 %v15188_v0 }
  0xae   : > { %13766 = vmatmul.mubr.msk.f32.vlgmr.msra.gmra.mrb[14].mxu0 %vm1102_vm0, %v732_v8  ;;  %v911_v8 = vld [vmem:[%s15545_s21 + $0x208] sm:$0xff] }
  0xaf   : > { %14626 = vmatpush3.bf16.xpose.msk.msra.mxu0 %vm15549_vm2, %v14624_v9  ;;  %13773 = vmatmul.mubr.msk.f32.vlgmr.msra.gmra.mrb[14].mxu1 %vm1102_vm0, %v733_v10  ;;  %v912_v9 = vld [vmem:[%s15545_s21 + $0x210] sm:$0xff]  ;;  %v913_v10 = vld [vmem:[%s15545_s21 + $0x218] sm:$0xff]  ;;  %v14688_v12 = vpack.c.bf16 %v911_v8, %v910_v7  ;;  %v763_v8 = vld [vmem:[%s15570_s22 + $0x168] sm:$0xff] }
  0xb0   : > { %14630 = vmatpush3.bf16.xpose.msk.msra.mxu1 %vm15549_vm2, %v14628_v11  ;;  %13779 = vmatprep.mubr.msk.f32.mxu0 %vm15189_vm1, %v18920_v1  ;;  %v748_v11 = vld [vmem:[%s15570_s22 + $0xf0] sm:$0xff]  ;;  %v14692_v14 = vpack.c.bf16 %v913_v10, %v912_v9  ;;  %v942_v10 = vld [vmem:[%s15545_s21 + $0x300] sm:$0xff] }
  0xb1   : > { %14631 = vmatprep.subr.bf16.mxu0 %v15188_v0  ;;  %13786 = vmatprep.mubr.msk.f32.mxu1 %vm15189_vm1, %v18920_v1 }
  0xb2   : > { %14635 = vmatprep.subr.bf16.mxu1 %v15188_v0 }
  0xb6   : > { %13780 = vmatmul.mubr.msk.f32.vlgmr.msra.gmra.mrb[16].mxu0 %vm1102_vm0, %v734_v16  ;;  %v915_v16 = vld [vmem:[%s15545_s21 + $0x228] sm:$0xff] }
  0xb7   : > { %14634 = vmatpush3.bf16.xpose.msk.msra.mxu0 %vm15549_vm2, %v14632_v17  ;;  %13787 = vmatmul.mubr.msk.f32.vlgmr.msra.gmra.mrb[16].mxu1 %vm1102_vm0, %v735_v18  ;;  %v916_v17 = vld [vmem:[%s15545_s21 + $0x230] sm:$0xff]  ;;  %v917_v18 = vld [vmem:[%s15545_s21 + $0x238] sm:$0xff]  ;;  %v14696_v20 = vpack.c.bf16 %v915_v16, %v914_v15 }
  0xb8   : > { %14638 = vmatpush3.bf16.xpose.msk.msra.mxu1 %vm15549_vm2, %v14636_v19  ;;  %13793 = vmatprep.mubr.msk.f32.mxu0 %vm15189_vm1, %v18920_v1  ;;  %v750_v19 = vld [vmem:[%s15570_s22 + $0x100] sm:$0xff]  ;;  %v14700_v22 = vpack.c.bf16 %v917_v18, %v916_v17  ;;  %v765_v16 = vld [vmem:[%s15570_s22 + $0x178] sm:$0xff] }
  0xb9   : > { %14639 = vmatprep.subr.bf16.mxu0 %v15188_v0  ;;  %13800 = vmatprep.mubr.msk.f32.mxu1 %vm15189_vm1, %v18920_v1  ;;  %v946_v18 = vld [vmem:[%s15545_s21 + $0x320] sm:$0xff] }
  0xba   : > { %14643 = vmatprep.subr.bf16.mxu1 %v15188_v0 }
  0xbe   : > { %13794 = vmatmul.mubr.msk.f32.vlgmr.msra.gmra.mrb[18].mxu0 %vm1102_vm0, %v736_v24  ;;  %v919_v24 = vld [vmem:[%s15545_s21 + $0x248] sm:$0xff] }
  0xbf   : > { %14642 = vmatpush3.bf16.xpose.msk.msra.mxu0 %vm15549_vm2, %v14640_v25  ;;  %13801 = vmatmul.mubr.msk.f32.vlgmr.msra.gmra.mrb[18].mxu1 %vm1102_vm0, %v737_v26  ;;  %v920_v25 = vld [vmem:[%s15545_s21 + $0x250] sm:$0xff]  ;;  %v921_v26 = vld [vmem:[%s15545_s21 + $0x258] sm:$0xff]  ;;  %v14704_v28 = vpack.c.bf16 %v919_v24, %v918_v23  ;;  %v767_v24 = vld [vmem:[%s15570_s22 + $0x188] sm:$0xff] }
  0xc0   : > { %14646 = vmatpush3.bf16.xpose.msk.msra.mxu1 %vm15549_vm2, %v14644_v27  ;;  %13807 = vmatprep.mubr.msk.f32.mxu0 %vm15189_vm1, %v18920_v1  ;;  %v752_v27 = vld [vmem:[%s15570_s22 + $0x110] sm:$0xff]  ;;  %v14708_v30 = vpack.c.bf16 %v921_v26, %v920_v25  ;;  %v950_v26 = vld [vmem:[%s15545_s21 + $0x340] sm:$0xff] }
  0xc1   : > { %14647 = vmatprep.subr.bf16.mxu0 %v15188_v0  ;;  %13814 = vmatprep.mubr.msk.f32.mxu1 %vm15189_vm1, %v18920_v1 }
  0xc2   : > { %14651 = vmatprep.subr.bf16.mxu1 %v15188_v0 }
  0xc6   : > { %13808 = vmatmul.mubr.msk.f32.vlgmr.msra.gmra.mrb[20].mxu0 %vm1102_vm0, %v738_v32  ;;  %v923_v32 = vld [vmem:[%s15545_s21 + $0x268] sm:$0xff] }
  0xc7   : > { %14650 = vmatpush3.bf16.xpose.msk.msra.mxu0 %vm15549_vm2, %v14648_v33  ;;  %13815 = vmatmul.mubr.msk.f32.vlgmr.msra.gmra.mrb[20].mxu1 %vm1102_vm0, %v739_v34  ;;  %v924_v33 = vld [vmem:[%s15545_s21 + $0x270] sm:$0xff]  ;;  %v925_v34 = vld [vmem:[%s15545_s21 + $0x278] sm:$0xff]  ;;  %v14712_v36 = vpack.c.bf16 %v923_v32, %v922_v31 }
  0xc8   : > { %14654 = vmatpush3.bf16.xpose.msk.msra.mxu1 %vm15549_vm2, %v14652_v35  ;;  %13821 = vmatprep.mubr.msk.f32.mxu0 %vm15189_vm1, %v18920_v1  ;;  %v754_v35 = vld [vmem:[%s15570_s22 + $0x120] sm:$0xff]  ;;  %v14716_v38 = vpack.c.bf16 %v925_v34, %v924_v33  ;;  %v769_v32 = vld [vmem:[%s15570_s22 + $0x198] sm:$0xff] }
  0xc9   : > { %14655 = vmatprep.subr.bf16.mxu0 %v15188_v0  ;;  %13828 = vmatprep.mubr.msk.f32.mxu1 %vm15189_vm1, %v18920_v1  ;;  %v954_v34 = vld [vmem:[%s15545_s21 + $0x360] sm:$0xff] }
  0xca   : > { %14659 = vmatprep.subr.bf16.mxu1 %v15188_v0 }
  0xce   : > { %13822 = vmatmul.mubr.msk.f32.vlgmr.msra.gmra.mrb[22].mxu0 %vm1102_vm0, %v740_v40  ;;  %v927_v40 = vld [vmem:[%s15545_s21 + $0x288] sm:$0xff] }
  0xcf   : > { %14658 = vmatpush3.bf16.xpose.msk.msra.mxu0 %vm15549_vm2, %v14656_v41  ;;  %13829 = vmatmul.mubr.msk.f32.vlgmr.msra.gmra.mrb[22].mxu1 %vm1102_vm0, %v741_v42  ;;  %v928_v41 = vld [vmem:[%s15545_s21 + $0x290] sm:$0xff]  ;;  %v929_v42 = vld [vmem:[%s15545_s21 + $0x298] sm:$0xff]  ;;  %v14720_v44 = vpack.c.bf16 %v927_v40, %v926_v39  ;;  %v771_v40 = vld [vmem:[%s15570_s22 + $0x1a8] sm:$0xff] }
  0xd0   : > { %14662 = vmatpush3.bf16.xpose.msk.msra.mxu1 %vm15549_vm2, %v14660_v43  ;;  %13835 = vmatprep.mubr.msk.f32.mxu0 %vm15189_vm1, %v18920_v1  ;;  %v756_v43 = vld [vmem:[%s15570_s22 + $0x130] sm:$0xff]  ;;  %v14724_v46 = vpack.c.bf16 %v929_v42, %v928_v41  ;;  %v958_v42 = vld [vmem:[%s15545_s21 + $0x380] sm:$0xff] }
  0xd1   : > { %14663 = vmatprep.subr.bf16.mxu0 %v15188_v0  ;;  %13842 = vmatprep.mubr.msk.f32.mxu1 %vm15189_vm1, %v18920_v1 }
  0xd2   : > { %14667 = vmatprep.subr.bf16.mxu1 %v15188_v0 }
  0xd6   : > { %13836 = vmatmul.mubr.msk.f32.vlgmr.msra.gmra.mrb[24].mxu0 %vm1102_vm0, %v742_v48  ;;  %v931_v48 = vld [vmem:[%s15545_s21 + $0x2a8] sm:$0xff] }
  0xd7   : > { %14666 = vmatpush3.bf16.xpose.msk.msra.mxu0 %vm15549_vm2, %v14664_v49  ;;  %13843 = vmatmul.mubr.msk.f32.vlgmr.msra.gmra.mrb[24].mxu1 %vm1102_vm0, %v743_v50  ;;  %v932_v49 = vld [vmem:[%s15545_s21 + $0x2b0] sm:$0xff]  ;;  %v933_v50 = vld [vmem:[%s15545_s21 + $0x2b8] sm:$0xff]  ;;  %v14728_v52 = vpack.c.bf16 %v931_v48, %v930_v47 }
  0xd8   : > { %14670 = vmatpush3.bf16.xpose.msk.msra.mxu1 %vm15549_vm2, %v14668_v51  ;;  %13849 = vmatprep.mubr.msk.f32.mxu0 %vm15189_vm1, %v18920_v1  ;;  %v758_v51 = vld [vmem:[%s15570_s22 + $0x140] sm:$0xff]  ;;  %v14732_v54 = vpack.c.bf16 %v933_v50, %v932_v49 }
  0xd9   : > { %14671 = vmatprep.subr.bf16.mxu0 %v15188_v0  ;;  %13856 = vmatprep.mubr.msk.f32.mxu1 %vm15189_vm1, %v18920_v1 }
  0xda   : > { %14675 = vmatprep.subr.bf16.mxu1 %v15188_v0 }
  0xde   : > { %13850 = vmatmul.mubr.msk.f32.vlgmr.msra.gmra.mrb[26].mxu0 %vm1102_vm0, %v744_v56  ;;  %v935_v56 = vld [vmem:[%s15545_s21 + $0x2c8] sm:$0xff] }
  0xdf   : > { %14674 = vmatpush3.bf16.xpose.msk.msra.mxu0 %vm15549_vm2, %v14672_v57  ;;  %13857 = vmatmul.mubr.msk.f32.vlgmr.msra.gmra.mrb[26].mxu1 %vm1102_vm0, %v745_v58  ;;  %v936_v57 = vld [vmem:[%s15545_s21 + $0x2d0] sm:$0xff]  ;;  %v937_v58 = vld [vmem:[%s15545_s21 + $0x2d8] sm:$0xff]  ;;  %v14736_v60 = vpack.c.bf16 %v935_v56, %v934_v55 }
  0xe0   : > { %14678 = vmatpush3.bf16.xpose.msk.msra.mxu1 %vm15549_vm2, %v14676_v59  ;;  %13863 = vmatprep.mubr.msk.f32.mxu0 %vm15189_vm1, %v18920_v1  ;;  %v760_v59 = vld [vmem:[%s15570_s22 + $0x150] sm:$0xff]  ;;  %v14740_v62 = vpack.c.bf16 %v937_v58, %v936_v57  ;;  %v773_v55 = vld [vmem:[%s15570_s22 + $0x1b8] sm:$0xff]  ;;  %v962_v57 = vld [vmem:[%s15545_s21 + $0x3a0] sm:$0xff] }
  0xe1   : > { %14679 = vmatprep.subr.bf16.mxu0 %v15188_v0  ;;  %13870 = vmatprep.mubr.msk.f32.mxu1 %vm15189_vm1, %v18920_v1  ;;  %v963_v58 = vld [vmem:[%s15545_s21 + $0x3a8] sm:$0xff] }
  0xe2   : > { %14683 = vmatprep.subr.bf16.mxu1 %v15188_v0 }
  0xe6   : > { %13864 = vmatmul.mubr.msk.f32.vlgmr.msra.gmra.mrb[28].mxu0 %vm1102_vm0, %v746_v3  ;;  %v939_v3 = vld [vmem:[%s15545_s21 + $0x2e8] sm:$0xff] }
  0xe7   : > { %14682 = vmatpush3.bf16.xpose.msk.msra.mxu0 %vm15549_vm2, %v14680_v4  ;;  %13871 = vmatmul.mubr.msk.f32.vlgmr.msra.gmra.mrb[28].mxu1 %vm1102_vm0, %v747_v5  ;;  %v940_v4 = vld [vmem:[%s15545_s21 + $0x2f0] sm:$0xff]  ;;  %v941_v5 = vld [vmem:[%s15545_s21 + $0x2f8] sm:$0xff]  ;;  %v14744_v7 = vpack.c.bf16 %v939_v3, %v938_v63 }
  0xe8   : > { %14686 = vmatpush3.bf16.xpose.msk.msra.mxu1 %vm15549_vm2, %v14684_v6  ;;  %13877 = vmatprep.mubr.msk.f32.mxu0 %vm15189_vm1, %v18920_v1  ;;  %v762_v6 = vld [vmem:[%s15570_s22 + $0x160] sm:$0xff]  ;;  %v14748_v9 = vpack.c.bf16 %v941_v5, %v940_v4 }
  0xe9   : > { %14687 = vmatprep.subr.bf16.mxu0 %v15188_v0  ;;  %13884 = vmatprep.mubr.msk.f32.mxu1 %vm15189_vm1, %v18920_v1 }
  0xea   : > { %14691 = vmatprep.subr.bf16.mxu1 %v15188_v0 }
  0xee   : > { %13878 = vmatmul.mubr.msk.f32.vlgmr.msra.gmra.mrb[30].mxu0 %vm1102_vm0, %v748_v11  ;;  %v943_v11 = vld [vmem:[%s15545_s21 + $0x308] sm:$0xff] }
  0xef   : > { %14690 = vmatpush3.bf16.xpose.msk.msra.mxu0 %vm15549_vm2, %v14688_v12  ;;  %13885 = vmatmul.mubr.msk.f32.vlgmr.msra.gmra.mrb[30].mxu1 %vm1102_vm0, %v749_v13  ;;  %v944_v12 = vld [vmem:[%s15545_s21 + $0x310] sm:$0xff]  ;;  %v945_v13 = vld [vmem:[%s15545_s21 + $0x318] sm:$0xff]  ;;  %v14752_v15 = vpack.c.bf16 %v943_v11, %v942_v10 }
  0xf0   : > { %14694 = vmatpush3.bf16.xpose.msk.msra.mxu1 %vm15549_vm2, %v14692_v14  ;;  %13891 = vmatprep.mubr.msk.f32.mxu0 %vm15189_vm1, %v18920_v1  ;;  %v764_v14 = vld [vmem:[%s15570_s22 + $0x170] sm:$0xff]  ;;  %v14756_v17 = vpack.c.bf16 %v945_v13, %v944_v12  ;;  %v966_v12 = vld [vmem:[%s15545_s21 + $0x3c0] sm:$0xff]  ;;  %v967_v13 = vld [vmem:[%s15545_s21 + $0x3c8] sm:$0xff] }
  0xf1   : > { %14695 = vmatprep.subr.bf16.mxu0 %v15188_v0  ;;  %13898 = vmatprep.mubr.msk.f32.mxu1 %vm15189_vm1, %v18920_v1 }
  0xf2   : > { %14699 = vmatprep.subr.bf16.mxu1 %v15188_v0 }
  0xf6   : > { %13892 = vmatmul.mubr.msk.f32.vlgmr.msra.gmra.mrb[32].mxu0 %vm1102_vm0, %v750_v19  ;;  %v947_v19 = vld [vmem:[%s15545_s21 + $0x328] sm:$0xff] }
  0xf7   : > { %14698 = vmatpush3.bf16.xpose.msk.msra.mxu0 %vm15549_vm2, %v14696_v20  ;;  %13899 = vmatmul.mubr.msk.f32.vlgmr.msra.gmra.mrb[32].mxu1 %vm1102_vm0, %v751_v21  ;;  %v948_v20 = vld [vmem:[%s15545_s21 + $0x330] sm:$0xff]  ;;  %v949_v21 = vld [vmem:[%s15545_s21 + $0x338] sm:$0xff]  ;;  %v14760_v23 = vpack.c.bf16 %v947_v19, %v946_v18 }
  0xf8   : > { %14702 = vmatpush3.bf16.xpose.msk.msra.mxu1 %vm15549_vm2, %v14700_v22  ;;  %13905 = vmatprep.mubr.msk.f32.mxu0 %vm15189_vm1, %v18920_v1  ;;  %v766_v22 = vld [vmem:[%s15570_s22 + $0x180] sm:$0xff]  ;;  %v14764_v25 = vpack.c.bf16 %v949_v21, %v948_v20 }
  0xf9   : > { %14703 = vmatprep.subr.bf16.mxu0 %v15188_v0  ;;  %13912 = vmatprep.mubr.msk.f32.mxu1 %vm15189_vm1, %v18920_v1 }
  0xfa   : > { %14707 = vmatprep.subr.bf16.mxu1 %v15188_v0 }
  0xfe   : > { %13906 = vmatmul.mubr.msk.f32.vlgmr.msra.gmra.mrb[34].mxu0 %vm1102_vm0, %v752_v27  ;;  %v951_v27 = vld [vmem:[%s15545_s21 + $0x348] sm:$0xff] }
  0xff   : > { %14706 = vmatpush3.bf16.xpose.msk.msra.mxu0 %vm15549_vm2, %v14704_v28  ;;  %13913 = vmatmul.mubr.msk.f32.vlgmr.msra.gmra.mrb[34].mxu1 %vm1102_vm0, %v753_v29  ;;  %v952_v28 = vld [vmem:[%s15545_s21 + $0x350] sm:$0xff]  ;;  %v953_v29 = vld [vmem:[%s15545_s21 + $0x358] sm:$0xff]  ;;  %v14768_v31 = vpack.c.bf16 %v951_v27, %v950_v26 }
 0x100   : > { %14710 = vmatpush3.bf16.xpose.msk.msra.mxu1 %vm15549_vm2, %v14708_v30  ;;  %13919 = vmatprep.mubr.msk.f32.mxu0 %vm15189_vm1, %v18920_v1  ;;  %v768_v30 = vld [vmem:[%s15570_s22 + $0x190] sm:$0xff]  ;;  %v14772_v33 = vpack.c.bf16 %v953_v29, %v952_v28  ;;  %v970_v28 = vld [vmem:[%s15545_s21 + $0x3e0] sm:$0xff]  ;;  %v971_v29 = vld [vmem:[%s15545_s21 + $0x3e8] sm:$0xff] }
 0x101   : > { %14711 = vmatprep.subr.bf16.mxu0 %v15188_v0  ;;  %13926 = vmatprep.mubr.msk.f32.mxu1 %vm15189_vm1, %v18920_v1 }
 0x102   : > { %14715 = vmatprep.subr.bf16.mxu1 %v15188_v0 }
 0x106   : > { %13920 = vmatmul.mubr.msk.f32.vlgmr.msra.gmra.mrb[36].mxu0 %vm1102_vm0, %v754_v35  ;;  %v955_v35 = vld [vmem:[%s15545_s21 + $0x368] sm:$0xff] }
 0x107   : > { %14714 = vmatpush3.bf16.xpose.msk.msra.mxu0 %vm15549_vm2, %v14712_v36  ;;  %13927 = vmatmul.mubr.msk.f32.vlgmr.msra.gmra.mrb[36].mxu1 %vm1102_vm0, %v755_v37  ;;  %v956_v36 = vld [vmem:[%s15545_s21 + $0x370] sm:$0xff]  ;;  %v957_v37 = vld [vmem:[%s15545_s21 + $0x378] sm:$0xff]  ;;  %v14776_v39 = vpack.c.bf16 %v955_v35, %v954_v34 }
 0x108   : > { %14718 = vmatpush3.bf16.xpose.msk.msra.mxu1 %vm15549_vm2, %v14716_v38  ;;  %13933 = vmatprep.mubr.msk.f32.mxu0 %vm15189_vm1, %v18920_v1  ;;  %v770_v38 = vld [vmem:[%s15570_s22 + $0x1a0] sm:$0xff]  ;;  %v14780_v41 = vpack.c.bf16 %v957_v37, %v956_v36 }
 0x109   : > { %14719 = vmatprep.subr.bf16.mxu0 %v15188_v0  ;;  %13940 = vmatprep.mubr.msk.f32.mxu1 %vm15189_vm1, %v18920_v1 }
 0x10a   : > { %14723 = vmatprep.subr.bf16.mxu1 %v15188_v0 }
 0x10e   : > { %13934 = vmatmul.mubr.msk.f32.vlgmr.msra.gmra.mrb[38].mxu0 %vm1102_vm0, %v756_v43  ;;  %v959_v43 = vld [vmem:[%s15545_s21 + $0x388] sm:$0xff] }
 0x10f   : > { %14722 = vmatpush3.bf16.xpose.msk.msra.mxu0 %vm15549_vm2, %v14720_v44  ;;  %13941 = vmatmul.mubr.msk.f32.vlgmr.msra.gmra.mrb[38].mxu1 %vm1102_vm0, %v757_v45  ;;  %v960_v45 = vld [vmem:[%s15545_s21 + $0x390] sm:$0xff] }
 0x110   : > { %14726 = vmatpush3.bf16.xpose.msk.msra.mxu1 %vm15549_vm2, %v14724_v46  ;;  %13947 = vmatprep.mubr.msk.f32.mxu0 %vm15189_vm1, %v18920_v1  ;;  %v961_v46 = vld [vmem:[%s15545_s21 + $0x398] sm:$0xff] }
 0x111   : > { %14727 = vmatprep.subr.bf16.mxu0 %v15188_v0  ;;  %13954 = vmatprep.mubr.msk.f32.mxu1 %vm15189_vm1, %v18920_v1  ;;  %v14788_v56 = vpack.c.bf16 %v961_v46, %v960_v45  ;;  %v974_v45 = vld [vmem:[%s15545_s21 + $0x400] sm:$0xff]  ;;  %v975_v46 = vld [vmem:[%s15545_s21 + $0x408] sm:$0xff] }
 0x112   : > { %14731 = vmatprep.subr.bf16.mxu1 %v15188_v0 }
 0x116   : > { %13948 = vmatmul.mubr.msk.f32.vlgmr.msra.gmra.mrb[40].mxu0 %vm1102_vm0, %v758_v51 }
 0x117   : > { %14730 = vmatpush3.bf16.xpose.msk.msra.mxu0 %vm15549_vm2, %v14728_v52  ;;  %13955 = vmatmul.mubr.msk.f32.vlgmr.msra.gmra.mrb[40].mxu1 %vm1102_vm0, %v759_v53  ;;  %v772_v52 = vld [vmem:[%s15570_s22 + $0x1b0] sm:$0xff]  ;;  %v14784_v53 = vpack.c.bf16 %v959_v43, %v958_v42 }
 0x118   : > { %14734 = vmatpush3.bf16.xpose.msk.msra.mxu1 %vm15549_vm2, %v14732_v54  ;;  %13961 = vmatprep.mubr.msk.f32.mxu0 %vm15189_vm1, %v18920_v1 }
 0x119   : > { %14735 = vmatprep.subr.bf16.mxu0 %v15188_v0  ;;  %13968 = vmatprep.mubr.msk.f32.mxu1 %vm15189_vm1, %v18920_v1 }
 0x11a   : > { %14739 = vmatprep.subr.bf16.mxu1 %v15188_v0 }
 0x11e   : > { %13962 = vmatmul.mubr.msk.f32.vlgmr.msra.gmra.mrb[42].mxu0 %vm1102_vm0, %v760_v59 }
 0x11f   : > { %14738 = vmatpush3.bf16.xpose.msk.msra.mxu0 %vm15549_vm2, %v14736_v60  ;;  %13969 = vmatmul.mubr.msk.f32.vlgmr.msra.gmra.mrb[42].mxu1 %vm1102_vm0, %v761_v61  ;;  %v964_v60 = vld [vmem:[%s15545_s21 + $0x3b0] sm:$0xff]  ;;  %v965_v61 = vld [vmem:[%s15545_s21 + $0x3b8] sm:$0xff] }
 0x120   : > { %14742 = vmatpush3.bf16.xpose.msk.msra.mxu1 %vm15549_vm2, %v14740_v62  ;;  %13975 = vmatprep.mubr.msk.f32.mxu0 %vm15189_vm1, %v18920_v1  ;;  %v14796_v10 = vpack.c.bf16 %v965_v61, %v964_v60  ;;  %v781_v60 = vld [vmem:[%s15570_s22 + $0x1f8] sm:$0xff] }
 0x121   : > { %14743 = vmatprep.subr.bf16.mxu0 %v15188_v0  ;;  %13982 = vmatprep.mubr.msk.f32.mxu1 %vm15189_vm1, %v18920_v1 }
 0x122   : > { %14747 = vmatprep.subr.bf16.mxu1 %v15188_v0 }
 0x126   : > { %13976 = vmatmul.mubr.msk.f32.vlgmr.msra.gmra.mrb[44].mxu0 %vm1102_vm0, %v762_v6 }
 0x127   : > { %14746 = vmatpush3.bf16.xpose.msk.msra.mxu0 %vm15549_vm2, %v14744_v7  ;;  %13983 = vmatmul.mubr.msk.f32.vlgmr.msra.gmra.mrb[44].mxu1 %vm1102_vm0, %v763_v8  ;;  %v774_v7 = vld [vmem:[%s15570_s22 + $0x1c0] sm:$0xff]  ;;  %v14792_v8 = vpack.c.bf16 %v963_v58, %v962_v57  ;;  %v780_v57 = vld [vmem:[%s15570_s22 + $0x1f0] sm:$0xff]  ;;  %v14816_v58 = vpack.c.bf16 %v975_v46, %v974_v45 }
 0x128   : > { %14750 = vmatpush3.bf16.xpose.msk.msra.mxu1 %vm15549_vm2, %v14748_v9  ;;  %13989 = vmatprep.mubr.msk.f32.mxu0 %vm15189_vm1, %v18920_v1  ;;  %v775_v9 = vld [vmem:[%s15570_s22 + $0x1c8] sm:$0xff] }
 0x129   : > { %14751 = vmatprep.subr.bf16.mxu0 %v15188_v0  ;;  %13996 = vmatprep.mubr.msk.f32.mxu1 %vm15189_vm1, %v18920_v1 }
 0x12a   : > { %14755 = vmatprep.subr.bf16.mxu1 %v15188_v0 }
 0x12e   : > { %13990 = vmatmul.mubr.msk.f32.vlgmr.msra.gmra.mrb[46].mxu0 %vm1102_vm0, %v764_v14 }
 0x12f   : > { %14754 = vmatpush3.bf16.xpose.msk.msra.mxu0 %vm15549_vm2, %v14752_v15  ;;  %13997 = vmatmul.mubr.msk.f32.vlgmr.msra.gmra.mrb[46].mxu1 %vm1102_vm0, %v765_v16  ;;  %v968_v15 = vld [vmem:[%s15545_s21 + $0x3d0] sm:$0xff]  ;;  %v969_v16 = vld [vmem:[%s15545_s21 + $0x3d8] sm:$0xff] }
 0x130   : > { %14758 = vmatpush3.bf16.xpose.msk.msra.mxu1 %vm15549_vm2, %v14756_v17  ;;  %14003 = vmatprep.mubr.msk.f32.mxu0 %vm15189_vm1, %v18920_v1  ;;  %v14804_v26 = vpack.c.bf16 %v969_v16, %v968_v15  ;;  %v782_v15 = vld [vmem:[%s15570_s22 + $0x200] sm:$0xff] }
 0x131   : > { %14759 = vmatprep.subr.bf16.mxu0 %v15188_v0  ;;  %14010 = vmatprep.mubr.msk.f32.mxu1 %vm15189_vm1, %v18920_v1 }
 0x132   : > { %14763 = vmatprep.subr.bf16.mxu1 %v15188_v0 }
 0x136   : > { %14004 = vmatmul.mubr.msk.f32.vlgmr.msra.gmra.mrb[48].mxu0 %vm1102_vm0, %v766_v22 }
 0x137   : > { %14762 = vmatpush3.bf16.xpose.msk.msra.mxu0 %vm15549_vm2, %v14760_v23  ;;  %14011 = vmatmul.mubr.msk.f32.vlgmr.msra.gmra.mrb[48].mxu1 %vm1102_vm0, %v767_v24  ;;  %v776_v23 = vld [vmem:[%s15570_s22 + $0x1d0] sm:$0xff]  ;;  %v14800_v24 = vpack.c.bf16 %v967_v13, %v966_v12 }
 0x138   : > { %14766 = vmatpush3.bf16.xpose.msk.msra.mxu1 %vm15549_vm2, %v14764_v25  ;;  %14017 = vmatprep.mubr.msk.f32.mxu0 %vm15189_vm1, %v18920_v1  ;;  %v777_v25 = vld [vmem:[%s15570_s22 + $0x1d8] sm:$0xff] }
 0x139   : > { %14767 = vmatprep.subr.bf16.mxu0 %v15188_v0  ;;  %14024 = vmatprep.mubr.msk.f32.mxu1 %vm15189_vm1, %v18920_v1 }
 0x13a   : > { %14771 = vmatprep.subr.bf16.mxu1 %v15188_v0 }
 0x13e   : > { %14018 = vmatmul.mubr.msk.f32.vlgmr.msra.gmra.mrb[50].mxu0 %vm1102_vm0, %v768_v30 }
 0x13f   : > { %14770 = vmatpush3.bf16.xpose.msk.msra.mxu0 %vm15549_vm2, %v14768_v31  ;;  %14025 = vmatmul.mubr.msk.f32.vlgmr.msra.gmra.mrb[50].mxu1 %vm1102_vm0, %v769_v32  ;;  %v972_v31 = vld [vmem:[%s15545_s21 + $0x3f0] sm:$0xff]  ;;  %v973_v32 = vld [vmem:[%s15545_s21 + $0x3f8] sm:$0xff] }
 0x140   : > { %14774 = vmatpush3.bf16.xpose.msk.msra.mxu1 %vm15549_vm2, %v14772_v33  ;;  %14031 = vmatprep.mubr.msk.f32.mxu0 %vm15189_vm1, %v18920_v1  ;;  %v14812_v42 = vpack.c.bf16 %v973_v32, %v972_v31 }
 0x141   : > { %14775 = vmatprep.subr.bf16.mxu0 %v15188_v0  ;;  %14038 = vmatprep.mubr.msk.f32.mxu1 %vm15189_vm1, %v18920_v1 }
 0x142   : > { %14779 = vmatprep.subr.bf16.mxu1 %v15188_v0 }
 0x146   : > { %14032 = vmatmul.mubr.msk.f32.vlgmr.msra.gmra.mrb[52].mxu0 %vm1102_vm0, %v770_v38 }
 0x147   : > { %14778 = vmatpush3.bf16.xpose.msk.msra.mxu0 %vm15549_vm2, %v14776_v39  ;;  %14039 = vmatmul.mubr.msk.f32.vlgmr.msra.gmra.mrb[52].mxu1 %vm1102_vm0, %v771_v40  ;;  %v778_v39 = vld [vmem:[%s15570_s22 + $0x1e0] sm:$0xff]  ;;  %v14808_v40 = vpack.c.bf16 %v971_v29, %v970_v28 }
 0x148   : > { %14782 = vmatpush3.bf16.xpose.msk.msra.mxu1 %vm15549_vm2, %v14780_v41  ;;  %14045 = vmatprep.mubr.msk.f32.mxu0 %vm15189_vm1, %v18920_v1  ;;  %v779_v41 = vld [vmem:[%s15570_s22 + $0x1e8] sm:$0xff] }
 0x149   : > { %v16052_v44 = vpop.f32.mrb[0].mxu0  ;;  %14783 = vmatprep.subr.bf16.mxu0 %v15188_v0  ;;  %14052 = vmatprep.mubr.msk.f32.mxu1 %vm15189_vm1, %v18920_v1 }
 0x14a   : > { %v11215_v47 = vsel %vm1102_vm0, %v16052_v44, 0.0  ;;  %v13669_v48 = vpop.f32.mrb[1].mxu0  ;;  %v16061_v49 = vpop.f32.mrb[0].mxu1  ;;  %14787 = vmatprep.subr.bf16.mxu1 %v15188_v0 }
 0x14b   : > { %v11216_v50 = vsel %vm1102_vm0, %v16061_v49, 0.0  ;;  %v13676_v51 = vpop.f32.mrb[1].mxu1  ;;  %v976_v48 = vld [vmem:[%s15545_s21 + $0x410] sm:$0xff] }
 0x14c   : > { %v11217_v54 = vadd.f32 %v11216_v50, %v11215_v47  ;;  %v977_v50 = vld [vmem:[%s15545_s21 + $0x418] sm:$0xff] }
 0x14d   : > { %v14820_v61 = vpack.c.bf16 %v977_v50, %v976_v48 }
 0x14e   : > { %14046 = vmatmul.mubr.msk.f32.vlgmr.msra.gmra.mrb[54].mxu0 %vm1102_vm0, %v772_v52 }
 0x14f   : > { %14786 = vmatpush3.bf16.xpose.msk.msra.mxu0 %vm15549_vm2, %v14784_v53  ;;  %14053 = vmatmul.mubr.msk.f32.vlgmr.msra.gmra.mrb[54].mxu1 %vm1102_vm0, %v773_v55 }
 0x150   : > { %14790 = vmatpush3.bf16.xpose.msk.msra.mxu1 %vm15549_vm2, %v14788_v56  ;;  %14059 = vmatprep.mubr.msk.f32.mxu0 %vm15189_vm1, %v18920_v1 }
 0x151   : > { %v16078_v59 = vpop.f32.mrb[2].mxu0  ;;  %14791 = vmatprep.subr.bf16.mxu0 %v15188_v0  ;;  %14066 = vmatprep.mubr.msk.f32.mxu1 %vm15189_vm1, %v18920_v1 }
 0x152   : > { %v11218_v62 = vsel %vm1102_vm0, %v16078_v59, 0.0  ;;  %v13683_v63 = vpop.f32.mrb[3].mxu0  ;;  %v16087_v3 = vpop.f32.mrb[2].mxu1  ;;  %14795 = vmatprep.subr.bf16.mxu1 %v15188_v0 }
 0x153   : > { %v11219_v4 = vadd.f32 %v11218_v62, %v11217_v54  ;;  %v11220_v5 = vsel %vm1102_vm0, %v16087_v3, 0.0  ;;  %v13690_v6 = vpop.f32.mrb[3].mxu1  ;;  %v978_v63 = vld [vmem:[%s15545_s21 + $0x420] sm:$0xff] }
 0x154   : > { %v980_v6 = vld [vmem:[%s15545_s21 + $0x430] sm:$0xff] }
 0x155   : > { %v11221_v11 = vadd.f32 %v11220_v5, %v11219_v4  ;;  %v979_v4 = vld [vmem:[%s15545_s21 + $0x428] sm:$0xff] }
 0x156   : > { %14060 = vmatmul.mubr.msk.f32.vlgmr.msra.gmra.mrb[56].mxu0 %vm1102_vm0, %v774_v7  ;;  %v981_v7 = vld [vmem:[%s15545_s21 + $0x438] sm:$0xff]  ;;  %v14824_v16 = vpack.c.bf16 %v979_v4, %v978_v63  ;;  %v992_v63 = vld [vmem:[%s15545_s21 + $0x490] sm:$0xff] }
 0x157   : > { %14794 = vmatpush3.bf16.xpose.msk.msra.mxu0 %vm15549_vm2, %v14792_v8  ;;  %14067 = vmatmul.mubr.msk.f32.vlgmr.msra.gmra.mrb[56].mxu1 %vm1102_vm0, %v775_v9  ;;  %v993_v4 = vld [vmem:[%s15545_s21 + $0x498] sm:$0xff] }
 0x158   : > { %14798 = vmatpush3.bf16.xpose.msk.msra.mxu1 %vm15549_vm2, %v14796_v10  ;;  %14073 = vmatprep.mubr.msk.f32.mxu0 %vm15189_vm1, %v18920_v1 }
 0x159   : > { %v16104_v14 = vpop.f32.mrb[4].mxu0  ;;  %14799 = vmatprep.subr.bf16.mxu0 %v15188_v0  ;;  %14080 = vmatprep.mubr.msk.f32.mxu1 %vm15189_vm1, %v18920_v1 }
 0x15a   : > { %v11222_v17 = vsel %vm1102_vm0, %v16104_v14, 0.0  ;;  %v13697_v18 = vpop.f32.mrb[5].mxu0  ;;  %v16113_v19 = vpop.f32.mrb[4].mxu1  ;;  %14803 = vmatprep.subr.bf16.mxu1 %v15188_v0 }
 0x15b   : > { %v11223_v20 = vadd.f32 %v11222_v17, %v11221_v11  ;;  %v11224_v21 = vsel %vm1102_vm0, %v16113_v19, 0.0  ;;  %v13704_v22 = vpop.f32.mrb[5].mxu1  ;;  %v783_v17 = vld [vmem:[%s15570_s22 + $0x208] sm:$0xff]  ;;  %v14828_v18 = vpack.c.bf16 %v981_v7, %v980_v6 }
 0x15c   : > { %v983_v22 = vld [vmem:[%s15545_s21 + $0x448] sm:$0xff] }
 0x15d   : > { %v11225_v27 = vadd.f32 %v11224_v21, %v11223_v20  ;;  %v982_v21 = vld [vmem:[%s15545_s21 + $0x440] sm:$0xff] }
 0x15e   : > { %14074 = vmatmul.mubr.msk.f32.vlgmr.msra.gmra.mrb[58].mxu0 %vm1102_vm0, %v776_v23 }
 0x15f   : > { %14802 = vmatpush3.bf16.xpose.msk.msra.mxu0 %vm15549_vm2, %v14800_v24  ;;  %14081 = vmatmul.mubr.msk.f32.vlgmr.msra.gmra.mrb[58].mxu1 %vm1102_vm0, %v777_v25  ;;  %v984_v24 = vld [vmem:[%s15545_s21 + $0x450] sm:$0xff]  ;;  %v985_v25 = vld [vmem:[%s15545_s21 + $0x458] sm:$0xff] }
 0x160   : > { %14806 = vmatpush3.bf16.xpose.msk.msra.mxu1 %vm15549_vm2, %v14804_v26  ;;  %14087 = vmatprep.mubr.msk.f32.mxu0 %vm15189_vm1, %v18920_v1 }
 0x161   : > { %v16130_v30 = vpop.f32.mrb[6].mxu0  ;;  %14807 = vmatprep.subr.bf16.mxu0 %v15188_v0  ;;  %14094 = vmatprep.mubr.msk.f32.mxu1 %vm15189_vm1, %v18920_v1 }
 0x162   : > { %v11226_v33 = vsel %vm1102_vm0, %v16130_v30, 0.0  ;;  %v13711_v34 = vpop.f32.mrb[7].mxu0  ;;  %v16139_v35 = vpop.f32.mrb[6].mxu1  ;;  %14811 = vmatprep.subr.bf16.mxu1 %v15188_v0 }
 0x163   : > { %v11227_v36 = vadd.f32 %v11226_v33, %v11225_v27  ;;  %v11228_v37 = vsel %vm1102_vm0, %v16139_v35, 0.0  ;;  %v13718_v38 = vpop.f32.mrb[7].mxu1  ;;  %v784_v33 = vld [vmem:[%s15570_s22 + $0x210] sm:$0xff]  ;;  %v14832_v34 = vpack.c.bf16 %v983_v22, %v982_v21  ;;  %v995_v21 = vld [vmem:[%s15545_s21 + $0x4a8] sm:$0xff] }
 0x165   : > { %v11229_v43 = vadd.f32 %v11228_v37, %v11227_v36  ;;  %v785_v36 = vld [vmem:[%s15570_s22 + $0x218] sm:$0xff]  ;;  %v14836_v37 = vpack.c.bf16 %v985_v25, %v984_v24  ;;  %v996_v24 = vld [vmem:[%s15545_s21 + $0x4b0] sm:$0xff] }
 0x166   : > { %14088 = vmatmul.mubr.msk.f32.vlgmr.msra.gmra.mrb[60].mxu0 %vm1102_vm0, %v778_v39  ;;  %v986_v39 = vld [vmem:[%s15545_s21 + $0x460] sm:$0xff]  ;;  %v997_v25 = vld [vmem:[%s15545_s21 + $0x4b8] sm:$0xff] }
 0x167   : > { %14810 = vmatpush3.bf16.xpose.msk.msra.mxu0 %vm15549_vm2, %v14808_v40  ;;  %14095 = vmatmul.mubr.msk.f32.vlgmr.msra.gmra.mrb[60].mxu1 %vm1102_vm0, %v779_v41  ;;  %v987_v40 = vld [vmem:[%s15545_s21 + $0x468] sm:$0xff] }
 0x168   : > { %14814 = vmatpush3.bf16.xpose.msk.msra.mxu1 %vm15549_vm2, %v14812_v42  ;;  %14101 = vmatprep.mubr.msk.f32.mxu0 %vm15189_vm1, %v18920_v1  ;;  %v988_v42 = vld [vmem:[%s15545_s21 + $0x470] sm:$0xff] }
 0x169   : > { %v16156_v47 = vpop.f32.mrb[8].mxu0  ;;  %14815 = vmatprep.subr.bf16.mxu0 %v15188_v0  ;;  %14108 = vmatprep.mubr.msk.f32.mxu1 %vm15189_vm1, %v18920_v1 }
 0x16a   : > { %v11230_v51 = vsel %vm1102_vm0, %v16156_v47, 0.0  ;;  %v13725_v52 = vpop.f32.mrb[9].mxu0  ;;  %v16165_v53 = vpop.f32.mrb[8].mxu1  ;;  %14819 = vmatprep.subr.bf16.mxu1 %v15188_v0 }
 0x16b   : > { %v11231_v54 = vadd.f32 %v11230_v51, %v11229_v43  ;;  %v11232_v55 = vsel %vm1102_vm0, %v16165_v53, 0.0  ;;  %v13732_v56 = vpop.f32.mrb[9].mxu1  ;;  %v989_v43 = vld [vmem:[%s15545_s21 + $0x478] sm:$0xff] }
 0x16c   : > { %v787_v56 = vld [vmem:[%s15570_s22 + $0x228] sm:$0xff] }
 0x16d   : > { %v11233_v62 = vadd.f32 %v11232_v55, %v11231_v54  ;;  %v786_v54 = vld [vmem:[%s15570_s22 + $0x220] sm:$0xff]  ;;  %v14840_v55 = vpack.c.bf16 %v987_v40, %v986_v39 }
 0x16e   : > { %14102 = vmatmul.mubr.msk.f32.vlgmr.msra.gmra.mrb[62].mxu0 %vm1102_vm0, %v780_v57  ;;  %v14844_v57 = vpack.c.bf16 %v989_v43, %v988_v42  ;;  %v998_v40 = vld [vmem:[%s15545_s21 + $0x4c0] sm:$0xff]  ;;  %v999_v42 = vld [vmem:[%s15545_s21 + $0x4c8] sm:$0xff] }
 0x16f   : > { %14818 = vmatpush3.bf16.xpose.msk.msra.mxu0 %vm15549_vm2, %v14816_v58  ;;  %14109 = vmatmul.mubr.msk.f32.vlgmr.msra.gmra.mrb[62].mxu1 %vm1102_vm0, %v781_v60  ;;  %v990_v60 = vld [vmem:[%s15545_s21 + $0x480] sm:$0xff] }
 0x170   : > { %14822 = vmatpush3.bf16.xpose.msk.msra.mxu1 %vm15549_vm2, %v14820_v61  ;;  %14115 = vmatprep.mubr.msk.f32.mxu0 %vm15189_vm1, %v18920_v1  ;;  %v991_v61 = vld [vmem:[%s15545_s21 + $0x488] sm:$0xff] }
 0x171   : > { %v16182_v5 = vpop.f32.mrb[10].mxu0  ;;  %14823 = vmatprep.subr.bf16.mxu0 %v15188_v0  ;;  %14122 = vmatprep.mubr.msk.f32.mxu1 %vm15189_vm1, %v18920_v1 }
 0x172   : > { %v11234_v8 = vsel %vm1102_vm0, %v16182_v5, 0.0  ;;  %v13739_v9 = vpop.f32.mrb[11].mxu0  ;;  %v16191_v10 = vpop.f32.mrb[10].mxu1  ;;  %14827 = vmatprep.subr.bf16.mxu1 %v15188_v0 }
 0x173   : > { %v11235_v11 = vadd.f32 %v11234_v8, %v11233_v62  ;;  %v11236_v12 = vsel %vm1102_vm0, %v16191_v10, 0.0  ;;  %v13746_v13 = vpop.f32.mrb[11].mxu1 }
 0x174   : > { %v788_v13 = vld [vmem:[%s15570_s22 + $0x230] sm:$0xff] }
 0x175   : > { %v11237_v20 = vadd.f32 %v11236_v12, %v11235_v11 }
 0x176   : > { %14116 = vmatmul.mubr.msk.f32.vlgmr.msra.gmra.mrb[64].mxu0 %vm1102_vm0, %v782_v15  ;;  %v14848_v15 = vpack.c.bf16 %v991_v61, %v990_v60  ;;  %v793_v60 = vld [vmem:[%s15570_s22 + $0x258] sm:$0xff] }
 0x177   : > { %14826 = vmatpush3.bf16.xpose.msk.msra.mxu0 %vm15549_vm2, %v14824_v16  ;;  %14123 = vmatmul.mubr.msk.f32.vlgmr.msra.gmra.mrb[64].mxu1 %vm1102_vm0, %v783_v17  ;;  %v789_v16 = vld [vmem:[%s15570_s22 + $0x238] sm:$0xff]  ;;  %v14852_v17 = vpack.c.bf16 %v993_v4, %v992_v63  ;;  %v1002_v4 = vld [vmem:[%s15545_s21 + $0x4e0] sm:$0xff] }
 0x178   : > { %14830 = vmatpush3.bf16.xpose.msk.msra.mxu1 %vm15549_vm2, %v14828_v18  ;;  %14129 = vmatprep.mubr.msk.f32.mxu0 %vm15189_vm1, %v18920_v1 }
 0x179   : > { %v16208_v23 = vpop.f32.mrb[12].mxu0  ;;  %14831 = vmatprep.subr.bf16.mxu0 %v15188_v0  ;;  %14136 = vmatprep.mubr.msk.f32.mxu1 %vm15189_vm1, %v18920_v1 }
 0x17a   : > { %v11238_v26 = vsel %vm1102_vm0, %v16208_v23, 0.0  ;;  %v13753_v27 = vpop.f32.mrb[13].mxu0  ;;  %v16217_v28 = vpop.f32.mrb[12].mxu1  ;;  %14835 = vmatprep.subr.bf16.mxu1 %v15188_v0 }
 0x17b   : > { %v11239_v29 = vadd.f32 %v11238_v26, %v11237_v20  ;;  %v11240_v31 = vsel %vm1102_vm0, %v16217_v28, 0.0  ;;  %v13760_v32 = vpop.f32.mrb[13].mxu1  ;;  %v994_v20 = vld [vmem:[%s15545_s21 + $0x4a0] sm:$0xff] }
 0x17d   : > { %v11241_v38 = vadd.f32 %v11240_v31, %v11239_v29 }
 0x17e   : > { %14130 = vmatmul.mubr.msk.f32.vlgmr.msra.gmra.mrb[66].mxu0 %vm1102_vm0, %v784_v33 }
 0x17f   : > { %14834 = vmatpush3.bf16.xpose.msk.msra.mxu0 %vm15549_vm2, %v14832_v34  ;;  %14137 = vmatmul.mubr.msk.f32.vlgmr.msra.gmra.mrb[66].mxu1 %vm1102_vm0, %v785_v36  ;;  %v790_v34 = vld [vmem:[%s15570_s22 + $0x240] sm:$0xff]  ;;  %v14856_v36 = vpack.c.bf16 %v995_v21, %v994_v20 }
 0x180   : > { %14838 = vmatpush3.bf16.xpose.msk.msra.mxu1 %vm15549_vm2, %v14836_v37  ;;  %14143 = vmatprep.mubr.msk.f32.mxu0 %vm15189_vm1, %v18920_v1  ;;  %v791_v37 = vld [vmem:[%s15570_s22 + $0x248] sm:$0xff]  ;;  %v794_v20 = vld [vmem:[%s15570_s22 + $0x260] sm:$0xff] }
 0x181   : > { %v16234_v41 = vpop.f32.mrb[14].mxu0  ;;  %14839 = vmatprep.subr.bf16.mxu0 %v15188_v0  ;;  %14150 = vmatprep.mubr.msk.f32.mxu1 %vm15189_vm1, %v18920_v1 }
 0x182   : > { %v11242_v45 = vsel %vm1102_vm0, %v16234_v41, 0.0  ;;  %v13767_v46 = vpop.f32.mrb[15].mxu0  ;;  %v16243_v48 = vpop.f32.mrb[14].mxu1  ;;  %14843 = vmatprep.subr.bf16.mxu1 %v15188_v0 }
 0x183   : > { %v11243_v50 = vadd.f32 %v11242_v45, %v11241_v38  ;;  %v11244_v51 = vsel %vm1102_vm0, %v16243_v48, 0.0  ;;  %v13774_v52 = vpop.f32.mrb[15].mxu1  ;;  %v14860_v38 = vpack.c.bf16 %v997_v25, %v996_v24  ;;  %v1000_v45 = vld [vmem:[%s15545_s21 + $0x4d0] sm:$0xff]  ;;  %v1001_v46 = vld [vmem:[%s15545_s21 + $0x4d8] sm:$0xff]  ;;  %v795_v24 = vld [vmem:[%s15570_s22 + $0x268] sm:$0xff] }
 0x184   : > { %v14868_v61 = vpack.c.bf16 %v1001_v46, %v1000_v45  ;;  %v796_v45 = vld [vmem:[%s15570_s22 + $0x270] sm:$0xff] }
 0x185   : > { %v11245_v58 = vadd.f32 %v11244_v51, %v11243_v50 }
 0x186   : > { %14144 = vmatmul.mubr.msk.f32.vlgmr.msra.gmra.mrb[68].mxu0 %vm1102_vm0, %v786_v54 }
 0x187   : > { %14842 = vmatpush3.bf16.xpose.msk.msra.mxu0 %vm15549_vm2, %v14840_v55  ;;  %14151 = vmatmul.mubr.msk.f32.vlgmr.msra.gmra.mrb[68].mxu1 %vm1102_vm0, %v787_v56 }
 0x188   : > { %14846 = vmatpush3.bf16.xpose.msk.msra.mxu1 %vm15549_vm2, %v14844_v57  ;;  %14157 = vmatprep.mubr.msk.f32.mxu0 %vm15189_vm1, %v18920_v1  ;;  %v792_v57 = vld [vmem:[%s15570_s22 + $0x250] sm:$0xff] }
 0x189   : > { %v16260_v62 = vpop.f32.mrb[16].mxu0  ;;  %14847 = vmatprep.subr.bf16.mxu0 %v15188_v0  ;;  %14164 = vmatprep.mubr.msk.f32.mxu1 %vm15189_vm1, %v18920_v1 }
 0x18a   : > { %v11246_v6 = vsel %vm1102_vm0, %v16260_v62, 0.0  ;;  %v13781_v7 = vpop.f32.mrb[17].mxu0  ;;  %v16269_v8 = vpop.f32.mrb[16].mxu1  ;;  %14851 = vmatprep.subr.bf16.mxu1 %v15188_v0 }
 0x18b   : > { %v11247_v9 = vadd.f32 %v11246_v6, %v11245_v58  ;;  %v11248_v11 = vsel %vm1102_vm0, %v16269_v8, 0.0  ;;  %v13788_v12 = vpop.f32.mrb[17].mxu1  ;;  %v14864_v58 = vpack.c.bf16 %v999_v42, %v998_v40  ;;  %v1003_v6 = vld [vmem:[%s15545_s21 + $0x4e8] sm:$0xff] }
 0x18c   : > { %v14872_v21 = vpack.c.bf16 %v1003_v6, %v1002_v4 }
 0x18d   : > { %v11249_v18 = vadd.f32 %v11248_v11, %v11247_v9  ;;  %v1004_v9 = vld [vmem:[%s15545_s21 + $0x4f0] sm:$0xff]  ;;  %v1005_v11 = vld [vmem:[%s15545_s21 + $0x4f8] sm:$0xff] }
 0x18e   : > { %14158 = vmatmul.mubr.msk.f32.vlgmr.msra.gmra.mrb[70].mxu0 %vm1102_vm0, %v788_v13  ;;  %v14876_v25 = vpack.c.bf16 %v1005_v11, %v1004_v9 }
 0x18f   : > { %14850 = vmatpush3.bf16.xpose.msk.msra.mxu0 %vm15549_vm2, %v14848_v15  ;;  %14165 = vmatmul.mubr.msk.f32.vlgmr.msra.gmra.mrb[70].mxu1 %vm1102_vm0, %v789_v16 }
 0x190   : > { %14854 = vmatpush3.bf16.xpose.msk.msra.mxu1 %vm15549_vm2, %v14852_v17  ;;  %14171 = vmatprep.mubr.msk.f32.mxu0 %vm15189_vm1, %v18920_v1 }
 0x191   : > { %v16286_v22 = vpop.f32.mrb[18].mxu0  ;;  %14855 = vmatprep.subr.bf16.mxu0 %v15188_v0  ;;  %14178 = vmatprep.mubr.msk.f32.mxu1 %vm15189_vm1, %v18920_v1 }
 0x192   : > { %v11250_v26 = vsel %vm1102_vm0, %v16286_v22, 0.0  ;;  %v13795_v27 = vpop.f32.mrb[19].mxu0  ;;  %v16295_v29 = vpop.f32.mrb[18].mxu1  ;;  %14859 = vmatprep.subr.bf16.mxu1 %v15188_v0 }
 0x193   : > { %v11251_v31 = vadd.f32 %v11250_v26, %v11249_v18  ;;  %v11252_v32 = vsel %vm1102_vm0, %v16295_v29, 0.0  ;;  %v13802_v33 = vpop.f32.mrb[19].mxu1  ;;  %v1006_v27 = vld [vmem:[%s15545_s21 + $0x500] sm:$0xff] }
 0x194   : > { %v1008_v33 = vld [vmem:[%s15545_s21 + $0x510] sm:$0xff] }
 0x195   : > { %v11253_v39 = vadd.f32 %v11252_v32, %v11251_v31  ;;  %v1007_v31 = vld [vmem:[%s15545_s21 + $0x508] sm:$0xff] }
 0x196   : > { %14172 = vmatmul.mubr.msk.f32.vlgmr.msra.gmra.mrb[72].mxu0 %vm1102_vm0, %v790_v34  ;;  %v1009_v34 = vld [vmem:[%s15545_s21 + $0x518] sm:$0xff]  ;;  %v14880_v46 = vpack.c.bf16 %v1007_v31, %v1006_v27 }
 0x197   : > { %14858 = vmatpush3.bf16.xpose.msk.msra.mxu0 %vm15549_vm2, %v14856_v36  ;;  %14179 = vmatmul.mubr.msk.f32.vlgmr.msra.gmra.mrb[72].mxu1 %vm1102_vm0, %v791_v37 }
 0x198   : > { %14862 = vmatpush3.bf16.xpose.msk.msra.mxu1 %vm15549_vm2, %v14860_v38  ;;  %14185 = vmatprep.mubr.msk.f32.mxu0 %vm15189_vm1, %v18920_v1 }
 0x199   : > { %v16312_v43 = vpop.f32.mrb[20].mxu0  ;;  %14863 = vmatprep.subr.bf16.mxu0 %v15188_v0  ;;  %14192 = vmatprep.mubr.msk.f32.mxu1 %vm15189_vm1, %v18920_v1 }
 0x19a   : > { %v11254_v50 = vsel %vm1102_vm0, %v16312_v43, 0.0  ;;  %v13809_v51 = vpop.f32.mrb[21].mxu0  ;;  %v16321_v52 = vpop.f32.mrb[20].mxu1  ;;  %14867 = vmatprep.subr.bf16.mxu1 %v15188_v0 }
 0x19b   : > { %v11255_v54 = vadd.f32 %v11254_v50, %v11253_v39  ;;  %v11256_v55 = vsel %vm1102_vm0, %v16321_v52, 0.0  ;;  %v13816_v56 = vpop.f32.mrb[21].mxu1  ;;  %v797_v50 = vld [vmem:[%s15570_s22 + $0x278] sm:$0xff]  ;;  %v14884_v51 = vpack.c.bf16 %v1009_v34, %v1008_v33 }
 0x19c   : > { %v1011_v56 = vld [vmem:[%s15545_s21 + $0x528] sm:$0xff] }
 0x19d   : > { %v11257_v63 = vadd.f32 %v11256_v55, %v11255_v54  ;;  %v1010_v55 = vld [vmem:[%s15545_s21 + $0x520] sm:$0xff] }
 0x19e   : > { %14186 = vmatmul.mubr.msk.f32.vlgmr.msra.gmra.mrb[74].mxu0 %vm1102_vm0, %v792_v57 }
 0x19f   : > { %14866 = vmatpush3.bf16.xpose.msk.msra.mxu0 %vm15549_vm2, %v14864_v58  ;;  %14193 = vmatmul.mubr.msk.f32.vlgmr.msra.gmra.mrb[74].mxu1 %vm1102_vm0, %v793_v60  ;;  %v1012_v58 = vld [vmem:[%s15545_s21 + $0x530] sm:$0xff]  ;;  %v1013_v60 = vld [vmem:[%s15545_s21 + $0x538] sm:$0xff] }
 0x1a0   : > { %14870 = vmatpush3.bf16.xpose.msk.msra.mxu1 %vm15549_vm2, %v14868_v61  ;;  %14199 = vmatprep.mubr.msk.f32.mxu0 %vm15189_vm1, %v18920_v1 }
 0x1a1   : > { %v16338_v7 = vpop.f32.mrb[22].mxu0  ;;  %14871 = vmatprep.subr.bf16.mxu0 %v15188_v0  ;;  %14206 = vmatprep.mubr.msk.f32.mxu1 %vm15189_vm1, %v18920_v1 }
 0x1a2   : > { %v11258_v12 = vsel %vm1102_vm0, %v16338_v7, 0.0  ;;  %v13823_v13 = vpop.f32.mrb[23].mxu0  ;;  %v16347_v15 = vpop.f32.mrb[22].mxu1  ;;  %14875 = vmatprep.subr.bf16.mxu1 %v15188_v0 }
 0x1a3   : > { %v11259_v16 = vadd.f32 %v11258_v12, %v11257_v63  ;;  %v11260_v17 = vsel %vm1102_vm0, %v16347_v15, 0.0  ;;  %v13830_v18 = vpop.f32.mrb[23].mxu1  ;;  %v798_v12 = vld [vmem:[%s15570_s22 + $0x280] sm:$0xff]  ;;  %v14888_v13 = vpack.c.bf16 %v1011_v56, %v1010_v55  ;;  %v1020_v55 = vld [vmem:[%s15545_s21 + $0x570] sm:$0xff]  ;;  %v1021_v56 = vld [vmem:[%s15545_s21 + $0x578] sm:$0xff] }
 0x1a5   : > { %v11261_v26 = vadd.f32 %v11260_v17, %v11259_v16  ;;  %v799_v16 = vld [vmem:[%s15570_s22 + $0x288] sm:$0xff]  ;;  %v14892_v17 = vpack.c.bf16 %v1013_v60, %v1012_v58 }
 0x1a6   : > { %14200 = vmatmul.mubr.msk.f32.vlgmr.msra.gmra.mrb[76].mxu0 %vm1102_vm0, %v794_v20  ;;  %v1014_v20 = vld [vmem:[%s15545_s21 + $0x540] sm:$0xff] }
 0x1a7   : > { %14874 = vmatpush3.bf16.xpose.msk.msra.mxu0 %vm15549_vm2, %v14872_v21  ;;  %14207 = vmatmul.mubr.msk.f32.vlgmr.msra.gmra.mrb[76].mxu1 %vm1102_vm0, %v795_v24  ;;  %v1015_v21 = vld [vmem:[%s15545_s21 + $0x548] sm:$0xff] }
 0x1a8   : > { %14878 = vmatpush3.bf16.xpose.msk.msra.mxu1 %vm15549_vm2, %v14876_v25  ;;  %14213 = vmatprep.mubr.msk.f32.mxu0 %vm15189_vm1, %v18920_v1  ;;  %v1016_v25 = vld [vmem:[%s15545_s21 + $0x550] sm:$0xff] }
 0x1a9   : > { %v16364_v32 = vpop.f32.mrb[24].mxu0  ;;  %14879 = vmatprep.subr.bf16.mxu0 %v15188_v0  ;;  %14220 = vmatprep.mubr.msk.f32.mxu1 %vm15189_vm1, %v18920_v1 }
 0x1aa   : > { %v11262_v36 = vsel %vm1102_vm0, %v16364_v32, 0.0  ;;  %v13837_v37 = vpop.f32.mrb[25].mxu0  ;;  %v16373_v38 = vpop.f32.mrb[24].mxu1  ;;  %14883 = vmatprep.subr.bf16.mxu1 %v15188_v0 }
 0x1ab   : > { %v11263_v39 = vadd.f32 %v11262_v36, %v11261_v26  ;;  %v11264_v40 = vsel %vm1102_vm0, %v16373_v38, 0.0  ;;  %v13844_v42 = vpop.f32.mrb[25].mxu1  ;;  %v1017_v26 = vld [vmem:[%s15545_s21 + $0x558] sm:$0xff] }
 0x1ac   : > { %v801_v42 = vld [vmem:[%s15570_s22 + $0x298] sm:$0xff] }
 0x1ad   : > { %v11265_v54 = vadd.f32 %v11264_v40, %v11263_v39  ;;  %v800_v39 = vld [vmem:[%s15570_s22 + $0x290] sm:$0xff]  ;;  %v14896_v40 = vpack.c.bf16 %v1015_v21, %v1014_v20  ;;  %v1023_v20 = vld [vmem:[%s15545_s21 + $0x588] sm:$0xff] }
 0x1ae   : > { %14214 = vmatmul.mubr.msk.f32.vlgmr.msra.gmra.mrb[78].mxu0 %vm1102_vm0, %v796_v45  ;;  %v14900_v45 = vpack.c.bf16 %v1017_v26, %v1016_v25  ;;  %v1024_v25 = vld [vmem:[%s15545_s21 + $0x590] sm:$0xff]  ;;  %v1025_v26 = vld [vmem:[%s15545_s21 + $0x598] sm:$0xff] }
 0x1af   : > { %14882 = vmatpush3.bf16.xpose.msk.msra.mxu0 %vm15549_vm2, %v14880_v46  ;;  %14221 = vmatmul.mubr.msk.f32.vlgmr.msra.gmra.mrb[78].mxu1 %vm1102_vm0, %v797_v50  ;;  %v1018_v50 = vld [vmem:[%s15545_s21 + $0x560] sm:$0xff] }
 0x1b0   : > { %14886 = vmatpush3.bf16.xpose.msk.msra.mxu1 %vm15549_vm2, %v14884_v51  ;;  %14227 = vmatprep.mubr.msk.f32.mxu0 %vm15189_vm1, %v18920_v1  ;;  %v1019_v51 = vld [vmem:[%s15545_s21 + $0x568] sm:$0xff] }
 0x1b1   : > { %v16390_v57 = vpop.f32.mrb[26].mxu0  ;;  %14887 = vmatprep.subr.bf16.mxu0 %v15188_v0  ;;  %14234 = vmatprep.mubr.msk.f32.mxu1 %vm15189_vm1, %v18920_v1 }
 0x1b2   : > { %v11266_v61 = vsel %vm1102_vm0, %v16390_v57, 0.0  ;;  %v13851_v63 = vpop.f32.mrb[27].mxu0  ;;  %v16399_v4 = vpop.f32.mrb[26].mxu1  ;;  %14891 = vmatprep.subr.bf16.mxu1 %v15188_v0 }
 0x1b3   : > { %v11267_v6 = vadd.f32 %v11266_v61, %v11265_v54  ;;  %v11268_v9 = vsel %vm1102_vm0, %v16399_v4, 0.0  ;;  %v13858_v11 = vpop.f32.mrb[27].mxu1 }
 0x1b4   : > { %v802_v11 = vld [vmem:[%s15570_s22 + $0x2a0] sm:$0xff] }
 0x1b5   : > { %v11269_v18 = vadd.f32 %v11268_v9, %v11267_v6 }
 0x1b6   : > { %14228 = vmatmul.mubr.msk.f32.vlgmr.msra.gmra.mrb[80].mxu0 %vm1102_vm0, %v798_v12  ;;  %v14904_v12 = vpack.c.bf16 %v1019_v51, %v1018_v50  ;;  %v1026_v51 = vld [vmem:[%s15545_s21 + $0x5a0] sm:$0xff] }
 0x1b7   : > { %14890 = vmatpush3.bf16.xpose.msk.msra.mxu0 %vm15549_vm2, %v14888_v13  ;;  %14235 = vmatmul.mubr.msk.f32.vlgmr.msra.gmra.mrb[80].mxu1 %vm1102_vm0, %v799_v16  ;;  %v803_v13 = vld [vmem:[%s15570_s22 + $0x2a8] sm:$0xff]  ;;  %v14908_v16 = vpack.c.bf16 %v1021_v56, %v1020_v55 }
 0x1b8   : > { %14894 = vmatpush3.bf16.xpose.msk.msra.mxu1 %vm15549_vm2, %v14892_v17  ;;  %14241 = vmatprep.mubr.msk.f32.mxu0 %vm15189_vm1, %v18920_v1  ;;  %v1027_v55 = vld [vmem:[%s15545_s21 + $0x5a8] sm:$0xff] }
 0x1b9   : > { %v16416_v24 = vpop.f32.mrb[28].mxu0  ;;  %14895 = vmatprep.subr.bf16.mxu0 %v15188_v0  ;;  %14248 = vmatprep.mubr.msk.f32.mxu1 %vm15189_vm1, %v18920_v1 }
 0x1ba   : > { %v11270_v27 = vsel %vm1102_vm0, %v16416_v24, 0.0  ;;  %v13865_v31 = vpop.f32.mrb[29].mxu0  ;;  %v16425_v33 = vpop.f32.mrb[28].mxu1  ;;  %14899 = vmatprep.subr.bf16.mxu1 %v15188_v0 }
 0x1bb   : > { %v11271_v34 = vadd.f32 %v11270_v27, %v11269_v18  ;;  %v11272_v36 = vsel %vm1102_vm0, %v16425_v33, 0.0  ;;  %v13872_v37 = vpop.f32.mrb[29].mxu1  ;;  %v1022_v18 = vld [vmem:[%s15545_s21 + $0x580] sm:$0xff] }
 0x1bd   : > { %v11273_v46 = vadd.f32 %v11272_v36, %v11271_v34 }
 0x1be   : > { %14242 = vmatmul.mubr.msk.f32.vlgmr.msra.gmra.mrb[82].mxu0 %vm1102_vm0, %v800_v39 }
 0x1bf   : > { %14898 = vmatpush3.bf16.xpose.msk.msra.mxu0 %vm15549_vm2, %v14896_v40  ;;  %14249 = vmatmul.mubr.msk.f32.vlgmr.msra.gmra.mrb[82].mxu1 %vm1102_vm0, %v801_v42  ;;  %v804_v40 = vld [vmem:[%s15570_s22 + $0x2b0] sm:$0xff]  ;;  %v14912_v42 = vpack.c.bf16 %v1023_v20, %v1022_v18  ;;  %v807_v18 = vld [vmem:[%s15570_s22 + $0x2c8] sm:$0xff] }
 0x1c0   : > { %14902 = vmatpush3.bf16.xpose.msk.msra.mxu1 %vm15549_vm2, %v14900_v45  ;;  %14255 = vmatprep.mubr.msk.f32.mxu0 %vm15189_vm1, %v18920_v1  ;;  %v805_v45 = vld [vmem:[%s15570_s22 + $0x2b8] sm:$0xff] }
 0x1c1   : > { %v16442_v54 = vpop.f32.mrb[30].mxu0  ;;  %14903 = vmatprep.subr.bf16.mxu0 %v15188_v0  ;;  %14262 = vmatprep.mubr.msk.f32.mxu1 %vm15189_vm1, %v18920_v1 }
 0x1c2   : > { %v11274_v58 = vsel %vm1102_vm0, %v16442_v54, 0.0  ;;  %v13879_v60 = vpop.f32.mrb[31].mxu0  ;;  %v16451_v61 = vpop.f32.mrb[30].mxu1  ;;  %14907 = vmatprep.subr.bf16.mxu1 %v15188_v0 }
 0x1c3   : > { %v11275_v63 = vadd.f32 %v11274_v58, %v11273_v46  ;;  %v11276_v6 = vsel %vm1102_vm0, %v16451_v61, 0.0  ;;  %v13886_v9 = vpop.f32.mrb[31].mxu1  ;;  %v14916_v46 = vpack.c.bf16 %v1025_v26, %v1024_v25  ;;  %v1028_v58 = vld [vmem:[%s15545_s21 + $0x5b0] sm:$0xff]  ;;  %v1029_v60 = vld [vmem:[%s15545_s21 + $0x5b8] sm:$0xff]  ;;  %v1030_v26 = vld [vmem:[%s15545_s21 + $0x5c0] sm:$0xff] }
 0x1c4   : > { %v14924_v20 = vpack.c.bf16 %v1029_v60, %v1028_v58  ;;  %v809_v58 = vld [vmem:[%s15570_s22 + $0x2d8] sm:$0xff] }
 0x1c5   : > { %v11277_v17 = vadd.f32 %v11276_v6, %v11275_v63 }
 0x1c6   : > { %14256 = vmatmul.mubr.msk.f32.vlgmr.msra.gmra.mrb[84].mxu0 %vm1102_vm0, %v802_v11 }
 0x1c7   : > { %14906 = vmatpush3.bf16.xpose.msk.msra.mxu0 %vm15549_vm2, %v14904_v12  ;;  %14263 = vmatmul.mubr.msk.f32.vlgmr.msra.gmra.mrb[84].mxu1 %vm1102_vm0, %v803_v13 }
 0x1c8   : > { %14910 = vmatpush3.bf16.xpose.msk.msra.mxu1 %vm15549_vm2, %v14908_v16  ;;  %14269 = vmatprep.mubr.msk.f32.mxu0 %vm15189_vm1, %v18920_v1  ;;  %v806_v16 = vld [vmem:[%s15570_s22 + $0x2c0] sm:$0xff] }
 0x1c9   : > { %v16468_v21 = vpop.f32.mrb[32].mxu0  ;;  %14911 = vmatprep.subr.bf16.mxu0 %v15188_v0  ;;  %14276 = vmatprep.mubr.msk.f32.mxu1 %vm15189_vm1, %v18920_v1 }
 0x1ca   : > { %v11278_v27 = vsel %vm1102_vm0, %v16468_v21, 0.0  ;;  %v13893_v31 = vpop.f32.mrb[33].mxu0  ;;  %v16477_v34 = vpop.f32.mrb[32].mxu1  ;;  %14915 = vmatprep.subr.bf16.mxu1 %v15188_v0 }
 0x1cb   : > { %v11279_v36 = vadd.f32 %v11278_v27, %v11277_v17  ;;  %v11280_v37 = vsel %vm1102_vm0, %v16477_v34, 0.0  ;;  %v13900_v39 = vpop.f32.mrb[33].mxu1  ;;  %v14920_v17 = vpack.c.bf16 %v1027_v55, %v1026_v51  ;;  %v1031_v27 = vld [vmem:[%s15545_s21 + $0x5c8] sm:$0xff]  ;;  %v808_v51 = vld [vmem:[%s15570_s22 + $0x2d0] sm:$0xff] }
 0x1cc   : > { %v14928_v55 = vpack.c.bf16 %v1031_v27, %v1030_v26 }
 0x1cd   : > { %v11281_v50 = vadd.f32 %v11280_v37, %v11279_v36  ;;  %v1032_v36 = vld [vmem:[%s15545_s21 + $0x5d0] sm:$0xff]  ;;  %v1033_v37 = vld [vmem:[%s15545_s21 + $0x5d8] sm:$0xff] }
 0x1ce   : > { %14270 = vmatmul.mubr.msk.f32.vlgmr.msra.gmra.mrb[86].mxu0 %vm1102_vm0, %v804_v40  ;;  %v14932_v60 = vpack.c.bf16 %v1033_v37, %v1032_v36  ;;  %v810_v36 = vld [vmem:[%s15570_s22 + $0x2e0] sm:$0xff] }
 0x1cf   : > { %14914 = vmatpush3.bf16.xpose.msk.msra.mxu0 %vm15549_vm2, %v14912_v42  ;;  %14277 = vmatmul.mubr.msk.f32.vlgmr.msra.gmra.mrb[86].mxu1 %vm1102_vm0, %v805_v45 }
 0x1d0   : > { %14918 = vmatpush3.bf16.xpose.msk.msra.mxu1 %vm15549_vm2, %v14916_v46  ;;  %14283 = vmatprep.mubr.msk.f32.mxu0 %vm15189_vm1, %v18920_v1 }
 0x1d1   : > { %v16494_v56 = vpop.f32.mrb[34].mxu0  ;;  %14919 = vmatprep.subr.bf16.mxu0 %v15188_v0  ;;  %14290 = vmatprep.mubr.msk.f32.mxu1 %vm15189_vm1, %v18920_v1 }
 0x1d2   : > { %v11282_v63 = vsel %vm1102_vm0, %v16494_v56, 0.0  ;;  %v13907_v6 = vpop.f32.mrb[35].mxu0  ;;  %v16503_v9 = vpop.f32.mrb[34].mxu1  ;;  %14923 = vmatprep.subr.bf16.mxu1 %v15188_v0 }
 0x1d3   : > { %v11283_v11 = vadd.f32 %v11282_v63, %v11281_v50  ;;  %v11284_v12 = vsel %vm1102_vm0, %v16503_v9, 0.0  ;;  %v13914_v13 = vpop.f32.mrb[35].mxu1  ;;  %v1034_v6 = vld [vmem:[%s15545_s21 + $0x5e0] sm:$0xff] }
 0x1d4   : > { %v1036_v13 = vld [vmem:[%s15545_s21 + $0x5f0] sm:$0xff] }
 0x1d5   : > { %v11285_v25 = vadd.f32 %v11284_v12, %v11283_v11  ;;  %v1035_v11 = vld [vmem:[%s15545_s21 + $0x5e8] sm:$0xff] }
 0x1d6   : > { %14284 = vmatmul.mubr.msk.f32.vlgmr.msra.gmra.mrb[88].mxu0 %vm1102_vm0, %v806_v16  ;;  %v1037_v16 = vld [vmem:[%s15545_s21 + $0x5f8] sm:$0xff]  ;;  %v14936_v37 = vpack.c.bf16 %v1035_v11, %v1034_v6 }
 0x1d7   : > { %14922 = vmatpush3.bf16.xpose.msk.msra.mxu0 %vm15549_vm2, %v14920_v17  ;;  %14291 = vmatmul.mubr.msk.f32.vlgmr.msra.gmra.mrb[88].mxu1 %vm1102_vm0, %v807_v18 }
 0x1d8   : > { %14926 = vmatpush3.bf16.xpose.msk.msra.mxu1 %vm15549_vm2, %v14924_v20  ;;  %14297 = vmatprep.mubr.msk.f32.mxu0 %vm15189_vm1, %v18920_v1 }
 0x1d9   : > { %v16520_v31 = vpop.f32.mrb[36].mxu0  ;;  %14927 = vmatprep.subr.bf16.mxu0 %v15188_v0  ;;  %14304 = vmatprep.mubr.msk.f32.mxu1 %vm15189_vm1, %v18920_v1 }
 0x1da   : > { %v11286_v39 = vsel %vm1102_vm0, %v16520_v31, 0.0  ;;  %v13921_v40 = vpop.f32.mrb[37].mxu0  ;;  %v16529_v42 = vpop.f32.mrb[36].mxu1  ;;  %14931 = vmatprep.subr.bf16.mxu1 %v15188_v0 }
 0x1db   : > { %v11287_v45 = vadd.f32 %v11286_v39, %v11285_v25  ;;  %v11288_v46 = vsel %vm1102_vm0, %v16529_v42, 0.0  ;;  %v13928_v50 = vpop.f32.mrb[37].mxu1  ;;  %v811_v39 = vld [vmem:[%s15570_s22 + $0x2e8] sm:$0xff]  ;;  %v14940_v40 = vpack.c.bf16 %v1037_v16, %v1036_v13 }
 0x1dc   : > { %v1039_v50 = vld [vmem:[%s15545_s21 + $0x608] sm:$0xff] }
 0x1dd   : > { %v11289_v63 = vadd.f32 %v11288_v46, %v11287_v45  ;;  %v1038_v46 = vld [vmem:[%s15545_s21 + $0x600] sm:$0xff] }
 0x1de   : > { %14298 = vmatmul.mubr.msk.f32.vlgmr.msra.gmra.mrb[90].mxu0 %vm1102_vm0, %v808_v51 }
 0x1df   : > { %14930 = vmatpush3.bf16.xpose.msk.msra.mxu0 %vm15549_vm2, %v14928_v55  ;;  %14305 = vmatmul.mubr.msk.f32.vlgmr.msra.gmra.mrb[90].mxu1 %vm1102_vm0, %v809_v58  ;;  %v1040_v55 = vld [vmem:[%s15545_s21 + $0x610] sm:$0xff]  ;;  %v1041_v58 = vld [vmem:[%s15545_s21 + $0x618] sm:$0xff] }
 0x1e0   : > { %14934 = vmatpush3.bf16.xpose.msk.msra.mxu1 %vm15549_vm2, %v14932_v60  ;;  %14311 = vmatprep.mubr.msk.f32.mxu0 %vm15189_vm1, %v18920_v1 }
 0x1e1   : > { %v16546_v12 = vpop.f32.mrb[38].mxu0  ;;  %14935 = vmatprep.subr.bf16.mxu0 %v15188_v0  ;;  %14318 = vmatprep.mubr.msk.f32.mxu1 %vm15189_vm1, %v18920_v1 }
 0x1e2   : > { %v11290_v17 = vsel %vm1102_vm0, %v16546_v12, 0.0  ;;  %v13935_v18 = vpop.f32.mrb[39].mxu0  ;;  %v16555_v20 = vpop.f32.mrb[38].mxu1  ;;  %14939 = vmatprep.subr.bf16.mxu1 %v15188_v0 }
 0x1e3   : > { %v11291_v25 = vadd.f32 %v11290_v17, %v11289_v63  ;;  %v11292_v26 = vsel %vm1102_vm0, %v16555_v20, 0.0  ;;  %v13942_v27 = vpop.f32.mrb[39].mxu1  ;;  %v812_v17 = vld [vmem:[%s15570_s22 + $0x2f0] sm:$0xff]  ;;  %v14944_v18 = vpack.c.bf16 %v1039_v50, %v1038_v46 }
 0x1e5   : > { %v11293_v45 = vadd.f32 %v11292_v26, %v11291_v25  ;;  %v813_v25 = vld [vmem:[%s15570_s22 + $0x2f8] sm:$0xff]  ;;  %v14948_v26 = vpack.c.bf16 %v1041_v58, %v1040_v55 }
 0x1e6   : > { %14312 = vmatmul.mubr.msk.f32.vlgmr.msra.gmra.mrb[92].mxu0 %vm1102_vm0, %v810_v36  ;;  %v1042_v36 = vld [vmem:[%s15545_s21 + $0x620] sm:$0xff] }
 0x1e7   : > { %14938 = vmatpush3.bf16.xpose.msk.msra.mxu0 %vm15549_vm2, %v14936_v37  ;;  %14319 = vmatmul.mubr.msk.f32.vlgmr.msra.gmra.mrb[92].mxu1 %vm1102_vm0, %v811_v39  ;;  %v1043_v37 = vld [vmem:[%s15545_s21 + $0x628] sm:$0xff] }
 0x1e8   : > { %14942 = vmatpush3.bf16.xpose.msk.msra.mxu1 %vm15549_vm2, %v14940_v40  ;;  %14325 = vmatprep.mubr.msk.f32.mxu0 %vm15189_vm1, %v18920_v1  ;;  %v1044_v40 = vld [vmem:[%s15545_s21 + $0x630] sm:$0xff] }
 0x1e9   : > { %v16572_v51 = vpop.f32.mrb[40].mxu0  ;;  %14943 = vmatprep.subr.bf16.mxu0 %v15188_v0  ;;  %14332 = vmatprep.mubr.msk.f32.mxu1 %vm15189_vm1, %v18920_v1 }
 0x1ea   : > { %v11294_v60 = vsel %vm1102_vm0, %v16572_v51, 0.0  ;;  %v13949_v63 = vpop.f32.mrb[41].mxu0  ;;  %v16581_v6 = vpop.f32.mrb[40].mxu1  ;;  %14947 = vmatprep.subr.bf16.mxu1 %v15188_v0 }
 0x1eb   : > { %v11295_v11 = vadd.f32 %v11294_v60, %v11293_v45  ;;  %v11296_v13 = vsel %vm1102_vm0, %v16581_v6, 0.0  ;;  %v13956_v16 = vpop.f32.mrb[41].mxu1  ;;  %v1045_v45 = vld [vmem:[%s15545_s21 + $0x638] sm:$0xff] }
 0x1ec   : > { %v815_v16 = vld [vmem:[%s15570_s22 + $0x308] sm:$0xff] }
 0x1ed   : > { %v11297_v27 = vadd.f32 %v11296_v13, %v11295_v11  ;;  %v814_v11 = vld [vmem:[%s15570_s22 + $0x300] sm:$0xff]  ;;  %v14952_v13 = vpack.c.bf16 %v1043_v37, %v1042_v36  ;;  %v1048_v36 = vld [vmem:[%s15545_s21 + $0x650] sm:$0xff]  ;;  %v1049_v37 = vld [vmem:[%s15545_s21 + $0x658] sm:$0xff] }
 0x1ee   : > { %14326 = vmatmul.mubr.msk.f32.vlgmr.msra.gmra.mrb[94].mxu0 %vm1102_vm0, %v812_v17  ;;  %v14956_v17 = vpack.c.bf16 %v1045_v45, %v1044_v40 }
 0x1ef   : > { %14946 = vmatpush3.bf16.xpose.msk.msra.mxu0 %vm15549_vm2, %v14944_v18  ;;  %14333 = vmatmul.mubr.msk.f32.vlgmr.msra.gmra.mrb[94].mxu1 %vm1102_vm0, %v813_v25  ;;  %v1046_v25 = vld [vmem:[%s15545_s21 + $0x640] sm:$0xff] }
 0x1f0   : > { %14950 = vmatpush3.bf16.xpose.msk.msra.mxu1 %vm15549_vm2, %v14948_v26  ;;  %14339 = vmatprep.mubr.msk.f32.mxu0 %vm15189_vm1, %v18920_v1  ;;  %v1047_v26 = vld [vmem:[%s15545_s21 + $0x648] sm:$0xff] }
 0x1f1   : > { %v16598_v39 = vpop.f32.mrb[42].mxu0  ;;  %14951 = vmatprep.subr.bf16.mxu0 %v15188_v0  ;;  %14346 = vmatprep.mubr.msk.f32.mxu1 %vm15189_vm1, %v18920_v1 }
 0x1f2   : > { %v11298_v46 = vsel %vm1102_vm0, %v16598_v39, 0.0  ;;  %v13963_v50 = vpop.f32.mrb[43].mxu0  ;;  %v16607_v55 = vpop.f32.mrb[42].mxu1  ;;  %14955 = vmatprep.subr.bf16.mxu1 %v15188_v0 }
 0x1f3   : > { %v11299_v58 = vadd.f32 %v11298_v46, %v11297_v27  ;;  %v11300_v60 = vsel %vm1102_vm0, %v16607_v55, 0.0  ;;  %v13970_v63 = vpop.f32.mrb[43].mxu1 }
 0x1f4   : > { %v816_v63 = vld [vmem:[%s15570_s22 + $0x310] sm:$0xff] }
 0x1f5   : > { %v11301_v18 = vadd.f32 %v11300_v60, %v11299_v58 }
 0x1f6   : > { %14340 = vmatmul.mubr.msk.f32.vlgmr.msra.gmra.mrb[96].mxu0 %vm1102_vm0, %v814_v11  ;;  %v14960_v11 = vpack.c.bf16 %v1047_v26, %v1046_v25  ;;  %v1051_v25 = vld [vmem:[%s15545_s21 + $0x668] sm:$0xff] }
 0x1f7   : > { %14954 = vmatpush3.bf16.xpose.msk.msra.mxu0 %vm15549_vm2, %v14952_v13  ;;  %14347 = vmatmul.mubr.msk.f32.vlgmr.msra.gmra.mrb[96].mxu1 %vm1102_vm0, %v815_v16  ;;  %v817_v13 = vld [vmem:[%s15570_s22 + $0x318] sm:$0xff]  ;;  %v14964_v16 = vpack.c.bf16 %v1049_v37, %v1048_v36  ;;  %v1052_v36 = vld [vmem:[%s15545_s21 + $0x670] sm:$0xff] }
 0x1f8   : > { %14958 = vmatpush3.bf16.xpose.msk.msra.mxu1 %vm15549_vm2, %v14956_v17  ;;  %14353 = vmatprep.mubr.msk.f32.mxu0 %vm15189_vm1, %v18920_v1  ;;  %v1053_v37 = vld [vmem:[%s15545_s21 + $0x678] sm:$0xff] }
 0x1f9   : > { %v16624_v27 = vpop.f32.mrb[44].mxu0  ;;  %14959 = vmatprep.subr.bf16.mxu0 %v15188_v0  ;;  %14360 = vmatprep.mubr.msk.f32.mxu1 %vm15189_vm1, %v18920_v1 }
 0x1fa   : > { %19089 = vst [vmem:[#allocation4_spill] sm:$0xff] %v16624_v27  ;;  %v11302_v40 = vsel %vm1102_vm0, %v16624_v27, 0.0  ;;  %v13977_v45 = vpop.f32.mrb[45].mxu0  ;;  %v16633_v46 = vpop.f32.mrb[44].mxu1  ;;  %14963 = vmatprep.subr.bf16.mxu1 %v15188_v0 }
 0x1fb   : > { %19090 = vst [vmem:[#allocation5_spill] sm:$0xff] %v16633_v46  ;;  %v11303_v50 = vadd.f32 %v11302_v40, %v11301_v18  ;;  %v11304_v58 = vsel %vm1102_vm0, %v16633_v46, 0.0  ;;  %v13984_v60 = vpop.f32.mrb[45].mxu1  ;;  %v1050_v18 = vld [vmem:[%s15545_s21 + $0x660] sm:$0xff] }
 0x1fd   : > { %v11305_v17 = vadd.f32 %v11304_v58, %v11303_v50 }
 0x1fe   : > { %14354 = vmatmul.mubr.msk.f32.vlgmr.msra.gmra.mrb[98].mxu0 %vm1102_vm0, %v816_v63 }
 0x1ff   : > { %14962 = vmatpush3.bf16.xpose.msk.msra.mxu0 %vm15549_vm2, %v14960_v11  ;;  %14361 = vmatmul.mubr.msk.f32.vlgmr.msra.gmra.mrb[98].mxu1 %vm1102_vm0, %v817_v13  ;;  %v818_v11 = vld [vmem:[%s15570_s22 + $0x320] sm:$0xff]  ;;  %v14968_v13 = vpack.c.bf16 %v1051_v25, %v1050_v18  ;;  %v1055_v18 = vld [vmem:[%s15545_s21 + $0x688] sm:$0xff] }
 0x200   : > { %14966 = vmatpush3.bf16.xpose.msk.msra.mxu1 %vm15549_vm2, %v14964_v16  ;;  %14367 = vmatprep.mubr.msk.f32.mxu0 %vm15189_vm1, %v18920_v1  ;;  %v819_v16 = vld [vmem:[%s15570_s22 + $0x328] sm:$0xff] }
 0x201   : > { %v16650_v26 = vpop.f32.mrb[46].mxu0  ;;  %14967 = vmatprep.subr.bf16.mxu0 %v15188_v0  ;;  %14374 = vmatprep.mubr.msk.f32.mxu1 %vm15189_vm1, %v18920_v1  ;;  %v14972_v1 = vpack.c.bf16 %v1053_v37, %v1052_v36  ;;  %v1056_v36 = vld [vmem:[%s15545_s21 + $0x690] sm:$0xff]  ;;  %v1057_v37 = vld [vmem:[%s15545_s21 + $0x698] sm:$0xff] }
 0x202   : > { %19091 = vst [vmem:[#allocation6_spill] sm:$0xff] %v16650_v26  ;;  %v11306_v40 = vsel %vm1102_vm0, %v16650_v26, 0.0  ;;  %v13991_v45 = vpop.f32.mrb[47].mxu0  ;;  %v16659_v50 = vpop.f32.mrb[46].mxu1  ;;  %14971 = vmatprep.subr.bf16.mxu1 %v15188_v0  ;;  %v14980_v26 = vpack.c.bf16 %v1057_v37, %v1056_v36  ;;  %v1060_v36 = vld [vmem:[%s15545_s21 + $0x6b0] sm:$0xff]  ;;  %v1061_v37 = vld [vmem:[%s15545_s21 + $0x6b8] sm:$0xff] }
 0x203   : > { %19092 = vst [vmem:[#allocation7_spill] sm:$0xff] %v16659_v50  ;;  %v11307_v58 = vadd.f32 %v11306_v40, %v11305_v17  ;;  %v11308_v60 = vsel %vm1102_vm0, %v16659_v50, 0.0  ;;  %v13998_v63 = vpop.f32.mrb[47].mxu1  ;;  %v19093_v17 = vmov 0.0   ;;  %v1054_v40 = vld [vmem:[%s15545_s21 + $0x680] sm:$0xff]  ;;  %v821_v50 = vld [vmem:[%s15570_s22 + $0x338] sm:$0xff] }
 0x205   : > { %v11309_v46 = vadd.f32 %v11308_v60, %v11307_v58 }
 0x206   : > { %14368 = vmatmul.mubr.msk.f32.vlgmr.msra.gmra.mrb[100].mxu0 %vm1102_vm0, %v818_v11 }
 0x207   : > { %14970 = vmatpush3.bf16.xpose.msk.msra.mxu0 %vm15549_vm2, %v14968_v13  ;;  %14375 = vmatmul.mubr.msk.f32.vlgmr.msra.gmra.mrb[100].mxu1 %vm1102_vm0, %v819_v16  ;;  %v820_v13 = vld [vmem:[%s15570_s22 + $0x330] sm:$0xff]  ;;  %v14976_v16 = vpack.c.bf16 %v1055_v18, %v1054_v40  ;;  %v1059_v40 = vld [vmem:[%s15545_s21 + $0x6a8] sm:$0xff] }
 0x208   : > { %14974 = vmatpush3.bf16.xpose.msk.msra.mxu1 %vm15549_vm2, %v14972_v1  ;;  %14381 = vmatprep.mubr.msk.f32.mxu0 %vm15189_vm1, %v19093_v17 }
 0x209   : > { %v16676_v25 = vpop.f32.mrb[48].mxu0  ;;  %14975 = vmatprep.subr.bf16.mxu0 %v15188_v0  ;;  %14388 = vmatprep.mubr.msk.f32.mxu1 %vm15189_vm1, %v19093_v17 }
 0x20a   : > { %19094 = vst [vmem:[#allocation8_spill] sm:$0xff] %v16676_v25  ;;  %v11310_v45 = vsel %vm1102_vm0, %v16676_v25, 0.0  ;;  %v14005_v1 = vpop.f32.mrb[49].mxu0  ;;  %v16685_v58 = vpop.f32.mrb[48].mxu1  ;;  %14979 = vmatprep.subr.bf16.mxu1 %v15188_v0 }
 0x20b   : > { %19095 = vst [vmem:[#allocation9_spill] sm:$0xff] %v16685_v58  ;;  %v11311_v60 = vadd.f32 %v11310_v45, %v11309_v46  ;;  %v11312_v63 = vsel %vm1102_vm0, %v16685_v58, 0.0  ;;  %v14012_v11 = vpop.f32.mrb[49].mxu1  ;;  %v1058_v46 = vld [vmem:[%s15545_s21 + $0x6a0] sm:$0xff]  ;;  %v14988_v58 = vpack.c.bf16 %v1061_v37, %v1060_v36  ;;  %v1064_v36 = vld [vmem:[%s15545_s21 + $0x6d0] sm:$0xff]  ;;  %v1065_v37 = vld [vmem:[%s15545_s21 + $0x6d8] sm:$0xff] }
 0x20c   : > { %v822_v11 = vld [vmem:[%s15570_s22 + $0x340] sm:$0xff] }
 0x20d   : > { %v11313_v27 = vadd.f32 %v11312_v63, %v11311_v60 }
 0x20e   : > { %14382 = vmatmul.mubr.msk.f32.vlgmr.msra.gmra.mrb[102].mxu0 %vm1102_vm0, %v820_v13  ;;  %v14984_v13 = vpack.c.bf16 %v1059_v40, %v1058_v46  ;;  %v1063_v46 = vld [vmem:[%s15545_s21 + $0x6c8] sm:$0xff] }
 0x20f   : > { %14978 = vmatpush3.bf16.xpose.msk.msra.mxu0 %vm15549_vm2, %v14976_v16  ;;  %14389 = vmatmul.mubr.msk.f32.vlgmr.msra.gmra.mrb[102].mxu1 %vm1102_vm0, %v821_v50  ;;  %v823_v16 = vld [vmem:[%s15570_s22 + $0x348] sm:$0xff] }
 0x210   : > { %14982 = vmatpush3.bf16.xpose.msk.msra.mxu1 %vm15549_vm2, %v14980_v26  ;;  %14395 = vmatprep.mubr.msk.f32.mxu0 %vm15189_vm1, %v19093_v17 }
 0x211   : > { %v16702_v18 = vpop.f32.mrb[50].mxu0  ;;  %14983 = vmatprep.subr.bf16.mxu0 %v15188_v0  ;;  %14402 = vmatprep.mubr.msk.f32.mxu1 %vm15189_vm1, %v19093_v17 }
 0x212   : > { %19096 = vst [vmem:[#allocation10_spill] sm:$0xff] %v16702_v18  ;;  %v11314_v50 = vsel %vm1102_vm0, %v16702_v18, 0.0  ;;  %v14019_v26 = vpop.f32.mrb[51].mxu0  ;;  %v16711_v45 = vpop.f32.mrb[50].mxu1  ;;  %14987 = vmatprep.subr.bf16.mxu1 %v15188_v0 }
 0x213   : > { %19097 = vst [vmem:[#allocation11_spill] sm:$0xff] %v16711_v45  ;;  %v11315_v1 = vadd.f32 %v11314_v50, %v11313_v27  ;;  %v11316_v60 = vsel %vm1102_vm0, %v16711_v45, 0.0  ;;  %v14026_v63 = vpop.f32.mrb[51].mxu1  ;;  %v1062_v27 = vld [vmem:[%s15545_s21 + $0x6c0] sm:$0xff]  ;;  %v14996_v45 = vpack.c.bf16 %v1065_v37, %v1064_v36  ;;  %v1068_v36 = vld [vmem:[%s15545_s21 + $0x6f0] sm:$0xff]  ;;  %v1069_v37 = vld [vmem:[%s15545_s21 + $0x6f8] sm:$0xff] }
 0x215   : > { %v11317_v25 = vadd.f32 %v11316_v60, %v11315_v1 }
 0x216   : > { %14396 = vmatmul.mubr.msk.f32.vlgmr.msra.gmra.mrb[104].mxu0 %vm1102_vm0, %v822_v11  ;;  %v824_v11 = vld [vmem:[%s15570_s22 + $0x350] sm:$0xff] }
 0x217   : > { %14986 = vmatpush3.bf16.xpose.msk.msra.mxu0 %vm15549_vm2, %v14984_v13  ;;  %14403 = vmatmul.mubr.msk.f32.vlgmr.msra.gmra.mrb[104].mxu1 %vm1102_vm0, %v823_v16  ;;  %v14992_v13 = vpack.c.bf16 %v1063_v46, %v1062_v27  ;;  %v825_v16 = vld [vmem:[%s15570_s22 + $0x358] sm:$0xff]  ;;  %v1067_v27 = vld [vmem:[%s15545_s21 + $0x6e8] sm:$0xff] }
 0x218   : > { %14990 = vmatpush3.bf16.xpose.msk.msra.mxu1 %vm15549_vm2, %v14988_v58  ;;  %14409 = vmatprep.mubr.msk.f32.mxu0 %vm15189_vm1, %v19093_v17 }
 0x219   : > { %v16728_v40 = vpop.f32.mrb[52].mxu0  ;;  %14991 = vmatprep.subr.bf16.mxu0 %v15188_v0  ;;  %14416 = vmatprep.mubr.msk.f32.mxu1 %vm15189_vm1, %v19093_v17 }
 0x21a   : > { %19098 = vst [vmem:[#allocation12_spill] sm:$0xff] %v16728_v40  ;;  %v11318_v50 = vsel %vm1102_vm0, %v16728_v40, 0.0  ;;  %v14033_v58 = vpop.f32.mrb[53].mxu0  ;;  %v16737_v26 = vpop.f32.mrb[52].mxu1  ;;  %14995 = vmatprep.subr.bf16.mxu1 %v15188_v0 }
 0x21b   : > { %19099 = vst [vmem:[#allocation13_spill] sm:$0xff] %v16737_v26  ;;  %v11319_v1 = vadd.f32 %v11318_v50, %v11317_v25  ;;  %v11320_v60 = vsel %vm1102_vm0, %v16737_v26, 0.0  ;;  %v14040_v63 = vpop.f32.mrb[53].mxu1  ;;  %v1066_v25 = vld [vmem:[%s15545_s21 + $0x6e0] sm:$0xff]  ;;  %v15004_v26 = vpack.c.bf16 %v1069_v37, %v1068_v36  ;;  %v1072_v36 = vld [vmem:[%s15545_s21 + $0x710] sm:$0xff]  ;;  %v1073_v37 = vld [vmem:[%s15545_s21 + $0x718] sm:$0xff] }
 0x21d   : > { %v11321_v18 = vadd.f32 %v11320_v60, %v11319_v1 }
 0x21e   : > { %14410 = vmatmul.mubr.msk.f32.vlgmr.msra.gmra.mrb[106].mxu0 %vm1102_vm0, %v824_v11  ;;  %v826_v11 = vld [vmem:[%s15570_s22 + $0x360] sm:$0xff] }
 0x21f   : > { %14994 = vmatpush3.bf16.xpose.msk.msra.mxu0 %vm15549_vm2, %v14992_v13  ;;  %14417 = vmatmul.mubr.msk.f32.vlgmr.msra.gmra.mrb[106].mxu1 %vm1102_vm0, %v825_v16  ;;  %v15000_v13 = vpack.c.bf16 %v1067_v27, %v1066_v25  ;;  %v827_v16 = vld [vmem:[%s15570_s22 + $0x368] sm:$0xff] }
 0x220   : > { %14998 = vmatpush3.bf16.xpose.msk.msra.mxu1 %vm15549_vm2, %v14996_v45  ;;  %14423 = vmatprep.mubr.msk.f32.mxu0 %vm15189_vm1, %v19093_v17  ;;  %v1071_v25 = vld [vmem:[%s15545_s21 + $0x708] sm:$0xff] }
 0x221   : > { %v16754_v46 = vpop.f32.mrb[54].mxu0  ;;  %14999 = vmatprep.subr.bf16.mxu0 %v15188_v0  ;;  %14430 = vmatprep.mubr.msk.f32.mxu1 %vm15189_vm1, %v19093_v17 }
 0x222   : > { %19100 = vst [vmem:[#allocation14_spill] sm:$0xff] %v16754_v46  ;;  %v11322_v50 = vsel %vm1102_vm0, %v16754_v46, 0.0  ;;  %v14047_v45 = vpop.f32.mrb[55].mxu0  ;;  %v16763_v58 = vpop.f32.mrb[54].mxu1  ;;  %15003 = vmatprep.subr.bf16.mxu1 %v15188_v0 }
 0x223   : > { %19101 = vst [vmem:[#allocation15_spill] sm:$0xff] %v16763_v58  ;;  %v11323_v1 = vadd.f32 %v11322_v50, %v11321_v18  ;;  %v11324_v60 = vsel %vm1102_vm0, %v16763_v58, 0.0  ;;  %v14054_v63 = vpop.f32.mrb[55].mxu1  ;;  %v1070_v18 = vld [vmem:[%s15545_s21 + $0x700] sm:$0xff]  ;;  %v15012_v58 = vpack.c.bf16 %v1073_v37, %v1072_v36  ;;  %v1076_v36 = vld [vmem:[%s15545_s21 + $0x730] sm:$0xff]  ;;  %v1077_v37 = vld [vmem:[%s15545_s21 + $0x738] sm:$0xff] }
 0x225   : > { %v11325_v40 = vadd.f32 %v11324_v60, %v11323_v1 }
 0x226   : > { %14424 = vmatmul.mubr.msk.f32.vlgmr.msra.gmra.mrb[108].mxu0 %vm1102_vm0, %v826_v11  ;;  %v828_v11 = vld [vmem:[%s15570_s22 + $0x370] sm:$0xff] }
 0x227   : > { %15002 = vmatpush3.bf16.xpose.msk.msra.mxu0 %vm15549_vm2, %v15000_v13  ;;  %14431 = vmatmul.mubr.msk.f32.vlgmr.msra.gmra.mrb[108].mxu1 %vm1102_vm0, %v827_v16  ;;  %v15008_v13 = vpack.c.bf16 %v1071_v25, %v1070_v18  ;;  %v829_v16 = vld [vmem:[%s15570_s22 + $0x378] sm:$0xff]  ;;  %v1075_v18 = vld [vmem:[%s15545_s21 + $0x728] sm:$0xff] }
 0x228   : > { %15006 = vmatpush3.bf16.xpose.msk.msra.mxu1 %vm15549_vm2, %v15004_v26  ;;  %14437 = vmatprep.mubr.msk.f32.mxu0 %vm15189_vm1, %v19093_v17 }
 0x229   : > { %v16780_v27 = vpop.f32.mrb[56].mxu0  ;;  %15007 = vmatprep.subr.bf16.mxu0 %v15188_v0  ;;  %14444 = vmatprep.mubr.msk.f32.mxu1 %vm15189_vm1, %v19093_v17 }
 0x22a   : > { %19102 = vst [vmem:[#allocation16_spill] sm:$0xff] %v16780_v27  ;;  %v11326_v50 = vsel %vm1102_vm0, %v16780_v27, 0.0  ;;  %v14061_v26 = vpop.f32.mrb[57].mxu0  ;;  %v16789_v45 = vpop.f32.mrb[56].mxu1  ;;  %15011 = vmatprep.subr.bf16.mxu1 %v15188_v0 }
 0x22b   : > { %19103 = vst [vmem:[#allocation17_spill] sm:$0xff] %v16789_v45  ;;  %v11327_v1 = vadd.f32 %v11326_v50, %v11325_v40  ;;  %v11328_v60 = vsel %vm1102_vm0, %v16789_v45, 0.0  ;;  %v14068_v63 = vpop.f32.mrb[57].mxu1  ;;  %v1074_v40 = vld [vmem:[%s15545_s21 + $0x720] sm:$0xff]  ;;  %v15020_v45 = vpack.c.bf16 %v1077_v37, %v1076_v36  ;;  %v1080_v36 = vld [vmem:[%s15545_s21 + $0x750] sm:$0xff]  ;;  %v1081_v37 = vld [vmem:[%s15545_s21 + $0x758] sm:$0xff] }
 0x22d   : > { %v11329_v46 = vadd.f32 %v11328_v60, %v11327_v1 }
 0x22e   : > { %14438 = vmatmul.mubr.msk.f32.vlgmr.msra.gmra.mrb[110].mxu0 %vm1102_vm0, %v828_v11  ;;  %v830_v11 = vld [vmem:[%s15570_s22 + $0x380] sm:$0xff] }
 0x22f   : > { %15010 = vmatpush3.bf16.xpose.msk.msra.mxu0 %vm15549_vm2, %v15008_v13  ;;  %14445 = vmatmul.mubr.msk.f32.vlgmr.msra.gmra.mrb[110].mxu1 %vm1102_vm0, %v829_v16  ;;  %v15016_v13 = vpack.c.bf16 %v1075_v18, %v1074_v40  ;;  %v831_v16 = vld [vmem:[%s15570_s22 + $0x388] sm:$0xff] }
 0x230   : > { %15014 = vmatpush3.bf16.xpose.msk.msra.mxu1 %vm15549_vm2, %v15012_v58  ;;  %14451 = vmatprep.mubr.msk.f32.mxu0 %vm15189_vm1, %v19093_v17  ;;  %v1079_v40 = vld [vmem:[%s15545_s21 + $0x748] sm:$0xff] }
 0x231   : > { %v16806_v25 = vpop.f32.mrb[58].mxu0  ;;  %15015 = vmatprep.subr.bf16.mxu0 %v15188_v0  ;;  %14458 = vmatprep.mubr.msk.f32.mxu1 %vm15189_vm1, %v19093_v17 }
 0x232   : > { %19104 = vst [vmem:[#allocation18_spill] sm:$0xff] %v16806_v25  ;;  %v11330_v50 = vsel %vm1102_vm0, %v16806_v25, 0.0  ;;  %v14075_v58 = vpop.f32.mrb[59].mxu0  ;;  %v16815_v26 = vpop.f32.mrb[58].mxu1  ;;  %15019 = vmatprep.subr.bf16.mxu1 %v15188_v0 }
 0x233   : > { %19105 = vst [vmem:[#allocation19_spill] sm:$0xff] %v16815_v26  ;;  %v11331_v1 = vadd.f32 %v11330_v50, %v11329_v46  ;;  %v11332_v60 = vsel %vm1102_vm0, %v16815_v26, 0.0  ;;  %v14082_v63 = vpop.f32.mrb[59].mxu1  ;;  %v1078_v46 = vld [vmem:[%s15545_s21 + $0x740] sm:$0xff]  ;;  %v15028_v26 = vpack.c.bf16 %v1081_v37, %v1080_v36  ;;  %v1084_v36 = vld [vmem:[%s15545_s21 + $0x770] sm:$0xff]  ;;  %v1085_v37 = vld [vmem:[%s15545_s21 + $0x778] sm:$0xff] }
 0x235   : > { %v11333_v27 = vadd.f32 %v11332_v60, %v11331_v1 }
 0x236   : > { %14452 = vmatmul.mubr.msk.f32.vlgmr.msra.gmra.mrb[112].mxu0 %vm1102_vm0, %v830_v11  ;;  %v832_v11 = vld [vmem:[%s15570_s22 + $0x390] sm:$0xff] }
 0x237   : > { %15018 = vmatpush3.bf16.xpose.msk.msra.mxu0 %vm15549_vm2, %v15016_v13  ;;  %14459 = vmatmul.mubr.msk.f32.vlgmr.msra.gmra.mrb[112].mxu1 %vm1102_vm0, %v831_v16  ;;  %v15024_v13 = vpack.c.bf16 %v1079_v40, %v1078_v46  ;;  %v833_v16 = vld [vmem:[%s15570_s22 + $0x398] sm:$0xff]  ;;  %v1083_v46 = vld [vmem:[%s15545_s21 + $0x768] sm:$0xff] }
 0x238   : > { %15022 = vmatpush3.bf16.xpose.msk.msra.mxu1 %vm15549_vm2, %v15020_v45  ;;  %14465 = vmatprep.mubr.msk.f32.mxu0 %vm15189_vm1, %v19093_v17 }
 0x239   : > { %v16832_v18 = vpop.f32.mrb[60].mxu0  ;;  %15023 = vmatprep.subr.bf16.mxu0 %v15188_v0  ;;  %14472 = vmatprep.mubr.msk.f32.mxu1 %vm15189_vm1, %v19093_v17 }
 0x23a   : > { %19106 = vst [vmem:[#allocation20_spill] sm:$0xff] %v16832_v18  ;;  %v11334_v50 = vsel %vm1102_vm0, %v16832_v18, 0.0  ;;  %v14089_v45 = vpop.f32.mrb[61].mxu0  ;;  %v16841_v58 = vpop.f32.mrb[60].mxu1  ;;  %15027 = vmatprep.subr.bf16.mxu1 %v15188_v0 }
 0x23b   : > { %19107 = vst [vmem:[#allocation21_spill] sm:$0xff] %v16841_v58  ;;  %v11335_v1 = vadd.f32 %v11334_v50, %v11333_v27  ;;  %v11336_v60 = vsel %vm1102_vm0, %v16841_v58, 0.0  ;;  %v14096_v63 = vpop.f32.mrb[61].mxu1  ;;  %v1082_v27 = vld [vmem:[%s15545_s21 + $0x760] sm:$0xff]  ;;  %v15036_v58 = vpack.c.bf16 %v1085_v37, %v1084_v36  ;;  %v1088_v36 = vld [vmem:[%s15545_s21 + $0x790] sm:$0xff]  ;;  %v1089_v37 = vld [vmem:[%s15545_s21 + $0x798] sm:$0xff] }
 0x23d   : > { %v11337_v25 = vadd.f32 %v11336_v60, %v11335_v1 }
 0x23e   : > { %14466 = vmatmul.mubr.msk.f32.vlgmr.msra.gmra.mrb[114].mxu0 %vm1102_vm0, %v832_v11  ;;  %v834_v11 = vld [vmem:[%s15570_s22 + $0x3a0] sm:$0xff] }
 0x23f   : > { %15026 = vmatpush3.bf16.xpose.msk.msra.mxu0 %vm15549_vm2, %v15024_v13  ;;  %14473 = vmatmul.mubr.msk.f32.vlgmr.msra.gmra.mrb[114].mxu1 %vm1102_vm0, %v833_v16  ;;  %v15032_v13 = vpack.c.bf16 %v1083_v46, %v1082_v27  ;;  %v835_v16 = vld [vmem:[%s15570_s22 + $0x3a8] sm:$0xff] }
 0x240   : > { %15030 = vmatpush3.bf16.xpose.msk.msra.mxu1 %vm15549_vm2, %v15028_v26  ;;  %14479 = vmatprep.mubr.msk.f32.mxu0 %vm15189_vm1, %v19093_v17  ;;  %v1087_v27 = vld [vmem:[%s15545_s21 + $0x788] sm:$0xff] }
 0x241   : > { %v16858_v40 = vpop.f32.mrb[62].mxu0  ;;  %15031 = vmatprep.subr.bf16.mxu0 %v15188_v0  ;;  %14486 = vmatprep.mubr.msk.f32.mxu1 %vm15189_vm1, %v19093_v17 }
 0x242   : > { %19108 = vst [vmem:[#allocation22_spill] sm:$0xff] %v16858_v40  ;;  %v11338_v50 = vsel %vm1102_vm0, %v16858_v40, 0.0  ;;  %v14103_v26 = vpop.f32.mrb[63].mxu0  ;;  %v16867_v45 = vpop.f32.mrb[62].mxu1  ;;  %15035 = vmatprep.subr.bf16.mxu1 %v15188_v0 }
 0x243   : > { %19109 = vst [vmem:[#allocation23_spill] sm:$0xff] %v16867_v45  ;;  %v11339_v1 = vadd.f32 %v11338_v50, %v11337_v25  ;;  %v11340_v60 = vsel %vm1102_vm0, %v16867_v45, 0.0  ;;  %v14110_v63 = vpop.f32.mrb[63].mxu1  ;;  %v1086_v25 = vld [vmem:[%s15545_s21 + $0x780] sm:$0xff]  ;;  %v15044_v45 = vpack.c.bf16 %v1089_v37, %v1088_v36  ;;  %v1092_v36 = vld [vmem:[%s15545_s21 + $0x7b0] sm:$0xff]  ;;  %v1093_v37 = vld [vmem:[%s15545_s21 + $0x7b8] sm:$0xff] }
 0x245   : > { %v11341_v18 = vadd.f32 %v11340_v60, %v11339_v1 }
 0x246   : > { %14480 = vmatmul.mubr.msk.f32.vlgmr.msra.gmra.mrb[116].mxu0 %vm1102_vm0, %v834_v11  ;;  %v836_v11 = vld [vmem:[%s15570_s22 + $0x3b0] sm:$0xff] }
 0x247   : > { %15034 = vmatpush3.bf16.xpose.msk.msra.mxu0 %vm15549_vm2, %v15032_v13  ;;  %14487 = vmatmul.mubr.msk.f32.vlgmr.msra.gmra.mrb[116].mxu1 %vm1102_vm0, %v835_v16  ;;  %v15040_v13 = vpack.c.bf16 %v1087_v27, %v1086_v25  ;;  %v837_v16 = vld [vmem:[%s15570_s22 + $0x3b8] sm:$0xff]  ;;  %v1091_v25 = vld [vmem:[%s15545_s21 + $0x7a8] sm:$0xff] }
 0x248   : > { %15038 = vmatpush3.bf16.xpose.msk.msra.mxu1 %vm15549_vm2, %v15036_v58  ;;  %14493 = vmatprep.mubr.msk.f32.mxu0 %vm15189_vm1, %v19093_v17 }
 0x249   : > { %v16884_v46 = vpop.f32.mrb[64].mxu0  ;;  %15039 = vmatprep.subr.bf16.mxu0 %v15188_v0  ;;  %14500 = vmatprep.mubr.msk.f32.mxu1 %vm15189_vm1, %v19093_v17 }
 0x24a   : > { %19110 = vst [vmem:[#allocation24_spill] sm:$0xff] %v16884_v46  ;;  %v11342_v50 = vsel %vm1102_vm0, %v16884_v46, 0.0  ;;  %v14117_v58 = vpop.f32.mrb[65].mxu0  ;;  %v16893_v26 = vpop.f32.mrb[64].mxu1  ;;  %15043 = vmatprep.subr.bf16.mxu1 %v15188_v0 }
 0x24b   : > { %19111 = vst [vmem:[#allocation25_spill] sm:$0xff] %v16893_v26  ;;  %v11343_v1 = vadd.f32 %v11342_v50, %v11341_v18  ;;  %v11344_v60 = vsel %vm1102_vm0, %v16893_v26, 0.0  ;;  %v14124_v63 = vpop.f32.mrb[65].mxu1  ;;  %v1090_v18 = vld [vmem:[%s15545_s21 + $0x7a0] sm:$0xff]  ;;  %v15052_v26 = vpack.c.bf16 %v1093_v37, %v1092_v36  ;;  %v1096_v36 = vld [vmem:[%s15545_s21 + $0x7d0] sm:$0xff]  ;;  %v1097_v37 = vld [vmem:[%s15545_s21 + $0x7d8] sm:$0xff] }
 0x24d   : > { %v11345_v40 = vadd.f32 %v11344_v60, %v11343_v1 }
 0x24e   : > { %14494 = vmatmul.mubr.msk.f32.vlgmr.msra.gmra.mrb[118].mxu0 %vm1102_vm0, %v836_v11  ;;  %v838_v11 = vld [vmem:[%s15570_s22 + $0x3c0] sm:$0xff] }
 0x24f   : > { %15042 = vmatpush3.bf16.xpose.msk.msra.mxu0 %vm15549_vm2, %v15040_v13  ;;  %14501 = vmatmul.mubr.msk.f32.vlgmr.msra.gmra.mrb[118].mxu1 %vm1102_vm0, %v837_v16  ;;  %v15048_v13 = vpack.c.bf16 %v1091_v25, %v1090_v18  ;;  %v839_v16 = vld [vmem:[%s15570_s22 + $0x3c8] sm:$0xff] }
 0x250   : > { %15046 = vmatpush3.bf16.xpose.msk.msra.mxu1 %vm15549_vm2, %v15044_v45  ;;  %14507 = vmatprep.mubr.msk.f32.mxu0 %vm15189_vm1, %v19093_v17  ;;  %v1095_v18 = vld [vmem:[%s15545_s21 + $0x7c8] sm:$0xff] }
 0x251   : > { %v16910_v27 = vpop.f32.mrb[66].mxu0  ;;  %15047 = vmatprep.subr.bf16.mxu0 %v15188_v0  ;;  %14514 = vmatprep.mubr.msk.f32.mxu1 %vm15189_vm1, %v19093_v17 }
 0x252   : > { %19112 = vst [vmem:[#allocation26_spill] sm:$0xff] %v16910_v27  ;;  %v11346_v50 = vsel %vm1102_vm0, %v16910_v27, 0.0  ;;  %v14131_v45 = vpop.f32.mrb[67].mxu0  ;;  %v16919_v58 = vpop.f32.mrb[66].mxu1  ;;  %15051 = vmatprep.subr.bf16.mxu1 %v15188_v0 }
 0x253   : > { %19113 = vst [vmem:[#allocation27_spill] sm:$0xff] %v16919_v58  ;;  %v11347_v1 = vadd.f32 %v11346_v50, %v11345_v40  ;;  %v11348_v60 = vsel %vm1102_vm0, %v16919_v58, 0.0  ;;  %v14138_v63 = vpop.f32.mrb[67].mxu1  ;;  %v1094_v40 = vld [vmem:[%s15545_s21 + $0x7c0] sm:$0xff]  ;;  %v15060_v58 = vpack.c.bf16 %v1097_v37, %v1096_v36  ;;  %v1100_v36 = vld [vmem:[%s15545_s21 + $0x7f0] sm:$0xff]  ;;  %v1101_v37 = vld [vmem:[%s15545_s21 + $0x7f8] sm:$0xff] }
 0x255   : > { %v11349_v46 = vadd.f32 %v11348_v60, %v11347_v1 }
 0x256   : > { %14508 = vmatmul.mubr.msk.f32.vlgmr.msra.gmra.mrb[120].mxu0 %vm1102_vm0, %v838_v11  ;;  %v840_v11 = vld [vmem:[%s15570_s22 + $0x3d0] sm:$0xff] }
 0x257   : > { %15050 = vmatpush3.bf16.xpose.msk.msra.mxu0 %vm15549_vm2, %v15048_v13  ;;  %14515 = vmatmul.mubr.msk.f32.vlgmr.msra.gmra.mrb[120].mxu1 %vm1102_vm0, %v839_v16  ;;  %v15056_v13 = vpack.c.bf16 %v1095_v18, %v1094_v40  ;;  %v841_v16 = vld [vmem:[%s15570_s22 + $0x3d8] sm:$0xff]  ;;  %v1099_v40 = vld [vmem:[%s15545_s21 + $0x7e8] sm:$0xff] }
 0x258   : > { %15054 = vmatpush3.bf16.xpose.msk.msra.mxu1 %vm15549_vm2, %v15052_v26  ;;  %14521 = vmatprep.mubr.msk.f32.mxu0 %vm15189_vm1, %v19093_v17 }
 0x259   : > { %v16936_v25 = vpop.f32.mrb[68].mxu0  ;;  %15055 = vmatprep.subr.bf16.mxu0 %v15188_v0  ;;  %14528 = vmatprep.mubr.msk.f32.mxu1 %vm15189_vm1, %v19093_v17 }
 0x25a   : > { %19114 = vst [vmem:[#allocation28_spill] sm:$0xff] %v16936_v25  ;;  %v11350_v50 = vsel %vm1102_vm0, %v16936_v25, 0.0  ;;  %v14145_v26 = vpop.f32.mrb[69].mxu0  ;;  %v16945_v45 = vpop.f32.mrb[68].mxu1  ;;  %15059 = vmatprep.subr.bf16.mxu1 %v15188_v0 }
 0x25b   : > { %19115 = vst [vmem:[#allocation29_spill] sm:$0xff] %v16945_v45  ;;  %v11351_v1 = vadd.f32 %v11350_v50, %v11349_v46  ;;  %v11352_v60 = vsel %vm1102_vm0, %v16945_v45, 0.0  ;;  %v14152_v63 = vpop.f32.mrb[69].mxu1  ;;  %v1098_v46 = vld [vmem:[%s15545_s21 + $0x7e0] sm:$0xff]  ;;  %v15068_v45 = vpack.c.bf16 %v1101_v37, %v1100_v36 }
 0x25d   : > { %v11353_v27 = vadd.f32 %v11352_v60, %v11351_v1 }
 0x25e   : > { %14522 = vmatmul.mubr.msk.f32.vlgmr.msra.gmra.mrb[122].mxu0 %vm1102_vm0, %v840_v11  ;;  %v842_v11 = vld [vmem:[%s15570_s22 + $0x3e0] sm:$0xff] }
 0x25f   : > { %15058 = vmatpush3.bf16.xpose.msk.msra.mxu0 %vm15549_vm2, %v15056_v13  ;;  %14529 = vmatmul.mubr.msk.f32.vlgmr.msra.gmra.mrb[122].mxu1 %vm1102_vm0, %v841_v16  ;;  %v15064_v13 = vpack.c.bf16 %v1099_v40, %v1098_v46  ;;  %v843_v16 = vld [vmem:[%s15570_s22 + $0x3e8] sm:$0xff] }
 0x260   : > { %15062 = vmatpush3.bf16.xpose.msk.msra.mxu1 %vm15549_vm2, %v15060_v58  ;;  %14535 = vmatprep.mubr.msk.f32.mxu0 %vm15189_vm1, %v19093_v17 }
 0x261   : > { %v16962_v18 = vpop.f32.mrb[70].mxu0  ;;  %15063 = vmatprep.subr.bf16.mxu0 %v15188_v0  ;;  %14542 = vmatprep.mubr.msk.f32.mxu1 %vm15189_vm1, %v19093_v17 }
 0x262   : > { %v11354_v50 = vsel %vm1102_vm0, %v16962_v18, 0.0  ;;  %v14159_v58 = vpop.f32.mrb[71].mxu0  ;;  %v16971_v26 = vpop.f32.mrb[70].mxu1  ;;  %15067 = vmatprep.subr.bf16.mxu1 %v15188_v0 }
 0x263   : > { %v11355_v1 = vadd.f32 %v11354_v50, %v11353_v27  ;;  %v11356_v60 = vsel %vm1102_vm0, %v16971_v26, 0.0  ;;  %v14166_v63 = vpop.f32.mrb[71].mxu1  ;;  %v845_v50 = vld [vmem:[%s15570_s22 + $0x3f8] sm:$0xff] }
 0x265   : > { %v11357_v25 = vadd.f32 %v11356_v60, %v11355_v1 }
 0x266   : > { %14536 = vmatmul.mubr.msk.f32.vlgmr.msra.gmra.mrb[124].mxu0 %vm1102_vm0, %v842_v11 }
 0x267   : > { %15066 = vmatpush3.bf16.xpose.msk.msra.mxu0 %vm15549_vm2, %v15064_v13  ;;  %14543 = vmatmul.mubr.msk.f32.vlgmr.msra.gmra.mrb[124].mxu1 %vm1102_vm0, %v843_v16 }
 0x268   : > { %15070 = vmatpush3.bf16.xpose.msk.msra.mxu1 %vm15549_vm2, %v15068_v45  ;;  %14549 = vmatprep.mubr.msk.f32.mxu0 %vm15189_vm1, %v19093_v17  ;;  %v844_v45 = vld [vmem:[%s15570_s22 + $0x3f0] sm:$0xff] }
 0x269   : > { %v16986_v0 = vpop.f32.mrb[72].mxu0  ;;  %14556 = vmatprep.mubr.msk.f32.mxu1 %vm15189_vm1, %v19093_v17 }
 0x26a   : > { %v11358_v27 = vsel %vm1102_vm0, %v16986_v0, 0.0  ;;  %v14173_v46 = vpop.f32.mrb[73].mxu0  ;;  %v16992_v40 = vpop.f32.mrb[72].mxu1 }
 0x26b   : > { %v11359_v36 = vadd.f32 %v11358_v27, %v11357_v25  ;;  %v11360_v37 = vsel %vm1102_vm0, %v16992_v40, 0.0  ;;  %v14180_v2 = vpop.f32.mrb[73].mxu1 }
 0x26d   : > { %v11361_v58 = vadd.f32 %v11360_v37, %v11359_v36 }
 0x26e   : > { %14550 = vmatmul.mubr.msk.f32.vlgmr.msra.gmra.mrb[126].mxu0 %vm1102_vm0, %v844_v45 }
 0x26f   : > { %14557 = vmatmul.mubr.msk.f32.vlgmr.msra.gmra.mrb[126].mxu1 %vm1102_vm0, %v845_v50 }
 0x271   : > { %v17000_v1 = vpop.f32.mrb[74].mxu0 }
 0x272   : > { %v11362_v17 = vsel %vm1102_vm0, %v17000_v1, 0.0  ;;  %v14187_v60 = vpop.f32.mrb[75].mxu0  ;;  %v17004_v63 = vpop.f32.mrb[74].mxu1 }
 0x273   : > { %19116 = vst [vmem:[#allocation30_spill] sm:$0xff] %v17004_v63  ;;  %v11363_v25 = vadd.f32 %v11362_v17, %v11361_v58  ;;  %v11364_v11 = vsel %vm1102_vm0, %v17004_v63, 0.0  ;;  %v14194_v13 = vpop.f32.mrb[75].mxu1 }
 0x275   : > { %v11365_v16 = vadd.f32 %v11364_v11, %v11363_v25 }
 0x279   : > { %v17008_v27 = vpop.f32.mrb[76].mxu0 }
 0x27a   : > { %19117 = vst [vmem:[#allocation31_spill] sm:$0xff] %v17008_v27  ;;  %v11366_v46 = vsel %vm1102_vm0, %v17008_v27, 0.0  ;;  %v14201_v36 = vpop.f32.mrb[77].mxu0  ;;  %v17012_v37 = vpop.f32.mrb[76].mxu1 }
 0x27b   : > { %19118 = vst [vmem:[#allocation32_spill] sm:$0xff] %v17012_v37  ;;  %v11367_v2 = vadd.f32 %v11366_v46, %v11365_v16  ;;  %v11368_v45 = vsel %vm1102_vm0, %v17012_v37, 0.0  ;;  %v14208_v50 = vpop.f32.mrb[77].mxu1 }
 0x27d   : > { %v11369_v60 = vadd.f32 %v11368_v45, %v11367_v2 }
 0x281   : > { %v17016_v58 = vpop.f32.mrb[78].mxu0 }
 0x282   : > { %19119 = vst [vmem:[#allocation33_spill] sm:$0xff] %v17016_v58  ;;  %v11370_v17 = vsel %vm1102_vm0, %v17016_v58, 0.0  ;;  %v14215_v25 = vpop.f32.mrb[79].mxu0  ;;  %v17020_v11 = vpop.f32.mrb[78].mxu1 }
 0x283   : > { %19120 = vst [vmem:[#allocation34_spill] sm:$0xff] %v17020_v11  ;;  %v11371_v13 = vadd.f32 %v11370_v17, %v11369_v60  ;;  %v11372_v36 = vsel %vm1102_vm0, %v17020_v11, 0.0  ;;  %v14222_v27 = vpop.f32.mrb[79].mxu1 }
 0x285   : > { %v11373_v63 = vadd.f32 %v11372_v36, %v11371_v13 }
 0x289   : > { %v17024_v16 = vpop.f32.mrb[80].mxu0 }
 0x28a   : > { %19121 = vst [vmem:[#allocation35_spill] sm:$0xff] %v17024_v16  ;;  %v11374_v46 = vsel %vm1102_vm0, %v17024_v16, 0.0  ;;  %v14229_v2 = vpop.f32.mrb[81].mxu0  ;;  %v17028_v45 = vpop.f32.mrb[80].mxu1 }
 0x28b   : > { %19122 = vst [vmem:[#allocation36_spill] sm:$0xff] %v17028_v45  ;;  %v11375_v50 = vadd.f32 %v11374_v46, %v11373_v63  ;;  %v11376_v25 = vsel %vm1102_vm0, %v17028_v45, 0.0  ;;  %v14236_v58 = vpop.f32.mrb[81].mxu1 }
 0x28d   : > { %v11377_v37 = vadd.f32 %v11376_v25, %v11375_v50 }
 0x291   : > { %v17032_v60 = vpop.f32.mrb[82].mxu0 }
 0x292   : > { %19123 = vst [vmem:[#allocation37_spill] sm:$0xff] %v17032_v60  ;;  %v11378_v27 = vsel %vm1102_vm0, %v17032_v60, 0.0  ;;  %v14243_v17 = vpop.f32.mrb[83].mxu0  ;;  %v17036_v13 = vpop.f32.mrb[82].mxu1 }
 0x293   : > { %19124 = vst [vmem:[#allocation38_spill] sm:$0xff] %v17036_v13  ;;  %v11379_v36 = vadd.f32 %v11378_v27, %v11377_v37  ;;  %v11380_v2 = vsel %vm1102_vm0, %v17036_v13, 0.0  ;;  %v14250_v16 = vpop.f32.mrb[83].mxu1 }
 0x295   : > { %v11381_v11 = vadd.f32 %v11380_v2, %v11379_v36 }
 0x299   : > { %v17040_v63 = vpop.f32.mrb[84].mxu0 }
 0x29a   : > { %19125 = vst [vmem:[#allocation39_spill] sm:$0xff] %v17040_v63  ;;  %v11382_v58 = vsel %vm1102_vm0, %v17040_v63, 0.0  ;;  %v14257_v46 = vpop.f32.mrb[85].mxu0  ;;  %v17044_v50 = vpop.f32.mrb[84].mxu1 }
 0x29b   : > { %19126 = vst [vmem:[#allocation40_spill] sm:$0xff] %v17044_v50  ;;  %v11383_v25 = vadd.f32 %v11382_v58, %v11381_v11  ;;  %v11384_v17 = vsel %vm1102_vm0, %v17044_v50, 0.0  ;;  %v14264_v60 = vpop.f32.mrb[85].mxu1 }
 0x29d   : > { %v11385_v45 = vadd.f32 %v11384_v17, %v11383_v25 }
 0x2a1   : > { %v17048_v37 = vpop.f32.mrb[86].mxu0 }
 0x2a2   : > { %19127 = vst [vmem:[#allocation41_spill] sm:$0xff] %v17048_v37  ;;  %v11386_v16 = vsel %vm1102_vm0, %v17048_v37, 0.0  ;;  %v14271_v27 = vpop.f32.mrb[87].mxu0  ;;  %v17052_v36 = vpop.f32.mrb[86].mxu1 }
 0x2a3   : > { %19128 = vst [vmem:[#allocation42_spill] sm:$0xff] %v17052_v36  ;;  %v11387_v2 = vadd.f32 %v11386_v16, %v11385_v45  ;;  %v11388_v46 = vsel %vm1102_vm0, %v17052_v36, 0.0  ;;  %v14278_v63 = vpop.f32.mrb[87].mxu1 }
 0x2a5   : > { %v11389_v13 = vadd.f32 %v11388_v46, %v11387_v2 }
 0x2a9   : > { %v17056_v11 = vpop.f32.mrb[88].mxu0 }
 0x2aa   : > { %19129 = vst [vmem:[#allocation43_spill] sm:$0xff] %v17056_v11  ;;  %v11390_v60 = vsel %vm1102_vm0, %v17056_v11, 0.0  ;;  %v14285_v58 = vpop.f32.mrb[89].mxu0  ;;  %v17060_v25 = vpop.f32.mrb[88].mxu1 }
 0x2ab   : > { %19130 = vst [vmem:[#allocation44_spill] sm:$0xff] %v17060_v25  ;;  %v11391_v17 = vadd.f32 %v11390_v60, %v11389_v13  ;;  %v11392_v27 = vsel %vm1102_vm0, %v17060_v25, 0.0  ;;  %v14292_v37 = vpop.f32.mrb[89].mxu1 }
 0x2ad   : > { %v11393_v50 = vadd.f32 %v11392_v27, %v11391_v17 }
 0x2b1   : > { %v17064_v45 = vpop.f32.mrb[90].mxu0 }
 0x2b2   : > { %19131 = vst [vmem:[#allocation45_spill] sm:$0xff] %v17064_v45  ;;  %v11394_v63 = vsel %vm1102_vm0, %v17064_v45, 0.0  ;;  %v14299_v16 = vpop.f32.mrb[91].mxu0  ;;  %v17068_v2 = vpop.f32.mrb[90].mxu1 }
 0x2b3   : > { %19132 = vst [vmem:[#allocation46_spill] sm:$0xff] %v17068_v2  ;;  %v11395_v46 = vadd.f32 %v11394_v63, %v11393_v50  ;;  %v11396_v58 = vsel %vm1102_vm0, %v17068_v2, 0.0  ;;  %v14306_v11 = vpop.f32.mrb[91].mxu1 }
 0x2b5   : > { %v11397_v36 = vadd.f32 %v11396_v58, %v11395_v46 }
 0x2b9   : > { %v17072_v13 = vpop.f32.mrb[92].mxu0 }
 0x2ba   : > { %19133 = vst [vmem:[#allocation47_spill] sm:$0xff] %v17072_v13  ;;  %v11398_v37 = vsel %vm1102_vm0, %v17072_v13, 0.0  ;;  %v14313_v60 = vpop.f32.mrb[93].mxu0  ;;  %v17076_v17 = vpop.f32.mrb[92].mxu1 }
 0x2bb   : > { %19134 = vst [vmem:[#allocation48_spill] sm:$0xff] %v17076_v17  ;;  %v11399_v27 = vadd.f32 %v11398_v37, %v11397_v36  ;;  %v11400_v16 = vsel %vm1102_vm0, %v17076_v17, 0.0  ;;  %v14320_v45 = vpop.f32.mrb[93].mxu1 }
 0x2bd   : > { %v11401_v25 = vadd.f32 %v11400_v16, %v11399_v27 }
 0x2c1   : > { %v17080_v50 = vpop.f32.mrb[94].mxu0 }
 0x2c2   : > { %19135 = vst [vmem:[#allocation49_spill] sm:$0xff] %v17080_v50  ;;  %v11402_v11 = vsel %vm1102_vm0, %v17080_v50, 0.0  ;;  %v14327_v63 = vpop.f32.mrb[95].mxu0  ;;  %v17084_v46 = vpop.f32.mrb[94].mxu1 }
 0x2c3   : > { %19136 = vst [vmem:[#allocation50_spill] sm:$0xff] %v17084_v46  ;;  %v11403_v58 = vadd.f32 %v11402_v11, %v11401_v25  ;;  %v11404_v60 = vsel %vm1102_vm0, %v17084_v46, 0.0  ;;  %v14334_v13 = vpop.f32.mrb[95].mxu1 }
 0x2c5   : > { %v11405_v2 = vadd.f32 %v11404_v60, %v11403_v58 }
 0x2c9   : > { %v17088_v36 = vpop.f32.mrb[96].mxu0 }
 0x2ca   : > { %19137 = vst [vmem:[#allocation51_spill] sm:$0xff] %v17088_v36  ;;  %v11406_v45 = vsel %vm1102_vm0, %v17088_v36, 0.0  ;;  %v14341_v37 = vpop.f32.mrb[97].mxu0  ;;  %v17092_v27 = vpop.f32.mrb[96].mxu1 }
 0x2cb   : > { %19138 = vst [vmem:[#allocation52_spill] sm:$0xff] %v17092_v27  ;;  %v11407_v16 = vadd.f32 %v11406_v45, %v11405_v2  ;;  %v11408_v63 = vsel %vm1102_vm0, %v17092_v27, 0.0  ;;  %v14348_v50 = vpop.f32.mrb[97].mxu1 }
 0x2cd   : > { %v11409_v17 = vadd.f32 %v11408_v63, %v11407_v16 }
 0x2d1   : > { %v17096_v25 = vpop.f32.mrb[98].mxu0 }
 0x2d2   : > { %19139 = vst [vmem:[#allocation53_spill] sm:$0xff] %v17096_v25  ;;  %v11410_v13 = vsel %vm1102_vm0, %v17096_v25, 0.0  ;;  %v14355_v11 = vpop.f32.mrb[99].mxu0  ;;  %v17100_v58 = vpop.f32.mrb[98].mxu1 }
 0x2d3   : > { %19140 = vst [vmem:[#allocation54_spill] sm:$0xff] %v17100_v58  ;;  %v11411_v60 = vadd.f32 %v11410_v13, %v11409_v17  ;;  %v11412_v37 = vsel %vm1102_vm0, %v17100_v58, 0.0  ;;  %v14362_v36 = vpop.f32.mrb[99].mxu1 }
 0x2d5   : > { %v11413_v46 = vadd.f32 %v11412_v37, %v11411_v60 }
 0x2d9   : > { %v17104_v2 = vpop.f32.mrb[100].mxu0 }
 0x2da   : > { %19141 = vst [vmem:[#allocation55_spill] sm:$0xff] %v17104_v2  ;;  %v11414_v50 = vsel %vm1102_vm0, %v17104_v2, 0.0  ;;  %v14369_v45 = vpop.f32.mrb[101].mxu0  ;;  %v17108_v16 = vpop.f32.mrb[100].mxu1 }
 0x2db   : > { %19142 = vst [vmem:[#allocation56_spill] sm:$0xff] %v17108_v16  ;;  %v11415_v63 = vadd.f32 %v11414_v50, %v11413_v46  ;;  %v11416_v11 = vsel %vm1102_vm0, %v17108_v16, 0.0  ;;  %v14376_v25 = vpop.f32.mrb[101].mxu1 }
 0x2dd   : > { %v11417_v27 = vadd.f32 %v11416_v11, %v11415_v63 }
 0x2e1   : > { %v17112_v17 = vpop.f32.mrb[102].mxu0 }
 0x2e2   : > { %19143 = vst [vmem:[#allocation57_spill] sm:$0xff] %v17112_v17  ;;  %v11418_v36 = vsel %vm1102_vm0, %v17112_v17, 0.0  ;;  %v14383_v13 = vpop.f32.mrb[103].mxu0  ;;  %v17116_v60 = vpop.f32.mrb[102].mxu1 }
 0x2e3   : > { %19144 = vst [vmem:[#allocation58_spill] sm:$0xff] %v17116_v60  ;;  %v11419_v37 = vadd.f32 %v11418_v36, %v11417_v27  ;;  %v11420_v45 = vsel %vm1102_vm0, %v17116_v60, 0.0  ;;  %v14390_v2 = vpop.f32.mrb[103].mxu1 }
 0x2e5   : > { %v11421_v58 = vadd.f32 %v11420_v45, %v11419_v37 }
 0x2e9   : > { %v17120_v46 = vpop.f32.mrb[104].mxu0 }
 0x2ea   : > { %19145 = vst [vmem:[#allocation59_spill] sm:$0xff] %v17120_v46  ;;  %v11422_v25 = vsel %vm1102_vm0, %v17120_v46, 0.0  ;;  %v14397_v50 = vpop.f32.mrb[105].mxu0  ;;  %v17124_v63 = vpop.f32.mrb[104].mxu1 }
 0x2eb   : > { %19146 = vst [vmem:[#allocation60_spill] sm:$0xff] %v17124_v63  ;;  %v11423_v11 = vadd.f32 %v11422_v25, %v11421_v58  ;;  %v11424_v13 = vsel %vm1102_vm0, %v17124_v63, 0.0  ;;  %v14404_v17 = vpop.f32.mrb[105].mxu1 }
 0x2ed   : > { %v11425_v16 = vadd.f32 %v11424_v13, %v11423_v11 }
 0x2f1   : > { %v17128_v27 = vpop.f32.mrb[106].mxu0 }
 0x2f2   : > { %19147 = vst [vmem:[#allocation61_spill] sm:$0xff] %v17128_v27  ;;  %v11426_v2 = vsel %vm1102_vm0, %v17128_v27, 0.0  ;;  %v14411_v36 = vpop.f32.mrb[107].mxu0  ;;  %v17132_v37 = vpop.f32.mrb[106].mxu1 }
 0x2f3   : > { %19148 = vst [vmem:[#allocation62_spill] sm:$0xff] %v17132_v37  ;;  %v11427_v45 = vadd.f32 %v11426_v2, %v11425_v16  ;;  %v11428_v50 = vsel %vm1102_vm0, %v17132_v37, 0.0  ;;  %v14418_v46 = vpop.f32.mrb[107].mxu1 }
 0x2f5   : > { %v11429_v60 = vadd.f32 %v11428_v50, %v11427_v45 }
 0x2f9   : > { %v17136_v58 = vpop.f32.mrb[108].mxu0 }
 0x2fa   : > { %19149 = vst [vmem:[#allocation63_spill] sm:$0xff] %v17136_v58  ;;  %v11430_v17 = vsel %vm1102_vm0, %v17136_v58, 0.0  ;;  %v14425_v25 = vpop.f32.mrb[109].mxu0  ;;  %v17140_v11 = vpop.f32.mrb[108].mxu1 }
 0x2fb   : > { %19150 = vst [vmem:[#allocation64_spill] sm:$0xff] %v17140_v11  ;;  %v11431_v13 = vadd.f32 %v11430_v17, %v11429_v60  ;;  %v11432_v36 = vsel %vm1102_vm0, %v17140_v11, 0.0  ;;  %v14432_v27 = vpop.f32.mrb[109].mxu1 }
 0x2fd   : > { %v11433_v63 = vadd.f32 %v11432_v36, %v11431_v13 }
 0x301   : > { %v17144_v16 = vpop.f32.mrb[110].mxu0 }
 0x302   : > { %19151 = vst [vmem:[#allocation65_spill] sm:$0xff] %v17144_v16  ;;  %v11434_v46 = vsel %vm1102_vm0, %v17144_v16, 0.0  ;;  %v14439_v2 = vpop.f32.mrb[111].mxu0  ;;  %v17148_v45 = vpop.f32.mrb[110].mxu1 }
 0x303   : > { %19152 = vst [vmem:[#allocation66_spill] sm:$0xff] %v17148_v45  ;;  %v11435_v50 = vadd.f32 %v11434_v46, %v11433_v63  ;;  %v11436_v25 = vsel %vm1102_vm0, %v17148_v45, 0.0  ;;  %v14446_v58 = vpop.f32.mrb[111].mxu1 }
 0x305   : > { %v11437_v37 = vadd.f32 %v11436_v25, %v11435_v50 }
 0x309   : > { %v17152_v60 = vpop.f32.mrb[112].mxu0 }
 0x30a   : > { %19153 = vst [vmem:[#allocation67_spill] sm:$0xff] %v17152_v60  ;;  %v11438_v27 = vsel %vm1102_vm0, %v17152_v60, 0.0  ;;  %v14453_v17 = vpop.f32.mrb[113].mxu0  ;;  %v17156_v13 = vpop.f32.mrb[112].mxu1 }
 0x30b   : > { %19154 = vst [vmem:[#allocation68_spill] sm:$0xff] %v17156_v13  ;;  %v11439_v36 = vadd.f32 %v11438_v27, %v11437_v37  ;;  %v11440_v2 = vsel %vm1102_vm0, %v17156_v13, 0.0  ;;  %v14460_v16 = vpop.f32.mrb[113].mxu1 }
 0x30d   : > { %v11441_v11 = vadd.f32 %v11440_v2, %v11439_v36 }
 0x311   : > { %v17160_v63 = vpop.f32.mrb[114].mxu0 }
 0x312   : > { %19155 = vst [vmem:[#allocation69_spill] sm:$0xff] %v17160_v63  ;;  %v11442_v58 = vsel %vm1102_vm0, %v17160_v63, 0.0  ;;  %v14467_v46 = vpop.f32.mrb[115].mxu0  ;;  %v17164_v50 = vpop.f32.mrb[114].mxu1 }
 0x313   : > { %19156 = vst [vmem:[#allocation70_spill] sm:$0xff] %v17164_v50  ;;  %v11443_v25 = vadd.f32 %v11442_v58, %v11441_v11  ;;  %v11444_v17 = vsel %vm1102_vm0, %v17164_v50, 0.0  ;;  %v14474_v60 = vpop.f32.mrb[115].mxu1 }
 0x315   : > { %v11445_v45 = vadd.f32 %v11444_v17, %v11443_v25 }
 0x319   : > { %v17168_v37 = vpop.f32.mrb[116].mxu0 }
 0x31a   : > { %19157 = vst [vmem:[#allocation71_spill] sm:$0xff] %v17168_v37  ;;  %v11446_v16 = vsel %vm1102_vm0, %v17168_v37, 0.0  ;;  %v14481_v27 = vpop.f32.mrb[117].mxu0  ;;  %v17172_v36 = vpop.f32.mrb[116].mxu1 }
 0x31b   : > { %19158 = vst [vmem:[#allocation72_spill] sm:$0xff] %v17172_v36  ;;  %v11447_v2 = vadd.f32 %v11446_v16, %v11445_v45  ;;  %v11448_v46 = vsel %vm1102_vm0, %v17172_v36, 0.0  ;;  %v14488_v63 = vpop.f32.mrb[117].mxu1 }
 0x31d   : > { %v11449_v13 = vadd.f32 %v11448_v46, %v11447_v2 }
 0x321   : > { %v17176_v11 = vpop.f32.mrb[118].mxu0 }
 0x322   : > { %19159 = vst [vmem:[#allocation73_spill] sm:$0xff] %v17176_v11  ;;  %v11450_v60 = vsel %vm1102_vm0, %v17176_v11, 0.0  ;;  %v14495_v58 = vpop.f32.mrb[119].mxu0  ;;  %v17180_v25 = vpop.f32.mrb[118].mxu1 }
 0x323   : > { %19160 = vst [vmem:[#allocation74_spill] sm:$0xff] %v17180_v25  ;;  %v11451_v17 = vadd.f32 %v11450_v60, %v11449_v13  ;;  %v11452_v27 = vsel %vm1102_vm0, %v17180_v25, 0.0  ;;  %v14502_v37 = vpop.f32.mrb[119].mxu1 }
 0x325   : > { %v11453_v50 = vadd.f32 %v11452_v27, %v11451_v17 }
 0x329   : > { %v17184_v45 = vpop.f32.mrb[120].mxu0 }
 0x32a   : > { %19161 = vst [vmem:[#allocation75_spill] sm:$0xff] %v17184_v45  ;;  %v11454_v63 = vsel %vm1102_vm0, %v17184_v45, 0.0  ;;  %v14509_v16 = vpop.f32.mrb[121].mxu0  ;;  %v17188_v2 = vpop.f32.mrb[120].mxu1 }
 0x32b   : > { %19162 = vst [vmem:[#allocation76_spill] sm:$0xff] %v17188_v2  ;;  %v11455_v46 = vadd.f32 %v11454_v63, %v11453_v50  ;;  %v11456_v58 = vsel %vm1102_vm0, %v17188_v2, 0.0  ;;  %v14516_v11 = vpop.f32.mrb[121].mxu1 }
 0x32d   : > { %v11457_v36 = vadd.f32 %v11456_v58, %v11455_v46 }
 0x331   : > { %v17192_v13 = vpop.f32.mrb[122].mxu0 }
 0x332   : > { %19163 = vst [vmem:[#allocation77_spill] sm:$0xff] %v17192_v13  ;;  %v11458_v37 = vsel %vm1102_vm0, %v17192_v13, 0.0  ;;  %v14523_v60 = vpop.f32.mrb[123].mxu0  ;;  %v17196_v17 = vpop.f32.mrb[122].mxu1 }
 0x333   : > { %19164 = vst [vmem:[#allocation78_spill] sm:$0xff] %v17196_v17  ;;  %v11459_v27 = vadd.f32 %v11458_v37, %v11457_v36  ;;  %v11460_v16 = vsel %vm1102_vm0, %v17196_v17, 0.0  ;;  %v14530_v45 = vpop.f32.mrb[123].mxu1 }
 0x335   : > { %v11461_v25 = vadd.f32 %v11460_v16, %v11459_v27 }
 0x339   : > { %v17200_v50 = vpop.f32.mrb[124].mxu0 }
 0x33a   : > { %19165 = vst [vmem:[#allocation79_spill] sm:$0xff] %v17200_v50  ;;  %v11462_v11 = vsel %vm1102_vm0, %v17200_v50, 0.0  ;;  %v14537_v63 = vpop.f32.mrb[125].mxu0  ;;  %v17204_v46 = vpop.f32.mrb[124].mxu1 }
 0x33b   : > { %v11463_v58 = vadd.f32 %v11462_v11, %v11461_v25  ;;  %v11464_v60 = vsel %vm1102_vm0, %v17204_v46, 0.0  ;;  %v14544_v13 = vpop.f32.mrb[125].mxu1 }
 0x33d   : > { %v11465_v2 = vadd.f32 %v11464_v60, %v11463_v58  ;;  %v19175_v60 = vld [vmem:[#allocation5_spill] sm:$0xff] }
 0x341   : > { %v17208_v36 = vpop.f32.mrb[126].mxu0 }
 0x342   : > { %v11466_v45 = vsel %vm1102_vm0, %v17208_v36, 0.0  ;;  %v14551_v37 = vpop.f32.mrb[127].mxu0  ;;  %v17212_v27 = vpop.f32.mrb[126].mxu1 }
 0x343   : > { %v11467_v16 = vadd.f32 %v11466_v45, %v11465_v2  ;;  %v11468_v63 = vsel %vm1102_vm0, %v17212_v27, 0.0  ;;  %v14558_v50 = vpop.f32.mrb[127].mxu1  ;;  %v19177_v45 = vld [vmem:[#allocation6_spill] sm:$0xff]  ;;  %v19179_v37 = vld [vmem:[#allocation7_spill] sm:$0xff] }
 0x344   : > { %v19173_v50 = vld [vmem:[#allocation4_spill] sm:$0xff] }
 0x345   : > { %v11469_v17 = vadd.f32 %v11468_v63, %v11467_v16  ;;  %v19181_v16 = vld [vmem:[#allocation8_spill] sm:$0xff]  ;;  %v19183_v63 = vld [vmem:[#allocation9_spill] sm:$0xff] }
 0x347   : > { %v17216_v25 = vmul.f32 0.0078125, %v11469_v17 }
 0x349   : > { %v17220_v13 = vsub.f32 %v16052_v44, %v17216_v25  ;;  %v17224_v11 = vsub.f32 %v16061_v49, %v17216_v25  ;;  %v17228_v58 = vsub.f32 %v16078_v59, %v17216_v25  ;;  %v17232_v2 = vsub.f32 %v16087_v3, %v17216_v25 }
 0x34a   : > { %v17236_v17 = vsub.f32 %v16104_v14, %v17216_v25  ;;  %v17240_v44 = vsub.f32 %v16113_v19, %v17216_v25  ;;  %v17244_v49 = vsub.f32 %v16130_v30, %v17216_v25  ;;  %v17248_v59 = vsub.f32 %v16139_v35, %v17216_v25 }
 0x34b   : > { %19166 = vst [vmem:[#allocation80_spill] sm:$0xff] %v17220_v13  ;;  %19167 = vst [vmem:[#allocation81_spill] sm:$0xff] %v17224_v11  ;;  %v17252_v3 = vsub.f32 %v16156_v47, %v17216_v25  ;;  %v17256_v14 = vsub.f32 %v16165_v53, %v17216_v25  ;;  %v17260_v19 = vsub.f32 %v16182_v5, %v17216_v25 }
 0x34c   : > { %19168 = vst [vmem:[#allocation82_spill] sm:$0xff] %v17228_v58  ;;  %19169 = vst [vmem:[#allocation83_spill] sm:$0xff] %v17232_v2  ;;  %v17264_v30 = vsub.f32 %v16191_v10, %v17216_v25  ;;  %v17268_v35 = vsub.f32 %v16208_v23, %v17216_v25  ;;  %v17272_v47 = vsub.f32 %v16217_v28, %v17216_v25 }
 0x34d   : > { %v17276_v53 = vsub.f32 %v16234_v41, %v17216_v25  ;;  %v17280_v5 = vsub.f32 %v16243_v48, %v17216_v25  ;;  %v17284_v10 = vsub.f32 %v16260_v62, %v17216_v25  ;;  %v17288_v23 = vsub.f32 %v16269_v8, %v17216_v25 }
 0x34e   : > { %v17292_v28 = vsub.f32 %v16286_v22, %v17216_v25  ;;  %v17296_v41 = vsub.f32 %v16295_v29, %v17216_v25  ;;  %v17300_v48 = vsub.f32 %v16312_v43, %v17216_v25  ;;  %v17304_v62 = vsub.f32 %v16321_v52, %v17216_v25 }
 0x34f   : > { %v17308_v8 = vsub.f32 %v16338_v7, %v17216_v25  ;;  %v17312_v22 = vsub.f32 %v16347_v15, %v17216_v25  ;;  %v17316_v29 = vsub.f32 %v16364_v32, %v17216_v25  ;;  %v17320_v43 = vsub.f32 %v16373_v38, %v17216_v25 }
 0x350   : > { %v17324_v52 = vsub.f32 %v16390_v57, %v17216_v25  ;;  %v17328_v7 = vsub.f32 %v16399_v4, %v17216_v25  ;;  %v17332_v15 = vsub.f32 %v16416_v24, %v17216_v25  ;;  %v17336_v32 = vsub.f32 %v16425_v33, %v17216_v25 }
 0x351   : > { %v17340_v38 = vsub.f32 %v16442_v54, %v17216_v25  ;;  %v17344_v57 = vsub.f32 %v16451_v61, %v17216_v25  ;;  %v17348_v4 = vsub.f32 %v16468_v21, %v17216_v25  ;;  %v17352_v24 = vsub.f32 %v16477_v34, %v17216_v25 }
 0x352   : > { %v17356_v33 = vsub.f32 %v16494_v56, %v17216_v25  ;;  %v17360_v54 = vsub.f32 %v16503_v9, %v17216_v25  ;;  %v17364_v61 = vsub.f32 %v16520_v31, %v17216_v25  ;;  %v17368_v21 = vsub.f32 %v16529_v42, %v17216_v25 }
 0x353   : > { %v17372_v34 = vsub.f32 %v16546_v12, %v17216_v25  ;;  %v17376_v56 = vsub.f32 %v16555_v20, %v17216_v25  ;;  %v17380_v9 = vsub.f32 %v16572_v51, %v17216_v25  ;;  %v17384_v31 = vsub.f32 %v16581_v6, %v17216_v25 }
 0x354   : > { %v17388_v42 = vsub.f32 %v16598_v39, %v17216_v25  ;;  %v17392_v12 = vsub.f32 %v16607_v55, %v17216_v25  ;;  %v17396_v20 = vsub.f32 %v19173_v50, %v17216_v25  ;;  %v17400_v51 = vsub.f32 %v19175_v60, %v17216_v25 }
 0x355   : > { %19170 = vst [vmem:[#allocation84_spill] sm:$0xff] %v17384_v31  ;;  %v17404_v6 = vsub.f32 %v19177_v45, %v17216_v25  ;;  %v17408_v39 = vsub.f32 %v19179_v37, %v17216_v25  ;;  %v17412_v55 = vsub.f32 %v19181_v16, %v17216_v25  ;;  %v17416_v50 = vsub.f32 %v19183_v63, %v17216_v25 }
 0x356   : > { %19171 = vst [vmem:[#allocation85_spill] sm:$0xff] %v17388_v42  ;;  %19172 = vst [vmem:[#allocation86_spill] sm:$0xff] %v17392_v12 }
 0x357   : > { %19174 = vst [vmem:[#allocation4_spill] sm:$0xff] %v17396_v20  ;;  %19176 = vst [vmem:[#allocation5_spill] sm:$0xff] %v17400_v51  ;;  %v19185_v20 = vld [vmem:[#allocation10_spill] sm:$0xff]  ;;  %v19187_v51 = vld [vmem:[#allocation11_spill] sm:$0xff] }
 0x358   : > { %19178 = vst [vmem:[#allocation6_spill] sm:$0xff] %v17404_v6  ;;  %19180 = vst [vmem:[#allocation7_spill] sm:$0xff] %v17408_v39  ;;  %v17420_v60 = vsub.f32 %v19185_v20, %v17216_v25  ;;  %v17424_v45 = vsub.f32 %v19187_v51, %v17216_v25  ;;  %v19189_v6 = vld [vmem:[#allocation12_spill] sm:$0xff]  ;;  %v19191_v39 = vld [vmem:[#allocation13_spill] sm:$0xff] }
 0x359   : > { %19182 = vst [vmem:[#allocation8_spill] sm:$0xff] %v17412_v55  ;;  %19184 = vst [vmem:[#allocation9_spill] sm:$0xff] %v17416_v50  ;;  %v17428_v37 = vsub.f32 %v19189_v6, %v17216_v25  ;;  %v17432_v16 = vsub.f32 %v19191_v39, %v17216_v25  ;;  %v19193_v55 = vld [vmem:[#allocation14_spill] sm:$0xff]  ;;  %v19195_v50 = vld [vmem:[#allocation15_spill] sm:$0xff] }
 0x35a   : > { %19186 = vst [vmem:[#allocation10_spill] sm:$0xff] %v17420_v60  ;;  %19188 = vst [vmem:[#allocation11_spill] sm:$0xff] %v17424_v45  ;;  %v17436_v63 = vsub.f32 %v19193_v55, %v17216_v25  ;;  %v17440_v20 = vsub.f32 %v19195_v50, %v17216_v25  ;;  %v19197_v60 = vld [vmem:[#allocation16_spill] sm:$0xff]  ;;  %v19199_v45 = vld [vmem:[#allocation17_spill] sm:$0xff] }
 0x35b   : > { %19190 = vst [vmem:[#allocation12_spill] sm:$0xff] %v17428_v37  ;;  %19192 = vst [vmem:[#allocation13_spill] sm:$0xff] %v17432_v16  ;;  %v17444_v51 = vsub.f32 %v19197_v60, %v17216_v25  ;;  %v17448_v6 = vsub.f32 %v19199_v45, %v17216_v25  ;;  %v19201_v37 = vld [vmem:[#allocation18_spill] sm:$0xff]  ;;  %v19203_v16 = vld [vmem:[#allocation19_spill] sm:$0xff] }
 0x35c   : > { %19194 = vst [vmem:[#allocation14_spill] sm:$0xff] %v17436_v63  ;;  %19196 = vst [vmem:[#allocation15_spill] sm:$0xff] %v17440_v20  ;;  %v17452_v39 = vsub.f32 %v19201_v37, %v17216_v25  ;;  %v17456_v55 = vsub.f32 %v19203_v16, %v17216_v25  ;;  %v19205_v63 = vld [vmem:[#allocation20_spill] sm:$0xff]  ;;  %v19207_v20 = vld [vmem:[#allocation21_spill] sm:$0xff] }
 0x35d   : > { %19198 = vst [vmem:[#allocation16_spill] sm:$0xff] %v17444_v51  ;;  %19200 = vst [vmem:[#allocation17_spill] sm:$0xff] %v17448_v6  ;;  %v17460_v50 = vsub.f32 %v19205_v63, %v17216_v25  ;;  %v17464_v60 = vsub.f32 %v19207_v20, %v17216_v25  ;;  %v19209_v51 = vld [vmem:[#allocation22_spill] sm:$0xff]  ;;  %v19211_v6 = vld [vmem:[#allocation23_spill] sm:$0xff] }
 0x35e   : > { %19202 = vst [vmem:[#allocation18_spill] sm:$0xff] %v17452_v39  ;;  %19204 = vst [vmem:[#allocation19_spill] sm:$0xff] %v17456_v55  ;;  %v17468_v45 = vsub.f32 %v19209_v51, %v17216_v25  ;;  %v17472_v37 = vsub.f32 %v19211_v6, %v17216_v25  ;;  %v19213_v39 = vld [vmem:[#allocation24_spill] sm:$0xff]  ;;  %v19214_v55 = vld [vmem:[#allocation25_spill] sm:$0xff] }
 0x35f   : > { %19206 = vst [vmem:[#allocation20_spill] sm:$0xff] %v17460_v50  ;;  %19208 = vst [vmem:[#allocation21_spill] sm:$0xff] %v17464_v60  ;;  %v17476_v16 = vsub.f32 %v19213_v39, %v17216_v25  ;;  %v17480_v63 = vsub.f32 %v19214_v55, %v17216_v25  ;;  %v19215_v50 = vld [vmem:[#allocation26_spill] sm:$0xff]  ;;  %v19217_v60 = vld [vmem:[#allocation27_spill] sm:$0xff]  ;;  %v17500_v55 = vsub.f32 %v16962_v18, %v17216_v25 }
 0x360   : > { %19210 = vst [vmem:[#allocation22_spill] sm:$0xff] %v17468_v45  ;;  %19212 = vst [vmem:[#allocation23_spill] sm:$0xff] %v17472_v37  ;;  %v17484_v20 = vsub.f32 %v19215_v50, %v17216_v25  ;;  %v17488_v51 = vsub.f32 %v19217_v60, %v17216_v25  ;;  %v19219_v45 = vld [vmem:[#allocation28_spill] sm:$0xff]  ;;  %v19221_v37 = vld [vmem:[#allocation29_spill] sm:$0xff]  ;;  %v17504_v50 = vsub.f32 %v16971_v26, %v17216_v25 }
 0x361   : > { %v17492_v6 = vsub.f32 %v19219_v45, %v17216_v25  ;;  %v17496_v39 = vsub.f32 %v19221_v37, %v17216_v25  ;;  %19223 = vst [vmem:[#allocation28_spill] sm:$0xff] %v17500_v55  ;;  %v17508_v60 = vsub.f32 %v16986_v0, %v17216_v25  ;;  %v17512_v45 = vsub.f32 %v16992_v40, %v17216_v25  ;;  %v19230_v55 = vld [vmem:[#allocation31_spill] sm:$0xff] }
 0x362   : > { %19216 = vst [vmem:[#allocation24_spill] sm:$0xff] %v17484_v20  ;;  %19218 = vst [vmem:[#allocation25_spill] sm:$0xff] %v17488_v51  ;;  %v17516_v37 = vsub.f32 %v17000_v1, %v17216_v25  ;;  %v17524_v26 = vsub.f32 %v19230_v55, %v17216_v25 }
 0x363   : > { %19220 = vst [vmem:[#allocation26_spill] sm:$0xff] %v17492_v6  ;;  %19222 = vst [vmem:[#allocation27_spill] sm:$0xff] %v17496_v39  ;;  %v19228_v39 = vld [vmem:[#allocation30_spill] sm:$0xff] }
 0x364   : > { %19224 = vst [vmem:[#allocation29_spill] sm:$0xff] %v17504_v50  ;;  %19225 = vst [vmem:[#allocation87_spill] sm:$0xff] %v17508_v60  ;;  %v17520_v18 = vsub.f32 %v19228_v39, %v17216_v25  ;;  %v19232_v50 = vld [vmem:[#allocation32_spill] sm:$0xff]  ;;  %v19234_v60 = vld [vmem:[#allocation33_spill] sm:$0xff] }
 0x365   : > { %19226 = vst [vmem:[#allocation88_spill] sm:$0xff] %v17512_v45  ;;  %19227 = vst [vmem:[#allocation89_spill] sm:$0xff] %v17516_v37  ;;  %v17528_v0 = vsub.f32 %v19232_v50, %v17216_v25  ;;  %v17532_v40 = vsub.f32 %v19234_v60, %v17216_v25  ;;  %v19236_v45 = vld [vmem:[#allocation34_spill] sm:$0xff]  ;;  %v19238_v37 = vld [vmem:[#allocation35_spill] sm:$0xff] }
 0x366   : > { %19229 = vst [vmem:[#allocation30_spill] sm:$0xff] %v17520_v18  ;;  %19231 = vst [vmem:[#allocation31_spill] sm:$0xff] %v17524_v26  ;;  %v17536_v1 = vsub.f32 %v19236_v45, %v17216_v25  ;;  %v17540_v39 = vsub.f32 %v19238_v37, %v17216_v25  ;;  %v19240_v18 = vld [vmem:[#allocation36_spill] sm:$0xff]  ;;  %v19242_v26 = vld [vmem:[#allocation37_spill] sm:$0xff] }
 0x367   : > { %19233 = vst [vmem:[#allocation32_spill] sm:$0xff] %v17528_v0  ;;  %19235 = vst [vmem:[#allocation33_spill] sm:$0xff] %v17532_v40  ;;  %v17544_v55 = vsub.f32 %v19240_v18, %v17216_v25  ;;  %v17548_v50 = vsub.f32 %v19242_v26, %v17216_v25  ;;  %v19244_v0 = vld [vmem:[#allocation38_spill] sm:$0xff]  ;;  %v19246_v40 = vld [vmem:[#allocation39_spill] sm:$0xff] }
 0x368   : > { %19237 = vst [vmem:[#allocation34_spill] sm:$0xff] %v17536_v1  ;;  %19239 = vst [vmem:[#allocation35_spill] sm:$0xff] %v17540_v39  ;;  %v17552_v60 = vsub.f32 %v19244_v0, %v17216_v25  ;;  %v17556_v45 = vsub.f32 %v19246_v40, %v17216_v25  ;;  %v19248_v1 = vld [vmem:[#allocation40_spill] sm:$0xff]  ;;  %v19250_v39 = vld [vmem:[#allocation41_spill] sm:$0xff] }
 0x369   : > { %19241 = vst [vmem:[#allocation36_spill] sm:$0xff] %v17544_v55  ;;  %19243 = vst [vmem:[#allocation37_spill] sm:$0xff] %v17548_v50  ;;  %v17560_v37 = vsub.f32 %v19248_v1, %v17216_v25  ;;  %v17564_v18 = vsub.f32 %v19250_v39, %v17216_v25  ;;  %v19252_v55 = vld [vmem:[#allocation42_spill] sm:$0xff]  ;;  %v19254_v50 = vld [vmem:[#allocation43_spill] sm:$0xff] }
 0x36a   : > { %19245 = vst [vmem:[#allocation38_spill] sm:$0xff] %v17552_v60  ;;  %19247 = vst [vmem:[#allocation39_spill] sm:$0xff] %v17556_v45  ;;  %v17568_v26 = vsub.f32 %v19252_v55, %v17216_v25  ;;  %v17572_v0 = vsub.f32 %v19254_v50, %v17216_v25  ;;  %v19256_v60 = vld [vmem:[#allocation44_spill] sm:$0xff]  ;;  %v19258_v45 = vld [vmem:[#allocation45_spill] sm:$0xff] }
 0x36b   : > { %19249 = vst [vmem:[#allocation40_spill] sm:$0xff] %v17560_v37  ;;  %19251 = vst [vmem:[#allocation41_spill] sm:$0xff] %v17564_v18  ;;  %v17576_v40 = vsub.f32 %v19256_v60, %v17216_v25  ;;  %v17580_v1 = vsub.f32 %v19258_v45, %v17216_v25  ;;  %v19260_v37 = vld [vmem:[#allocation46_spill] sm:$0xff]  ;;  %v19262_v18 = vld [vmem:[#allocation47_spill] sm:$0xff] }
 0x36c   : > { %19253 = vst [vmem:[#allocation42_spill] sm:$0xff] %v17568_v26  ;;  %19255 = vst [vmem:[#allocation43_spill] sm:$0xff] %v17572_v0  ;;  %v17584_v39 = vsub.f32 %v19260_v37, %v17216_v25  ;;  %v17588_v55 = vsub.f32 %v19262_v18, %v17216_v25  ;;  %v19264_v26 = vld [vmem:[#allocation48_spill] sm:$0xff]  ;;  %v19266_v0 = vld [vmem:[#allocation49_spill] sm:$0xff] }
 0x36d   : > { %19257 = vst [vmem:[#allocation44_spill] sm:$0xff] %v17576_v40  ;;  %19259 = vst [vmem:[#allocation45_spill] sm:$0xff] %v17580_v1  ;;  %v17592_v50 = vsub.f32 %v19264_v26, %v17216_v25  ;;  %v17596_v60 = vsub.f32 %v19266_v0, %v17216_v25  ;;  %v19268_v40 = vld [vmem:[#allocation50_spill] sm:$0xff]  ;;  %v19270_v1 = vld [vmem:[#allocation51_spill] sm:$0xff] }
 0x36e   : > { %19261 = vst [vmem:[#allocation46_spill] sm:$0xff] %v17584_v39  ;;  %19263 = vst [vmem:[#allocation47_spill] sm:$0xff] %v17588_v55  ;;  %v17600_v45 = vsub.f32 %v19268_v40, %v17216_v25  ;;  %v17604_v37 = vsub.f32 %v19270_v1, %v17216_v25  ;;  %v19272_v39 = vld [vmem:[#allocation52_spill] sm:$0xff]  ;;  %v19274_v55 = vld [vmem:[#allocation53_spill] sm:$0xff] }
 0x36f   : > { %19265 = vst [vmem:[#allocation48_spill] sm:$0xff] %v17592_v50  ;;  %19267 = vst [vmem:[#allocation49_spill] sm:$0xff] %v17596_v60  ;;  %v17608_v18 = vsub.f32 %v19272_v39, %v17216_v25  ;;  %v17612_v26 = vsub.f32 %v19274_v55, %v17216_v25  ;;  %v19276_v50 = vld [vmem:[#allocation54_spill] sm:$0xff]  ;;  %v19278_v60 = vld [vmem:[#allocation55_spill] sm:$0xff] }
 0x370   : > { %19269 = vst [vmem:[#allocation50_spill] sm:$0xff] %v17600_v45  ;;  %19271 = vst [vmem:[#allocation51_spill] sm:$0xff] %v17604_v37  ;;  %v17616_v0 = vsub.f32 %v19276_v50, %v17216_v25  ;;  %v17620_v40 = vsub.f32 %v19278_v60, %v17216_v25  ;;  %v19280_v45 = vld [vmem:[#allocation56_spill] sm:$0xff]  ;;  %v19282_v37 = vld [vmem:[#allocation57_spill] sm:$0xff] }
 0x371   : > { %19273 = vst [vmem:[#allocation52_spill] sm:$0xff] %v17608_v18  ;;  %19275 = vst [vmem:[#allocation53_spill] sm:$0xff] %v17612_v26  ;;  %v17624_v1 = vsub.f32 %v19280_v45, %v17216_v25  ;;  %v17628_v39 = vsub.f32 %v19282_v37, %v17216_v25  ;;  %v19284_v18 = vld [vmem:[#allocation58_spill] sm:$0xff]  ;;  %v19286_v26 = vld [vmem:[#allocation59_spill] sm:$0xff] }
 0x372   : > { %19277 = vst [vmem:[#allocation54_spill] sm:$0xff] %v17616_v0  ;;  %19279 = vst [vmem:[#allocation55_spill] sm:$0xff] %v17620_v40  ;;  %v17632_v55 = vsub.f32 %v19284_v18, %v17216_v25  ;;  %v17636_v50 = vsub.f32 %v19286_v26, %v17216_v25  ;;  %v19288_v0 = vld [vmem:[#allocation60_spill] sm:$0xff]  ;;  %v19290_v40 = vld [vmem:[#allocation61_spill] sm:$0xff] }
 0x373   : > { %19281 = vst [vmem:[#allocation56_spill] sm:$0xff] %v17624_v1  ;;  %19283 = vst [vmem:[#allocation57_spill] sm:$0xff] %v17628_v39  ;;  %v17640_v60 = vsub.f32 %v19288_v0, %v17216_v25  ;;  %v17644_v45 = vsub.f32 %v19290_v40, %v17216_v25  ;;  %v19292_v1 = vld [vmem:[#allocation62_spill] sm:$0xff]  ;;  %v19294_v39 = vld [vmem:[#allocation63_spill] sm:$0xff] }
 0x374   : > { %19285 = vst [vmem:[#allocation58_spill] sm:$0xff] %v17632_v55  ;;  %19287 = vst [vmem:[#allocation59_spill] sm:$0xff] %v17636_v50  ;;  %v17648_v37 = vsub.f32 %v19292_v1, %v17216_v25  ;;  %v17652_v18 = vsub.f32 %v19294_v39, %v17216_v25  ;;  %v19296_v55 = vld [vmem:[#allocation64_spill] sm:$0xff]  ;;  %v19298_v50 = vld [vmem:[#allocation65_spill] sm:$0xff] }
 0x375   : > { %19289 = vst [vmem:[#allocation60_spill] sm:$0xff] %v17640_v60  ;;  %19291 = vst [vmem:[#allocation61_spill] sm:$0xff] %v17644_v45  ;;  %v17656_v26 = vsub.f32 %v19296_v55, %v17216_v25  ;;  %v17660_v0 = vsub.f32 %v19298_v50, %v17216_v25  ;;  %v19300_v60 = vld [vmem:[#allocation66_spill] sm:$0xff]  ;;  %v19302_v45 = vld [vmem:[#allocation67_spill] sm:$0xff] }
 0x376   : > { %19293 = vst [vmem:[#allocation62_spill] sm:$0xff] %v17648_v37  ;;  %19295 = vst [vmem:[#allocation63_spill] sm:$0xff] %v17652_v18  ;;  %v17664_v40 = vsub.f32 %v19300_v60, %v17216_v25  ;;  %v17668_v1 = vsub.f32 %v19302_v45, %v17216_v25  ;;  %v19304_v37 = vld [vmem:[#allocation68_spill] sm:$0xff]  ;;  %v19306_v18 = vld [vmem:[#allocation69_spill] sm:$0xff] }
 0x377   : > { %19297 = vst [vmem:[#allocation64_spill] sm:$0xff] %v17656_v26  ;;  %19299 = vst [vmem:[#allocation65_spill] sm:$0xff] %v17660_v0  ;;  %v17672_v39 = vsub.f32 %v19304_v37, %v17216_v25  ;;  %v17676_v55 = vsub.f32 %v19306_v18, %v17216_v25  ;;  %v19308_v26 = vld [vmem:[#allocation70_spill] sm:$0xff]  ;;  %v19310_v0 = vld [vmem:[#allocation71_spill] sm:$0xff] }
 0x378   : > { %19301 = vst [vmem:[#allocation66_spill] sm:$0xff] %v17664_v40  ;;  %19303 = vst [vmem:[#allocation67_spill] sm:$0xff] %v17668_v1  ;;  %v17680_v50 = vsub.f32 %v19308_v26, %v17216_v25  ;;  %v17684_v60 = vsub.f32 %v19310_v0, %v17216_v25  ;;  %v19312_v40 = vld [vmem:[#allocation72_spill] sm:$0xff]  ;;  %v19314_v1 = vld [vmem:[#allocation73_spill] sm:$0xff] }
 0x379   : > { %19305 = vst [vmem:[#allocation68_spill] sm:$0xff] %v17672_v39  ;;  %19307 = vst [vmem:[#allocation69_spill] sm:$0xff] %v17676_v55  ;;  %v17688_v45 = vsub.f32 %v19312_v40, %v17216_v25  ;;  %v17692_v37 = vsub.f32 %v19314_v1, %v17216_v25  ;;  %v19316_v39 = vld [vmem:[#allocation74_spill] sm:$0xff]  ;;  %v19317_v55 = vld [vmem:[#allocation75_spill] sm:$0xff] }
 0x37a   : > { %19309 = vst [vmem:[#allocation70_spill] sm:$0xff] %v17680_v50  ;;  %19311 = vst [vmem:[#allocation71_spill] sm:$0xff] %v17684_v60  ;;  %v17696_v18 = vsub.f32 %v19316_v39, %v17216_v25  ;;  %v17700_v26 = vsub.f32 %v19317_v55, %v17216_v25  ;;  %v19319_v50 = vld [vmem:[#allocation76_spill] sm:$0xff]  ;;  %v19321_v60 = vld [vmem:[#allocation77_spill] sm:$0xff]  ;;  %v17720_v55 = vsub.f32 %v17204_v46, %v17216_v25 }
 0x37b   : > { %19313 = vst [vmem:[#allocation72_spill] sm:$0xff] %v17688_v45  ;;  %19315 = vst [vmem:[#allocation73_spill] sm:$0xff] %v17692_v37  ;;  %v17704_v0 = vsub.f32 %v19319_v50, %v17216_v25  ;;  %v17708_v40 = vsub.f32 %v19321_v60, %v17216_v25  ;;  %v19323_v45 = vld [vmem:[#allocation78_spill] sm:$0xff]  ;;  %v19325_v37 = vld [vmem:[#allocation79_spill] sm:$0xff]  ;;  %v17724_v50 = vsub.f32 %v17208_v36, %v17216_v25 }
 0x37c   : > { %19318 = vst [vmem:[#allocation74_spill] sm:$0xff] %v17700_v26  ;;  %v17712_v1 = vsub.f32 %v19323_v45, %v17216_v25  ;;  %v17716_v39 = vsub.f32 %v19325_v37, %v17216_v25  ;;  %19327 = vst [vmem:[#allocation79_spill] sm:$0xff] %v17720_v55  ;;  %v17728_v60 = vsub.f32 %v17212_v27, %v17216_v25 }
 0x37d   : > { %19320 = vst [vmem:[#allocation75_spill] sm:$0xff] %v17704_v0  ;;  %19322 = vst [vmem:[#allocation76_spill] sm:$0xff] %v17708_v40  ;;  %v11600_v45 = vmul.f32 %v17220_v13, %v17220_v13  ;;  %v11602_v37 = vmul.f32 %v17228_v58, %v17228_v58  ;;  %v11603_v46 = vmul.f32 %v17232_v2, %v17232_v2 }
 0x37e   : > { %19324 = vst [vmem:[#allocation77_spill] sm:$0xff] %v17712_v1  ;;  %19326 = vst [vmem:[#allocation78_spill] sm:$0xff] %v17716_v39  ;;  %v11601_v1 = vmul.f32 %v17224_v11, %v17224_v11  ;;  %v11604_v27 = vmul.f32 %v17236_v17, %v17236_v17  ;;  %v11605_v11 = vmul.f32 %v17240_v44, %v17240_v44 }
 0x37f   : > { %19328 = vst [vmem:[#allocation90_spill] sm:$0xff] %v17724_v50  ;;  %19329 = vst [vmem:[#allocation91_spill] sm:$0xff] %v17728_v60  ;;  %v11728_v55 = vsel %vm1102_vm0, %v11600_v45, 0.0  ;;  %v11731_v25 = vsel %vm1102_vm0, %v11602_v37, 0.0  ;;  %v11733_v60 = vsel %vm1102_vm0, %v11603_v46, 0.0  ;;  %v11606_v2 = vmul.f32 %v17244_v49, %v17244_v49 }
 0x380   : > { %v11729_v36 = vsel %vm1102_vm0, %v11601_v1, 0.0  ;;  %v11735_v45 = vsel %vm1102_vm0, %v11604_v27, 0.0  ;;  %v11607_v1 = vmul.f32 %v17248_v59, %v17248_v59 }
 0x381   : > { %v11730_v50 = vadd.f32 %v11729_v36, %v11728_v55  ;;  %v11737_v55 = vsel %vm1102_vm0, %v11605_v11, 0.0  ;;  %v11739_v37 = vsel %vm1102_vm0, %v11606_v2, 0.0  ;;  %v11611_v11 = vmul.f32 %v17264_v30, %v17264_v30 }
 0x382   : > { %v11612_v2 = vmul.f32 %v17268_v35, %v17268_v35 }
 0x383   : > { %v11732_v13 = vadd.f32 %v11731_v25, %v11730_v50  ;;  %v11608_v50 = vmul.f32 %v17252_v3, %v17252_v3 }
 0x385   : > { %v11734_v58 = vadd.f32 %v11733_v60, %v11732_v13  ;;  %v11609_v13 = vmul.f32 %v17256_v14, %v17256_v14  ;;  %v11741_v60 = vsel %vm1102_vm0, %v11607_v1, 0.0  ;;  %v11743_v27 = vsel %vm1102_vm0, %v11608_v50, 0.0 }
 0x386   : > { %v11613_v1 = vmul.f32 %v17272_v47, %v17272_v47  ;;  %v11614_v50 = vmul.f32 %v17276_v53, %v17276_v53 }
 0x387   : > { %v11736_v39 = vadd.f32 %v11735_v45, %v11734_v58  ;;  %v11610_v58 = vmul.f32 %v17260_v19, %v17260_v19 }
 0x389   : > { %v11738_v36 = vadd.f32 %v11737_v55, %v11736_v39  ;;  %v11745_v39 = vsel %vm1102_vm0, %v11609_v13, 0.0  ;;  %v11615_v13 = vmul.f32 %v17280_v5, %v17280_v5 }
 0x38b   : > { %v11740_v25 = vadd.f32 %v11739_v37, %v11738_v36  ;;  %v11747_v36 = vsel %vm1102_vm0, %v11610_v58, 0.0  ;;  %v11616_v58 = vmul.f32 %v17284_v10, %v17284_v10 }
 0x38d   : > { %v11742_v46 = vadd.f32 %v11741_v60, %v11740_v25  ;;  %v11749_v25 = vsel %vm1102_vm0, %v11611_v11, 0.0  ;;  %v11617_v11 = vmul.f32 %v17288_v23, %v17288_v23 }
 0x38f   : > { %v11744_v45 = vadd.f32 %v11743_v27, %v11742_v46  ;;  %v11751_v46 = vsel %vm1102_vm0, %v11612_v2, 0.0  ;;  %v11618_v2 = vmul.f32 %v17292_v28, %v17292_v28 }
 0x391   : > { %v11746_v55 = vadd.f32 %v11745_v39, %v11744_v45  ;;  %v11753_v45 = vsel %vm1102_vm0, %v11613_v1, 0.0  ;;  %v11619_v1 = vmul.f32 %v17296_v41, %v17296_v41 }
 0x393   : > { %v11748_v37 = vadd.f32 %v11747_v36, %v11746_v55  ;;  %v11755_v55 = vsel %vm1102_vm0, %v11614_v50, 0.0  ;;  %v11620_v50 = vmul.f32 %v17300_v48, %v17300_v48 }
 0x395   : > { %v11750_v60 = vadd.f32 %v11749_v25, %v11748_v37  ;;  %v11757_v37 = vsel %vm1102_vm0, %v11615_v13, 0.0  ;;  %v11621_v13 = vmul.f32 %v17304_v62, %v17304_v62 }
 0x397   : > { %v11752_v27 = vadd.f32 %v11751_v46, %v11750_v60  ;;  %v11759_v60 = vsel %vm1102_vm0, %v11616_v58, 0.0  ;;  %v11622_v58 = vmul.f32 %v17308_v8, %v17308_v8 }
 0x399   : > { %v11754_v39 = vadd.f32 %v11753_v45, %v11752_v27  ;;  %v11761_v27 = vsel %vm1102_vm0, %v11617_v11, 0.0  ;;  %v11623_v11 = vmul.f32 %v17312_v22, %v17312_v22 }
 0x39b   : > { %v11756_v36 = vadd.f32 %v11755_v55, %v11754_v39  ;;  %v11763_v39 = vsel %vm1102_vm0, %v11618_v2, 0.0  ;;  %v11624_v2 = vmul.f32 %v17316_v29, %v17316_v29 }
 0x39d   : > { %v11758_v25 = vadd.f32 %v11757_v37, %v11756_v36  ;;  %v11765_v36 = vsel %vm1102_vm0, %v11619_v1, 0.0  ;;  %v11625_v1 = vmul.f32 %v17320_v43, %v17320_v43 }
 0x39f   : > { %v11760_v46 = vadd.f32 %v11759_v60, %v11758_v25  ;;  %v11767_v25 = vsel %vm1102_vm0, %v11620_v50, 0.0  ;;  %v11626_v50 = vmul.f32 %v17324_v52, %v17324_v52 }
 0x3a1   : > { %v11762_v45 = vadd.f32 %v11761_v27, %v11760_v46  ;;  %v11769_v46 = vsel %vm1102_vm0, %v11621_v13, 0.0  ;;  %v11627_v13 = vmul.f32 %v17328_v7, %v17328_v7 }
 0x3a3   : > { %v11764_v55 = vadd.f32 %v11763_v39, %v11762_v45  ;;  %v11771_v45 = vsel %vm1102_vm0, %v11622_v58, 0.0  ;;  %v11628_v58 = vmul.f32 %v17332_v15, %v17332_v15 }
 0x3a5   : > { %v11766_v37 = vadd.f32 %v11765_v36, %v11764_v55  ;;  %v11773_v55 = vsel %vm1102_vm0, %v11623_v11, 0.0  ;;  %v11629_v11 = vmul.f32 %v17336_v32, %v17336_v32 }
 0x3a7   : > { %v11768_v60 = vadd.f32 %v11767_v25, %v11766_v37  ;;  %v11775_v37 = vsel %vm1102_vm0, %v11624_v2, 0.0  ;;  %v11630_v2 = vmul.f32 %v17340_v38, %v17340_v38 }
 0x3a9   : > { %v11770_v27 = vadd.f32 %v11769_v46, %v11768_v60  ;;  %v11777_v60 = vsel %vm1102_vm0, %v11625_v1, 0.0  ;;  %v11631_v1 = vmul.f32 %v17344_v57, %v17344_v57 }
 0x3ab   : > { %v11772_v39 = vadd.f32 %v11771_v45, %v11770_v27  ;;  %v11779_v27 = vsel %vm1102_vm0, %v11626_v50, 0.0  ;;  %v11632_v50 = vmul.f32 %v17348_v4, %v17348_v4 }
 0x3ad   : > { %v11774_v36 = vadd.f32 %v11773_v55, %v11772_v39  ;;  %v11781_v39 = vsel %vm1102_vm0, %v11627_v13, 0.0  ;;  %v11633_v13 = vmul.f32 %v17352_v24, %v17352_v24 }
 0x3af   : > { %v11776_v25 = vadd.f32 %v11775_v37, %v11774_v36  ;;  %v11783_v36 = vsel %vm1102_vm0, %v11628_v58, 0.0  ;;  %v11634_v58 = vmul.f32 %v17356_v33, %v17356_v33 }
 0x3b1   : > { %v11778_v46 = vadd.f32 %v11777_v60, %v11776_v25  ;;  %v11785_v25 = vsel %vm1102_vm0, %v11629_v11, 0.0  ;;  %v11635_v11 = vmul.f32 %v17360_v54, %v17360_v54 }
 0x3b3   : > { %v11780_v45 = vadd.f32 %v11779_v27, %v11778_v46  ;;  %v11787_v46 = vsel %vm1102_vm0, %v11630_v2, 0.0  ;;  %v11636_v2 = vmul.f32 %v17364_v61, %v17364_v61 }
 0x3b5   : > { %v11782_v55 = vadd.f32 %v11781_v39, %v11780_v45  ;;  %v11789_v45 = vsel %vm1102_vm0, %v11631_v1, 0.0  ;;  %v11637_v1 = vmul.f32 %v17368_v21, %v17368_v21 }
 0x3b7   : > { %v11784_v37 = vadd.f32 %v11783_v36, %v11782_v55  ;;  %v11791_v55 = vsel %vm1102_vm0, %v11632_v50, 0.0  ;;  %v11638_v50 = vmul.f32 %v17372_v34, %v17372_v34 }
 0x3b9   : > { %v11786_v60 = vadd.f32 %v11785_v25, %v11784_v37  ;;  %v11793_v37 = vsel %vm1102_vm0, %v11633_v13, 0.0  ;;  %v11639_v13 = vmul.f32 %v17376_v56, %v17376_v56 }
 0x3bb   : > { %v11788_v27 = vadd.f32 %v11787_v46, %v11786_v60  ;;  %v11795_v60 = vsel %vm1102_vm0, %v11634_v58, 0.0  ;;  %v11640_v58 = vmul.f32 %v17380_v9, %v17380_v9 }
 0x3bd   : > { %v11790_v39 = vadd.f32 %v11789_v45, %v11788_v27  ;;  %v11797_v27 = vsel %vm1102_vm0, %v11635_v11, 0.0  ;;  %v11641_v11 = vmul.f32 %v17384_v31, %v17384_v31 }
 0x3bf   : > { %v11792_v36 = vadd.f32 %v11791_v55, %v11790_v39  ;;  %v11799_v39 = vsel %vm1102_vm0, %v11636_v2, 0.0  ;;  %v11642_v2 = vmul.f32 %v17388_v42, %v17388_v42 }
 0x3c1   : > { %v11794_v25 = vadd.f32 %v11793_v37, %v11792_v36  ;;  %v11801_v36 = vsel %vm1102_vm0, %v11637_v1, 0.0  ;;  %v11643_v1 = vmul.f32 %v17392_v12, %v17392_v12 }
 0x3c3   : > { %v11796_v46 = vadd.f32 %v11795_v60, %v11794_v25  ;;  %v11803_v25 = vsel %vm1102_vm0, %v11638_v50, 0.0  ;;  %v19330_v50 = vld [vmem:[#allocation4_spill] sm:$0xff] }
 0x3c5   : > { %v11798_v45 = vadd.f32 %v11797_v27, %v11796_v46  ;;  %v11805_v46 = vsel %vm1102_vm0, %v11639_v13, 0.0  ;;  %v19331_v13 = vld [vmem:[#allocation5_spill] sm:$0xff] }
 0x3c7   : > { %v11800_v55 = vadd.f32 %v11799_v39, %v11798_v45  ;;  %v11807_v45 = vsel %vm1102_vm0, %v11640_v58, 0.0  ;;  %v19332_v58 = vld [vmem:[#allocation6_spill] sm:$0xff] }
 0x3c9   : > { %v11802_v37 = vadd.f32 %v11801_v36, %v11800_v55  ;;  %v11809_v55 = vsel %vm1102_vm0, %v11641_v11, 0.0  ;;  %v19333_v11 = vld [vmem:[#allocation7_spill] sm:$0xff] }
 0x3cb   : > { %v11804_v60 = vadd.f32 %v11803_v25, %v11802_v37  ;;  %v11644_v37 = vmul.f32 %v19330_v50, %v19330_v50  ;;  %v11811_v25 = vsel %vm1102_vm0, %v11642_v2, 0.0  ;;  %v19334_v2 = vld [vmem:[#allocation8_spill] sm:$0xff] }
 0x3cd   : > { %v11806_v27 = vadd.f32 %v11805_v46, %v11804_v60  ;;  %v11645_v60 = vmul.f32 %v19331_v13, %v19331_v13  ;;  %v11813_v46 = vsel %vm1102_vm0, %v11643_v1, 0.0  ;;  %v19335_v1 = vld [vmem:[#allocation9_spill] sm:$0xff] }
 0x3cf   : > { %v11808_v39 = vadd.f32 %v11807_v45, %v11806_v27  ;;  %v11646_v27 = vmul.f32 %v19332_v58, %v19332_v58  ;;  %v11815_v45 = vsel %vm1102_vm0, %v11644_v37, 0.0  ;;  %v19336_v37 = vld [vmem:[#allocation10_spill] sm:$0xff] }
 0x3d1   : > { %v11810_v36 = vadd.f32 %v11809_v55, %v11808_v39  ;;  %v11647_v39 = vmul.f32 %v19333_v11, %v19333_v11  ;;  %v11817_v55 = vsel %vm1102_vm0, %v11645_v60, 0.0  ;;  %v19337_v60 = vld [vmem:[#allocation11_spill] sm:$0xff] }
 0x3d3   : > { %v11812_v31 = vadd.f32 %v11811_v25, %v11810_v36  ;;  %v11648_v36 = vmul.f32 %v19334_v2, %v19334_v2  ;;  %v11819_v25 = vsel %vm1102_vm0, %v11646_v27, 0.0  ;;  %v19338_v27 = vld [vmem:[#allocation12_spill] sm:$0xff] }
 0x3d5   : > { %v11814_v42 = vadd.f32 %v11813_v46, %v11812_v31  ;;  %v11649_v31 = vmul.f32 %v19335_v1, %v19335_v1  ;;  %v11821_v46 = vsel %vm1102_vm0, %v11647_v39, 0.0  ;;  %v19339_v39 = vld [vmem:[#allocation13_spill] sm:$0xff] }
 0x3d7   : > { %v11816_v12 = vadd.f32 %v11815_v45, %v11814_v42  ;;  %v11650_v42 = vmul.f32 %v19336_v37, %v19336_v37  ;;  %v11823_v45 = vsel %vm1102_vm0, %v11648_v36, 0.0  ;;  %v19340_v36 = vld [vmem:[#allocation14_spill] sm:$0xff] }
 0x3d9   : > { %v11818_v50 = vadd.f32 %v11817_v55, %v11816_v12  ;;  %v11651_v12 = vmul.f32 %v19337_v60, %v19337_v60  ;;  %v11825_v55 = vsel %vm1102_vm0, %v11649_v31, 0.0  ;;  %v19341_v31 = vld [vmem:[#allocation15_spill] sm:$0xff] }
 0x3db   : > { %v11820_v13 = vadd.f32 %v11819_v25, %v11818_v50  ;;  %v11652_v50 = vmul.f32 %v19338_v27, %v19338_v27  ;;  %v11827_v25 = vsel %vm1102_vm0, %v11650_v42, 0.0  ;;  %v19342_v42 = vld [vmem:[#allocation16_spill] sm:$0xff] }
 0x3dd   : > { %v11822_v58 = vadd.f32 %v11821_v46, %v11820_v13  ;;  %v11653_v13 = vmul.f32 %v19339_v39, %v19339_v39  ;;  %v11829_v46 = vsel %vm1102_vm0, %v11651_v12, 0.0  ;;  %v19343_v12 = vld [vmem:[#allocation17_spill] sm:$0xff] }
 0x3df   : > { %v11824_v11 = vadd.f32 %v11823_v45, %v11822_v58  ;;  %v11654_v58 = vmul.f32 %v19340_v36, %v19340_v36  ;;  %v11831_v45 = vsel %vm1102_vm0, %v11652_v50, 0.0  ;;  %v19344_v50 = vld [vmem:[#allocation18_spill] sm:$0xff] }
 0x3e1   : > { %v11826_v2 = vadd.f32 %v11825_v55, %v11824_v11  ;;  %v11655_v11 = vmul.f32 %v19341_v31, %v19341_v31  ;;  %v11833_v55 = vsel %vm1102_vm0, %v11653_v13, 0.0  ;;  %v19345_v13 = vld [vmem:[#allocation19_spill] sm:$0xff] }
 0x3e3   : > { %v11828_v1 = vadd.f32 %v11827_v25, %v11826_v2  ;;  %v11656_v2 = vmul.f32 %v19342_v42, %v19342_v42  ;;  %v11835_v25 = vsel %vm1102_vm0, %v11654_v58, 0.0  ;;  %v19346_v58 = vld [vmem:[#allocation20_spill] sm:$0xff] }
 0x3e5   : > { %v11830_v37 = vadd.f32 %v11829_v46, %v11828_v1  ;;  %v11657_v1 = vmul.f32 %v19343_v12, %v19343_v12  ;;  %v11837_v46 = vsel %vm1102_vm0, %v11655_v11, 0.0  ;;  %v19347_v11 = vld [vmem:[#allocation21_spill] sm:$0xff] }
 0x3e7   : > { %v11832_v60 = vadd.f32 %v11831_v45, %v11830_v37  ;;  %v11658_v37 = vmul.f32 %v19344_v50, %v19344_v50  ;;  %v11839_v45 = vsel %vm1102_vm0, %v11656_v2, 0.0  ;;  %v19348_v2 = vld [vmem:[#allocation22_spill] sm:$0xff] }
 0x3e9   : > { %v11834_v27 = vadd.f32 %v11833_v55, %v11832_v60  ;;  %v11659_v60 = vmul.f32 %v19345_v13, %v19345_v13  ;;  %v11841_v55 = vsel %vm1102_vm0, %v11657_v1, 0.0  ;;  %v19349_v1 = vld [vmem:[#allocation23_spill] sm:$0xff] }
 0x3eb   : > { %v11836_v39 = vadd.f32 %v11835_v25, %v11834_v27  ;;  %v11660_v27 = vmul.f32 %v19346_v58, %v19346_v58  ;;  %v11843_v25 = vsel %vm1102_vm0, %v11658_v37, 0.0 }
 0x3ed   : > { %v11838_v36 = vadd.f32 %v11837_v46, %v11836_v39  ;;  %v11661_v39 = vmul.f32 %v19347_v11, %v19347_v11  ;;  %v11845_v46 = vsel %vm1102_vm0, %v11659_v60, 0.0 }
 0x3ef   : > { %v11840_v31 = vadd.f32 %v11839_v45, %v11838_v36  ;;  %v11662_v36 = vmul.f32 %v19348_v2, %v19348_v2  ;;  %v11847_v45 = vsel %vm1102_vm0, %v11660_v27, 0.0 }
 0x3f1   : > { %v11842_v42 = vadd.f32 %v11841_v55, %v11840_v31  ;;  %v11663_v31 = vmul.f32 %v19349_v1, %v19349_v1  ;;  %v11849_v55 = vsel %vm1102_vm0, %v11661_v39, 0.0  ;;  %v11851_v37 = vsel %vm1102_vm0, %v11662_v36, 0.0 }
 0x3f3   : > { %v11844_v12 = vadd.f32 %v11843_v25, %v11842_v42  ;;  %v11664_v42 = vmul.f32 %v17476_v16, %v17476_v16  ;;  %v11853_v60 = vsel %vm1102_vm0, %v11663_v31, 0.0  ;;  %v19350_v31 = vld [vmem:[#allocation27_spill] sm:$0xff] }
 0x3f5   : > { %v11846_v50 = vadd.f32 %v11845_v46, %v11844_v12  ;;  %v11665_v12 = vmul.f32 %v17480_v63, %v17480_v63  ;;  %v11855_v27 = vsel %vm1102_vm0, %v11664_v42, 0.0  ;;  %v19351_v42 = vld [vmem:[#allocation28_spill] sm:$0xff] }
 0x3f7   : > { %v11848_v13 = vadd.f32 %v11847_v45, %v11846_v50  ;;  %v11666_v50 = vmul.f32 %v17484_v20, %v17484_v20  ;;  %v11857_v39 = vsel %vm1102_vm0, %v11665_v12, 0.0  ;;  %v19352_v12 = vld [vmem:[#allocation29_spill] sm:$0xff] }
 0x3f9   : > { %v11850_v58 = vadd.f32 %v11849_v55, %v11848_v13  ;;  %v11667_v13 = vmul.f32 %v17488_v51, %v17488_v51  ;;  %v11859_v36 = vsel %vm1102_vm0, %v11666_v50, 0.0  ;;  %v19353_v50 = vld [vmem:[#allocation87_spill] sm:$0xff] }
 0x3fb   : > { %v11852_v25 = vadd.f32 %v11851_v37, %v11850_v58  ;;  %v11668_v58 = vmul.f32 %v17492_v6, %v17492_v6 }
 0x3fd   : > { %v11854_v46 = vadd.f32 %v11853_v60, %v11852_v25  ;;  %v11669_v25 = vmul.f32 %v19350_v31, %v19350_v31  ;;  %v11861_v60 = vsel %vm1102_vm0, %v11667_v13, 0.0  ;;  %v19354_v13 = vld [vmem:[#allocation88_spill] sm:$0xff] }
 0x3ff   : > { %v11856_v45 = vadd.f32 %v11855_v27, %v11854_v46  ;;  %v11670_v46 = vmul.f32 %v19351_v42, %v19351_v42  ;;  %v11863_v27 = vsel %vm1102_vm0, %v11668_v58, 0.0  ;;  %v19355_v58 = vld [vmem:[#allocation89_spill] sm:$0xff] }
 0x401   : > { %v11858_v55 = vadd.f32 %v11857_v39, %v11856_v45  ;;  %v11671_v45 = vmul.f32 %v19352_v12, %v19352_v12  ;;  %v11865_v39 = vsel %vm1102_vm0, %v11669_v25, 0.0  ;;  %v19356_v25 = vld [vmem:[#allocation30_spill] sm:$0xff] }
 0x403   : > { %v11860_v37 = vadd.f32 %v11859_v36, %v11858_v55  ;;  %v11672_v55 = vmul.f32 %v19353_v50, %v19353_v50  ;;  %v11867_v36 = vsel %vm1102_vm0, %v11670_v46, 0.0  ;;  %v19357_v46 = vld [vmem:[#allocation31_spill] sm:$0xff] }
 0x405   : > { %v11862_v20 = vadd.f32 %v11861_v60, %v11860_v37  ;;  %v11673_v37 = vmul.f32 %v19354_v13, %v19354_v13  ;;  %v11869_v60 = vsel %vm1102_vm0, %v11671_v45, 0.0  ;;  %v19358_v45 = vld [vmem:[#allocation32_spill] sm:$0xff] }
 0x407   : > { %v11864_v51 = vadd.f32 %v11863_v27, %v11862_v20  ;;  %v11674_v20 = vmul.f32 %v19355_v58, %v19355_v58  ;;  %v11871_v27 = vsel %vm1102_vm0, %v11672_v55, 0.0  ;;  %v19359_v55 = vld [vmem:[#allocation33_spill] sm:$0xff] }
 0x409   : > { %v11866_v6 = vadd.f32 %v11865_v39, %v11864_v51  ;;  %v11675_v51 = vmul.f32 %v19356_v25, %v19356_v25  ;;  %v11873_v39 = vsel %vm1102_vm0, %v11673_v37, 0.0  ;;  %v19360_v37 = vld [vmem:[#allocation34_spill] sm:$0xff] }
 0x40b   : > { %v11868_v31 = vadd.f32 %v11867_v36, %v11866_v6  ;;  %v11676_v6 = vmul.f32 %v19357_v46, %v19357_v46  ;;  %v11875_v36 = vsel %vm1102_vm0, %v11674_v20, 0.0  ;;  %v19361_v20 = vld [vmem:[#allocation35_spill] sm:$0xff] }
 0x40d   : > { %v11870_v42 = vadd.f32 %v11869_v60, %v11868_v31  ;;  %v11677_v31 = vmul.f32 %v19358_v45, %v19358_v45  ;;  %v11877_v60 = vsel %vm1102_vm0, %v11675_v51, 0.0  ;;  %v19362_v51 = vld [vmem:[#allocation36_spill] sm:$0xff] }
 0x40f   : > { %v11872_v12 = vadd.f32 %v11871_v27, %v11870_v42  ;;  %v11678_v42 = vmul.f32 %v19359_v55, %v19359_v55  ;;  %v11879_v27 = vsel %vm1102_vm0, %v11676_v6, 0.0  ;;  %v19363_v6 = vld [vmem:[#allocation37_spill] sm:$0xff] }
 0x411   : > { %v11874_v50 = vadd.f32 %v11873_v39, %v11872_v12  ;;  %v11679_v12 = vmul.f32 %v19360_v37, %v19360_v37  ;;  %v11881_v39 = vsel %vm1102_vm0, %v11677_v31, 0.0  ;;  %v19364_v31 = vld [vmem:[#allocation38_spill] sm:$0xff] }
 0x413   : > { %v11876_v13 = vadd.f32 %v11875_v36, %v11874_v50  ;;  %v11680_v50 = vmul.f32 %v19361_v20, %v19361_v20  ;;  %v11883_v36 = vsel %vm1102_vm0, %v11678_v42, 0.0  ;;  %v19365_v42 = vld [vmem:[#allocation39_spill] sm:$0xff] }
 0x415   : > { %v11878_v58 = vadd.f32 %v11877_v60, %v11876_v13  ;;  %v11681_v13 = vmul.f32 %v19362_v51, %v19362_v51  ;;  %v11885_v60 = vsel %vm1102_vm0, %v11679_v12, 0.0  ;;  %v19366_v12 = vld [vmem:[#allocation40_spill] sm:$0xff] }
 0x417   : > { %v11880_v25 = vadd.f32 %v11879_v27, %v11878_v58  ;;  %v11682_v58 = vmul.f32 %v19363_v6, %v19363_v6  ;;  %v11887_v27 = vsel %vm1102_vm0, %v11680_v50, 0.0  ;;  %v19367_v50 = vld [vmem:[#allocation41_spill] sm:$0xff] }
 0x419   : > { %v11882_v46 = vadd.f32 %v11881_v39, %v11880_v25  ;;  %v11683_v25 = vmul.f32 %v19364_v31, %v19364_v31  ;;  %v11889_v39 = vsel %vm1102_vm0, %v11681_v13, 0.0  ;;  %v19368_v13 = vld [vmem:[#allocation42_spill] sm:$0xff] }
 0x41b   : > { %v11884_v45 = vadd.f32 %v11883_v36, %v11882_v46  ;;  %v11684_v46 = vmul.f32 %v19365_v42, %v19365_v42  ;;  %v11891_v36 = vsel %vm1102_vm0, %v11682_v58, 0.0  ;;  %v19369_v58 = vld [vmem:[#allocation43_spill] sm:$0xff] }
 0x41d   : > { %v11886_v55 = vadd.f32 %v11885_v60, %v11884_v45  ;;  %v11685_v45 = vmul.f32 %v19366_v12, %v19366_v12  ;;  %v11893_v60 = vsel %vm1102_vm0, %v11683_v25, 0.0  ;;  %v19370_v25 = vld [vmem:[#allocation44_spill] sm:$0xff] }
 0x41f   : > { %v11888_v37 = vadd.f32 %v11887_v27, %v11886_v55  ;;  %v11686_v55 = vmul.f32 %v19367_v50, %v19367_v50  ;;  %v11895_v27 = vsel %vm1102_vm0, %v11684_v46, 0.0  ;;  %v19371_v46 = vld [vmem:[#allocation45_spill] sm:$0xff] }
 0x421   : > { %v11890_v20 = vadd.f32 %v11889_v39, %v11888_v37  ;;  %v11687_v37 = vmul.f32 %v19368_v13, %v19368_v13  ;;  %v11897_v39 = vsel %vm1102_vm0, %v11685_v45, 0.0  ;;  %v19372_v45 = vld [vmem:[#allocation46_spill] sm:$0xff] }
 0x423   : > { %v11892_v51 = vadd.f32 %v11891_v36, %v11890_v20  ;;  %v11688_v20 = vmul.f32 %v19369_v58, %v19369_v58  ;;  %v11899_v36 = vsel %vm1102_vm0, %v11686_v55, 0.0  ;;  %v19373_v55 = vld [vmem:[#allocation47_spill] sm:$0xff] }
 0x425   : > { %v11894_v6 = vadd.f32 %v11893_v60, %v11892_v51  ;;  %v11689_v51 = vmul.f32 %v19370_v25, %v19370_v25  ;;  %v11901_v60 = vsel %vm1102_vm0, %v11687_v37, 0.0  ;;  %v19374_v37 = vld [vmem:[#allocation48_spill] sm:$0xff] }
 0x427   : > { %v11896_v31 = vadd.f32 %v11895_v27, %v11894_v6  ;;  %v11690_v6 = vmul.f32 %v19371_v46, %v19371_v46  ;;  %v11903_v27 = vsel %vm1102_vm0, %v11688_v20, 0.0  ;;  %v19375_v20 = vld [vmem:[#allocation49_spill] sm:$0xff] }
 0x429   : > { %v11898_v42 = vadd.f32 %v11897_v39, %v11896_v31  ;;  %v11691_v31 = vmul.f32 %v19372_v45, %v19372_v45  ;;  %v11905_v39 = vsel %vm1102_vm0, %v11689_v51, 0.0  ;;  %v19376_v51 = vld [vmem:[#allocation50_spill] sm:$0xff] }
 0x42b   : > { %v11900_v12 = vadd.f32 %v11899_v36, %v11898_v42  ;;  %v11692_v42 = vmul.f32 %v19373_v55, %v19373_v55  ;;  %v11907_v36 = vsel %vm1102_vm0, %v11690_v6, 0.0  ;;  %v19377_v6 = vld [vmem:[#allocation51_spill] sm:$0xff] }
 0x42d   : > { %v11902_v50 = vadd.f32 %v11901_v60, %v11900_v12  ;;  %v11693_v12 = vmul.f32 %v19374_v37, %v19374_v37  ;;  %v11909_v60 = vsel %vm1102_vm0, %v11691_v31, 0.0  ;;  %v19378_v31 = vld [vmem:[#allocation52_spill] sm:$0xff] }
 0x42f   : > { %v11904_v13 = vadd.f32 %v11903_v27, %v11902_v50  ;;  %v11694_v50 = vmul.f32 %v19375_v20, %v19375_v20  ;;  %v11911_v27 = vsel %vm1102_vm0, %v11692_v42, 0.0  ;;  %v19379_v42 = vld [vmem:[#allocation53_spill] sm:$0xff] }
 0x431   : > { %v11906_v58 = vadd.f32 %v11905_v39, %v11904_v13  ;;  %v11695_v13 = vmul.f32 %v19376_v51, %v19376_v51  ;;  %v11913_v39 = vsel %vm1102_vm0, %v11693_v12, 0.0  ;;  %v19380_v12 = vld [vmem:[#allocation54_spill] sm:$0xff] }
 0x433   : > { %v11908_v25 = vadd.f32 %v11907_v36, %v11906_v58  ;;  %v11696_v58 = vmul.f32 %v19377_v6, %v19377_v6  ;;  %v11915_v36 = vsel %vm1102_vm0, %v11694_v50, 0.0  ;;  %v19381_v50 = vld [vmem:[#allocation55_spill] sm:$0xff] }
 0x435   : > { %v11910_v46 = vadd.f32 %v11909_v60, %v11908_v25  ;;  %v11697_v25 = vmul.f32 %v19378_v31, %v19378_v31  ;;  %v11917_v60 = vsel %vm1102_vm0, %v11695_v13, 0.0  ;;  %v19382_v13 = vld [vmem:[#allocation56_spill] sm:$0xff] }
 0x437   : > { %v11912_v45 = vadd.f32 %v11911_v27, %v11910_v46  ;;  %v11698_v46 = vmul.f32 %v19379_v42, %v19379_v42  ;;  %v11919_v27 = vsel %vm1102_vm0, %v11696_v58, 0.0  ;;  %v19383_v58 = vld [vmem:[#allocation57_spill] sm:$0xff] }
 0x439   : > { %v11914_v55 = vadd.f32 %v11913_v39, %v11912_v45  ;;  %v11699_v45 = vmul.f32 %v19380_v12, %v19380_v12  ;;  %v11921_v39 = vsel %vm1102_vm0, %v11697_v25, 0.0  ;;  %v19384_v25 = vld [vmem:[#allocation58_spill] sm:$0xff] }
 0x43b   : > { %v11916_v37 = vadd.f32 %v11915_v36, %v11914_v55  ;;  %v11700_v55 = vmul.f32 %v19381_v50, %v19381_v50  ;;  %v11923_v36 = vsel %vm1102_vm0, %v11698_v46, 0.0  ;;  %v19385_v46 = vld [vmem:[#allocation59_spill] sm:$0xff] }
 0x43d   : > { %v11918_v20 = vadd.f32 %v11917_v60, %v11916_v37  ;;  %v11701_v37 = vmul.f32 %v19382_v13, %v19382_v13  ;;  %v11925_v60 = vsel %vm1102_vm0, %v11699_v45, 0.0  ;;  %v19386_v45 = vld [vmem:[#allocation60_spill] sm:$0xff] }
 0x43f   : > { %v11920_v51 = vadd.f32 %v11919_v27, %v11918_v20  ;;  %v11702_v20 = vmul.f32 %v19383_v58, %v19383_v58  ;;  %v11927_v27 = vsel %vm1102_vm0, %v11700_v55, 0.0  ;;  %v19387_v55 = vld [vmem:[#allocation61_spill] sm:$0xff] }
 0x441   : > { %v11922_v6 = vadd.f32 %v11921_v39, %v11920_v51  ;;  %v11703_v51 = vmul.f32 %v19384_v25, %v19384_v25  ;;  %v11929_v39 = vsel %vm1102_vm0, %v11701_v37, 0.0  ;;  %v19388_v37 = vld [vmem:[#allocation62_spill] sm:$0xff] }
 0x443   : > { %v11924_v31 = vadd.f32 %v11923_v36, %v11922_v6  ;;  %v11704_v6 = vmul.f32 %v19385_v46, %v19385_v46  ;;  %v11931_v36 = vsel %vm1102_vm0, %v11702_v20, 0.0  ;;  %v19389_v20 = vld [vmem:[#allocation63_spill] sm:$0xff] }
 0x445   : > { %v11926_v42 = vadd.f32 %v11925_v60, %v11924_v31  ;;  %v11705_v31 = vmul.f32 %v19386_v45, %v19386_v45  ;;  %v11933_v60 = vsel %vm1102_vm0, %v11703_v51, 0.0  ;;  %v19390_v51 = vld [vmem:[#allocation64_spill] sm:$0xff] }
 0x447   : > { %v11928_v12 = vadd.f32 %v11927_v27, %v11926_v42  ;;  %v11706_v42 = vmul.f32 %v19387_v55, %v19387_v55  ;;  %v11935_v27 = vsel %vm1102_vm0, %v11704_v6, 0.0  ;;  %v19391_v6 = vld [vmem:[#allocation65_spill] sm:$0xff] }
 0x449   : > { %v11930_v50 = vadd.f32 %v11929_v39, %v11928_v12  ;;  %v11707_v12 = vmul.f32 %v19388_v37, %v19388_v37  ;;  %v11937_v39 = vsel %vm1102_vm0, %v11705_v31, 0.0  ;;  %v19392_v31 = vld [vmem:[#allocation66_spill] sm:$0xff] }
 0x44b   : > { %v11932_v13 = vadd.f32 %v11931_v36, %v11930_v50  ;;  %v11708_v50 = vmul.f32 %v19389_v20, %v19389_v20  ;;  %v11939_v36 = vsel %vm1102_vm0, %v11706_v42, 0.0  ;;  %v19393_v42 = vld [vmem:[#allocation67_spill] sm:$0xff] }
 0x44d   : > { %v11934_v58 = vadd.f32 %v11933_v60, %v11932_v13  ;;  %v11709_v13 = vmul.f32 %v19390_v51, %v19390_v51  ;;  %v11941_v60 = vsel %vm1102_vm0, %v11707_v12, 0.0  ;;  %v19394_v12 = vld [vmem:[#allocation68_spill] sm:$0xff] }
 0x44f   : > { %v11936_v25 = vadd.f32 %v11935_v27, %v11934_v58  ;;  %v11710_v58 = vmul.f32 %v19391_v6, %v19391_v6  ;;  %v11943_v27 = vsel %vm1102_vm0, %v11708_v50, 0.0  ;;  %v19395_v50 = vld [vmem:[#allocation69_spill] sm:$0xff] }
 0x451   : > { %v11938_v46 = vadd.f32 %v11937_v39, %v11936_v25  ;;  %v11711_v25 = vmul.f32 %v19392_v31, %v19392_v31  ;;  %v11945_v39 = vsel %vm1102_vm0, %v11709_v13, 0.0  ;;  %v19396_v13 = vld [vmem:[#allocation70_spill] sm:$0xff] }
 0x453   : > { %v11940_v45 = vadd.f32 %v11939_v36, %v11938_v46  ;;  %v11712_v46 = vmul.f32 %v19393_v42, %v19393_v42  ;;  %v11947_v36 = vsel %vm1102_vm0, %v11710_v58, 0.0  ;;  %v19397_v58 = vld [vmem:[#allocation71_spill] sm:$0xff] }
 0x455   : > { %v11942_v55 = vadd.f32 %v11941_v60, %v11940_v45  ;;  %v11713_v45 = vmul.f32 %v19394_v12, %v19394_v12  ;;  %v11949_v60 = vsel %vm1102_vm0, %v11711_v25, 0.0  ;;  %v19398_v25 = vld [vmem:[#allocation72_spill] sm:$0xff] }
 0x457   : > { %v11944_v37 = vadd.f32 %v11943_v27, %v11942_v55  ;;  %v11714_v55 = vmul.f32 %v19395_v50, %v19395_v50  ;;  %v11951_v27 = vsel %vm1102_vm0, %v11712_v46, 0.0  ;;  %v19399_v46 = vld [vmem:[#allocation73_spill] sm:$0xff] }
 0x459   : > { %v11946_v20 = vadd.f32 %v11945_v39, %v11944_v37  ;;  %v11715_v37 = vmul.f32 %v19396_v13, %v19396_v13  ;;  %v11953_v39 = vsel %vm1102_vm0, %v11713_v45, 0.0 }
 0x45b   : > { %v11948_v51 = vadd.f32 %v11947_v36, %v11946_v20  ;;  %v11716_v20 = vmul.f32 %v19397_v58, %v19397_v58  ;;  %v11955_v36 = vsel %vm1102_vm0, %v11714_v55, 0.0 }
 0x45d   : > { %v11950_v6 = vadd.f32 %v11949_v60, %v11948_v51  ;;  %v11717_v51 = vmul.f32 %v19398_v25, %v19398_v25  ;;  %v11957_v60 = vsel %vm1102_vm0, %v11715_v37, 0.0 }
 0x45f   : > { %v11952_v31 = vadd.f32 %v11951_v27, %v11950_v6  ;;  %v11718_v6 = vmul.f32 %v19399_v46, %v19399_v46  ;;  %v11959_v27 = vsel %vm1102_vm0, %v11716_v20, 0.0  ;;  %v11961_v45 = vsel %vm1102_vm0, %v11717_v51, 0.0  ;;  %v19400_v51 = vld [vmem:[#allocation77_spill] sm:$0xff] }
 0x461   : > { %v11954_v42 = vadd.f32 %v11953_v39, %v11952_v31  ;;  %v11719_v31 = vmul.f32 %v17696_v18, %v17696_v18  ;;  %v11963_v55 = vsel %vm1102_vm0, %v11718_v6, 0.0  ;;  %v19401_v6 = vld [vmem:[#allocation78_spill] sm:$0xff] }
 0x463   : > { %v11956_v12 = vadd.f32 %v11955_v36, %v11954_v42  ;;  %v11720_v42 = vmul.f32 %v17700_v26, %v17700_v26  ;;  %v11965_v37 = vsel %vm1102_vm0, %v11719_v31, 0.0  ;;  %v19402_v31 = vld [vmem:[#allocation79_spill] sm:$0xff] }
 0x465   : > { %v11958_v50 = vadd.f32 %v11957_v60, %v11956_v12  ;;  %v11721_v12 = vmul.f32 %v17704_v0, %v17704_v0  ;;  %v11967_v20 = vsel %vm1102_vm0, %v11720_v42, 0.0  ;;  %v19403_v42 = vld [vmem:[#allocation90_spill] sm:$0xff] }
 0x467   : > { %v11960_v13 = vadd.f32 %v11959_v27, %v11958_v50  ;;  %v11722_v50 = vmul.f32 %v17708_v40, %v17708_v40 }
 0x469   : > { %v11962_v39 = vadd.f32 %v11961_v45, %v11960_v13  ;;  %v11723_v13 = vmul.f32 %v19400_v51, %v19400_v51  ;;  %v11969_v45 = vsel %vm1102_vm0, %v11721_v12, 0.0  ;;  %v19404_v12 = vld [vmem:[#allocation91_spill] sm:$0xff] }
 0x46b   : > { %v11964_v36 = vadd.f32 %v11963_v55, %v11962_v39  ;;  %v11724_v39 = vmul.f32 %v19401_v6, %v19401_v6  ;;  %v11971_v55 = vsel %vm1102_vm0, %v11722_v50, 0.0 }
 0x46d   : > { %v11966_v60 = vadd.f32 %v11965_v37, %v11964_v36  ;;  %v11725_v36 = vmul.f32 %v19402_v31, %v19402_v31  ;;  %v11973_v37 = vsel %vm1102_vm0, %v11723_v13, 0.0 }
 0x46f   : > { %v11968_v27 = vadd.f32 %v11967_v20, %v11966_v60  ;;  %v11726_v60 = vmul.f32 %v19403_v42, %v19403_v42  ;;  %v11975_v20 = vsel %vm1102_vm0, %v11724_v39, 0.0  ;;  %v19405_v39 = vld [vmem:[#allocation80_spill] sm:$0xff] }
 0x471   : > { %v11970_v26 = vadd.f32 %v11969_v45, %v11968_v27  ;;  %v11727_v27 = vmul.f32 %v19404_v12, %v19404_v12  ;;  %v11977_v45 = vsel %vm1102_vm0, %v11725_v36, 0.0  ;;  %v19407_v36 = vld [vmem:[#allocation82_spill] sm:$0xff] }
 0x473   : > { %v11972_v0 = vadd.f32 %v11971_v55, %v11970_v26  ;;  %v11979_v26 = vsel %vm1102_vm0, %v11726_v60, 0.0  ;;  %v11981_v55 = vsel %vm1102_vm0, %v11727_v27, 0.0  ;;  %v19408_v60 = vld [vmem:[#allocation83_spill] sm:$0xff] }
 0x475   : > { %v11974_v40 = vadd.f32 %v11973_v37, %v11972_v0 }
 0x477   : > { %v11976_v51 = vadd.f32 %v11975_v20, %v11974_v40  ;;  %v19406_v20 = vld [vmem:[#allocation81_spill] sm:$0xff] }
 0x479   : > { %v11978_v6 = vadd.f32 %v11977_v45, %v11976_v51 }
 0x47b   : > { %v11980_v50 = vadd.f32 %v11979_v26, %v11978_v6 }
 0x47d   : > { %v11982_v31 = vadd.f32 %v11981_v55, %v11980_v50 }
 0x47f   : > { %v11983_v13 = vmul.f32 0.0078125, %v11982_v31 }
 0x481   : > { %v11984_v0 = vadd.f32 1e-05, %v11983_v13 }
 0x483   : > { %15130 = vrsqrt.f32 %v11984_v0  ;;  %v19413_v0 = vld [vmem:[#allocation5_spill] sm:$0xff] }
 0x48d   : > { %v18114_v37 = vpop.eup %15130 }
 0x48e   : > { %v11986_v40 = vmul.f32 %v18114_v37, %v19405_v39  ;;  %v11987_v12 = vmul.f32 %v18114_v37, %v19406_v20  ;;  %v11988_v51 = vmul.f32 %v18114_v37, %v19407_v36  ;;  %v11989_v6 = vmul.f32 %v18114_v37, %v19408_v60  ;;  %v19415_v36 = vld [vmem:[#allocation7_spill] sm:$0xff]  ;;  %v19416_v60 = vld [vmem:[#allocation8_spill] sm:$0xff] }
 0x48f   : > { %v11990_v31 = vmul.f32 %v18114_v37, %v17236_v17  ;;  %v11991_v27 = vmul.f32 %v18114_v37, %v17240_v44  ;;  %v11992_v45 = vmul.f32 %v18114_v37, %v17244_v49  ;;  %v11993_v26 = vmul.f32 %v18114_v37, %v17248_v59 }
 0x490   : > { %v11994_v50 = vmul.f32 %v18114_v37, %v17252_v3  ;;  %v11995_v55 = vmul.f32 %v18114_v37, %v17256_v14  ;;  %v11996_v13 = vmul.f32 %v18114_v37, %v17260_v19  ;;  %v11997_v17 = vmul.f32 %v18114_v37, %v17264_v30  ;;  %12114 = vst.msk [vmem:[%s18141_s23] sm:$0xff] %vm1102_vm0, %v11986_v40  ;;  %v19414_v40 = vld [vmem:[#allocation6_spill] sm:$0xff] }
 0x491   : > { %12115 = vst.msk [vmem:[%s18141_s23 + $0x8] sm:$0xff] %vm1102_vm0, %v11987_v12  ;;  %12116 = vst.msk [vmem:[%s18141_s23 + $0x10] sm:$0xff] %vm1102_vm0, %v11988_v51  ;;  %v11998_v44 = vmul.f32 %v18114_v37, %v17268_v35  ;;  %v11999_v49 = vmul.f32 %v18114_v37, %v17272_v47  ;;  %v12000_v59 = vmul.f32 %v18114_v37, %v17276_v53 }
 0x492   : > { %12117 = vst.msk [vmem:[%s18141_s23 + $0x18] sm:$0xff] %vm1102_vm0, %v11989_v6  ;;  %v12001_v3 = vmul.f32 %v18114_v37, %v17280_v5  ;;  %12118 = vst.msk [vmem:[%s18141_s23 + $0x20] sm:$0xff] %vm1102_vm0, %v11990_v31  ;;  %v12002_v14 = vmul.f32 %v18114_v37, %v17284_v10  ;;  %v12003_v19 = vmul.f32 %v18114_v37, %v17288_v23  ;;  %v19417_v31 = vld [vmem:[#allocation9_spill] sm:$0xff] }
 0x493   : > { %12119 = vst.msk [vmem:[%s18141_s23 + $0x28] sm:$0xff] %vm1102_vm0, %v11991_v27  ;;  %12120 = vst.msk [vmem:[%s18141_s23 + $0x30] sm:$0xff] %vm1102_vm0, %v11992_v45  ;;  %v12004_v30 = vmul.f32 %v18114_v37, %v17292_v28  ;;  %v12005_v35 = vmul.f32 %v18114_v37, %v17296_v41  ;;  %v12006_v47 = vmul.f32 %v18114_v37, %v17300_v48  ;;  %v19418_v45 = vld [vmem:[#allocation10_spill] sm:$0xff] }
 0x494   : > { %12121 = vst.msk [vmem:[%s18141_s23 + $0x38] sm:$0xff] %vm1102_vm0, %v11993_v26  ;;  %12122 = vst.msk [vmem:[%s18141_s23 + $0x40] sm:$0xff] %vm1102_vm0, %v11994_v50  ;;  %v12007_v53 = vmul.f32 %v18114_v37, %v17304_v62  ;;  %v12008_v5 = vmul.f32 %v18114_v37, %v17308_v8  ;;  %v12009_v10 = vmul.f32 %v18114_v37, %v17312_v22  ;;  %v19419_v50 = vld [vmem:[#allocation11_spill] sm:$0xff] }
 0x495   : > { %12123 = vst.msk [vmem:[%s18141_s23 + $0x48] sm:$0xff] %vm1102_vm0, %v11995_v55  ;;  %12124 = vst.msk [vmem:[%s18141_s23 + $0x50] sm:$0xff] %vm1102_vm0, %v11996_v13  ;;  %v12010_v23 = vmul.f32 %v18114_v37, %v17316_v29  ;;  %v12011_v28 = vmul.f32 %v18114_v37, %v17320_v43  ;;  %v12012_v41 = vmul.f32 %v18114_v37, %v17324_v52  ;;  %v19420_v13 = vld [vmem:[#allocation12_spill] sm:$0xff] }
 0x496   : > { %12125 = vst.msk [vmem:[%s18141_s23 + $0x58] sm:$0xff] %vm1102_vm0, %v11997_v17  ;;  %12126 = vst.msk [vmem:[%s18141_s23 + $0x60] sm:$0xff] %vm1102_vm0, %v11998_v44  ;;  %v12013_v48 = vmul.f32 %v18114_v37, %v17328_v7  ;;  %v12014_v62 = vmul.f32 %v18114_v37, %v17332_v15  ;;  %v12015_v8 = vmul.f32 %v18114_v37, %v17336_v32  ;;  %v19421_v44 = vld [vmem:[#allocation13_spill] sm:$0xff] }
 0x497   : > { %12127 = vst.msk [vmem:[%s18141_s23 + $0x68] sm:$0xff] %vm1102_vm0, %v11999_v49  ;;  %12128 = vst.msk [vmem:[%s18141_s23 + $0x70] sm:$0xff] %vm1102_vm0, %v12000_v59  ;;  %v12016_v22 = vmul.f32 %v18114_v37, %v17340_v38  ;;  %v12017_v29 = vmul.f32 %v18114_v37, %v17344_v57  ;;  %v12018_v43 = vmul.f32 %v18114_v37, %v17348_v4  ;;  %v19422_v59 = vld [vmem:[#allocation14_spill] sm:$0xff] }
 0x498   : > { %12129 = vst.msk [vmem:[%s18141_s23 + $0x78] sm:$0xff] %vm1102_vm0, %v12001_v3  ;;  %12130 = vst.msk [vmem:[%s18141_s23 + $0x80] sm:$0xff] %vm1102_vm0, %v12002_v14  ;;  %v12019_v52 = vmul.f32 %v18114_v37, %v17352_v24  ;;  %v12020_v7 = vmul.f32 %v18114_v37, %v17356_v33  ;;  %v12021_v15 = vmul.f32 %v18114_v37, %v17360_v54  ;;  %v19409_v33 = vld [vmem:[#allocation84_spill] sm:$0xff]  ;;  %v19423_v14 = vld [vmem:[#allocation15_spill] sm:$0xff] }
 0x499   : > { %12131 = vst.msk [vmem:[%s18141_s23 + $0x88] sm:$0xff] %vm1102_vm0, %v12003_v19  ;;  %12132 = vst.msk [vmem:[%s18141_s23 + $0x90] sm:$0xff] %vm1102_vm0, %v12004_v30  ;;  %v12022_v32 = vmul.f32 %v18114_v37, %v17364_v61  ;;  %v12023_v38 = vmul.f32 %v18114_v37, %v17368_v21  ;;  %v12024_v57 = vmul.f32 %v18114_v37, %v17372_v34  ;;  %v19410_v61 = vld [vmem:[#allocation85_spill] sm:$0xff]  ;;  %v19411_v34 = vld [vmem:[#allocation86_spill] sm:$0xff] }
 0x49a   : > { %12133 = vst.msk [vmem:[%s18141_s23 + $0x98] sm:$0xff] %vm1102_vm0, %v12005_v35  ;;  %12134 = vst.msk [vmem:[%s18141_s23 + $0xa0] sm:$0xff] %vm1102_vm0, %v12006_v47  ;;  %v12025_v4 = vmul.f32 %v18114_v37, %v17376_v56  ;;  %v12026_v24 = vmul.f32 %v18114_v37, %v17380_v9  ;;  %v12027_v54 = vmul.f32 %v18114_v37, %v19409_v33  ;;  %v19412_v9 = vld [vmem:[#allocation4_spill] sm:$0xff]  ;;  %v19425_v47 = vld [vmem:[#allocation17_spill] sm:$0xff] }
 0x49b   : > { %12135 = vst.msk [vmem:[%s18141_s23 + $0xa8] sm:$0xff] %vm1102_vm0, %v12007_v53  ;;  %12136 = vst.msk [vmem:[%s18141_s23 + $0xb0] sm:$0xff] %vm1102_vm0, %v12008_v5  ;;  %v12028_v21 = vmul.f32 %v18114_v37, %v19410_v61  ;;  %v12029_v56 = vmul.f32 %v18114_v37, %v19411_v34  ;;  %v12030_v12 = vmul.f32 %v18114_v37, %v19412_v9  ;;  %v19424_v30 = vld [vmem:[#allocation16_spill] sm:$0xff]  ;;  %v19426_v5 = vld [vmem:[#allocation18_spill] sm:$0xff] }
 0x49c   : > { %12137 = vst.msk [vmem:[%s18141_s23 + $0xb8] sm:$0xff] %vm1102_vm0, %v12009_v10  ;;  %12138 = vst.msk [vmem:[%s18141_s23 + $0xc0] sm:$0xff] %vm1102_vm0, %v12010_v23  ;;  %v12031_v39 = vmul.f32 %v18114_v37, %v19413_v0  ;;  %v12032_v20 = vmul.f32 %v18114_v37, %v19414_v40  ;;  %v12033_v51 = vmul.f32 %v18114_v37, %v19415_v36  ;;  %v19427_v23 = vld [vmem:[#allocation19_spill] sm:$0xff] }
 0x49d   : > { %12139 = vst.msk [vmem:[%s18141_s23 + $0xc8] sm:$0xff] %vm1102_vm0, %v12011_v28  ;;  %12140 = vst.msk [vmem:[%s18141_s23 + $0xd0] sm:$0xff] %vm1102_vm0, %v12012_v41  ;;  %v12034_v6 = vmul.f32 %v18114_v37, %v19416_v60  ;;  %v12035_v27 = vmul.f32 %v18114_v37, %v19417_v31  ;;  %v12036_v26 = vmul.f32 %v18114_v37, %v19418_v45  ;;  %v19428_v41 = vld [vmem:[#allocation20_spill] sm:$0xff] }
 0x49e   : > { %12141 = vst.msk [vmem:[%s18141_s23 + $0xd8] sm:$0xff] %vm1102_vm0, %v12013_v48  ;;  %12142 = vst.msk [vmem:[%s18141_s23 + $0xe0] sm:$0xff] %vm1102_vm0, %v12014_v62  ;;  %v12037_v55 = vmul.f32 %v18114_v37, %v19419_v50  ;;  %v12038_v17 = vmul.f32 %v18114_v37, %v19420_v13  ;;  %v12039_v49 = vmul.f32 %v18114_v37, %v19421_v44 }
 0x49f   : > { %12143 = vst.msk [vmem:[%s18141_s23 + $0xe8] sm:$0xff] %vm1102_vm0, %v12015_v8  ;;  %12144 = vst.msk [vmem:[%s18141_s23 + $0xf0] sm:$0xff] %vm1102_vm0, %v12016_v22  ;;  %v12040_v3 = vmul.f32 %v18114_v37, %v19422_v59  ;;  %v12041_v19 = vmul.f32 %v18114_v37, %v19423_v14  ;;  %v12042_v35 = vmul.f32 %v18114_v37, %v19424_v30 }
 0x4a0   : > { %12145 = vst.msk [vmem:[%s18141_s23 + $0xf8] sm:$0xff] %vm1102_vm0, %v12017_v29  ;;  %12146 = vst.msk [vmem:[%s18141_s23 + $0x100] sm:$0xff] %vm1102_vm0, %v12018_v43  ;;  %v12043_v53 = vmul.f32 %v18114_v37, %v19425_v47  ;;  %v12044_v10 = vmul.f32 %v18114_v37, %v19426_v5  ;;  %v12045_v28 = vmul.f32 %v18114_v37, %v19427_v23  ;;  %v19429_v29 = vld [vmem:[#allocation24_spill] sm:$0xff]  ;;  %v19430_v43 = vld [vmem:[#allocation25_spill] sm:$0xff] }
 0x4a1   : > { %12147 = vst.msk [vmem:[%s18141_s23 + $0x108] sm:$0xff] %vm1102_vm0, %v12019_v52  ;;  %12148 = vst.msk [vmem:[%s18141_s23 + $0x110] sm:$0xff] %vm1102_vm0, %v12020_v7  ;;  %v12046_v48 = vmul.f32 %v18114_v37, %v19428_v41  ;;  %v12047_v62 = vmul.f32 %v18114_v37, %v19347_v11  ;;  %v12048_v8 = vmul.f32 %v18114_v37, %v19348_v2  ;;  %v19432_v7 = vld [vmem:[#allocation27_spill] sm:$0xff] }
 0x4a2   : > { %12149 = vst.msk [vmem:[%s18141_s23 + $0x118] sm:$0xff] %vm1102_vm0, %v12021_v15  ;;  %12150 = vst.msk [vmem:[%s18141_s23 + $0x120] sm:$0xff] %vm1102_vm0, %v12022_v32  ;;  %v12049_v22 = vmul.f32 %v18114_v37, %v19349_v1  ;;  %v12050_v11 = vmul.f32 %v18114_v37, %v17476_v16  ;;  %v12051_v2 = vmul.f32 %v18114_v37, %v17480_v63  ;;  %v19431_v16 = vld [vmem:[#allocation26_spill] sm:$0xff]  ;;  %v19433_v32 = vld [vmem:[#allocation28_spill] sm:$0xff] }
 0x4a3   : > { %12151 = vst.msk [vmem:[%s18141_s23 + $0x128] sm:$0xff] %vm1102_vm0, %v12023_v38  ;;  %12152 = vst.msk [vmem:[%s18141_s23 + $0x130] sm:$0xff] %vm1102_vm0, %v12024_v57  ;;  %v12052_v1 = vmul.f32 %v18114_v37, %v19429_v29  ;;  %v12053_v52 = vmul.f32 %v18114_v37, %v19430_v43  ;;  %v12054_v63 = vmul.f32 %v18114_v37, %v19431_v16  ;;  %v19434_v57 = vld [vmem:[#allocation29_spill] sm:$0xff]  ;;  %v19458_v29 = vld [vmem:[#allocation50_spill] sm:$0xff] }
 0x4a4   : > { %12153 = vst.msk [vmem:[%s18141_s23 + $0x138] sm:$0xff] %vm1102_vm0, %v12025_v4  ;;  %12154 = vst.msk [vmem:[%s18141_s23 + $0x140] sm:$0xff] %vm1102_vm0, %v12026_v24  ;;  %v12055_v15 = vmul.f32 %v18114_v37, %v19432_v7  ;;  %v12056_v38 = vmul.f32 %v18114_v37, %v19433_v32  ;;  %v12057_v4 = vmul.f32 %v18114_v37, %v19434_v57  ;;  %v19435_v24 = vld [vmem:[#allocation87_spill] sm:$0xff]  ;;  %v19460_v16 = vld [vmem:[#allocation52_spill] sm:$0xff] }
 0x4a5   : > { %12155 = vst.msk [vmem:[%s18141_s23 + $0x148] sm:$0xff] %vm1102_vm0, %v12027_v54  ;;  %12156 = vst.msk [vmem:[%s18141_s23 + $0x150] sm:$0xff] %vm1102_vm0, %v12028_v21  ;;  %v12058_v33 = vmul.f32 %v18114_v37, %v19435_v24  ;;  %v19436_v54 = vld [vmem:[#allocation88_spill] sm:$0xff]  ;;  %v19437_v21 = vld [vmem:[#allocation89_spill] sm:$0xff] }
 0x4a6   : > { %12157 = vst.msk [vmem:[%s18141_s23 + $0x158] sm:$0xff] %vm1102_vm0, %v12029_v56  ;;  %12158 = vst.msk [vmem:[%s18141_s23 + $0x160] sm:$0xff] %vm1102_vm0, %v12030_v12  ;;  %v12059_v61 = vmul.f32 %v18114_v37, %v19436_v54  ;;  %v12060_v34 = vmul.f32 %v18114_v37, %v19437_v21  ;;  %v19438_v56 = vld [vmem:[#allocation30_spill] sm:$0xff]  ;;  %v19439_v12 = vld [vmem:[#allocation31_spill] sm:$0xff] }
 0x4a7   : > { %12159 = vst.msk [vmem:[%s18141_s23 + $0x168] sm:$0xff] %vm1102_vm0, %v12031_v39  ;;  %12160 = vst.msk [vmem:[%s18141_s23 + $0x170] sm:$0xff] %vm1102_vm0, %v12032_v20  ;;  %v12061_v9 = vmul.f32 %v18114_v37, %v19438_v56  ;;  %v12062_v0 = vmul.f32 %v18114_v37, %v19439_v12  ;;  %v19440_v39 = vld [vmem:[#allocation32_spill] sm:$0xff]  ;;  %v19441_v20 = vld [vmem:[#allocation33_spill] sm:$0xff] }
 0x4a8   : > { %12161 = vst.msk [vmem:[%s18141_s23 + $0x178] sm:$0xff] %vm1102_vm0, %v12033_v51  ;;  %12162 = vst.msk [vmem:[%s18141_s23 + $0x180] sm:$0xff] %vm1102_vm0, %v12034_v6  ;;  %v12063_v40 = vmul.f32 %v18114_v37, %v19440_v39  ;;  %v12064_v36 = vmul.f32 %v18114_v37, %v19441_v20  ;;  %v19442_v51 = vld [vmem:[#allocation34_spill] sm:$0xff]  ;;  %v19443_v6 = vld [vmem:[#allocation35_spill] sm:$0xff] }
 0x4a9   : > { %12163 = vst.msk [vmem:[%s18141_s23 + $0x188] sm:$0xff] %vm1102_vm0, %v12035_v27  ;;  %12164 = vst.msk [vmem:[%s18141_s23 + $0x190] sm:$0xff] %vm1102_vm0, %v12036_v26  ;;  %v12065_v60 = vmul.f32 %v18114_v37, %v19442_v51  ;;  %v12066_v31 = vmul.f32 %v18114_v37, %v19443_v6  ;;  %v19444_v27 = vld [vmem:[#allocation36_spill] sm:$0xff]  ;;  %v19445_v26 = vld [vmem:[#allocation37_spill] sm:$0xff] }
 0x4aa   : > { %12165 = vst.msk [vmem:[%s18141_s23 + $0x198] sm:$0xff] %vm1102_vm0, %v12037_v55  ;;  %12166 = vst.msk [vmem:[%s18141_s23 + $0x1a0] sm:$0xff] %vm1102_vm0, %v12038_v17  ;;  %v12067_v45 = vmul.f32 %v18114_v37, %v19444_v27  ;;  %v12068_v50 = vmul.f32 %v18114_v37, %v19445_v26  ;;  %v19446_v55 = vld [vmem:[#allocation38_spill] sm:$0xff]  ;;  %v19447_v17 = vld [vmem:[#allocation39_spill] sm:$0xff] }
 0x4ab   : > { %12167 = vst.msk [vmem:[%s18141_s23 + $0x1a8] sm:$0xff] %vm1102_vm0, %v12039_v49  ;;  %12168 = vst.msk [vmem:[%s18141_s23 + $0x1b0] sm:$0xff] %vm1102_vm0, %v12040_v3  ;;  %v12069_v13 = vmul.f32 %v18114_v37, %v19446_v55  ;;  %v12070_v44 = vmul.f32 %v18114_v37, %v19447_v17  ;;  %v19448_v49 = vld [vmem:[#allocation40_spill] sm:$0xff]  ;;  %v19449_v3 = vld [vmem:[#allocation41_spill] sm:$0xff] }
 0x4ac   : > { %12169 = vst.msk [vmem:[%s18141_s23 + $0x1b8] sm:$0xff] %vm1102_vm0, %v12041_v19  ;;  %12170 = vst.msk [vmem:[%s18141_s23 + $0x1c0] sm:$0xff] %vm1102_vm0, %v12042_v35  ;;  %v12071_v59 = vmul.f32 %v18114_v37, %v19448_v49  ;;  %v12072_v14 = vmul.f32 %v18114_v37, %v19449_v3  ;;  %v19450_v19 = vld [vmem:[#allocation42_spill] sm:$0xff]  ;;  %v19451_v35 = vld [vmem:[#allocation43_spill] sm:$0xff] }
 0x4ad   : > { %12171 = vst.msk [vmem:[%s18141_s23 + $0x1c8] sm:$0xff] %vm1102_vm0, %v12043_v53  ;;  %12172 = vst.msk [vmem:[%s18141_s23 + $0x1d0] sm:$0xff] %vm1102_vm0, %v12044_v10  ;;  %v12073_v30 = vmul.f32 %v18114_v37, %v19450_v19  ;;  %v12074_v47 = vmul.f32 %v18114_v37, %v19451_v35  ;;  %v19452_v53 = vld [vmem:[#allocation44_spill] sm:$0xff]  ;;  %v19453_v10 = vld [vmem:[#allocation45_spill] sm:$0xff]  ;;  %v12102_v19 = vmul.f32 %v18114_v37, %v19397_v58 }
 0x4ae   : > { %12173 = vst.msk [vmem:[%s18141_s23 + $0x1d8] sm:$0xff] %vm1102_vm0, %v12045_v28  ;;  %12174 = vst.msk [vmem:[%s18141_s23 + $0x1e0] sm:$0xff] %vm1102_vm0, %v12046_v48  ;;  %v12075_v5 = vmul.f32 %v18114_v37, %v19452_v53  ;;  %v12076_v23 = vmul.f32 %v18114_v37, %v19453_v10  ;;  %v19454_v28 = vld [vmem:[#allocation46_spill] sm:$0xff]  ;;  %v19455_v48 = vld [vmem:[#allocation47_spill] sm:$0xff]  ;;  %v12104_v35 = vmul.f32 %v18114_v37, %v19399_v46 }
 0x4af   : > { %12175 = vst.msk [vmem:[%s18141_s23 + $0x1e8] sm:$0xff] %vm1102_vm0, %v12047_v62  ;;  %12176 = vst.msk [vmem:[%s18141_s23 + $0x1f0] sm:$0xff] %vm1102_vm0, %v12048_v8  ;;  %v12077_v41 = vmul.f32 %v18114_v37, %v19454_v28  ;;  %v12078_v62 = vmul.f32 %v18114_v37, %v19455_v48  ;;  %v19456_v8 = vld [vmem:[#allocation48_spill] sm:$0xff]  ;;  %v19459_v43 = vld [vmem:[#allocation51_spill] sm:$0xff] }
 0x4b0   : > { %12177 = vst.msk [vmem:[%s18141_s23 + $0x1f8] sm:$0xff] %vm1102_vm0, %v12049_v22  ;;  %12178 = vst.msk [vmem:[%s18141_s23 + $0x200] sm:$0xff] %vm1102_vm0, %v12050_v11  ;;  %v12079_v22 = vmul.f32 %v18114_v37, %v19456_v8  ;;  %v19457_v11 = vld [vmem:[#allocation49_spill] sm:$0xff]  ;;  %v19462_v32 = vld [vmem:[#allocation54_spill] sm:$0xff]  ;;  %v12112_v8 = vmul.f32 %v18114_v37, %v19403_v42 }
 0x4b1   : > { %12179 = vst.msk [vmem:[%s18141_s23 + $0x208] sm:$0xff] %vm1102_vm0, %v12051_v2  ;;  %12180 = vst.msk [vmem:[%s18141_s23 + $0x210] sm:$0xff] %vm1102_vm0, %v12052_v1  ;;  %v12080_v2 = vmul.f32 %v18114_v37, %v19457_v11  ;;  %v12081_v1 = vmul.f32 %v18114_v37, %v19458_v29  ;;  %v19461_v7 = vld [vmem:[#allocation53_spill] sm:$0xff]  ;;  %v19463_v57 = vld [vmem:[#allocation55_spill] sm:$0xff] }
 0x4b2   : > { %12181 = vst.msk [vmem:[%s18141_s23 + $0x218] sm:$0xff] %vm1102_vm0, %v12053_v52  ;;  %12182 = vst.msk [vmem:[%s18141_s23 + $0x220] sm:$0xff] %vm1102_vm0, %v12054_v63  ;;  %v12082_v52 = vmul.f32 %v18114_v37, %v19459_v43  ;;  %v12083_v63 = vmul.f32 %v18114_v37, %v19460_v16  ;;  %v19464_v24 = vld [vmem:[#allocation56_spill] sm:$0xff]  ;;  %v19465_v54 = vld [vmem:[#allocation57_spill] sm:$0xff] }
 0x4b3   : > { %12183 = vst.msk [vmem:[%s18141_s23 + $0x228] sm:$0xff] %vm1102_vm0, %v12055_v15  ;;  %12184 = vst.msk [vmem:[%s18141_s23 + $0x230] sm:$0xff] %vm1102_vm0, %v12056_v38  ;;  %v12084_v15 = vmul.f32 %v18114_v37, %v19461_v7  ;;  %v12085_v38 = vmul.f32 %v18114_v37, %v19462_v32  ;;  %v19466_v21 = vld [vmem:[#allocation58_spill] sm:$0xff]  ;;  %v19467_v56 = vld [vmem:[#allocation59_spill] sm:$0xff] }
 0x4b4   : > { %12185 = vst.msk [vmem:[%s18141_s23 + $0x238] sm:$0xff] %vm1102_vm0, %v12057_v4  ;;  %12186 = vst.msk [vmem:[%s18141_s23 + $0x240] sm:$0xff] %vm1102_vm0, %v12058_v33  ;;  %v12086_v4 = vmul.f32 %v18114_v37, %v19463_v57  ;;  %v12087_v33 = vmul.f32 %v18114_v37, %v19464_v24  ;;  %v19468_v12 = vld [vmem:[#allocation60_spill] sm:$0xff]  ;;  %v19469_v39 = vld [vmem:[#allocation61_spill] sm:$0xff] }
 0x4b5   : > { %12187 = vst.msk [vmem:[%s18141_s23 + $0x248] sm:$0xff] %vm1102_vm0, %v12059_v61  ;;  %12188 = vst.msk [vmem:[%s18141_s23 + $0x250] sm:$0xff] %vm1102_vm0, %v12060_v34  ;;  %v12088_v61 = vmul.f32 %v18114_v37, %v19465_v54  ;;  %v12089_v34 = vmul.f32 %v18114_v37, %v19466_v21  ;;  %v19470_v20 = vld [vmem:[#allocation62_spill] sm:$0xff]  ;;  %v19471_v51 = vld [vmem:[#allocation63_spill] sm:$0xff] }
 0x4b6   : > { %12189 = vst.msk [vmem:[%s18141_s23 + $0x258] sm:$0xff] %vm1102_vm0, %v12061_v9  ;;  %12190 = vst.msk [vmem:[%s18141_s23 + $0x260] sm:$0xff] %vm1102_vm0, %v12062_v0  ;;  %v12090_v9 = vmul.f32 %v18114_v37, %v19467_v56  ;;  %v12091_v0 = vmul.f32 %v18114_v37, %v19468_v12  ;;  %v19472_v6 = vld [vmem:[#allocation64_spill] sm:$0xff]  ;;  %v19473_v27 = vld [vmem:[#allocation65_spill] sm:$0xff] }
 0x4b7   : > { %12191 = vst.msk [vmem:[%s18141_s23 + $0x268] sm:$0xff] %vm1102_vm0, %v12063_v40  ;;  %12192 = vst.msk [vmem:[%s18141_s23 + $0x270] sm:$0xff] %vm1102_vm0, %v12064_v36  ;;  %v12092_v40 = vmul.f32 %v18114_v37, %v19469_v39  ;;  %v12093_v36 = vmul.f32 %v18114_v37, %v19470_v20  ;;  %v19474_v26 = vld [vmem:[#allocation66_spill] sm:$0xff]  ;;  %v19475_v55 = vld [vmem:[#allocation67_spill] sm:$0xff] }
 0x4b8   : > { %12193 = vst.msk [vmem:[%s18141_s23 + $0x278] sm:$0xff] %vm1102_vm0, %v12065_v60  ;;  %12194 = vst.msk [vmem:[%s18141_s23 + $0x280] sm:$0xff] %vm1102_vm0, %v12066_v31  ;;  %v12094_v60 = vmul.f32 %v18114_v37, %v19471_v51  ;;  %v12095_v31 = vmul.f32 %v18114_v37, %v19472_v6  ;;  %v19476_v17 = vld [vmem:[#allocation68_spill] sm:$0xff]  ;;  %v19477_v49 = vld [vmem:[#allocation69_spill] sm:$0xff] }
 0x4b9   : > { %12195 = vst.msk [vmem:[%s18141_s23 + $0x288] sm:$0xff] %vm1102_vm0, %v12067_v45  ;;  %12196 = vst.msk [vmem:[%s18141_s23 + $0x290] sm:$0xff] %vm1102_vm0, %v12068_v50  ;;  %v12096_v45 = vmul.f32 %v18114_v37, %v19473_v27  ;;  %v12097_v50 = vmul.f32 %v18114_v37, %v19474_v26  ;;  %v19478_v3 = vld [vmem:[#allocation70_spill] sm:$0xff]  ;;  %v19480_v53 = vld [vmem:[#allocation75_spill] sm:$0xff] }
 0x4ba   : > { %12197 = vst.msk [vmem:[%s18141_s23 + $0x298] sm:$0xff] %vm1102_vm0, %v12069_v13  ;;  %12198 = vst.msk [vmem:[%s18141_s23 + $0x2a0] sm:$0xff] %vm1102_vm0, %v12070_v44  ;;  %v12098_v13 = vmul.f32 %v18114_v37, %v19475_v55  ;;  %v12099_v44 = vmul.f32 %v18114_v37, %v19476_v17  ;;  %v19479_v58 = vld [vmem:[#allocation74_spill] sm:$0xff]  ;;  %v12107_v46 = vmul.f32 %v18114_v37, %v19480_v53  ;;  %v19482_v10 = vld [vmem:[#allocation77_spill] sm:$0xff] }
 0x4bb   : > { %12199 = vst.msk [vmem:[%s18141_s23 + $0x2a8] sm:$0xff] %vm1102_vm0, %v12071_v59  ;;  %12200 = vst.msk [vmem:[%s18141_s23 + $0x2b0] sm:$0xff] %vm1102_vm0, %v12072_v14  ;;  %v12100_v59 = vmul.f32 %v18114_v37, %v19477_v49  ;;  %v12101_v14 = vmul.f32 %v18114_v37, %v19478_v3  ;;  %v19483_v28 = vld [vmem:[#allocation78_spill] sm:$0xff]  ;;  %v19484_v48 = vld [vmem:[#allocation79_spill] sm:$0xff] }
 0x4bc   : > { %12201 = vst.msk [vmem:[%s18141_s23 + $0x2b8] sm:$0xff] %vm1102_vm0, %v12073_v30  ;;  %12202 = vst.msk [vmem:[%s18141_s23 + $0x2c0] sm:$0xff] %vm1102_vm0, %v12074_v47  ;;  %v12103_v30 = vmul.f32 %v18114_v37, %v19398_v25  ;;  %v12105_v47 = vmul.f32 %v18114_v37, %v17696_v18  ;;  %v12106_v25 = vmul.f32 %v18114_v37, %v19479_v58  ;;  %v19481_v18 = vld [vmem:[#allocation76_spill] sm:$0xff]  ;;  %v12540_v29 = vld [vmem:[%s18141_s23 + $0x18] sm:$0xff] (%p15254_p6) }
 0x4bd   : > { %12203 = vst.msk [vmem:[%s18141_s23 + $0x2c8] sm:$0xff] %vm1102_vm0, %v12075_v5  ;;  %12204 = vst.msk [vmem:[%s18141_s23 + $0x2d0] sm:$0xff] %vm1102_vm0, %v12076_v23  ;;  %v12108_v5 = vmul.f32 %v18114_v37, %v19481_v18  ;;  %v12109_v23 = vmul.f32 %v18114_v37, %v19482_v10  ;;  %v12534_v42 = vld [vmem:[%s18141_s23] sm:$0xff] (%p15254_p6)  ;;  %v12544_v43 = vld [vmem:[%s18141_s23 + $0x28] sm:$0xff] (%p15254_p6) }
 0x4be   : > { %12205 = vst.msk [vmem:[%s18141_s23 + $0x2d8] sm:$0xff] %vm1102_vm0, %v12077_v41  ;;  %12206 = vst.msk [vmem:[%s18141_s23 + $0x2e0] sm:$0xff] %vm1102_vm0, %v12078_v62  ;;  %v12110_v41 = vmul.f32 %v18114_v37, %v19483_v28  ;;  %v12111_v62 = vmul.f32 %v18114_v37, %v19484_v48  ;;  %v12548_v16 = vld [vmem:[%s18141_s23 + $0x38] sm:$0xff] (%p15254_p6)  ;;  %v12552_v7 = vld [vmem:[%s18141_s23 + $0x48] sm:$0xff] (%p15254_p6) }
 0x4bf   : > { %12207 = vst.msk [vmem:[%s18141_s23 + $0x2e8] sm:$0xff] %vm1102_vm0, %v12079_v22  ;;  %12208 = vst.msk [vmem:[%s18141_s23 + $0x2f0] sm:$0xff] %vm1102_vm0, %v12080_v2  ;;  %v19485_v22 = vld [vmem:[#allocation91_spill] sm:$0xff]  ;;  %v12538_v2 = vld [vmem:[%s18141_s23 + $0x10] sm:$0xff] (%p15254_p6) }
 0x4c0   : > { %12209 = vst.msk [vmem:[%s18141_s23 + $0x2f8] sm:$0xff] %vm1102_vm0, %v12081_v1  ;;  %12210 = vst.msk [vmem:[%s18141_s23 + $0x300] sm:$0xff] %vm1102_vm0, %v12082_v52  ;;  %v12113_v11 = vmul.f32 %v18114_v37, %v19485_v22  ;;  %v12536_v37 = vld [vmem:[%s18141_s23 + $0x8] sm:$0xff] (%p15254_p6)  ;;  %v12542_v1 = vld [vmem:[%s18141_s23 + $0x20] sm:$0xff] (%p15254_p6) }
 0x4c1   : > { %12211 = vst.msk [vmem:[%s18141_s23 + $0x308] sm:$0xff] %vm1102_vm0, %v12083_v63  ;;  %12212 = vst.msk [vmem:[%s18141_s23 + $0x310] sm:$0xff] %vm1102_vm0, %v12084_v15  ;;  %v12546_v52 = vld [vmem:[%s18141_s23 + $0x30] sm:$0xff] (%p15254_p6)  ;;  %v12550_v63 = vld [vmem:[%s18141_s23 + $0x40] sm:$0xff] (%p15254_p6) }
 0x4c2   : > { %12213 = vst.msk [vmem:[%s18141_s23 + $0x318] sm:$0xff] %vm1102_vm0, %v12085_v38  ;;  %12214 = vst.msk [vmem:[%s18141_s23 + $0x320] sm:$0xff] %vm1102_vm0, %v12086_v4  ;;  %v12554_v15 = vld [vmem:[%s18141_s23 + $0x50] sm:$0xff] (%p15254_p6)  ;;  %v12556_v32 = vld [vmem:[%s18141_s23 + $0x58] sm:$0xff] (%p15254_p6) }
 0x4c3   : > { %12215 = vst.msk [vmem:[%s18141_s23 + $0x328] sm:$0xff] %vm1102_vm0, %v12087_v33  ;;  %12216 = vst.msk [vmem:[%s18141_s23 + $0x330] sm:$0xff] %vm1102_vm0, %v12088_v61  ;;  %v12558_v38 = vld [vmem:[%s18141_s23 + $0x60] sm:$0xff] (%p15254_p6)  ;;  %v12560_v57 = vld [vmem:[%s18141_s23 + $0x68] sm:$0xff] (%p15254_p6) }
 0x4c4   : > { %12217 = vst.msk [vmem:[%s18141_s23 + $0x338] sm:$0xff] %vm1102_vm0, %v12089_v34  ;;  %12218 = vst.msk [vmem:[%s18141_s23 + $0x340] sm:$0xff] %vm1102_vm0, %v12090_v9  ;;  %v12562_v4 = vld [vmem:[%s18141_s23 + $0x70] sm:$0xff] (%p15254_p6)  ;;  %v12564_v24 = vld [vmem:[%s18141_s23 + $0x78] sm:$0xff] (%p15254_p6) }
 0x4c5   : > { %12219 = vst.msk [vmem:[%s18141_s23 + $0x348] sm:$0xff] %vm1102_vm0, %v12091_v0  ;;  %12220 = vst.msk [vmem:[%s18141_s23 + $0x350] sm:$0xff] %vm1102_vm0, %v12092_v40  ;;  %v12566_v33 = vld [vmem:[%s18141_s23 + $0x80] sm:$0xff] (%p15254_p6)  ;;  %v12568_v54 = vld [vmem:[%s18141_s23 + $0x88] sm:$0xff] (%p15254_p6) }
 0x4c6   : > { %12221 = vst.msk [vmem:[%s18141_s23 + $0x358] sm:$0xff] %vm1102_vm0, %v12093_v36  ;;  %12222 = vst.msk [vmem:[%s18141_s23 + $0x360] sm:$0xff] %vm1102_vm0, %v12094_v60  ;;  %v12570_v61 = vld [vmem:[%s18141_s23 + $0x90] sm:$0xff] (%p15254_p6)  ;;  %v12572_v21 = vld [vmem:[%s18141_s23 + $0x98] sm:$0xff] (%p15254_p6) }
 0x4c7   : > { %12223 = vst.msk [vmem:[%s18141_s23 + $0x368] sm:$0xff] %vm1102_vm0, %v12095_v31  ;;  %12224 = vst.msk [vmem:[%s18141_s23 + $0x370] sm:$0xff] %vm1102_vm0, %v12096_v45  ;;  %v12574_v34 = vld [vmem:[%s18141_s23 + $0xa0] sm:$0xff] (%p15254_p6)  ;;  %v12576_v56 = vld [vmem:[%s18141_s23 + $0xa8] sm:$0xff] (%p15254_p6) }
 0x4c8   : > { %12225 = vst.msk [vmem:[%s18141_s23 + $0x378] sm:$0xff] %vm1102_vm0, %v12097_v50  ;;  %12226 = vst.msk [vmem:[%s18141_s23 + $0x380] sm:$0xff] %vm1102_vm0, %v12098_v13  ;;  %v12578_v9 = vld [vmem:[%s18141_s23 + $0xb0] sm:$0xff] (%p15254_p6)  ;;  %v12580_v12 = vld [vmem:[%s18141_s23 + $0xb8] sm:$0xff] (%p15254_p6) }
 0x4c9   : > { %12227 = vst.msk [vmem:[%s18141_s23 + $0x388] sm:$0xff] %vm1102_vm0, %v12099_v44  ;;  %12228 = vst.msk [vmem:[%s18141_s23 + $0x390] sm:$0xff] %vm1102_vm0, %v12100_v59  ;;  %v12582_v0 = vld [vmem:[%s18141_s23 + $0xc0] sm:$0xff] (%p15254_p6)  ;;  %v12584_v39 = vld [vmem:[%s18141_s23 + $0xc8] sm:$0xff] (%p15254_p6) }
 0x4ca   : > { %12229 = vst.msk [vmem:[%s18141_s23 + $0x398] sm:$0xff] %vm1102_vm0, %v12101_v14  ;;  %12230 = vst.msk [vmem:[%s18141_s23 + $0x3a0] sm:$0xff] %vm1102_vm0, %v12102_v19  ;;  %12248 = sbr.rel (!%p15254_p6) target bundleno = 1297 (0x511), region = 70  ;;  %v12586_v40 = vld [vmem:[%s18141_s23 + $0xd0] sm:$0xff] (%p15254_p6)  ;;  %v12588_v20 = vld [vmem:[%s18141_s23 + $0xd8] sm:$0xff] (%p15254_p6) }
 0x4cb   : > { %12231 = vst.msk [vmem:[%s18141_s23 + $0x3a8] sm:$0xff] %vm1102_vm0, %v12103_v30  ;;  %12232 = vst.msk [vmem:[%s18141_s23 + $0x3b0] sm:$0xff] %vm1102_vm0, %v12104_v35  ;;  %v12590_v36 = vld [vmem:[%s18141_s23 + $0xe0] sm:$0xff] (%p15254_p6)  ;;  %v12592_v51 = vld [vmem:[%s18141_s23 + $0xe8] sm:$0xff] (%p15254_p6) }
 0x4cc   : > { %12233 = vst.msk [vmem:[%s18141_s23 + $0x3b8] sm:$0xff] %vm1102_vm0, %v12105_v47  ;;  %12234 = vst.msk [vmem:[%s18141_s23 + $0x3c0] sm:$0xff] %vm1102_vm0, %v12106_v25  ;;  %v12594_v60 = vld [vmem:[%s18141_s23 + $0xf0] sm:$0xff] (%p15254_p6)  ;;  %v12596_v6 = vld [vmem:[%s18141_s23 + $0xf8] sm:$0xff] (%p15254_p6) }
 0x4cd   : > { %12235 = vst.msk [vmem:[%s18141_s23 + $0x3c8] sm:$0xff] %vm1102_vm0, %v12107_v46  ;;  %12236 = vst.msk [vmem:[%s18141_s23 + $0x3d0] sm:$0xff] %vm1102_vm0, %v12108_v5  ;;  %v12598_v31 = vld [vmem:[%s18141_s23 + $0x100] sm:$0xff] (%p15254_p6)  ;;  %v12600_v27 = vld [vmem:[%s18141_s23 + $0x108] sm:$0xff] (%p15254_p6) }
 0x4ce   : > { %12237 = vst.msk [vmem:[%s18141_s23 + $0x3d8] sm:$0xff] %vm1102_vm0, %v12109_v23  ;;  %12238 = vst.msk [vmem:[%s18141_s23 + $0x3e0] sm:$0xff] %vm1102_vm0, %v12110_v41  ;;  %v12602_v45 = vld [vmem:[%s18141_s23 + $0x110] sm:$0xff] (%p15254_p6)  ;;  %v12604_v26 = vld [vmem:[%s18141_s23 + $0x118] sm:$0xff] (%p15254_p6) }
 0x4cf   : > { %12239 = vst.msk [vmem:[%s18141_s23 + $0x3e8] sm:$0xff] %vm1102_vm0, %v12111_v62  ;;  %12240 = vst.msk [vmem:[%s18141_s23 + $0x3f0] sm:$0xff] %vm1102_vm0, %v12112_v8  ;;  %v12606_v50 = vld [vmem:[%s18141_s23 + $0x120] sm:$0xff] (%p15254_p6)  ;;  %v12608_v55 = vld [vmem:[%s18141_s23 + $0x128] sm:$0xff] (%p15254_p6) }
 0x4d0   : > { %12241 = vst.msk [vmem:[%s18141_s23 + $0x3f8] sm:$0xff] %vm1102_vm0, %v12113_v11  ;;  %12535 = vst [vmem:[%s18647_s29] sm:$0xff] (%p15254_p6), %v12534_v42  ;;  %v12610_v13 = vld [vmem:[%s18141_s23 + $0x130] sm:$0xff] (%p15254_p6)  ;;  %v12612_v17 = vld [vmem:[%s18141_s23 + $0x138] sm:$0xff] (%p15254_p6) }
 0x4d1   : > { %12537 = vst [vmem:[%s18647_s29 + $0x10] sm:$0xff] %v12536_v37  ;;  %12539 = vst [vmem:[%s18647_s29 + $0x20] sm:$0xff] %v12538_v2  ;;  %v12614_v44 = vld [vmem:[%s18141_s23 + $0x140] sm:$0xff]  ;;  %v12616_v49 = vld [vmem:[%s18141_s23 + $0x148] sm:$0xff] }
 0x4d2   : > { %12541 = vst [vmem:[%s18647_s29 + $0x30] sm:$0xff] %v12540_v29  ;;  %12543 = vst [vmem:[%s18647_s29 + $0x40] sm:$0xff] %v12542_v1  ;;  %v12618_v59 = vld [vmem:[%s18141_s23 + $0x150] sm:$0xff]  ;;  %v12620_v3 = vld [vmem:[%s18141_s23 + $0x158] sm:$0xff] }
 0x4d3   : > { %12545 = vst [vmem:[%s18647_s29 + $0x50] sm:$0xff] %v12544_v43  ;;  %12547 = vst [vmem:[%s18647_s29 + $0x60] sm:$0xff] %v12546_v52  ;;  %v12622_v14 = vld [vmem:[%s18141_s23 + $0x160] sm:$0xff]  ;;  %v12624_v19 = vld [vmem:[%s18141_s23 + $0x168] sm:$0xff] }
 0x4d4   : > { %12549 = vst [vmem:[%s18647_s29 + $0x70] sm:$0xff] %v12548_v16  ;;  %12551 = vst [vmem:[%s18647_s29 + $0x80] sm:$0xff] %v12550_v63  ;;  %v12626_v30 = vld [vmem:[%s18141_s23 + $0x170] sm:$0xff]  ;;  %v12628_v35 = vld [vmem:[%s18141_s23 + $0x178] sm:$0xff] }
 0x4d5   : > { %12553 = vst [vmem:[%s18647_s29 + $0x90] sm:$0xff] %v12552_v7  ;;  %12555 = vst [vmem:[%s18647_s29 + $0xa0] sm:$0xff] %v12554_v15  ;;  %v12630_v47 = vld [vmem:[%s18141_s23 + $0x180] sm:$0xff]  ;;  %v12632_v58 = vld [vmem:[%s18141_s23 + $0x188] sm:$0xff] }
 0x4d6   : > { %12557 = vst [vmem:[%s18647_s29 + $0xb0] sm:$0xff] %v12556_v32  ;;  %12559 = vst [vmem:[%s18647_s29 + $0xc0] sm:$0xff] %v12558_v38  ;;  %v12634_v25 = vld [vmem:[%s18141_s23 + $0x190] sm:$0xff]  ;;  %v12636_v53 = vld [vmem:[%s18141_s23 + $0x198] sm:$0xff] }
 0x4d7   : > { %12561 = vst [vmem:[%s18647_s29 + $0xd0] sm:$0xff] %v12560_v57  ;;  %12563 = vst [vmem:[%s18647_s29 + $0xe0] sm:$0xff] %v12562_v4  ;;  %v12638_v46 = vld [vmem:[%s18141_s23 + $0x1a0] sm:$0xff]  ;;  %v12640_v18 = vld [vmem:[%s18141_s23 + $0x1a8] sm:$0xff] }
 0x4d8   : > { %12565 = vst [vmem:[%s18647_s29 + $0xf0] sm:$0xff] %v12564_v24  ;;  %12567 = vst [vmem:[%s18647_s29 + $0x100] sm:$0xff] %v12566_v33  ;;  %v12642_v5 = vld [vmem:[%s18141_s23 + $0x1b0] sm:$0xff]  ;;  %v12644_v10 = vld [vmem:[%s18141_s23 + $0x1b8] sm:$0xff] }
 0x4d9   : > { %12569 = vst [vmem:[%s18647_s29 + $0x110] sm:$0xff] %v12568_v54  ;;  %12571 = vst [vmem:[%s18647_s29 + $0x120] sm:$0xff] %v12570_v61  ;;  %v12646_v23 = vld [vmem:[%s18141_s23 + $0x1c0] sm:$0xff]  ;;  %v12648_v28 = vld [vmem:[%s18141_s23 + $0x1c8] sm:$0xff] }
 0x4da   : > { %12573 = vst [vmem:[%s18647_s29 + $0x130] sm:$0xff] %v12572_v21  ;;  %12575 = vst [vmem:[%s18647_s29 + $0x140] sm:$0xff] %v12574_v34  ;;  %v12650_v41 = vld [vmem:[%s18141_s23 + $0x1d0] sm:$0xff]  ;;  %v12652_v48 = vld [vmem:[%s18141_s23 + $0x1d8] sm:$0xff] }
 0x4db   : > { %12577 = vst [vmem:[%s18647_s29 + $0x150] sm:$0xff] %v12576_v56  ;;  %12579 = vst [vmem:[%s18647_s29 + $0x160] sm:$0xff] %v12578_v9  ;;  %v12654_v62 = vld [vmem:[%s18141_s23 + $0x1e0] sm:$0xff]  ;;  %v12656_v8 = vld [vmem:[%s18141_s23 + $0x1e8] sm:$0xff] }
 0x4dc   : > { %12581 = vst [vmem:[%s18647_s29 + $0x170] sm:$0xff] %v12580_v12  ;;  %12583 = vst [vmem:[%s18647_s29 + $0x180] sm:$0xff] %v12582_v0  ;;  %v12658_v22 = vld [vmem:[%s18141_s23 + $0x1f0] sm:$0xff]  ;;  %v12660_v11 = vld [vmem:[%s18141_s23 + $0x1f8] sm:$0xff] }
 0x4dd   : > { %12585 = vst [vmem:[%s18647_s29 + $0x190] sm:$0xff] %v12584_v39  ;;  %12587 = vst [vmem:[%s18647_s29 + $0x1a0] sm:$0xff] %v12586_v40  ;;  %v12662_v42 = vld [vmem:[%s18141_s23 + $0x200] sm:$0xff]  ;;  %v12664_v37 = vld [vmem:[%s18141_s23 + $0x208] sm:$0xff] }
 0x4de   : > { %12589 = vst [vmem:[%s18647_s29 + $0x1b0] sm:$0xff] %v12588_v20  ;;  %12591 = vst [vmem:[%s18647_s29 + $0x1c0] sm:$0xff] %v12590_v36  ;;  %v12666_v2 = vld [vmem:[%s18141_s23 + $0x210] sm:$0xff]  ;;  %v12668_v29 = vld [vmem:[%s18141_s23 + $0x218] sm:$0xff] }
 0x4df   : > { %12593 = vst [vmem:[%s18647_s29 + $0x1d0] sm:$0xff] %v12592_v51  ;;  %12595 = vst [vmem:[%s18647_s29 + $0x1e0] sm:$0xff] %v12594_v60  ;;  %v12670_v1 = vld [vmem:[%s18141_s23 + $0x220] sm:$0xff]  ;;  %v12672_v43 = vld [vmem:[%s18141_s23 + $0x228] sm:$0xff] }
 0x4e0   : > { %12597 = vst [vmem:[%s18647_s29 + $0x1f0] sm:$0xff] %v12596_v6  ;;  %12599 = vst [vmem:[%s18647_s29 + $0x200] sm:$0xff] %v12598_v31  ;;  %v12674_v52 = vld [vmem:[%s18141_s23 + $0x230] sm:$0xff]  ;;  %v12676_v16 = vld [vmem:[%s18141_s23 + $0x238] sm:$0xff] }
 0x4e1   : > { %12601 = vst [vmem:[%s18647_s29 + $0x210] sm:$0xff] %v12600_v27  ;;  %12603 = vst [vmem:[%s18647_s29 + $0x220] sm:$0xff] %v12602_v45  ;;  %v12678_v63 = vld [vmem:[%s18141_s23 + $0x240] sm:$0xff]  ;;  %v12680_v7 = vld [vmem:[%s18141_s23 + $0x248] sm:$0xff] }
 0x4e2   : > { %12605 = vst [vmem:[%s18647_s29 + $0x230] sm:$0xff] %v12604_v26  ;;  %12607 = vst [vmem:[%s18647_s29 + $0x240] sm:$0xff] %v12606_v50  ;;  %v12682_v15 = vld [vmem:[%s18141_s23 + $0x250] sm:$0xff]  ;;  %v12684_v32 = vld [vmem:[%s18141_s23 + $0x258] sm:$0xff] }
 0x4e3   : > { %12609 = vst [vmem:[%s18647_s29 + $0x250] sm:$0xff] %v12608_v55  ;;  %12611 = vst [vmem:[%s18647_s29 + $0x260] sm:$0xff] %v12610_v13  ;;  %v12686_v38 = vld [vmem:[%s18141_s23 + $0x260] sm:$0xff]  ;;  %v12688_v57 = vld [vmem:[%s18141_s23 + $0x268] sm:$0xff] }
 0x4e4   : > { %12613 = vst [vmem:[%s18647_s29 + $0x270] sm:$0xff] %v12612_v17  ;;  %12615 = vst [vmem:[%s18647_s29 + $0x280] sm:$0xff] %v12614_v44  ;;  %v12690_v4 = vld [vmem:[%s18141_s23 + $0x270] sm:$0xff]  ;;  %v12692_v24 = vld [vmem:[%s18141_s23 + $0x278] sm:$0xff] }
 0x4e5   : > { %12617 = vst [vmem:[%s18647_s29 + $0x290] sm:$0xff] %v12616_v49  ;;  %12619 = vst [vmem:[%s18647_s29 + $0x2a0] sm:$0xff] %v12618_v59  ;;  %v12694_v33 = vld [vmem:[%s18141_s23 + $0x280] sm:$0xff]  ;;  %v12696_v54 = vld [vmem:[%s18141_s23 + $0x288] sm:$0xff] }
 0x4e6   : > { %12621 = vst [vmem:[%s18647_s29 + $0x2b0] sm:$0xff] %v12620_v3  ;;  %12623 = vst [vmem:[%s18647_s29 + $0x2c0] sm:$0xff] %v12622_v14  ;;  %v12698_v61 = vld [vmem:[%s18141_s23 + $0x290] sm:$0xff]  ;;  %v12700_v21 = vld [vmem:[%s18141_s23 + $0x298] sm:$0xff] }
 0x4e7   : > { %12625 = vst [vmem:[%s18647_s29 + $0x2d0] sm:$0xff] %v12624_v19  ;;  %12627 = vst [vmem:[%s18647_s29 + $0x2e0] sm:$0xff] %v12626_v30  ;;  %v12702_v34 = vld [vmem:[%s18141_s23 + $0x2a0] sm:$0xff]  ;;  %v12704_v56 = vld [vmem:[%s18141_s23 + $0x2a8] sm:$0xff] }
 0x4e8   : > { %12629 = vst [vmem:[%s18647_s29 + $0x2f0] sm:$0xff] %v12628_v35  ;;  %12631 = vst [vmem:[%s18647_s29 + $0x300] sm:$0xff] %v12630_v47  ;;  %v12706_v9 = vld [vmem:[%s18141_s23 + $0x2b0] sm:$0xff]  ;;  %v12708_v12 = vld [vmem:[%s18141_s23 + $0x2b8] sm:$0xff] }
 0x4e9   : > { %12633 = vst [vmem:[%s18647_s29 + $0x310] sm:$0xff] %v12632_v58  ;;  %12635 = vst [vmem:[%s18647_s29 + $0x320] sm:$0xff] %v12634_v25  ;;  %v12710_v0 = vld [vmem:[%s18141_s23 + $0x2c0] sm:$0xff]  ;;  %v12712_v39 = vld [vmem:[%s18141_s23 + $0x2c8] sm:$0xff] }
 0x4ea   : > { %12637 = vst [vmem:[%s18647_s29 + $0x330] sm:$0xff] %v12636_v53  ;;  %12639 = vst [vmem:[%s18647_s29 + $0x340] sm:$0xff] %v12638_v46  ;;  %v12714_v40 = vld [vmem:[%s18141_s23 + $0x2d0] sm:$0xff]  ;;  %v12716_v20 = vld [vmem:[%s18141_s23 + $0x2d8] sm:$0xff] }
 0x4eb   : > { %12641 = vst [vmem:[%s18647_s29 + $0x350] sm:$0xff] %v12640_v18  ;;  %12643 = vst [vmem:[%s18647_s29 + $0x360] sm:$0xff] %v12642_v5  ;;  %v12718_v36 = vld [vmem:[%s18141_s23 + $0x2e0] sm:$0xff]  ;;  %v12720_v51 = vld [vmem:[%s18141_s23 + $0x2e8] sm:$0xff] }
 0x4ec   : > { %12645 = vst [vmem:[%s18647_s29 + $0x370] sm:$0xff] %v12644_v10  ;;  %12647 = vst [vmem:[%s18647_s29 + $0x380] sm:$0xff] %v12646_v23  ;;  %v12722_v60 = vld [vmem:[%s18141_s23 + $0x2f0] sm:$0xff]  ;;  %v12724_v6 = vld [vmem:[%s18141_s23 + $0x2f8] sm:$0xff] }
 0x4ed   : > { %12649 = vst [vmem:[%s18647_s29 + $0x390] sm:$0xff] %v12648_v28  ;;  %12651 = vst [vmem:[%s18647_s29 + $0x3a0] sm:$0xff] %v12650_v41  ;;  %v12726_v31 = vld [vmem:[%s18141_s23 + $0x300] sm:$0xff]  ;;  %v12728_v27 = vld [vmem:[%s18141_s23 + $0x308] sm:$0xff] }
 0x4ee   : > { %12653 = vst [vmem:[%s18647_s29 + $0x3b0] sm:$0xff] %v12652_v48  ;;  %12655 = vst [vmem:[%s18647_s29 + $0x3c0] sm:$0xff] %v12654_v62  ;;  %v12730_v45 = vld [vmem:[%s18141_s23 + $0x310] sm:$0xff]  ;;  %v12732_v26 = vld [vmem:[%s18141_s23 + $0x318] sm:$0xff] }
 0x4ef   : > { %12657 = vst [vmem:[%s18647_s29 + $0x3d0] sm:$0xff] %v12656_v8  ;;  %12659 = vst [vmem:[%s18647_s29 + $0x3e0] sm:$0xff] %v12658_v22  ;;  %v12734_v50 = vld [vmem:[%s18141_s23 + $0x320] sm:$0xff]  ;;  %v12736_v55 = vld [vmem:[%s18141_s23 + $0x328] sm:$0xff] }
 0x4f0   : > { %12661 = vst [vmem:[%s18647_s29 + $0x3f0] sm:$0xff] %v12660_v11  ;;  %12663 = vst [vmem:[%s18647_s29 + $0x400] sm:$0xff] %v12662_v42  ;;  %v12738_v13 = vld [vmem:[%s18141_s23 + $0x330] sm:$0xff]  ;;  %v12740_v17 = vld [vmem:[%s18141_s23 + $0x338] sm:$0xff] }
 0x4f1   : > { %12665 = vst [vmem:[%s18647_s29 + $0x410] sm:$0xff] %v12664_v37  ;;  %12667 = vst [vmem:[%s18647_s29 + $0x420] sm:$0xff] %v12666_v2  ;;  %v12742_v44 = vld [vmem:[%s18141_s23 + $0x340] sm:$0xff]  ;;  %v12744_v49 = vld [vmem:[%s18141_s23 + $0x348] sm:$0xff] }
 0x4f2   : > { %12669 = vst [vmem:[%s18647_s29 + $0x430] sm:$0xff] %v12668_v29  ;;  %12671 = vst [vmem:[%s18647_s29 + $0x440] sm:$0xff] %v12670_v1  ;;  %v12746_v59 = vld [vmem:[%s18141_s23 + $0x350] sm:$0xff]  ;;  %v12748_v3 = vld [vmem:[%s18141_s23 + $0x358] sm:$0xff] }
 0x4f3   : > { %12673 = vst [vmem:[%s18647_s29 + $0x450] sm:$0xff] %v12672_v43  ;;  %12675 = vst [vmem:[%s18647_s29 + $0x460] sm:$0xff] %v12674_v52  ;;  %v12750_v14 = vld [vmem:[%s18141_s23 + $0x360] sm:$0xff]  ;;  %v12752_v19 = vld [vmem:[%s18141_s23 + $0x368] sm:$0xff] }
 0x4f4   : > { %12677 = vst [vmem:[%s18647_s29 + $0x470] sm:$0xff] %v12676_v16  ;;  %12679 = vst [vmem:[%s18647_s29 + $0x480] sm:$0xff] %v12678_v63  ;;  %v12754_v30 = vld [vmem:[%s18141_s23 + $0x370] sm:$0xff]  ;;  %v12756_v35 = vld [vmem:[%s18141_s23 + $0x378] sm:$0xff] }
 0x4f5   : > { %12681 = vst [vmem:[%s18647_s29 + $0x490] sm:$0xff] %v12680_v7  ;;  %12683 = vst [vmem:[%s18647_s29 + $0x4a0] sm:$0xff] %v12682_v15  ;;  %v12758_v47 = vld [vmem:[%s18141_s23 + $0x380] sm:$0xff]  ;;  %v12760_v58 = vld [vmem:[%s18141_s23 + $0x388] sm:$0xff] }
 0x4f6   : > { %12685 = vst [vmem:[%s18647_s29 + $0x4b0] sm:$0xff] %v12684_v32  ;;  %12687 = vst [vmem:[%s18647_s29 + $0x4c0] sm:$0xff] %v12686_v38  ;;  %v12762_v25 = vld [vmem:[%s18141_s23 + $0x390] sm:$0xff]  ;;  %v12764_v53 = vld [vmem:[%s18141_s23 + $0x398] sm:$0xff] }
 0x4f7   : > { %12689 = vst [vmem:[%s18647_s29 + $0x4d0] sm:$0xff] %v12688_v57  ;;  %12691 = vst [vmem:[%s18647_s29 + $0x4e0] sm:$0xff] %v12690_v4  ;;  %v12766_v46 = vld [vmem:[%s18141_s23 + $0x3a0] sm:$0xff]  ;;  %v12768_v18 = vld [vmem:[%s18141_s23 + $0x3a8] sm:$0xff] }
 0x4f8   : > { %12693 = vst [vmem:[%s18647_s29 + $0x4f0] sm:$0xff] %v12692_v24  ;;  %12695 = vst [vmem:[%s18647_s29 + $0x500] sm:$0xff] %v12694_v33  ;;  %v12770_v5 = vld [vmem:[%s18141_s23 + $0x3b0] sm:$0xff]  ;;  %v12772_v10 = vld [vmem:[%s18141_s23 + $0x3b8] sm:$0xff] }
 0x4f9   : > { %12697 = vst [vmem:[%s18647_s29 + $0x510] sm:$0xff] %v12696_v54  ;;  %12699 = vst [vmem:[%s18647_s29 + $0x520] sm:$0xff] %v12698_v61  ;;  %v12774_v23 = vld [vmem:[%s18141_s23 + $0x3c0] sm:$0xff]  ;;  %v12776_v28 = vld [vmem:[%s18141_s23 + $0x3c8] sm:$0xff] }
 0x4fa   : > { %12701 = vst [vmem:[%s18647_s29 + $0x530] sm:$0xff] %v12700_v21  ;;  %12703 = vst [vmem:[%s18647_s29 + $0x540] sm:$0xff] %v12702_v34  ;;  %v12778_v41 = vld [vmem:[%s18141_s23 + $0x3d0] sm:$0xff]  ;;  %v12780_v48 = vld [vmem:[%s18141_s23 + $0x3d8] sm:$0xff] }
 0x4fb   : > { %12705 = vst [vmem:[%s18647_s29 + $0x550] sm:$0xff] %v12704_v56  ;;  %12707 = vst [vmem:[%s18647_s29 + $0x560] sm:$0xff] %v12706_v9  ;;  %v12782_v62 = vld [vmem:[%s18141_s23 + $0x3e0] sm:$0xff]  ;;  %v12784_v8 = vld [vmem:[%s18141_s23 + $0x3e8] sm:$0xff] }
 0x4fc   : > { %12709 = vst [vmem:[%s18647_s29 + $0x570] sm:$0xff] %v12708_v12  ;;  %12711 = vst [vmem:[%s18647_s29 + $0x580] sm:$0xff] %v12710_v0  ;;  %v12786_v22 = vld [vmem:[%s18141_s23 + $0x3f0] sm:$0xff]  ;;  %v12788_v11 = vld [vmem:[%s18141_s23 + $0x3f8] sm:$0xff] }
 0x4fd   : > { %12713 = vst [vmem:[%s18647_s29 + $0x590] sm:$0xff] %v12712_v39  ;;  %12715 = vst [vmem:[%s18647_s29 + $0x5a0] sm:$0xff] %v12714_v40 }
 0x4fe   : > { %12717 = vst [vmem:[%s18647_s29 + $0x5b0] sm:$0xff] %v12716_v20  ;;  %12719 = vst [vmem:[%s18647_s29 + $0x5c0] sm:$0xff] %v12718_v36 }
 0x4ff   : > { %12721 = vst [vmem:[%s18647_s29 + $0x5d0] sm:$0xff] %v12720_v51  ;;  %12723 = vst [vmem:[%s18647_s29 + $0x5e0] sm:$0xff] %v12722_v60 }
 0x500   : > { %12725 = vst [vmem:[%s18647_s29 + $0x5f0] sm:$0xff] %v12724_v6  ;;  %12727 = vst [vmem:[%s18647_s29 + $0x600] sm:$0xff] %v12726_v31 }
 0x501   : > { %12729 = vst [vmem:[%s18647_s29 + $0x610] sm:$0xff] %v12728_v27  ;;  %12731 = vst [vmem:[%s18647_s29 + $0x620] sm:$0xff] %v12730_v45 }
 0x502   : > { %12733 = vst [vmem:[%s18647_s29 + $0x630] sm:$0xff] %v12732_v26  ;;  %12735 = vst [vmem:[%s18647_s29 + $0x640] sm:$0xff] %v12734_v50 }
 0x503   : > { %12737 = vst [vmem:[%s18647_s29 + $0x650] sm:$0xff] %v12736_v55  ;;  %12739 = vst [vmem:[%s18647_s29 + $0x660] sm:$0xff] %v12738_v13 }
 0x504   : > { %12741 = vst [vmem:[%s18647_s29 + $0x670] sm:$0xff] %v12740_v17  ;;  %12743 = vst [vmem:[%s18647_s29 + $0x680] sm:$0xff] %v12742_v44 }
 0x505   : > { %12745 = vst [vmem:[%s18647_s29 + $0x690] sm:$0xff] %v12744_v49  ;;  %12747 = vst [vmem:[%s18647_s29 + $0x6a0] sm:$0xff] %v12746_v59 }
 0x506   : > { %12749 = vst [vmem:[%s18647_s29 + $0x6b0] sm:$0xff] %v12748_v3  ;;  %12751 = vst [vmem:[%s18647_s29 + $0x6c0] sm:$0xff] %v12750_v14 }
 0x507   : > { %12753 = vst [vmem:[%s18647_s29 + $0x6d0] sm:$0xff] %v12752_v19  ;;  %12755 = vst [vmem:[%s18647_s29 + $0x6e0] sm:$0xff] %v12754_v30 }
 0x508   : > { %12757 = vst [vmem:[%s18647_s29 + $0x6f0] sm:$0xff] %v12756_v35  ;;  %12759 = vst [vmem:[%s18647_s29 + $0x700] sm:$0xff] %v12758_v47 }
 0x509   : > { %12761 = vst [vmem:[%s18647_s29 + $0x710] sm:$0xff] %v12760_v58  ;;  %12763 = vst [vmem:[%s18647_s29 + $0x720] sm:$0xff] %v12762_v25 }
 0x50a   : > { %12765 = vst [vmem:[%s18647_s29 + $0x730] sm:$0xff] %v12764_v53  ;;  %12767 = vst [vmem:[%s18647_s29 + $0x740] sm:$0xff] %v12766_v46 }
 0x50b   : > { %12769 = vst [vmem:[%s18647_s29 + $0x750] sm:$0xff] %v12768_v18  ;;  %12771 = vst [vmem:[%s18647_s29 + $0x760] sm:$0xff] %v12770_v5 }
 0x50c   : > { %12773 = vst [vmem:[%s18647_s29 + $0x770] sm:$0xff] %v12772_v10  ;;  %12775 = vst [vmem:[%s18647_s29 + $0x780] sm:$0xff] %v12774_v23 }
 0x50d   : > { %12777 = vst [vmem:[%s18647_s29 + $0x790] sm:$0xff] %v12776_v28  ;;  %12779 = vst [vmem:[%s18647_s29 + $0x7a0] sm:$0xff] %v12778_v41 }
 0x50e   : > { %12781 = vst [vmem:[%s18647_s29 + $0x7b0] sm:$0xff] %v12780_v48  ;;  %12783 = vst [vmem:[%s18647_s29 + $0x7c0] sm:$0xff] %v12782_v62 }
 0x50f   : > { %12785 = vst [vmem:[%s18647_s29 + $0x7d0] sm:$0xff] %v12784_v8  ;;  %12787 = vst [vmem:[%s18647_s29 + $0x7e0] sm:$0xff] %v12786_v22 }
 0x510   : > { %12789 = vst [vmem:[%s18647_s29 + $0x7f0] sm:$0xff] %v12788_v11 }
 0x511 PF: > { %s12_s15 = sadd.s32 1, %s15186_s15   ;;  %s19486_s9 = smov %s15166_s10 }
 0x512   : > { %p9_p13 = scmp.ge.s32.totalorder %s12_s15, 6   ;;  %s19487_s10 = smov %s15262_s24 }
 0x513   : > { %s19488_s11 = smov %s15178_s13  ;;  %s19489_s12 = smov %s15182_s14 }
 0x514   : > { %s19490_s13 = smov %s19493_s16  ;;  %s19491_s14 = smov %s19497_s17 }
 0x515   :  { %11 = sbr.rel (!%p9_p13) target bundleno = 4 (0x4), region = 142 }

</bundles_post_ra>
